<compile_context>
chip_gen: v6e
topology: v6e:2x2x1
jax: 0.10.0
libtpu: 0.0.40
codegen_flags: <defaults>
</compile_context>

<pallas_src>
import functools

import jax
import jax.numpy as jnp
from jax import lax
from jax.experimental import pallas as pl
from jax.experimental.pallas import tpu as pltpu


# ---------------------------------------------------------------------------
# Constants for the (cin, 28, 28) variant, plus lane-dense padded widths.
# ---------------------------------------------------------------------------
H_IN = 28          # input spatial size
K = 5              # conv kernel size
HO1 = H_IN - K + 1 # 24: conv1 output spatial
P1 = HO1 // 2      # 12: pool1 output spatial
HO2 = P1 - K + 1   # 8 : conv2 output spatial
P2 = HO2 // 2      # 4 : pool2 output spatial

C1_REAL, C2_REAL, F1_REAL = 20, 50, 500
C1P = 128          # conv1 channels padded (lane dense)
C2P = 128          # conv2 channels padded
F1P = 512          # fc1 features padded
NCP = 128          # logits padded


# ---------------------------------------------------------------------------
# Fused LeNet kernel (one grid step == one sample)
# ---------------------------------------------------------------------------
def _lenet_kernel(x_ref, w1_ref, b1_ref, w2_ref, b2_ref,
                  fc1w_ref, fc1b_ref, fc2w_ref, fc2b_ref,
                  o_ref, pool1_ref, pool2_ref, *, cin):
    b1 = b1_ref[...]          # (1, C1P) f32
    b2 = b2_ref[...]          # (1, C2P) f32

    # ---- conv1 (5x5 valid) + bias + ReLU, one output row at a time ----------
    def conv1_row(ho):
        acc = jnp.zeros((HO1, C1P), jnp.float32)
        for kh in range(K):
            row = x_ref[0, ho + kh, :, :]                # (28, cin) f32
            for kw in range(K):
                xs = row[kw:kw + HO1, :]                 # (HO1, cin)
                wt = w1_ref[kh * K + kw]                 # (cin, C1P) f32
                if cin == 1:
                    acc = acc + xs * wt                  # rank-1 update (VPU)
                else:
                    acc = acc + jnp.dot(
                        xs, wt, preferred_element_type=jnp.float32)
        return jnp.maximum(acc + b1, 0.0)

    # conv1 + fused 2x2 maxpool -> pool1 scratch (P1, P1, C1P) f32
    def c1_body(p, carry):
        ra = conv1_row(2 * p)
        rb = conv1_row(2 * p + 1)
        rm = jnp.maximum(ra, rb)                         # vertical pool
        for j in range(P1):                              # horizontal pool
            va = rm[2 * j:2 * j + 1, :]
            vb = rm[2 * j + 1:2 * j + 2, :]
            pool1_ref[p, pl.ds(j, 1), :] = jnp.maximum(va, vb)
        return carry

    lax.fori_loop(0, P1, c1_body, 0)

    # ---- conv2 (5x5 valid) + bias + ReLU on pooled1 --------------------------
    def conv2_row(ho):
        acc = jnp.zeros((HO2, C2P), jnp.float32)
        for kh in range(K):
            for kw in range(K):
                xs = pool1_ref[ho + kh, pl.ds(kw, HO2), :].astype(jnp.bfloat16)
                wt = w2_ref[kh * K + kw]                 # (C1P, C2P) bf16
                acc = acc + jnp.dot(
                    xs, wt, preferred_element_type=jnp.float32)
        return jnp.maximum(acc + b2, 0.0)

    # conv2 + fused 2x2 maxpool -> pool2 scratch (P2, P2, C2P) f32
    def c2_body(p, carry):
        ra = conv2_row(2 * p)
        rb = conv2_row(2 * p + 1)
        rm = jnp.maximum(ra, rb)
        for j in range(P2):
            va = rm[2 * j:2 * j + 1, :]
            vb = rm[2 * j + 1:2 * j + 2, :]
            pool2_ref[p, pl.ds(j, 1), :] = jnp.maximum(va, vb)
        return carry

    lax.fori_loop(0, P2, c2_body, 0)

    # ---- fc1 + ReLU + fc2 (contraction over (h, w, c) as 16 small dots) ------
    acc = jnp.zeros((1, F1P), jnp.float32)
    for h in range(P2):
        for w in range(P2):
            xs = pool2_ref[h, pl.ds(w, 1), :].astype(jnp.bfloat16)   # (1, C2P)
            acc = acc + jnp.dot(
                xs, fc1w_ref[h, w], preferred_element_type=jnp.float32)
    a1 = jnp.maximum(acc + fc1b_ref[...], 0.0).astype(jnp.bfloat16)  # (1, F1P)
    logits = jnp.dot(
        a1, fc2w_ref[...], preferred_element_type=jnp.float32) + fc2b_ref[...]
    o_ref[0] = logits                                                # (1, NCP)


def _lenet_pallas_call(x_nhwc, prepped):
    n, _, _, cin = x_nhwc.shape
    w1, b1, w2, b2, fc1w, fc1b, fc2w, fc2b = prepped

    flops_per_sample = 2 * (HO1 * HO1 * K * K * cin * C1_REAL
                            + HO2 * HO2 * K * K * C1_REAL * C2_REAL
                            + (C2_REAL * P2 * P2) * F1_REAL
                            + F1_REAL * NCP)
    param_bytes = sum(int(a.size) * a.dtype.itemsize for a in prepped)
    cost = pl.CostEstimate(
        flops=n * flops_per_sample,
        transcendentals=0,
        bytes_accessed=int(param_bytes + x_nhwc.size * 4 + n * NCP * 4),
    )

    out = pl.pallas_call(
        functools.partial(_lenet_kernel, cin=cin),
        out_shape=jax.ShapeDtypeStruct((n, 1, NCP), jnp.float32),
        grid=(n,),
        in_specs=[
            pl.BlockSpec((1, H_IN, H_IN, cin), lambda i: (i, 0, 0, 0)),
            pl.BlockSpec(w1.shape, lambda i: (0, 0, 0)),
            pl.BlockSpec(b1.shape, lambda i: (0, 0)),
            pl.BlockSpec(w2.shape, lambda i: (0, 0, 0)),
            pl.BlockSpec(b2.shape, lambda i: (0, 0)),
            pl.BlockSpec(fc1w.shape, lambda i: (0, 0, 0, 0)),
            pl.BlockSpec(fc1b.shape, lambda i: (0, 0)),
            pl.BlockSpec(fc2w.shape, lambda i: (0, 0)),
            pl.BlockSpec(fc2b.shape, lambda i: (0, 0)),
        ],
        out_specs=pl.BlockSpec((1, 1, NCP), lambda i: (i, 0, 0)),
        scratch_shapes=[
            pltpu.VMEM((P1, P1, C1P), jnp.float32),   # pooled conv1 activations
            pltpu.VMEM((P2, P2, C2P), jnp.float32),   # pooled conv2 activations
        ],
        compiler_params=pltpu.CompilerParams(
            dimension_semantics=("parallel",),
        ),
        cost_estimate=cost,
    )(x_nhwc, w1, b1, w2, b2, fc1w, fc1b, fc2w, fc2b)
    return out[:, 0, :]


# ---------------------------------------------------------------------------
# One-time parameter preparation (transpose / pad / bf16 cast) — NOT in hot path
# ---------------------------------------------------------------------------
def prepare_params(params, num_classes):
    assert num_classes <= NCP
    cin = params["conv1_w"].shape[1]

    def pad_axis(a, axis, new):
        pads = [(0, 0)] * a.ndim
        pads[axis] = (0, new - a.shape[axis])
        return jnp.pad(a, pads)

    # conv1: (20, cin, 5, 5) -> (25, cin, C1P) f32, tap-major (kh, kw).
    w1 = jnp.transpose(params["conv1_w"], (2, 3, 1, 0)).reshape(K * K, cin, C1_REAL)
    w1 = pad_axis(w1, 2, C1P).astype(jnp.float32)
    b1 = pad_axis(params["conv1_b"], 0, C1P).reshape(1, C1P).astype(jnp.float32)

    # conv2: (50, 20, 5, 5) -> (25, C1P, C2P) bf16.
    w2 = jnp.transpose(params["conv2_w"], (2, 3, 1, 0)).reshape(K * K, C1_REAL, C2_REAL)
    w2 = pad_axis(pad_axis(w2, 1, C1P), 2, C2P).astype(jnp.bfloat16)
    b2 = pad_axis(params["conv2_b"], 0, C2P).reshape(1, C2P).astype(jnp.float32)

    # fc1: (500, 800) with PyTorch NCHW flatten (c*16 + h*4 + w) -> (h, w, c, n).
    fc1 = params["fc1_w"].reshape(F1_REAL, C2_REAL, P2, P2)
    fc1 = jnp.transpose(fc1, (2, 3, 1, 0))                    # (h, w, c, n)
    fc1 = pad_axis(pad_axis(fc1, 2, C2P), 3, F1P).astype(jnp.bfloat16)
    fc1b = pad_axis(params["fc1_b"], 0, F1P).reshape(1, F1P).astype(jnp.float32)

    # fc2: (num_classes, 500) -> (F1P, NCP) bf16.
    fc2 = jnp.transpose(params["fc2_w"], (1, 0))              # (500, num_classes)
    fc2 = pad_axis(pad_axis(fc2, 0, F1P), 1, NCP).astype(jnp.bfloat16)
    fc2b = pad_axis(params["fc2_b"], 0, NCP).reshape(1, NCP).astype(jnp.float32)

    return (w1, b1, w2, b2, fc1, fc1b, fc2, fc2b)


@functools.partial(jax.jit, static_argnames=("num_classes",))
def lenet_forward(prepped, x_nchw, num_classes):
    # Input follows the PyTorch NCHW convention; channels go to lanes (NHWC).
    x = jnp.transpose(x_nchw, (0, 2, 3, 1))
    out = _lenet_pallas_call(x, prepped)
    return out[:, :num_classes]


# ---------------------------------------------------------------------------
# Parameter init + pure-JAX reference (faithful PyTorch port) for validation
# ---------------------------------------------------------------------------
def init_lenet_params(key, n_channels=1, num_classes=10):
    ks = jax.random.split(key, 8)
    s = 0.05
    return {
        "conv1_w": jax.random.normal(ks[0], (C1_REAL, n_channels, K, K), jnp.float32) * s,
        "conv1_b": jax.random.normal(ks[1], (C1_REAL,), jnp.float32) * s,
        "conv2_w": jax.random.normal(ks[2], (C2_REAL, C1_REAL, K, K), jnp.float32) * s,
        "conv2_b": jax.random.normal(ks[3], (C2_REAL,), jnp.float32) * s,
        "fc1_w": jax.random.normal(ks[4], (F1_REAL, C2_REAL * P2 * P2), jnp.float32) * s,
        "fc1_b": jax.random.normal(ks[5], (F1_REAL,), jnp.float32) * s,
        "fc2_w": jax.random.normal(ks[6], (num_classes, F1_REAL), jnp.float32) * s,
        "fc2_b": jax.random.normal(ks[7], (num_classes,), jnp.float32) * s,
    }


def lenet_reference(params, x_nchw):
    out = lax.conv_general_dilated(
        x_nchw, params["conv1_w"], (1, 1), "VALID",
        dimension_numbers=("NCHW", "OIHW", "NCHW"))
    out = jax.nn.relu(out + params["conv1_b"][None, :, None, None])
    out = lax.reduce_window(out, -jnp.inf, lax.max, (1, 1, 2, 2), (1, 1, 2, 2), "VALID")
    out = lax.conv_general_dilated(
        out, params["conv2_w"], (1, 1), "VALID",
        dimension_numbers=("NCHW", "OIHW", "NCHW"))
    out = jax.nn.relu(out + params["conv2_b"][None, :, None, None])
    out = lax.reduce_window(out, -jnp.inf, lax.max, (1, 1, 2, 2), (1, 1, 2, 2), "VALID")
    out = out.reshape(out.shape[0], -1)
    out = jax.nn.relu(out @ params["fc1_w"].T + params["fc1_b"])
    return out @ params["fc2_w"].T + params["fc2_b"]


if __name__ == "__main__":
    key = jax.random.PRNGKey(0)
    pkey, xkey = jax.random.split(key)

    num_classes = 10
    params = init_lenet_params(pkey, n_channels=1, num_classes=num_classes)
    x = jax.random.normal(xkey, (2, 1, 28, 28), jnp.float32)

    prepped = prepare_params(params, num_classes)          # one-time, off hot path
    logits = lenet_forward(prepped, x, num_classes=num_classes)
    jax.block_until_ready(logits)

    assert logits.shape == (2, num_classes), logits.shape
    assert logits.dtype == jnp.float32

    ref = lenet_reference(params, x)
    err = float(jnp.max(jnp.abs(logits - ref)))
    assert err < 5e-2, f"max abs error vs reference: {err}"

    print("KERNEL_OK")
</pallas_src>

<mosaic_0001>
module attributes {stable_mosaic.version = 11 : i64} {
  func.func @_lenet_kernel(%arg0: i32, %arg1: memref<1x28x28x1xf32, #tpu.memory_space<vmem>>, %arg2: memref<25x1x128xf32, #tpu.memory_space<vmem>>, %arg3: memref<1x128xf32, #tpu.memory_space<vmem>>, %arg4: memref<25x128x128xbf16, #tpu.memory_space<vmem>>, %arg5: memref<1x128xf32, #tpu.memory_space<vmem>>, %arg6: memref<4x4x128x512xbf16, #tpu.memory_space<vmem>>, %arg7: memref<1x512xf32, #tpu.memory_space<vmem>>, %arg8: memref<512x128xbf16, #tpu.memory_space<vmem>>, %arg9: memref<1x128xf32, #tpu.memory_space<vmem>>, %arg10: memref<1x1x128xf32, #tpu.memory_space<vmem>>, %arg11: memref<12x12x128xf32, #tpu.memory_space<vmem>>, %arg12: memref<4x4x128xf32, #tpu.memory_space<vmem>>) attributes {dimension_semantics = [#tpu.dimension_semantics<parallel>], iteration_bounds = array<i64: 2>, scalar_prefetch = 0 : i64, scratch_operands = 2 : i64, tpu.core_type = #tpu.core_type<tc>, window_params = [{transform_indices = @transform_0, window_bounds = array<i64: 1, 28, 28, 1>}, {pipeline_mode = #tpu.pipeline_mode<synchronous>, transform_indices = @transform_1, window_bounds = array<i64: 25, 1, 128>}, {pipeline_mode = #tpu.pipeline_mode<synchronous>, transform_indices = @transform_2, window_bounds = array<i64: 1, 128>}, {pipeline_mode = #tpu.pipeline_mode<synchronous>, transform_indices = @transform_3, window_bounds = array<i64: 25, 128, 128>}, {pipeline_mode = #tpu.pipeline_mode<synchronous>, transform_indices = @transform_4, window_bounds = array<i64: 1, 128>}, {pipeline_mode = #tpu.pipeline_mode<synchronous>, transform_indices = @transform_5, window_bounds = array<i64: 4, 4, 128, 512>}, {pipeline_mode = #tpu.pipeline_mode<synchronous>, transform_indices = @transform_6, window_bounds = array<i64: 1, 512>}, {pipeline_mode = #tpu.pipeline_mode<synchronous>, transform_indices = @transform_7, window_bounds = array<i64: 512, 128>}, {pipeline_mode = #tpu.pipeline_mode<synchronous>, transform_indices = @transform_8, window_bounds = array<i64: 1, 128>}, {transform_indices = @transform_9, window_bounds = array<i64: 1, 1, 128>}]} {
    %c0 = arith.constant 0 : index
    %c0_0 = arith.constant 0 : index
    %0 = vector.load %arg3[%c0, %c0_0] : memref<1x128xf32, #tpu.memory_space<vmem>>, vector<1x128xf32>
    %c0_1 = arith.constant 0 : index
    %c0_2 = arith.constant 0 : index
    %1 = vector.load %arg5[%c0_1, %c0_2] : memref<1x128xf32, #tpu.memory_space<vmem>>, vector<1x128xf32>
    %c0_i32 = arith.constant 0 : i32
    %c12_i32 = arith.constant 12 : i32
    %2 = arith.addi %c0_i32, %c12_i32 : i32
    %c1_i32 = arith.constant 1 : i32
    scf.for %arg13 = %c0_i32 to %2 step %c1_i32  : i32 {
      %c2_i32 = arith.constant 2 : i32
      %129 = arith.muli %c2_i32, %arg13 : i32
      %cst_143 = arith.constant 0.000000e+00 : f32
      %130 = vector.broadcast %cst_143 : f32 to vector<24x128xf32>
      %c0_i32_144 = arith.constant 0 : i32
      %131 = arith.addi %129, %c0_i32_144 : i32
      %c0_145 = arith.constant 0 : index
      %132 = arith.index_cast %131 : i32 to index
      %c0_146 = arith.constant 0 : index
      %c0_147 = arith.constant 0 : index
      %133 = vector.load %arg1[%c0_145, %132, %c0_146, %c0_147] : memref<1x28x28x1xf32, #tpu.memory_space<vmem>>, vector<1x1x28x1xf32>
      %134 = vector.shape_cast %133 : vector<1x1x28x1xf32> to vector<28x1xf32>
      %135 = vector.extract_strided_slice %134 {offsets = [0, 0], sizes = [24, 1], strides = [1, 1]} : vector<28x1xf32> to vector<24x1xf32>
      %c0_148 = arith.constant 0 : index
      %c0_149 = arith.constant 0 : index
      %c0_150 = arith.constant 0 : index
      %136 = vector.load %arg2[%c0_148, %c0_149, %c0_150] : memref<25x1x128xf32, #tpu.memory_space<vmem>>, vector<1x1x128xf32>
      %137 = vector.shape_cast %136 : vector<1x1x128xf32> to vector<1x128xf32>
      %138 = vector.broadcast %135 : vector<24x1xf32> to vector<24x128xf32>
      %139 = vector.broadcast %137 : vector<1x128xf32> to vector<24x128xf32>
      %140 = arith.mulf %138, %139 : vector<24x128xf32>
      %141 = arith.addf %130, %140 : vector<24x128xf32>
      %142 = vector.extract_strided_slice %134 {offsets = [1, 0], sizes = [24, 1], strides = [1, 1]} : vector<28x1xf32> to vector<24x1xf32>
      %c1_151 = arith.constant 1 : index
      %c0_152 = arith.constant 0 : index
      %c0_153 = arith.constant 0 : index
      %143 = vector.load %arg2[%c1_151, %c0_152, %c0_153] : memref<25x1x128xf32, #tpu.memory_space<vmem>>, vector<1x1x128xf32>
      %144 = vector.shape_cast %143 : vector<1x1x128xf32> to vector<1x128xf32>
      %145 = vector.broadcast %142 : vector<24x1xf32> to vector<24x128xf32>
      %146 = vector.broadcast %144 : vector<1x128xf32> to vector<24x128xf32>
      %147 = arith.mulf %145, %146 : vector<24x128xf32>
      %148 = arith.addf %141, %147 : vector<24x128xf32>
      %149 = vector.extract_strided_slice %134 {offsets = [2, 0], sizes = [24, 1], strides = [1, 1]} : vector<28x1xf32> to vector<24x1xf32>
      %c2_154 = arith.constant 2 : index
      %c0_155 = arith.constant 0 : index
      %c0_156 = arith.constant 0 : index
      %150 = vector.load %arg2[%c2_154, %c0_155, %c0_156] : memref<25x1x128xf32, #tpu.memory_space<vmem>>, vector<1x1x128xf32>
      %151 = vector.shape_cast %150 : vector<1x1x128xf32> to vector<1x128xf32>
      %152 = vector.broadcast %149 : vector<24x1xf32> to vector<24x128xf32>
      %153 = vector.broadcast %151 : vector<1x128xf32> to vector<24x128xf32>
      %154 = arith.mulf %152, %153 : vector<24x128xf32>
      %155 = arith.addf %148, %154 : vector<24x128xf32>
      %156 = vector.extract_strided_slice %134 {offsets = [3, 0], sizes = [24, 1], strides = [1, 1]} : vector<28x1xf32> to vector<24x1xf32>
      %c3_157 = arith.constant 3 : index
      %c0_158 = arith.constant 0 : index
      %c0_159 = arith.constant 0 : index
      %157 = vector.load %arg2[%c3_157, %c0_158, %c0_159] : memref<25x1x128xf32, #tpu.memory_space<vmem>>, vector<1x1x128xf32>
      %158 = vector.shape_cast %157 : vector<1x1x128xf32> to vector<1x128xf32>
      %159 = vector.broadcast %156 : vector<24x1xf32> to vector<24x128xf32>
      %160 = vector.broadcast %158 : vector<1x128xf32> to vector<24x128xf32>
      %161 = arith.mulf %159, %160 : vector<24x128xf32>
      %162 = arith.addf %155, %161 : vector<24x128xf32>
      %163 = vector.extract_strided_slice %134 {offsets = [4, 0], sizes = [24, 1], strides = [1, 1]} : vector<28x1xf32> to vector<24x1xf32>
      %c4 = arith.constant 4 : index
      %c0_160 = arith.constant 0 : index
      %c0_161 = arith.constant 0 : index
      %164 = vector.load %arg2[%c4, %c0_160, %c0_161] : memref<25x1x128xf32, #tpu.memory_space<vmem>>, vector<1x1x128xf32>
      %165 = vector.shape_cast %164 : vector<1x1x128xf32> to vector<1x128xf32>
      %166 = vector.broadcast %163 : vector<24x1xf32> to vector<24x128xf32>
      %167 = vector.broadcast %165 : vector<1x128xf32> to vector<24x128xf32>
      %168 = arith.mulf %166, %167 : vector<24x128xf32>
      %169 = arith.addf %162, %168 : vector<24x128xf32>
      %c1_i32_162 = arith.constant 1 : i32
      %170 = arith.addi %129, %c1_i32_162 : i32
      %c0_163 = arith.constant 0 : index
      %171 = arith.index_cast %170 : i32 to index
      %c0_164 = arith.constant 0 : index
      %c0_165 = arith.constant 0 : index
      %172 = vector.load %arg1[%c0_163, %171, %c0_164, %c0_165] : memref<1x28x28x1xf32, #tpu.memory_space<vmem>>, vector<1x1x28x1xf32>
      %173 = vector.shape_cast %172 : vector<1x1x28x1xf32> to vector<28x1xf32>
      %174 = vector.extract_strided_slice %173 {offsets = [0, 0], sizes = [24, 1], strides = [1, 1]} : vector<28x1xf32> to vector<24x1xf32>
      %c5 = arith.constant 5 : index
      %c0_166 = arith.constant 0 : index
      %c0_167 = arith.constant 0 : index
      %175 = vector.load %arg2[%c5, %c0_166, %c0_167] : memref<25x1x128xf32, #tpu.memory_space<vmem>>, vector<1x1x128xf32>
      %176 = vector.shape_cast %175 : vector<1x1x128xf32> to vector<1x128xf32>
      %177 = vector.broadcast %174 : vector<24x1xf32> to vector<24x128xf32>
      %178 = vector.broadcast %176 : vector<1x128xf32> to vector<24x128xf32>
      %179 = arith.mulf %177, %178 : vector<24x128xf32>
      %180 = arith.addf %169, %179 : vector<24x128xf32>
      %181 = vector.extract_strided_slice %173 {offsets = [1, 0], sizes = [24, 1], strides = [1, 1]} : vector<28x1xf32> to vector<24x1xf32>
      %c6 = arith.constant 6 : index
      %c0_168 = arith.constant 0 : index
      %c0_169 = arith.constant 0 : index
      %182 = vector.load %arg2[%c6, %c0_168, %c0_169] : memref<25x1x128xf32, #tpu.memory_space<vmem>>, vector<1x1x128xf32>
      %183 = vector.shape_cast %182 : vector<1x1x128xf32> to vector<1x128xf32>
      %184 = vector.broadcast %181 : vector<24x1xf32> to vector<24x128xf32>
      %185 = vector.broadcast %183 : vector<1x128xf32> to vector<24x128xf32>
      %186 = arith.mulf %184, %185 : vector<24x128xf32>
      %187 = arith.addf %180, %186 : vector<24x128xf32>
      %188 = vector.extract_strided_slice %173 {offsets = [2, 0], sizes = [24, 1], strides = [1, 1]} : vector<28x1xf32> to vector<24x1xf32>
      %c7 = arith.constant 7 : index
      %c0_170 = arith.constant 0 : index
      %c0_171 = arith.constant 0 : index
      %189 = vector.load %arg2[%c7, %c0_170, %c0_171] : memref<25x1x128xf32, #tpu.memory_space<vmem>>, vector<1x1x128xf32>
      %190 = vector.shape_cast %189 : vector<1x1x128xf32> to vector<1x128xf32>
      %191 = vector.broadcast %188 : vector<24x1xf32> to vector<24x128xf32>
      %192 = vector.broadcast %190 : vector<1x128xf32> to vector<24x128xf32>
      %193 = arith.mulf %191, %192 : vector<24x128xf32>
      %194 = arith.addf %187, %193 : vector<24x128xf32>
      %195 = vector.extract_strided_slice %173 {offsets = [3, 0], sizes = [24, 1], strides = [1, 1]} : vector<28x1xf32> to vector<24x1xf32>
      %c8 = arith.constant 8 : index
      %c0_172 = arith.constant 0 : index
      %c0_173 = arith.constant 0 : index
      %196 = vector.load %arg2[%c8, %c0_172, %c0_173] : memref<25x1x128xf32, #tpu.memory_space<vmem>>, vector<1x1x128xf32>
      %197 = vector.shape_cast %196 : vector<1x1x128xf32> to vector<1x128xf32>
      %198 = vector.broadcast %195 : vector<24x1xf32> to vector<24x128xf32>
      %199 = vector.broadcast %197 : vector<1x128xf32> to vector<24x128xf32>
      %200 = arith.mulf %198, %199 : vector<24x128xf32>
      %201 = arith.addf %194, %200 : vector<24x128xf32>
      %202 = vector.extract_strided_slice %173 {offsets = [4, 0], sizes = [24, 1], strides = [1, 1]} : vector<28x1xf32> to vector<24x1xf32>
      %c9 = arith.constant 9 : index
      %c0_174 = arith.constant 0 : index
      %c0_175 = arith.constant 0 : index
      %203 = vector.load %arg2[%c9, %c0_174, %c0_175] : memref<25x1x128xf32, #tpu.memory_space<vmem>>, vector<1x1x128xf32>
      %204 = vector.shape_cast %203 : vector<1x1x128xf32> to vector<1x128xf32>
      %205 = vector.broadcast %202 : vector<24x1xf32> to vector<24x128xf32>
      %206 = vector.broadcast %204 : vector<1x128xf32> to vector<24x128xf32>
      %207 = arith.mulf %205, %206 : vector<24x128xf32>
      %208 = arith.addf %201, %207 : vector<24x128xf32>
      %c2_i32_176 = arith.constant 2 : i32
      %209 = arith.addi %129, %c2_i32_176 : i32
      %c0_177 = arith.constant 0 : index
      %210 = arith.index_cast %209 : i32 to index
      %c0_178 = arith.constant 0 : index
      %c0_179 = arith.constant 0 : index
      %211 = vector.load %arg1[%c0_177, %210, %c0_178, %c0_179] : memref<1x28x28x1xf32, #tpu.memory_space<vmem>>, vector<1x1x28x1xf32>
      %212 = vector.shape_cast %211 : vector<1x1x28x1xf32> to vector<28x1xf32>
      %213 = vector.extract_strided_slice %212 {offsets = [0, 0], sizes = [24, 1], strides = [1, 1]} : vector<28x1xf32> to vector<24x1xf32>
      %c10 = arith.constant 10 : index
      %c0_180 = arith.constant 0 : index
      %c0_181 = arith.constant 0 : index
      %214 = vector.load %arg2[%c10, %c0_180, %c0_181] : memref<25x1x128xf32, #tpu.memory_space<vmem>>, vector<1x1x128xf32>
      %215 = vector.shape_cast %214 : vector<1x1x128xf32> to vector<1x128xf32>
      %216 = vector.broadcast %213 : vector<24x1xf32> to vector<24x128xf32>
      %217 = vector.broadcast %215 : vector<1x128xf32> to vector<24x128xf32>
      %218 = arith.mulf %216, %217 : vector<24x128xf32>
      %219 = arith.addf %208, %218 : vector<24x128xf32>
      %220 = vector.extract_strided_slice %212 {offsets = [1, 0], sizes = [24, 1], strides = [1, 1]} : vector<28x1xf32> to vector<24x1xf32>
      %c11 = arith.constant 11 : index
      %c0_182 = arith.constant 0 : index
      %c0_183 = arith.constant 0 : index
      %221 = vector.load %arg2[%c11, %c0_182, %c0_183] : memref<25x1x128xf32, #tpu.memory_space<vmem>>, vector<1x1x128xf32>
      %222 = vector.shape_cast %221 : vector<1x1x128xf32> to vector<1x128xf32>
      %223 = vector.broadcast %220 : vector<24x1xf32> to vector<24x128xf32>
      %224 = vector.broadcast %222 : vector<1x128xf32> to vector<24x128xf32>
      %225 = arith.mulf %223, %224 : vector<24x128xf32>
      %226 = arith.addf %219, %225 : vector<24x128xf32>
      %227 = vector.extract_strided_slice %212 {offsets = [2, 0], sizes = [24, 1], strides = [1, 1]} : vector<28x1xf32> to vector<24x1xf32>
      %c12 = arith.constant 12 : index
      %c0_184 = arith.constant 0 : index
      %c0_185 = arith.constant 0 : index
      %228 = vector.load %arg2[%c12, %c0_184, %c0_185] : memref<25x1x128xf32, #tpu.memory_space<vmem>>, vector<1x1x128xf32>
      %229 = vector.shape_cast %228 : vector<1x1x128xf32> to vector<1x128xf32>
      %230 = vector.broadcast %227 : vector<24x1xf32> to vector<24x128xf32>
      %231 = vector.broadcast %229 : vector<1x128xf32> to vector<24x128xf32>
      %232 = arith.mulf %230, %231 : vector<24x128xf32>
      %233 = arith.addf %226, %232 : vector<24x128xf32>
      %234 = vector.extract_strided_slice %212 {offsets = [3, 0], sizes = [24, 1], strides = [1, 1]} : vector<28x1xf32> to vector<24x1xf32>
      %c13 = arith.constant 13 : index
      %c0_186 = arith.constant 0 : index
      %c0_187 = arith.constant 0 : index
      %235 = vector.load %arg2[%c13, %c0_186, %c0_187] : memref<25x1x128xf32, #tpu.memory_space<vmem>>, vector<1x1x128xf32>
      %236 = vector.shape_cast %235 : vector<1x1x128xf32> to vector<1x128xf32>
      %237 = vector.broadcast %234 : vector<24x1xf32> to vector<24x128xf32>
      %238 = vector.broadcast %236 : vector<1x128xf32> to vector<24x128xf32>
      %239 = arith.mulf %237, %238 : vector<24x128xf32>
      %240 = arith.addf %233, %239 : vector<24x128xf32>
      %241 = vector.extract_strided_slice %212 {offsets = [4, 0], sizes = [24, 1], strides = [1, 1]} : vector<28x1xf32> to vector<24x1xf32>
      %c14 = arith.constant 14 : index
      %c0_188 = arith.constant 0 : index
      %c0_189 = arith.constant 0 : index
      %242 = vector.load %arg2[%c14, %c0_188, %c0_189] : memref<25x1x128xf32, #tpu.memory_space<vmem>>, vector<1x1x128xf32>
      %243 = vector.shape_cast %242 : vector<1x1x128xf32> to vector<1x128xf32>
      %244 = vector.broadcast %241 : vector<24x1xf32> to vector<24x128xf32>
      %245 = vector.broadcast %243 : vector<1x128xf32> to vector<24x128xf32>
      %246 = arith.mulf %244, %245 : vector<24x128xf32>
      %247 = arith.addf %240, %246 : vector<24x128xf32>
      %c3_i32 = arith.constant 3 : i32
      %248 = arith.addi %129, %c3_i32 : i32
      %c0_190 = arith.constant 0 : index
      %249 = arith.index_cast %248 : i32 to index
      %c0_191 = arith.constant 0 : index
      %c0_192 = arith.constant 0 : index
      %250 = vector.load %arg1[%c0_190, %249, %c0_191, %c0_192] : memref<1x28x28x1xf32, #tpu.memory_space<vmem>>, vector<1x1x28x1xf32>
      %251 = vector.shape_cast %250 : vector<1x1x28x1xf32> to vector<28x1xf32>
      %252 = vector.extract_strided_slice %251 {offsets = [0, 0], sizes = [24, 1], strides = [1, 1]} : vector<28x1xf32> to vector<24x1xf32>
      %c15 = arith.constant 15 : index
      %c0_193 = arith.constant 0 : index
      %c0_194 = arith.constant 0 : index
      %253 = vector.load %arg2[%c15, %c0_193, %c0_194] : memref<25x1x128xf32, #tpu.memory_space<vmem>>, vector<1x1x128xf32>
      %254 = vector.shape_cast %253 : vector<1x1x128xf32> to vector<1x128xf32>
      %255 = vector.broadcast %252 : vector<24x1xf32> to vector<24x128xf32>
      %256 = vector.broadcast %254 : vector<1x128xf32> to vector<24x128xf32>
      %257 = arith.mulf %255, %256 : vector<24x128xf32>
      %258 = arith.addf %247, %257 : vector<24x128xf32>
      %259 = vector.extract_strided_slice %251 {offsets = [1, 0], sizes = [24, 1], strides = [1, 1]} : vector<28x1xf32> to vector<24x1xf32>
      %c16 = arith.constant 16 : index
      %c0_195 = arith.constant 0 : index
      %c0_196 = arith.constant 0 : index
      %260 = vector.load %arg2[%c16, %c0_195, %c0_196] : memref<25x1x128xf32, #tpu.memory_space<vmem>>, vector<1x1x128xf32>
      %261 = vector.shape_cast %260 : vector<1x1x128xf32> to vector<1x128xf32>
      %262 = vector.broadcast %259 : vector<24x1xf32> to vector<24x128xf32>
      %263 = vector.broadcast %261 : vector<1x128xf32> to vector<24x128xf32>
      %264 = arith.mulf %262, %263 : vector<24x128xf32>
      %265 = arith.addf %258, %264 : vector<24x128xf32>
      %266 = vector.extract_strided_slice %251 {offsets = [2, 0], sizes = [24, 1], strides = [1, 1]} : vector<28x1xf32> to vector<24x1xf32>
      %c17 = arith.constant 17 : index
      %c0_197 = arith.constant 0 : index
      %c0_198 = arith.constant 0 : index
      %267 = vector.load %arg2[%c17, %c0_197, %c0_198] : memref<25x1x128xf32, #tpu.memory_space<vmem>>, vector<1x1x128xf32>
      %268 = vector.shape_cast %267 : vector<1x1x128xf32> to vector<1x128xf32>
      %269 = vector.broadcast %266 : vector<24x1xf32> to vector<24x128xf32>
      %270 = vector.broadcast %268 : vector<1x128xf32> to vector<24x128xf32>
      %271 = arith.mulf %269, %270 : vector<24x128xf32>
      %272 = arith.addf %265, %271 : vector<24x128xf32>
      %273 = vector.extract_strided_slice %251 {offsets = [3, 0], sizes = [24, 1], strides = [1, 1]} : vector<28x1xf32> to vector<24x1xf32>
      %c18 = arith.constant 18 : index
      %c0_199 = arith.constant 0 : index
      %c0_200 = arith.constant 0 : index
      %274 = vector.load %arg2[%c18, %c0_199, %c0_200] : memref<25x1x128xf32, #tpu.memory_space<vmem>>, vector<1x1x128xf32>
      %275 = vector.shape_cast %274 : vector<1x1x128xf32> to vector<1x128xf32>
      %276 = vector.broadcast %273 : vector<24x1xf32> to vector<24x128xf32>
      %277 = vector.broadcast %275 : vector<1x128xf32> to vector<24x128xf32>
      %278 = arith.mulf %276, %277 : vector<24x128xf32>
      %279 = arith.addf %272, %278 : vector<24x128xf32>
      %280 = vector.extract_strided_slice %251 {offsets = [4, 0], sizes = [24, 1], strides = [1, 1]} : vector<28x1xf32> to vector<24x1xf32>
      %c19 = arith.constant 19 : index
      %c0_201 = arith.constant 0 : index
      %c0_202 = arith.constant 0 : index
      %281 = vector.load %arg2[%c19, %c0_201, %c0_202] : memref<25x1x128xf32, #tpu.memory_space<vmem>>, vector<1x1x128xf32>
      %282 = vector.shape_cast %281 : vector<1x1x128xf32> to vector<1x128xf32>
      %283 = vector.broadcast %280 : vector<24x1xf32> to vector<24x128xf32>
      %284 = vector.broadcast %282 : vector<1x128xf32> to vector<24x128xf32>
      %285 = arith.mulf %283, %284 : vector<24x128xf32>
      %286 = arith.addf %279, %285 : vector<24x128xf32>
      %c4_i32_203 = arith.constant 4 : i32
      %287 = arith.addi %129, %c4_i32_203 : i32
      %c0_204 = arith.constant 0 : index
      %288 = arith.index_cast %287 : i32 to index
      %c0_205 = arith.constant 0 : index
      %c0_206 = arith.constant 0 : index
      %289 = vector.load %arg1[%c0_204, %288, %c0_205, %c0_206] : memref<1x28x28x1xf32, #tpu.memory_space<vmem>>, vector<1x1x28x1xf32>
      %290 = vector.shape_cast %289 : vector<1x1x28x1xf32> to vector<28x1xf32>
      %291 = vector.extract_strided_slice %290 {offsets = [0, 0], sizes = [24, 1], strides = [1, 1]} : vector<28x1xf32> to vector<24x1xf32>
      %c20 = arith.constant 20 : index
      %c0_207 = arith.constant 0 : index
      %c0_208 = arith.constant 0 : index
      %292 = vector.load %arg2[%c20, %c0_207, %c0_208] : memref<25x1x128xf32, #tpu.memory_space<vmem>>, vector<1x1x128xf32>
      %293 = vector.shape_cast %292 : vector<1x1x128xf32> to vector<1x128xf32>
      %294 = vector.broadcast %291 : vector<24x1xf32> to vector<24x128xf32>
      %295 = vector.broadcast %293 : vector<1x128xf32> to vector<24x128xf32>
      %296 = arith.mulf %294, %295 : vector<24x128xf32>
      %297 = arith.addf %286, %296 : vector<24x128xf32>
      %298 = vector.extract_strided_slice %290 {offsets = [1, 0], sizes = [24, 1], strides = [1, 1]} : vector<28x1xf32> to vector<24x1xf32>
      %c21 = arith.constant 21 : index
      %c0_209 = arith.constant 0 : index
      %c0_210 = arith.constant 0 : index
      %299 = vector.load %arg2[%c21, %c0_209, %c0_210] : memref<25x1x128xf32, #tpu.memory_space<vmem>>, vector<1x1x128xf32>
      %300 = vector.shape_cast %299 : vector<1x1x128xf32> to vector<1x128xf32>
      %301 = vector.broadcast %298 : vector<24x1xf32> to vector<24x128xf32>
      %302 = vector.broadcast %300 : vector<1x128xf32> to vector<24x128xf32>
      %303 = arith.mulf %301, %302 : vector<24x128xf32>
      %304 = arith.addf %297, %303 : vector<24x128xf32>
      %305 = vector.extract_strided_slice %290 {offsets = [2, 0], sizes = [24, 1], strides = [1, 1]} : vector<28x1xf32> to vector<24x1xf32>
      %c22 = arith.constant 22 : index
      %c0_211 = arith.constant 0 : index
      %c0_212 = arith.constant 0 : index
      %306 = vector.load %arg2[%c22, %c0_211, %c0_212] : memref<25x1x128xf32, #tpu.memory_space<vmem>>, vector<1x1x128xf32>
      %307 = vector.shape_cast %306 : vector<1x1x128xf32> to vector<1x128xf32>
      %308 = vector.broadcast %305 : vector<24x1xf32> to vector<24x128xf32>
      %309 = vector.broadcast %307 : vector<1x128xf32> to vector<24x128xf32>
      %310 = arith.mulf %308, %309 : vector<24x128xf32>
      %311 = arith.addf %304, %310 : vector<24x128xf32>
      %312 = vector.extract_strided_slice %290 {offsets = [3, 0], sizes = [24, 1], strides = [1, 1]} : vector<28x1xf32> to vector<24x1xf32>
      %c23 = arith.constant 23 : index
      %c0_213 = arith.constant 0 : index
      %c0_214 = arith.constant 0 : index
      %313 = vector.load %arg2[%c23, %c0_213, %c0_214] : memref<25x1x128xf32, #tpu.memory_space<vmem>>, vector<1x1x128xf32>
      %314 = vector.shape_cast %313 : vector<1x1x128xf32> to vector<1x128xf32>
      %315 = vector.broadcast %312 : vector<24x1xf32> to vector<24x128xf32>
      %316 = vector.broadcast %314 : vector<1x128xf32> to vector<24x128xf32>
      %317 = arith.mulf %315, %316 : vector<24x128xf32>
      %318 = arith.addf %311, %317 : vector<24x128xf32>
      %319 = vector.extract_strided_slice %290 {offsets = [4, 0], sizes = [24, 1], strides = [1, 1]} : vector<28x1xf32> to vector<24x1xf32>
      %c24 = arith.constant 24 : index
      %c0_215 = arith.constant 0 : index
      %c0_216 = arith.constant 0 : index
      %320 = vector.load %arg2[%c24, %c0_215, %c0_216] : memref<25x1x128xf32, #tpu.memory_space<vmem>>, vector<1x1x128xf32>
      %321 = vector.shape_cast %320 : vector<1x1x128xf32> to vector<1x128xf32>
      %322 = vector.broadcast %319 : vector<24x1xf32> to vector<24x128xf32>
      %323 = vector.broadcast %321 : vector<1x128xf32> to vector<24x128xf32>
      %324 = arith.mulf %322, %323 : vector<24x128xf32>
      %325 = arith.addf %318, %324 : vector<24x128xf32>
      %326 = vector.broadcast %0 : vector<1x128xf32> to vector<24x128xf32>
      %327 = arith.addf %325, %326 : vector<24x128xf32>
      %cst_217 = arith.constant 0.000000e+00 : f32
      %328 = vector.broadcast %cst_217 : f32 to vector<24x128xf32>
      %329 = arith.maximumf %327, %328 : vector<24x128xf32>
      %c2_i32_218 = arith.constant 2 : i32
      %330 = arith.muli %c2_i32_218, %arg13 : i32
      %c1_i32_219 = arith.constant 1 : i32
      %331 = arith.addi %330, %c1_i32_219 : i32
      %cst_220 = arith.constant 0.000000e+00 : f32
      %332 = vector.broadcast %cst_220 : f32 to vector<24x128xf32>
      %c0_i32_221 = arith.constant 0 : i32
      %333 = arith.addi %331, %c0_i32_221 : i32
      %c0_222 = arith.constant 0 : index
      %334 = arith.index_cast %333 : i32 to index
      %c0_223 = arith.constant 0 : index
      %c0_224 = arith.constant 0 : index
      %335 = vector.load %arg1[%c0_222, %334, %c0_223, %c0_224] : memref<1x28x28x1xf32, #tpu.memory_space<vmem>>, vector<1x1x28x1xf32>
      %336 = vector.shape_cast %335 : vector<1x1x28x1xf32> to vector<28x1xf32>
      %337 = vector.extract_strided_slice %336 {offsets = [0, 0], sizes = [24, 1], strides = [1, 1]} : vector<28x1xf32> to vector<24x1xf32>
      %c0_225 = arith.constant 0 : index
      %c0_226 = arith.constant 0 : index
      %c0_227 = arith.constant 0 : index
      %338 = vector.load %arg2[%c0_225, %c0_226, %c0_227] : memref<25x1x128xf32, #tpu.memory_space<vmem>>, vector<1x1x128xf32>
      %339 = vector.shape_cast %338 : vector<1x1x128xf32> to vector<1x128xf32>
      %340 = vector.broadcast %337 : vector<24x1xf32> to vector<24x128xf32>
      %341 = vector.broadcast %339 : vector<1x128xf32> to vector<24x128xf32>
      %342 = arith.mulf %340, %341 : vector<24x128xf32>
      %343 = arith.addf %332, %342 : vector<24x128xf32>
      %344 = vector.extract_strided_slice %336 {offsets = [1, 0], sizes = [24, 1], strides = [1, 1]} : vector<28x1xf32> to vector<24x1xf32>
      %c1_228 = arith.constant 1 : index
      %c0_229 = arith.constant 0 : index
      %c0_230 = arith.constant 0 : index
      %345 = vector.load %arg2[%c1_228, %c0_229, %c0_230] : memref<25x1x128xf32, #tpu.memory_space<vmem>>, vector<1x1x128xf32>
      %346 = vector.shape_cast %345 : vector<1x1x128xf32> to vector<1x128xf32>
      %347 = vector.broadcast %344 : vector<24x1xf32> to vector<24x128xf32>
      %348 = vector.broadcast %346 : vector<1x128xf32> to vector<24x128xf32>
      %349 = arith.mulf %347, %348 : vector<24x128xf32>
      %350 = arith.addf %343, %349 : vector<24x128xf32>
      %351 = vector.extract_strided_slice %336 {offsets = [2, 0], sizes = [24, 1], strides = [1, 1]} : vector<28x1xf32> to vector<24x1xf32>
      %c2_231 = arith.constant 2 : index
      %c0_232 = arith.constant 0 : index
      %c0_233 = arith.constant 0 : index
      %352 = vector.load %arg2[%c2_231, %c0_232, %c0_233] : memref<25x1x128xf32, #tpu.memory_space<vmem>>, vector<1x1x128xf32>
      %353 = vector.shape_cast %352 : vector<1x1x128xf32> to vector<1x128xf32>
      %354 = vector.broadcast %351 : vector<24x1xf32> to vector<24x128xf32>
      %355 = vector.broadcast %353 : vector<1x128xf32> to vector<24x128xf32>
      %356 = arith.mulf %354, %355 : vector<24x128xf32>
      %357 = arith.addf %350, %356 : vector<24x128xf32>
      %358 = vector.extract_strided_slice %336 {offsets = [3, 0], sizes = [24, 1], strides = [1, 1]} : vector<28x1xf32> to vector<24x1xf32>
      %c3_234 = arith.constant 3 : index
      %c0_235 = arith.constant 0 : index
      %c0_236 = arith.constant 0 : index
      %359 = vector.load %arg2[%c3_234, %c0_235, %c0_236] : memref<25x1x128xf32, #tpu.memory_space<vmem>>, vector<1x1x128xf32>
      %360 = vector.shape_cast %359 : vector<1x1x128xf32> to vector<1x128xf32>
      %361 = vector.broadcast %358 : vector<24x1xf32> to vector<24x128xf32>
      %362 = vector.broadcast %360 : vector<1x128xf32> to vector<24x128xf32>
      %363 = arith.mulf %361, %362 : vector<24x128xf32>
      %364 = arith.addf %357, %363 : vector<24x128xf32>
      %365 = vector.extract_strided_slice %336 {offsets = [4, 0], sizes = [24, 1], strides = [1, 1]} : vector<28x1xf32> to vector<24x1xf32>
      %c4_237 = arith.constant 4 : index
      %c0_238 = arith.constant 0 : index
      %c0_239 = arith.constant 0 : index
      %366 = vector.load %arg2[%c4_237, %c0_238, %c0_239] : memref<25x1x128xf32, #tpu.memory_space<vmem>>, vector<1x1x128xf32>
      %367 = vector.shape_cast %366 : vector<1x1x128xf32> to vector<1x128xf32>
      %368 = vector.broadcast %365 : vector<24x1xf32> to vector<24x128xf32>
      %369 = vector.broadcast %367 : vector<1x128xf32> to vector<24x128xf32>
      %370 = arith.mulf %368, %369 : vector<24x128xf32>
      %371 = arith.addf %364, %370 : vector<24x128xf32>
      %c1_i32_240 = arith.constant 1 : i32
      %372 = arith.addi %331, %c1_i32_240 : i32
      %c0_241 = arith.constant 0 : index
      %373 = arith.index_cast %372 : i32 to index
      %c0_242 = arith.constant 0 : index
      %c0_243 = arith.constant 0 : index
      %374 = vector.load %arg1[%c0_241, %373, %c0_242, %c0_243] : memref<1x28x28x1xf32, #tpu.memory_space<vmem>>, vector<1x1x28x1xf32>
      %375 = vector.shape_cast %374 : vector<1x1x28x1xf32> to vector<28x1xf32>
      %376 = vector.extract_strided_slice %375 {offsets = [0, 0], sizes = [24, 1], strides = [1, 1]} : vector<28x1xf32> to vector<24x1xf32>
      %c5_244 = arith.constant 5 : index
      %c0_245 = arith.constant 0 : index
      %c0_246 = arith.constant 0 : index
      %377 = vector.load %arg2[%c5_244, %c0_245, %c0_246] : memref<25x1x128xf32, #tpu.memory_space<vmem>>, vector<1x1x128xf32>
      %378 = vector.shape_cast %377 : vector<1x1x128xf32> to vector<1x128xf32>
      %379 = vector.broadcast %376 : vector<24x1xf32> to vector<24x128xf32>
      %380 = vector.broadcast %378 : vector<1x128xf32> to vector<24x128xf32>
      %381 = arith.mulf %379, %380 : vector<24x128xf32>
      %382 = arith.addf %371, %381 : vector<24x128xf32>
      %383 = vector.extract_strided_slice %375 {offsets = [1, 0], sizes = [24, 1], strides = [1, 1]} : vector<28x1xf32> to vector<24x1xf32>
      %c6_247 = arith.constant 6 : index
      %c0_248 = arith.constant 0 : index
      %c0_249 = arith.constant 0 : index
      %384 = vector.load %arg2[%c6_247, %c0_248, %c0_249] : memref<25x1x128xf32, #tpu.memory_space<vmem>>, vector<1x1x128xf32>
      %385 = vector.shape_cast %384 : vector<1x1x128xf32> to vector<1x128xf32>
      %386 = vector.broadcast %383 : vector<24x1xf32> to vector<24x128xf32>
      %387 = vector.broadcast %385 : vector<1x128xf32> to vector<24x128xf32>
      %388 = arith.mulf %386, %387 : vector<24x128xf32>
      %389 = arith.addf %382, %388 : vector<24x128xf32>
      %390 = vector.extract_strided_slice %375 {offsets = [2, 0], sizes = [24, 1], strides = [1, 1]} : vector<28x1xf32> to vector<24x1xf32>
      %c7_250 = arith.constant 7 : index
      %c0_251 = arith.constant 0 : index
      %c0_252 = arith.constant 0 : index
      %391 = vector.load %arg2[%c7_250, %c0_251, %c0_252] : memref<25x1x128xf32, #tpu.memory_space<vmem>>, vector<1x1x128xf32>
      %392 = vector.shape_cast %391 : vector<1x1x128xf32> to vector<1x128xf32>
      %393 = vector.broadcast %390 : vector<24x1xf32> to vector<24x128xf32>
      %394 = vector.broadcast %392 : vector<1x128xf32> to vector<24x128xf32>
      %395 = arith.mulf %393, %394 : vector<24x128xf32>
      %396 = arith.addf %389, %395 : vector<24x128xf32>
      %397 = vector.extract_strided_slice %375 {offsets = [3, 0], sizes = [24, 1], strides = [1, 1]} : vector<28x1xf32> to vector<24x1xf32>
      %c8_253 = arith.constant 8 : index
      %c0_254 = arith.constant 0 : index
      %c0_255 = arith.constant 0 : index
      %398 = vector.load %arg2[%c8_253, %c0_254, %c0_255] : memref<25x1x128xf32, #tpu.memory_space<vmem>>, vector<1x1x128xf32>
      %399 = vector.shape_cast %398 : vector<1x1x128xf32> to vector<1x128xf32>
      %400 = vector.broadcast %397 : vector<24x1xf32> to vector<24x128xf32>
      %401 = vector.broadcast %399 : vector<1x128xf32> to vector<24x128xf32>
      %402 = arith.mulf %400, %401 : vector<24x128xf32>
      %403 = arith.addf %396, %402 : vector<24x128xf32>
      %404 = vector.extract_strided_slice %375 {offsets = [4, 0], sizes = [24, 1], strides = [1, 1]} : vector<28x1xf32> to vector<24x1xf32>
      %c9_256 = arith.constant 9 : index
      %c0_257 = arith.constant 0 : index
      %c0_258 = arith.constant 0 : index
      %405 = vector.load %arg2[%c9_256, %c0_257, %c0_258] : memref<25x1x128xf32, #tpu.memory_space<vmem>>, vector<1x1x128xf32>
      %406 = vector.shape_cast %405 : vector<1x1x128xf32> to vector<1x128xf32>
      %407 = vector.broadcast %404 : vector<24x1xf32> to vector<24x128xf32>
      %408 = vector.broadcast %406 : vector<1x128xf32> to vector<24x128xf32>
      %409 = arith.mulf %407, %408 : vector<24x128xf32>
      %410 = arith.addf %403, %409 : vector<24x128xf32>
      %c2_i32_259 = arith.constant 2 : i32
      %411 = arith.addi %331, %c2_i32_259 : i32
      %c0_260 = arith.constant 0 : index
      %412 = arith.index_cast %411 : i32 to index
      %c0_261 = arith.constant 0 : index
      %c0_262 = arith.constant 0 : index
      %413 = vector.load %arg1[%c0_260, %412, %c0_261, %c0_262] : memref<1x28x28x1xf32, #tpu.memory_space<vmem>>, vector<1x1x28x1xf32>
      %414 = vector.shape_cast %413 : vector<1x1x28x1xf32> to vector<28x1xf32>
      %415 = vector.extract_strided_slice %414 {offsets = [0, 0], sizes = [24, 1], strides = [1, 1]} : vector<28x1xf32> to vector<24x1xf32>
      %c10_263 = arith.constant 10 : index
      %c0_264 = arith.constant 0 : index
      %c0_265 = arith.constant 0 : index
      %416 = vector.load %arg2[%c10_263, %c0_264, %c0_265] : memref<25x1x128xf32, #tpu.memory_space<vmem>>, vector<1x1x128xf32>
      %417 = vector.shape_cast %416 : vector<1x1x128xf32> to vector<1x128xf32>
      %418 = vector.broadcast %415 : vector<24x1xf32> to vector<24x128xf32>
      %419 = vector.broadcast %417 : vector<1x128xf32> to vector<24x128xf32>
      %420 = arith.mulf %418, %419 : vector<24x128xf32>
      %421 = arith.addf %410, %420 : vector<24x128xf32>
      %422 = vector.extract_strided_slice %414 {offsets = [1, 0], sizes = [24, 1], strides = [1, 1]} : vector<28x1xf32> to vector<24x1xf32>
      %c11_266 = arith.constant 11 : index
      %c0_267 = arith.constant 0 : index
      %c0_268 = arith.constant 0 : index
      %423 = vector.load %arg2[%c11_266, %c0_267, %c0_268] : memref<25x1x128xf32, #tpu.memory_space<vmem>>, vector<1x1x128xf32>
      %424 = vector.shape_cast %423 : vector<1x1x128xf32> to vector<1x128xf32>
      %425 = vector.broadcast %422 : vector<24x1xf32> to vector<24x128xf32>
      %426 = vector.broadcast %424 : vector<1x128xf32> to vector<24x128xf32>
      %427 = arith.mulf %425, %426 : vector<24x128xf32>
      %428 = arith.addf %421, %427 : vector<24x128xf32>
      %429 = vector.extract_strided_slice %414 {offsets = [2, 0], sizes = [24, 1], strides = [1, 1]} : vector<28x1xf32> to vector<24x1xf32>
      %c12_269 = arith.constant 12 : index
      %c0_270 = arith.constant 0 : index
      %c0_271 = arith.constant 0 : index
      %430 = vector.load %arg2[%c12_269, %c0_270, %c0_271] : memref<25x1x128xf32, #tpu.memory_space<vmem>>, vector<1x1x128xf32>
      %431 = vector.shape_cast %430 : vector<1x1x128xf32> to vector<1x128xf32>
      %432 = vector.broadcast %429 : vector<24x1xf32> to vector<24x128xf32>
      %433 = vector.broadcast %431 : vector<1x128xf32> to vector<24x128xf32>
      %434 = arith.mulf %432, %433 : vector<24x128xf32>
      %435 = arith.addf %428, %434 : vector<24x128xf32>
      %436 = vector.extract_strided_slice %414 {offsets = [3, 0], sizes = [24, 1], strides = [1, 1]} : vector<28x1xf32> to vector<24x1xf32>
      %c13_272 = arith.constant 13 : index
      %c0_273 = arith.constant 0 : index
      %c0_274 = arith.constant 0 : index
      %437 = vector.load %arg2[%c13_272, %c0_273, %c0_274] : memref<25x1x128xf32, #tpu.memory_space<vmem>>, vector<1x1x128xf32>
      %438 = vector.shape_cast %437 : vector<1x1x128xf32> to vector<1x128xf32>
      %439 = vector.broadcast %436 : vector<24x1xf32> to vector<24x128xf32>
      %440 = vector.broadcast %438 : vector<1x128xf32> to vector<24x128xf32>
      %441 = arith.mulf %439, %440 : vector<24x128xf32>
      %442 = arith.addf %435, %441 : vector<24x128xf32>
      %443 = vector.extract_strided_slice %414 {offsets = [4, 0], sizes = [24, 1], strides = [1, 1]} : vector<28x1xf32> to vector<24x1xf32>
      %c14_275 = arith.constant 14 : index
      %c0_276 = arith.constant 0 : index
      %c0_277 = arith.constant 0 : index
      %444 = vector.load %arg2[%c14_275, %c0_276, %c0_277] : memref<25x1x128xf32, #tpu.memory_space<vmem>>, vector<1x1x128xf32>
      %445 = vector.shape_cast %444 : vector<1x1x128xf32> to vector<1x128xf32>
      %446 = vector.broadcast %443 : vector<24x1xf32> to vector<24x128xf32>
      %447 = vector.broadcast %445 : vector<1x128xf32> to vector<24x128xf32>
      %448 = arith.mulf %446, %447 : vector<24x128xf32>
      %449 = arith.addf %442, %448 : vector<24x128xf32>
      %c3_i32_278 = arith.constant 3 : i32
      %450 = arith.addi %331, %c3_i32_278 : i32
      %c0_279 = arith.constant 0 : index
      %451 = arith.index_cast %450 : i32 to index
      %c0_280 = arith.constant 0 : index
      %c0_281 = arith.constant 0 : index
      %452 = vector.load %arg1[%c0_279, %451, %c0_280, %c0_281] : memref<1x28x28x1xf32, #tpu.memory_space<vmem>>, vector<1x1x28x1xf32>
      %453 = vector.shape_cast %452 : vector<1x1x28x1xf32> to vector<28x1xf32>
      %454 = vector.extract_strided_slice %453 {offsets = [0, 0], sizes = [24, 1], strides = [1, 1]} : vector<28x1xf32> to vector<24x1xf32>
      %c15_282 = arith.constant 15 : index
      %c0_283 = arith.constant 0 : index
      %c0_284 = arith.constant 0 : index
      %455 = vector.load %arg2[%c15_282, %c0_283, %c0_284] : memref<25x1x128xf32, #tpu.memory_space<vmem>>, vector<1x1x128xf32>
      %456 = vector.shape_cast %455 : vector<1x1x128xf32> to vector<1x128xf32>
      %457 = vector.broadcast %454 : vector<24x1xf32> to vector<24x128xf32>
      %458 = vector.broadcast %456 : vector<1x128xf32> to vector<24x128xf32>
      %459 = arith.mulf %457, %458 : vector<24x128xf32>
      %460 = arith.addf %449, %459 : vector<24x128xf32>
      %461 = vector.extract_strided_slice %453 {offsets = [1, 0], sizes = [24, 1], strides = [1, 1]} : vector<28x1xf32> to vector<24x1xf32>
      %c16_285 = arith.constant 16 : index
      %c0_286 = arith.constant 0 : index
      %c0_287 = arith.constant 0 : index
      %462 = vector.load %arg2[%c16_285, %c0_286, %c0_287] : memref<25x1x128xf32, #tpu.memory_space<vmem>>, vector<1x1x128xf32>
      %463 = vector.shape_cast %462 : vector<1x1x128xf32> to vector<1x128xf32>
      %464 = vector.broadcast %461 : vector<24x1xf32> to vector<24x128xf32>
      %465 = vector.broadcast %463 : vector<1x128xf32> to vector<24x128xf32>
      %466 = arith.mulf %464, %465 : vector<24x128xf32>
      %467 = arith.addf %460, %466 : vector<24x128xf32>
      %468 = vector.extract_strided_slice %453 {offsets = [2, 0], sizes = [24, 1], strides = [1, 1]} : vector<28x1xf32> to vector<24x1xf32>
      %c17_288 = arith.constant 17 : index
      %c0_289 = arith.constant 0 : index
      %c0_290 = arith.constant 0 : index
      %469 = vector.load %arg2[%c17_288, %c0_289, %c0_290] : memref<25x1x128xf32, #tpu.memory_space<vmem>>, vector<1x1x128xf32>
      %470 = vector.shape_cast %469 : vector<1x1x128xf32> to vector<1x128xf32>
      %471 = vector.broadcast %468 : vector<24x1xf32> to vector<24x128xf32>
      %472 = vector.broadcast %470 : vector<1x128xf32> to vector<24x128xf32>
      %473 = arith.mulf %471, %472 : vector<24x128xf32>
      %474 = arith.addf %467, %473 : vector<24x128xf32>
      %475 = vector.extract_strided_slice %453 {offsets = [3, 0], sizes = [24, 1], strides = [1, 1]} : vector<28x1xf32> to vector<24x1xf32>
      %c18_291 = arith.constant 18 : index
      %c0_292 = arith.constant 0 : index
      %c0_293 = arith.constant 0 : index
      %476 = vector.load %arg2[%c18_291, %c0_292, %c0_293] : memref<25x1x128xf32, #tpu.memory_space<vmem>>, vector<1x1x128xf32>
      %477 = vector.shape_cast %476 : vector<1x1x128xf32> to vector<1x128xf32>
      %478 = vector.broadcast %475 : vector<24x1xf32> to vector<24x128xf32>
      %479 = vector.broadcast %477 : vector<1x128xf32> to vector<24x128xf32>
      %480 = arith.mulf %478, %479 : vector<24x128xf32>
      %481 = arith.addf %474, %480 : vector<24x128xf32>
      %482 = vector.extract_strided_slice %453 {offsets = [4, 0], sizes = [24, 1], strides = [1, 1]} : vector<28x1xf32> to vector<24x1xf32>
      %c19_294 = arith.constant 19 : index
      %c0_295 = arith.constant 0 : index
      %c0_296 = arith.constant 0 : index
      %483 = vector.load %arg2[%c19_294, %c0_295, %c0_296] : memref<25x1x128xf32, #tpu.memory_space<vmem>>, vector<1x1x128xf32>
      %484 = vector.shape_cast %483 : vector<1x1x128xf32> to vector<1x128xf32>
      %485 = vector.broadcast %482 : vector<24x1xf32> to vector<24x128xf32>
      %486 = vector.broadcast %484 : vector<1x128xf32> to vector<24x128xf32>
      %487 = arith.mulf %485, %486 : vector<24x128xf32>
      %488 = arith.addf %481, %487 : vector<24x128xf32>
      %c4_i32_297 = arith.constant 4 : i32
      %489 = arith.addi %331, %c4_i32_297 : i32
      %c0_298 = arith.constant 0 : index
      %490 = arith.index_cast %489 : i32 to index
      %c0_299 = arith.constant 0 : index
      %c0_300 = arith.constant 0 : index
      %491 = vector.load %arg1[%c0_298, %490, %c0_299, %c0_300] : memref<1x28x28x1xf32, #tpu.memory_space<vmem>>, vector<1x1x28x1xf32>
      %492 = vector.shape_cast %491 : vector<1x1x28x1xf32> to vector<28x1xf32>
      %493 = vector.extract_strided_slice %492 {offsets = [0, 0], sizes = [24, 1], strides = [1, 1]} : vector<28x1xf32> to vector<24x1xf32>
      %c20_301 = arith.constant 20 : index
      %c0_302 = arith.constant 0 : index
      %c0_303 = arith.constant 0 : index
      %494 = vector.load %arg2[%c20_301, %c0_302, %c0_303] : memref<25x1x128xf32, #tpu.memory_space<vmem>>, vector<1x1x128xf32>
      %495 = vector.shape_cast %494 : vector<1x1x128xf32> to vector<1x128xf32>
      %496 = vector.broadcast %493 : vector<24x1xf32> to vector<24x128xf32>
      %497 = vector.broadcast %495 : vector<1x128xf32> to vector<24x128xf32>
      %498 = arith.mulf %496, %497 : vector<24x128xf32>
      %499 = arith.addf %488, %498 : vector<24x128xf32>
      %500 = vector.extract_strided_slice %492 {offsets = [1, 0], sizes = [24, 1], strides = [1, 1]} : vector<28x1xf32> to vector<24x1xf32>
      %c21_304 = arith.constant 21 : index
      %c0_305 = arith.constant 0 : index
      %c0_306 = arith.constant 0 : index
      %501 = vector.load %arg2[%c21_304, %c0_305, %c0_306] : memref<25x1x128xf32, #tpu.memory_space<vmem>>, vector<1x1x128xf32>
      %502 = vector.shape_cast %501 : vector<1x1x128xf32> to vector<1x128xf32>
      %503 = vector.broadcast %500 : vector<24x1xf32> to vector<24x128xf32>
      %504 = vector.broadcast %502 : vector<1x128xf32> to vector<24x128xf32>
      %505 = arith.mulf %503, %504 : vector<24x128xf32>
      %506 = arith.addf %499, %505 : vector<24x128xf32>
      %507 = vector.extract_strided_slice %492 {offsets = [2, 0], sizes = [24, 1], strides = [1, 1]} : vector<28x1xf32> to vector<24x1xf32>
      %c22_307 = arith.constant 22 : index
      %c0_308 = arith.constant 0 : index
      %c0_309 = arith.constant 0 : index
      %508 = vector.load %arg2[%c22_307, %c0_308, %c0_309] : memref<25x1x128xf32, #tpu.memory_space<vmem>>, vector<1x1x128xf32>
      %509 = vector.shape_cast %508 : vector<1x1x128xf32> to vector<1x128xf32>
      %510 = vector.broadcast %507 : vector<24x1xf32> to vector<24x128xf32>
      %511 = vector.broadcast %509 : vector<1x128xf32> to vector<24x128xf32>
      %512 = arith.mulf %510, %511 : vector<24x128xf32>
      %513 = arith.addf %506, %512 : vector<24x128xf32>
      %514 = vector.extract_strided_slice %492 {offsets = [3, 0], sizes = [24, 1], strides = [1, 1]} : vector<28x1xf32> to vector<24x1xf32>
      %c23_310 = arith.constant 23 : index
      %c0_311 = arith.constant 0 : index
      %c0_312 = arith.constant 0 : index
      %515 = vector.load %arg2[%c23_310, %c0_311, %c0_312] : memref<25x1x128xf32, #tpu.memory_space<vmem>>, vector<1x1x128xf32>
      %516 = vector.shape_cast %515 : vector<1x1x128xf32> to vector<1x128xf32>
      %517 = vector.broadcast %514 : vector<24x1xf32> to vector<24x128xf32>
      %518 = vector.broadcast %516 : vector<1x128xf32> to vector<24x128xf32>
      %519 = arith.mulf %517, %518 : vector<24x128xf32>
      %520 = arith.addf %513, %519 : vector<24x128xf32>
      %521 = vector.extract_strided_slice %492 {offsets = [4, 0], sizes = [24, 1], strides = [1, 1]} : vector<28x1xf32> to vector<24x1xf32>
      %c24_313 = arith.constant 24 : index
      %c0_314 = arith.constant 0 : index
      %c0_315 = arith.constant 0 : index
      %522 = vector.load %arg2[%c24_313, %c0_314, %c0_315] : memref<25x1x128xf32, #tpu.memory_space<vmem>>, vector<1x1x128xf32>
      %523 = vector.shape_cast %522 : vector<1x1x128xf32> to vector<1x128xf32>
      %524 = vector.broadcast %521 : vector<24x1xf32> to vector<24x128xf32>
      %525 = vector.broadcast %523 : vector<1x128xf32> to vector<24x128xf32>
      %526 = arith.mulf %524, %525 : vector<24x128xf32>
      %527 = arith.addf %520, %526 : vector<24x128xf32>
      %528 = vector.broadcast %0 : vector<1x128xf32> to vector<24x128xf32>
      %529 = arith.addf %527, %528 : vector<24x128xf32>
      %cst_316 = arith.constant 0.000000e+00 : f32
      %530 = vector.broadcast %cst_316 : f32 to vector<24x128xf32>
      %531 = arith.maximumf %529, %530 : vector<24x128xf32>
      %532 = arith.maximumf %329, %531 : vector<24x128xf32>
      %533 = vector.extract_strided_slice %532 {offsets = [0, 0], sizes = [1, 128], strides = [1, 1]} : vector<24x128xf32> to vector<1x128xf32>
      %534 = vector.extract_strided_slice %532 {offsets = [1, 0], sizes = [1, 128], strides = [1, 1]} : vector<24x128xf32> to vector<1x128xf32>
      %535 = arith.maximumf %533, %534 : vector<1x128xf32>
      %536 = arith.index_cast %arg13 : i32 to index
      %c0_317 = arith.constant 0 : index
      %c0_318 = arith.constant 0 : index
      %537 = vector.load %arg11[%536, %c0_317, %c0_318] : memref<12x12x128xf32, #tpu.memory_space<vmem>>, vector<1x1x128xf32>
      %538 = vector.shape_cast %537 : vector<1x1x128xf32> to vector<1x128xf32>
      %539 = vector.shape_cast %535 : vector<1x128xf32> to vector<1x1x128xf32>
      tpu.vector_store %arg11[%536, %c0_317, %c0_318], %539 {strides = array<i32>} : memref<12x12x128xf32, #tpu.memory_space<vmem>>, vector<1x1x128xf32>,
      %540 = vector.extract_strided_slice %532 {offsets = [2, 0], sizes = [1, 128], strides = [1, 1]} : vector<24x128xf32> to vector<1x128xf32>
      %541 = vector.extract_strided_slice %532 {offsets = [3, 0], sizes = [1, 128], strides = [1, 1]} : vector<24x128xf32> to vector<1x128xf32>
      %542 = arith.maximumf %540, %541 : vector<1x128xf32>
      %543 = arith.index_cast %arg13 : i32 to index
      %c1_319 = arith.constant 1 : index
      %c0_320 = arith.constant 0 : index
      %544 = vector.load %arg11[%543, %c1_319, %c0_320] : memref<12x12x128xf32, #tpu.memory_space<vmem>>, vector<1x1x128xf32>
      %545 = vector.shape_cast %544 : vector<1x1x128xf32> to vector<1x128xf32>
      %546 = vector.shape_cast %542 : vector<1x128xf32> to vector<1x1x128xf32>
      tpu.vector_store %arg11[%543, %c1_319, %c0_320], %546 {strides = array<i32>} : memref<12x12x128xf32, #tpu.memory_space<vmem>>, vector<1x1x128xf32>,
      %547 = vector.extract_strided_slice %532 {offsets = [4, 0], sizes = [1, 128], strides = [1, 1]} : vector<24x128xf32> to vector<1x128xf32>
      %548 = vector.extract_strided_slice %532 {offsets = [5, 0], sizes = [1, 128], strides = [1, 1]} : vector<24x128xf32> to vector<1x128xf32>
      %549 = arith.maximumf %547, %548 : vector<1x128xf32>
      %550 = arith.index_cast %arg13 : i32 to index
      %c2_321 = arith.constant 2 : index
      %c0_322 = arith.constant 0 : index
      %551 = vector.load %arg11[%550, %c2_321, %c0_322] : memref<12x12x128xf32, #tpu.memory_space<vmem>>, vector<1x1x128xf32>
      %552 = vector.shape_cast %551 : vector<1x1x128xf32> to vector<1x128xf32>
      %553 = vector.shape_cast %549 : vector<1x128xf32> to vector<1x1x128xf32>
      tpu.vector_store %arg11[%550, %c2_321, %c0_322], %553 {strides = array<i32>} : memref<12x12x128xf32, #tpu.memory_space<vmem>>, vector<1x1x128xf32>,
      %554 = vector.extract_strided_slice %532 {offsets = [6, 0], sizes = [1, 128], strides = [1, 1]} : vector<24x128xf32> to vector<1x128xf32>
      %555 = vector.extract_strided_slice %532 {offsets = [7, 0], sizes = [1, 128], strides = [1, 1]} : vector<24x128xf32> to vector<1x128xf32>
      %556 = arith.maximumf %554, %555 : vector<1x128xf32>
      %557 = arith.index_cast %arg13 : i32 to index
      %c3_323 = arith.constant 3 : index
      %c0_324 = arith.constant 0 : index
      %558 = vector.load %arg11[%557, %c3_323, %c0_324] : memref<12x12x128xf32, #tpu.memory_space<vmem>>, vector<1x1x128xf32>
      %559 = vector.shape_cast %558 : vector<1x1x128xf32> to vector<1x128xf32>
      %560 = vector.shape_cast %556 : vector<1x128xf32> to vector<1x1x128xf32>
      tpu.vector_store %arg11[%557, %c3_323, %c0_324], %560 {strides = array<i32>} : memref<12x12x128xf32, #tpu.memory_space<vmem>>, vector<1x1x128xf32>,
      %561 = vector.extract_strided_slice %532 {offsets = [8, 0], sizes = [1, 128], strides = [1, 1]} : vector<24x128xf32> to vector<1x128xf32>
      %562 = vector.extract_strided_slice %532 {offsets = [9, 0], sizes = [1, 128], strides = [1, 1]} : vector<24x128xf32> to vector<1x128xf32>
      %563 = arith.maximumf %561, %562 : vector<1x128xf32>
      %564 = arith.index_cast %arg13 : i32 to index
      %c4_325 = arith.constant 4 : index
      %c0_326 = arith.constant 0 : index
      %565 = vector.load %arg11[%564, %c4_325, %c0_326] : memref<12x12x128xf32, #tpu.memory_space<vmem>>, vector<1x1x128xf32>
      %566 = vector.shape_cast %565 : vector<1x1x128xf32> to vector<1x128xf32>
      %567 = vector.shape_cast %563 : vector<1x128xf32> to vector<1x1x128xf32>
      tpu.vector_store %arg11[%564, %c4_325, %c0_326], %567 {strides = array<i32>} : memref<12x12x128xf32, #tpu.memory_space<vmem>>, vector<1x1x128xf32>,
      %568 = vector.extract_strided_slice %532 {offsets = [10, 0], sizes = [1, 128], strides = [1, 1]} : vector<24x128xf32> to vector<1x128xf32>
      %569 = vector.extract_strided_slice %532 {offsets = [11, 0], sizes = [1, 128], strides = [1, 1]} : vector<24x128xf32> to vector<1x128xf32>
      %570 = arith.maximumf %568, %569 : vector<1x128xf32>
      %571 = arith.index_cast %arg13 : i32 to index
      %c5_327 = arith.constant 5 : index
      %c0_328 = arith.constant 0 : index
      %572 = vector.load %arg11[%571, %c5_327, %c0_328] : memref<12x12x128xf32, #tpu.memory_space<vmem>>, vector<1x1x128xf32>
      %573 = vector.shape_cast %572 : vector<1x1x128xf32> to vector<1x128xf32>
      %574 = vector.shape_cast %570 : vector<1x128xf32> to vector<1x1x128xf32>
      tpu.vector_store %arg11[%571, %c5_327, %c0_328], %574 {strides = array<i32>} : memref<12x12x128xf32, #tpu.memory_space<vmem>>, vector<1x1x128xf32>,
      %575 = vector.extract_strided_slice %532 {offsets = [12, 0], sizes = [1, 128], strides = [1, 1]} : vector<24x128xf32> to vector<1x128xf32>
      %576 = vector.extract_strided_slice %532 {offsets = [13, 0], sizes = [1, 128], strides = [1, 1]} : vector<24x128xf32> to vector<1x128xf32>
      %577 = arith.maximumf %575, %576 : vector<1x128xf32>
      %578 = arith.index_cast %arg13 : i32 to index
      %c6_329 = arith.constant 6 : index
      %c0_330 = arith.constant 0 : index
      %579 = vector.load %arg11[%578, %c6_329, %c0_330] : memref<12x12x128xf32, #tpu.memory_space<vmem>>, vector<1x1x128xf32>
      %580 = vector.shape_cast %579 : vector<1x1x128xf32> to vector<1x128xf32>
      %581 = vector.shape_cast %577 : vector<1x128xf32> to vector<1x1x128xf32>
      tpu.vector_store %arg11[%578, %c6_329, %c0_330], %581 {strides = array<i32>} : memref<12x12x128xf32, #tpu.memory_space<vmem>>, vector<1x1x128xf32>,
      %582 = vector.extract_strided_slice %532 {offsets = [14, 0], sizes = [1, 128], strides = [1, 1]} : vector<24x128xf32> to vector<1x128xf32>
      %583 = vector.extract_strided_slice %532 {offsets = [15, 0], sizes = [1, 128], strides = [1, 1]} : vector<24x128xf32> to vector<1x128xf32>
      %584 = arith.maximumf %582, %583 : vector<1x128xf32>
      %585 = arith.index_cast %arg13 : i32 to index
      %c7_331 = arith.constant 7 : index
      %c0_332 = arith.constant 0 : index
      %586 = vector.load %arg11[%585, %c7_331, %c0_332] : memref<12x12x128xf32, #tpu.memory_space<vmem>>, vector<1x1x128xf32>
      %587 = vector.shape_cast %586 : vector<1x1x128xf32> to vector<1x128xf32>
      %588 = vector.shape_cast %584 : vector<1x128xf32> to vector<1x1x128xf32>
      tpu.vector_store %arg11[%585, %c7_331, %c0_332], %588 {strides = array<i32>} : memref<12x12x128xf32, #tpu.memory_space<vmem>>, vector<1x1x128xf32>,
      %589 = vector.extract_strided_slice %532 {offsets = [16, 0], sizes = [1, 128], strides = [1, 1]} : vector<24x128xf32> to vector<1x128xf32>
      %590 = vector.extract_strided_slice %532 {offsets = [17, 0], sizes = [1, 128], strides = [1, 1]} : vector<24x128xf32> to vector<1x128xf32>
      %591 = arith.maximumf %589, %590 : vector<1x128xf32>
      %592 = arith.index_cast %arg13 : i32 to index
      %c8_333 = arith.constant 8 : index
      %c0_334 = arith.constant 0 : index
      %593 = vector.load %arg11[%592, %c8_333, %c0_334] : memref<12x12x128xf32, #tpu.memory_space<vmem>>, vector<1x1x128xf32>
      %594 = vector.shape_cast %593 : vector<1x1x128xf32> to vector<1x128xf32>
      %595 = vector.shape_cast %591 : vector<1x128xf32> to vector<1x1x128xf32>
      tpu.vector_store %arg11[%592, %c8_333, %c0_334], %595 {strides = array<i32>} : memref<12x12x128xf32, #tpu.memory_space<vmem>>, vector<1x1x128xf32>,
      %596 = vector.extract_strided_slice %532 {offsets = [18, 0], sizes = [1, 128], strides = [1, 1]} : vector<24x128xf32> to vector<1x128xf32>
      %597 = vector.extract_strided_slice %532 {offsets = [19, 0], sizes = [1, 128], strides = [1, 1]} : vector<24x128xf32> to vector<1x128xf32>
      %598 = arith.maximumf %596, %597 : vector<1x128xf32>
      %599 = arith.index_cast %arg13 : i32 to index
      %c9_335 = arith.constant 9 : index
      %c0_336 = arith.constant 0 : index
      %600 = vector.load %arg11[%599, %c9_335, %c0_336] : memref<12x12x128xf32, #tpu.memory_space<vmem>>, vector<1x1x128xf32>
      %601 = vector.shape_cast %600 : vector<1x1x128xf32> to vector<1x128xf32>
      %602 = vector.shape_cast %598 : vector<1x128xf32> to vector<1x1x128xf32>
      tpu.vector_store %arg11[%599, %c9_335, %c0_336], %602 {strides = array<i32>} : memref<12x12x128xf32, #tpu.memory_space<vmem>>, vector<1x1x128xf32>,
      %603 = vector.extract_strided_slice %532 {offsets = [20, 0], sizes = [1, 128], strides = [1, 1]} : vector<24x128xf32> to vector<1x128xf32>
      %604 = vector.extract_strided_slice %532 {offsets = [21, 0], sizes = [1, 128], strides = [1, 1]} : vector<24x128xf32> to vector<1x128xf32>
      %605 = arith.maximumf %603, %604 : vector<1x128xf32>
      %606 = arith.index_cast %arg13 : i32 to index
      %c10_337 = arith.constant 10 : index
      %c0_338 = arith.constant 0 : index
      %607 = vector.load %arg11[%606, %c10_337, %c0_338] : memref<12x12x128xf32, #tpu.memory_space<vmem>>, vector<1x1x128xf32>
      %608 = vector.shape_cast %607 : vector<1x1x128xf32> to vector<1x128xf32>
      %609 = vector.shape_cast %605 : vector<1x128xf32> to vector<1x1x128xf32>
      tpu.vector_store %arg11[%606, %c10_337, %c0_338], %609 {strides = array<i32>} : memref<12x12x128xf32, #tpu.memory_space<vmem>>, vector<1x1x128xf32>,
      %610 = vector.extract_strided_slice %532 {offsets = [22, 0], sizes = [1, 128], strides = [1, 1]} : vector<24x128xf32> to vector<1x128xf32>
      %611 = vector.extract_strided_slice %532 {offsets = [23, 0], sizes = [1, 128], strides = [1, 1]} : vector<24x128xf32> to vector<1x128xf32>
      %612 = arith.maximumf %610, %611 : vector<1x128xf32>
      %613 = arith.index_cast %arg13 : i32 to index
      %c11_339 = arith.constant 11 : index
      %c0_340 = arith.constant 0 : index
      %614 = vector.load %arg11[%613, %c11_339, %c0_340] : memref<12x12x128xf32, #tpu.memory_space<vmem>>, vector<1x1x128xf32>
      %615 = vector.shape_cast %614 : vector<1x1x128xf32> to vector<1x128xf32>
      %616 = vector.shape_cast %612 : vector<1x128xf32> to vector<1x1x128xf32>
      tpu.vector_store %arg11[%613, %c11_339, %c0_340], %616 {strides = array<i32>} : memref<12x12x128xf32, #tpu.memory_space<vmem>>, vector<1x1x128xf32>,
    }
    %c12_i32_3 = arith.constant 12 : i32
    %c0_i32_4 = arith.constant 0 : i32
    %c4_i32 = arith.constant 4 : i32
    %3 = arith.addi %c0_i32_4, %c4_i32 : i32
    %c1_i32_5 = arith.constant 1 : i32
    scf.for %arg13 = %c0_i32_4 to %3 step %c1_i32_5  : i32 {
      %c2_i32 = arith.constant 2 : i32
      %129 = arith.muli %c2_i32, %arg13 : i32
      %cst_143 = arith.constant 0.000000e+00 : f32
      %130 = vector.broadcast %cst_143 : f32 to vector<8x128xf32>
      %c0_i32_144 = arith.constant 0 : i32
      %131 = arith.addi %129, %c0_i32_144 : i32
      %132 = arith.index_cast %131 : i32 to index
      %c0_145 = arith.constant 0 : index
      %c0_146 = arith.constant 0 : index
      %133 = vector.load %arg11[%132, %c0_145, %c0_146] : memref<12x12x128xf32, #tpu.memory_space<vmem>>, vector<1x8x128xf32>
      %134 = vector.shape_cast %133 : vector<1x8x128xf32> to vector<8x128xf32>
      %135 = arith.truncf %134 : vector<8x128xf32> to vector<8x128xbf16>
      %c0_147 = arith.constant 0 : index
      %c0_148 = arith.constant 0 : index
      %c0_149 = arith.constant 0 : index
      %136 = vector.load %arg4[%c0_147, %c0_148, %c0_149] : memref<25x128x128xbf16, #tpu.memory_space<vmem>>, vector<1x128x128xbf16>
      %137 = vector.shape_cast %136 : vector<1x128x128xbf16> to vector<128x128xbf16>
      %cst_150 = arith.constant dense<0.000000e+00> : vector<8x128xf32>
      %138 = tpu.matmul %135, %137, %cst_150 {dimension_numbers = #tpu.dot_dimension_numbers<[1], [0], [0], [1], [0, 0, 1, 1], [], []>} : vector<8x128xbf16>, vector<128x128xbf16>, vector<8x128xf32> -> vector<8x128xf32>
      %139 = arith.addf %130, %138 : vector<8x128xf32>
      %c0_i32_151 = arith.constant 0 : i32
      %140 = arith.addi %129, %c0_i32_151 : i32
      %141 = arith.index_cast %140 : i32 to index
      %c1_152 = arith.constant 1 : index
      %c0_153 = arith.constant 0 : index
      %142 = vector.load %arg11[%141, %c1_152, %c0_153] : memref<12x12x128xf32, #tpu.memory_space<vmem>>, vector<1x8x128xf32>
      %143 = vector.shape_cast %142 : vector<1x8x128xf32> to vector<8x128xf32>
      %144 = arith.truncf %143 : vector<8x128xf32> to vector<8x128xbf16>
      %c1_154 = arith.constant 1 : index
      %c0_155 = arith.constant 0 : index
      %c0_156 = arith.constant 0 : index
      %145 = vector.load %arg4[%c1_154, %c0_155, %c0_156] : memref<25x128x128xbf16, #tpu.memory_space<vmem>>, vector<1x128x128xbf16>
      %146 = vector.shape_cast %145 : vector<1x128x128xbf16> to vector<128x128xbf16>
      %cst_157 = arith.constant dense<0.000000e+00> : vector<8x128xf32>
      %147 = tpu.matmul %144, %146, %cst_157 {dimension_numbers = #tpu.dot_dimension_numbers<[1], [0], [0], [1], [0, 0, 1, 1], [], []>} : vector<8x128xbf16>, vector<128x128xbf16>, vector<8x128xf32> -> vector<8x128xf32>
      %148 = arith.addf %139, %147 : vector<8x128xf32>
      %c0_i32_158 = arith.constant 0 : i32
      %149 = arith.addi %129, %c0_i32_158 : i32
      %150 = arith.index_cast %149 : i32 to index
      %c2_159 = arith.constant 2 : index
      %c0_160 = arith.constant 0 : index
      %151 = vector.load %arg11[%150, %c2_159, %c0_160] : memref<12x12x128xf32, #tpu.memory_space<vmem>>, vector<1x8x128xf32>
      %152 = vector.shape_cast %151 : vector<1x8x128xf32> to vector<8x128xf32>
      %153 = arith.truncf %152 : vector<8x128xf32> to vector<8x128xbf16>
      %c2_161 = arith.constant 2 : index
      %c0_162 = arith.constant 0 : index
      %c0_163 = arith.constant 0 : index
      %154 = vector.load %arg4[%c2_161, %c0_162, %c0_163] : memref<25x128x128xbf16, #tpu.memory_space<vmem>>, vector<1x128x128xbf16>
      %155 = vector.shape_cast %154 : vector<1x128x128xbf16> to vector<128x128xbf16>
      %cst_164 = arith.constant dense<0.000000e+00> : vector<8x128xf32>
      %156 = tpu.matmul %153, %155, %cst_164 {dimension_numbers = #tpu.dot_dimension_numbers<[1], [0], [0], [1], [0, 0, 1, 1], [], []>} : vector<8x128xbf16>, vector<128x128xbf16>, vector<8x128xf32> -> vector<8x128xf32>
      %157 = arith.addf %148, %156 : vector<8x128xf32>
      %c0_i32_165 = arith.constant 0 : i32
      %158 = arith.addi %129, %c0_i32_165 : i32
      %159 = arith.index_cast %158 : i32 to index
      %c3_166 = arith.constant 3 : index
      %c0_167 = arith.constant 0 : index
      %160 = vector.load %arg11[%159, %c3_166, %c0_167] : memref<12x12x128xf32, #tpu.memory_space<vmem>>, vector<1x8x128xf32>
      %161 = vector.shape_cast %160 : vector<1x8x128xf32> to vector<8x128xf32>
      %162 = arith.truncf %161 : vector<8x128xf32> to vector<8x128xbf16>
      %c3_168 = arith.constant 3 : index
      %c0_169 = arith.constant 0 : index
      %c0_170 = arith.constant 0 : index
      %163 = vector.load %arg4[%c3_168, %c0_169, %c0_170] : memref<25x128x128xbf16, #tpu.memory_space<vmem>>, vector<1x128x128xbf16>
      %164 = vector.shape_cast %163 : vector<1x128x128xbf16> to vector<128x128xbf16>
      %cst_171 = arith.constant dense<0.000000e+00> : vector<8x128xf32>
      %165 = tpu.matmul %162, %164, %cst_171 {dimension_numbers = #tpu.dot_dimension_numbers<[1], [0], [0], [1], [0, 0, 1, 1], [], []>} : vector<8x128xbf16>, vector<128x128xbf16>, vector<8x128xf32> -> vector<8x128xf32>
      %166 = arith.addf %157, %165 : vector<8x128xf32>
      %c0_i32_172 = arith.constant 0 : i32
      %167 = arith.addi %129, %c0_i32_172 : i32
      %168 = arith.index_cast %167 : i32 to index
      %c4 = arith.constant 4 : index
      %c0_173 = arith.constant 0 : index
      %169 = vector.load %arg11[%168, %c4, %c0_173] : memref<12x12x128xf32, #tpu.memory_space<vmem>>, vector<1x8x128xf32>
      %170 = vector.shape_cast %169 : vector<1x8x128xf32> to vector<8x128xf32>
      %171 = arith.truncf %170 : vector<8x128xf32> to vector<8x128xbf16>
      %c4_174 = arith.constant 4 : index
      %c0_175 = arith.constant 0 : index
      %c0_176 = arith.constant 0 : index
      %172 = vector.load %arg4[%c4_174, %c0_175, %c0_176] : memref<25x128x128xbf16, #tpu.memory_space<vmem>>, vector<1x128x128xbf16>
      %173 = vector.shape_cast %172 : vector<1x128x128xbf16> to vector<128x128xbf16>
      %cst_177 = arith.constant dense<0.000000e+00> : vector<8x128xf32>
      %174 = tpu.matmul %171, %173, %cst_177 {dimension_numbers = #tpu.dot_dimension_numbers<[1], [0], [0], [1], [0, 0, 1, 1], [], []>} : vector<8x128xbf16>, vector<128x128xbf16>, vector<8x128xf32> -> vector<8x128xf32>
      %175 = arith.addf %166, %174 : vector<8x128xf32>
      %c1_i32_178 = arith.constant 1 : i32
      %176 = arith.addi %129, %c1_i32_178 : i32
      %177 = arith.index_cast %176 : i32 to index
      %c0_179 = arith.constant 0 : index
      %c0_180 = arith.constant 0 : index
      %178 = vector.load %arg11[%177, %c0_179, %c0_180] : memref<12x12x128xf32, #tpu.memory_space<vmem>>, vector<1x8x128xf32>
      %179 = vector.shape_cast %178 : vector<1x8x128xf32> to vector<8x128xf32>
      %180 = arith.truncf %179 : vector<8x128xf32> to vector<8x128xbf16>
      %c5 = arith.constant 5 : index
      %c0_181 = arith.constant 0 : index
      %c0_182 = arith.constant 0 : index
      %181 = vector.load %arg4[%c5, %c0_181, %c0_182] : memref<25x128x128xbf16, #tpu.memory_space<vmem>>, vector<1x128x128xbf16>
      %182 = vector.shape_cast %181 : vector<1x128x128xbf16> to vector<128x128xbf16>
      %cst_183 = arith.constant dense<0.000000e+00> : vector<8x128xf32>
      %183 = tpu.matmul %180, %182, %cst_183 {dimension_numbers = #tpu.dot_dimension_numbers<[1], [0], [0], [1], [0, 0, 1, 1], [], []>} : vector<8x128xbf16>, vector<128x128xbf16>, vector<8x128xf32> -> vector<8x128xf32>
      %184 = arith.addf %175, %183 : vector<8x128xf32>
      %c1_i32_184 = arith.constant 1 : i32
      %185 = arith.addi %129, %c1_i32_184 : i32
      %186 = arith.index_cast %185 : i32 to index
      %c1_185 = arith.constant 1 : index
      %c0_186 = arith.constant 0 : index
      %187 = vector.load %arg11[%186, %c1_185, %c0_186] : memref<12x12x128xf32, #tpu.memory_space<vmem>>, vector<1x8x128xf32>
      %188 = vector.shape_cast %187 : vector<1x8x128xf32> to vector<8x128xf32>
      %189 = arith.truncf %188 : vector<8x128xf32> to vector<8x128xbf16>
      %c6 = arith.constant 6 : index
      %c0_187 = arith.constant 0 : index
      %c0_188 = arith.constant 0 : index
      %190 = vector.load %arg4[%c6, %c0_187, %c0_188] : memref<25x128x128xbf16, #tpu.memory_space<vmem>>, vector<1x128x128xbf16>
      %191 = vector.shape_cast %190 : vector<1x128x128xbf16> to vector<128x128xbf16>
      %cst_189 = arith.constant dense<0.000000e+00> : vector<8x128xf32>
      %192 = tpu.matmul %189, %191, %cst_189 {dimension_numbers = #tpu.dot_dimension_numbers<[1], [0], [0], [1], [0, 0, 1, 1], [], []>} : vector<8x128xbf16>, vector<128x128xbf16>, vector<8x128xf32> -> vector<8x128xf32>
      %193 = arith.addf %184, %192 : vector<8x128xf32>
      %c1_i32_190 = arith.constant 1 : i32
      %194 = arith.addi %129, %c1_i32_190 : i32
      %195 = arith.index_cast %194 : i32 to index
      %c2_191 = arith.constant 2 : index
      %c0_192 = arith.constant 0 : index
      %196 = vector.load %arg11[%195, %c2_191, %c0_192] : memref<12x12x128xf32, #tpu.memory_space<vmem>>, vector<1x8x128xf32>
      %197 = vector.shape_cast %196 : vector<1x8x128xf32> to vector<8x128xf32>
      %198 = arith.truncf %197 : vector<8x128xf32> to vector<8x128xbf16>
      %c7 = arith.constant 7 : index
      %c0_193 = arith.constant 0 : index
      %c0_194 = arith.constant 0 : index
      %199 = vector.load %arg4[%c7, %c0_193, %c0_194] : memref<25x128x128xbf16, #tpu.memory_space<vmem>>, vector<1x128x128xbf16>
      %200 = vector.shape_cast %199 : vector<1x128x128xbf16> to vector<128x128xbf16>
      %cst_195 = arith.constant dense<0.000000e+00> : vector<8x128xf32>
      %201 = tpu.matmul %198, %200, %cst_195 {dimension_numbers = #tpu.dot_dimension_numbers<[1], [0], [0], [1], [0, 0, 1, 1], [], []>} : vector<8x128xbf16>, vector<128x128xbf16>, vector<8x128xf32> -> vector<8x128xf32>
      %202 = arith.addf %193, %201 : vector<8x128xf32>
      %c1_i32_196 = arith.constant 1 : i32
      %203 = arith.addi %129, %c1_i32_196 : i32
      %204 = arith.index_cast %203 : i32 to index
      %c3_197 = arith.constant 3 : index
      %c0_198 = arith.constant 0 : index
      %205 = vector.load %arg11[%204, %c3_197, %c0_198] : memref<12x12x128xf32, #tpu.memory_space<vmem>>, vector<1x8x128xf32>
      %206 = vector.shape_cast %205 : vector<1x8x128xf32> to vector<8x128xf32>
      %207 = arith.truncf %206 : vector<8x128xf32> to vector<8x128xbf16>
      %c8 = arith.constant 8 : index
      %c0_199 = arith.constant 0 : index
      %c0_200 = arith.constant 0 : index
      %208 = vector.load %arg4[%c8, %c0_199, %c0_200] : memref<25x128x128xbf16, #tpu.memory_space<vmem>>, vector<1x128x128xbf16>
      %209 = vector.shape_cast %208 : vector<1x128x128xbf16> to vector<128x128xbf16>
      %cst_201 = arith.constant dense<0.000000e+00> : vector<8x128xf32>
      %210 = tpu.matmul %207, %209, %cst_201 {dimension_numbers = #tpu.dot_dimension_numbers<[1], [0], [0], [1], [0, 0, 1, 1], [], []>} : vector<8x128xbf16>, vector<128x128xbf16>, vector<8x128xf32> -> vector<8x128xf32>
      %211 = arith.addf %202, %210 : vector<8x128xf32>
      %c1_i32_202 = arith.constant 1 : i32
      %212 = arith.addi %129, %c1_i32_202 : i32
      %213 = arith.index_cast %212 : i32 to index
      %c4_203 = arith.constant 4 : index
      %c0_204 = arith.constant 0 : index
      %214 = vector.load %arg11[%213, %c4_203, %c0_204] : memref<12x12x128xf32, #tpu.memory_space<vmem>>, vector<1x8x128xf32>
      %215 = vector.shape_cast %214 : vector<1x8x128xf32> to vector<8x128xf32>
      %216 = arith.truncf %215 : vector<8x128xf32> to vector<8x128xbf16>
      %c9 = arith.constant 9 : index
      %c0_205 = arith.constant 0 : index
      %c0_206 = arith.constant 0 : index
      %217 = vector.load %arg4[%c9, %c0_205, %c0_206] : memref<25x128x128xbf16, #tpu.memory_space<vmem>>, vector<1x128x128xbf16>
      %218 = vector.shape_cast %217 : vector<1x128x128xbf16> to vector<128x128xbf16>
      %cst_207 = arith.constant dense<0.000000e+00> : vector<8x128xf32>
      %219 = tpu.matmul %216, %218, %cst_207 {dimension_numbers = #tpu.dot_dimension_numbers<[1], [0], [0], [1], [0, 0, 1, 1], [], []>} : vector<8x128xbf16>, vector<128x128xbf16>, vector<8x128xf32> -> vector<8x128xf32>
      %220 = arith.addf %211, %219 : vector<8x128xf32>
      %c2_i32_208 = arith.constant 2 : i32
      %221 = arith.addi %129, %c2_i32_208 : i32
      %222 = arith.index_cast %221 : i32 to index
      %c0_209 = arith.constant 0 : index
      %c0_210 = arith.constant 0 : index
      %223 = vector.load %arg11[%222, %c0_209, %c0_210] : memref<12x12x128xf32, #tpu.memory_space<vmem>>, vector<1x8x128xf32>
      %224 = vector.shape_cast %223 : vector<1x8x128xf32> to vector<8x128xf32>
      %225 = arith.truncf %224 : vector<8x128xf32> to vector<8x128xbf16>
      %c10 = arith.constant 10 : index
      %c0_211 = arith.constant 0 : index
      %c0_212 = arith.constant 0 : index
      %226 = vector.load %arg4[%c10, %c0_211, %c0_212] : memref<25x128x128xbf16, #tpu.memory_space<vmem>>, vector<1x128x128xbf16>
      %227 = vector.shape_cast %226 : vector<1x128x128xbf16> to vector<128x128xbf16>
      %cst_213 = arith.constant dense<0.000000e+00> : vector<8x128xf32>
      %228 = tpu.matmul %225, %227, %cst_213 {dimension_numbers = #tpu.dot_dimension_numbers<[1], [0], [0], [1], [0, 0, 1, 1], [], []>} : vector<8x128xbf16>, vector<128x128xbf16>, vector<8x128xf32> -> vector<8x128xf32>
      %229 = arith.addf %220, %228 : vector<8x128xf32>
      %c2_i32_214 = arith.constant 2 : i32
      %230 = arith.addi %129, %c2_i32_214 : i32
      %231 = arith.index_cast %230 : i32 to index
      %c1_215 = arith.constant 1 : index
      %c0_216 = arith.constant 0 : index
      %232 = vector.load %arg11[%231, %c1_215, %c0_216] : memref<12x12x128xf32, #tpu.memory_space<vmem>>, vector<1x8x128xf32>
      %233 = vector.shape_cast %232 : vector<1x8x128xf32> to vector<8x128xf32>
      %234 = arith.truncf %233 : vector<8x128xf32> to vector<8x128xbf16>
      %c11 = arith.constant 11 : index
      %c0_217 = arith.constant 0 : index
      %c0_218 = arith.constant 0 : index
      %235 = vector.load %arg4[%c11, %c0_217, %c0_218] : memref<25x128x128xbf16, #tpu.memory_space<vmem>>, vector<1x128x128xbf16>
      %236 = vector.shape_cast %235 : vector<1x128x128xbf16> to vector<128x128xbf16>
      %cst_219 = arith.constant dense<0.000000e+00> : vector<8x128xf32>
      %237 = tpu.matmul %234, %236, %cst_219 {dimension_numbers = #tpu.dot_dimension_numbers<[1], [0], [0], [1], [0, 0, 1, 1], [], []>} : vector<8x128xbf16>, vector<128x128xbf16>, vector<8x128xf32> -> vector<8x128xf32>
      %238 = arith.addf %229, %237 : vector<8x128xf32>
      %c2_i32_220 = arith.constant 2 : i32
      %239 = arith.addi %129, %c2_i32_220 : i32
      %240 = arith.index_cast %239 : i32 to index
      %c2_221 = arith.constant 2 : index
      %c0_222 = arith.constant 0 : index
      %241 = vector.load %arg11[%240, %c2_221, %c0_222] : memref<12x12x128xf32, #tpu.memory_space<vmem>>, vector<1x8x128xf32>
      %242 = vector.shape_cast %241 : vector<1x8x128xf32> to vector<8x128xf32>
      %243 = arith.truncf %242 : vector<8x128xf32> to vector<8x128xbf16>
      %c12 = arith.constant 12 : index
      %c0_223 = arith.constant 0 : index
      %c0_224 = arith.constant 0 : index
      %244 = vector.load %arg4[%c12, %c0_223, %c0_224] : memref<25x128x128xbf16, #tpu.memory_space<vmem>>, vector<1x128x128xbf16>
      %245 = vector.shape_cast %244 : vector<1x128x128xbf16> to vector<128x128xbf16>
      %cst_225 = arith.constant dense<0.000000e+00> : vector<8x128xf32>
      %246 = tpu.matmul %243, %245, %cst_225 {dimension_numbers = #tpu.dot_dimension_numbers<[1], [0], [0], [1], [0, 0, 1, 1], [], []>} : vector<8x128xbf16>, vector<128x128xbf16>, vector<8x128xf32> -> vector<8x128xf32>
      %247 = arith.addf %238, %246 : vector<8x128xf32>
      %c2_i32_226 = arith.constant 2 : i32
      %248 = arith.addi %129, %c2_i32_226 : i32
      %249 = arith.index_cast %248 : i32 to index
      %c3_227 = arith.constant 3 : index
      %c0_228 = arith.constant 0 : index
      %250 = vector.load %arg11[%249, %c3_227, %c0_228] : memref<12x12x128xf32, #tpu.memory_space<vmem>>, vector<1x8x128xf32>
      %251 = vector.shape_cast %250 : vector<1x8x128xf32> to vector<8x128xf32>
      %252 = arith.truncf %251 : vector<8x128xf32> to vector<8x128xbf16>
      %c13 = arith.constant 13 : index
      %c0_229 = arith.constant 0 : index
      %c0_230 = arith.constant 0 : index
      %253 = vector.load %arg4[%c13, %c0_229, %c0_230] : memref<25x128x128xbf16, #tpu.memory_space<vmem>>, vector<1x128x128xbf16>
      %254 = vector.shape_cast %253 : vector<1x128x128xbf16> to vector<128x128xbf16>
      %cst_231 = arith.constant dense<0.000000e+00> : vector<8x128xf32>
      %255 = tpu.matmul %252, %254, %cst_231 {dimension_numbers = #tpu.dot_dimension_numbers<[1], [0], [0], [1], [0, 0, 1, 1], [], []>} : vector<8x128xbf16>, vector<128x128xbf16>, vector<8x128xf32> -> vector<8x128xf32>
      %256 = arith.addf %247, %255 : vector<8x128xf32>
      %c2_i32_232 = arith.constant 2 : i32
      %257 = arith.addi %129, %c2_i32_232 : i32
      %258 = arith.index_cast %257 : i32 to index
      %c4_233 = arith.constant 4 : index
      %c0_234 = arith.constant 0 : index
      %259 = vector.load %arg11[%258, %c4_233, %c0_234] : memref<12x12x128xf32, #tpu.memory_space<vmem>>, vector<1x8x128xf32>
      %260 = vector.shape_cast %259 : vector<1x8x128xf32> to vector<8x128xf32>
      %261 = arith.truncf %260 : vector<8x128xf32> to vector<8x128xbf16>
      %c14 = arith.constant 14 : index
      %c0_235 = arith.constant 0 : index
      %c0_236 = arith.constant 0 : index
      %262 = vector.load %arg4[%c14, %c0_235, %c0_236] : memref<25x128x128xbf16, #tpu.memory_space<vmem>>, vector<1x128x128xbf16>
      %263 = vector.shape_cast %262 : vector<1x128x128xbf16> to vector<128x128xbf16>
      %cst_237 = arith.constant dense<0.000000e+00> : vector<8x128xf32>
      %264 = tpu.matmul %261, %263, %cst_237 {dimension_numbers = #tpu.dot_dimension_numbers<[1], [0], [0], [1], [0, 0, 1, 1], [], []>} : vector<8x128xbf16>, vector<128x128xbf16>, vector<8x128xf32> -> vector<8x128xf32>
      %265 = arith.addf %256, %264 : vector<8x128xf32>
      %c3_i32 = arith.constant 3 : i32
      %266 = arith.addi %129, %c3_i32 : i32
      %267 = arith.index_cast %266 : i32 to index
      %c0_238 = arith.constant 0 : index
      %c0_239 = arith.constant 0 : index
      %268 = vector.load %arg11[%267, %c0_238, %c0_239] : memref<12x12x128xf32, #tpu.memory_space<vmem>>, vector<1x8x128xf32>
      %269 = vector.shape_cast %268 : vector<1x8x128xf32> to vector<8x128xf32>
      %270 = arith.truncf %269 : vector<8x128xf32> to vector<8x128xbf16>
      %c15 = arith.constant 15 : index
      %c0_240 = arith.constant 0 : index
      %c0_241 = arith.constant 0 : index
      %271 = vector.load %arg4[%c15, %c0_240, %c0_241] : memref<25x128x128xbf16, #tpu.memory_space<vmem>>, vector<1x128x128xbf16>
      %272 = vector.shape_cast %271 : vector<1x128x128xbf16> to vector<128x128xbf16>
      %cst_242 = arith.constant dense<0.000000e+00> : vector<8x128xf32>
      %273 = tpu.matmul %270, %272, %cst_242 {dimension_numbers = #tpu.dot_dimension_numbers<[1], [0], [0], [1], [0, 0, 1, 1], [], []>} : vector<8x128xbf16>, vector<128x128xbf16>, vector<8x128xf32> -> vector<8x128xf32>
      %274 = arith.addf %265, %273 : vector<8x128xf32>
      %c3_i32_243 = arith.constant 3 : i32
      %275 = arith.addi %129, %c3_i32_243 : i32
      %276 = arith.index_cast %275 : i32 to index
      %c1_244 = arith.constant 1 : index
      %c0_245 = arith.constant 0 : index
      %277 = vector.load %arg11[%276, %c1_244, %c0_245] : memref<12x12x128xf32, #tpu.memory_space<vmem>>, vector<1x8x128xf32>
      %278 = vector.shape_cast %277 : vector<1x8x128xf32> to vector<8x128xf32>
      %279 = arith.truncf %278 : vector<8x128xf32> to vector<8x128xbf16>
      %c16 = arith.constant 16 : index
      %c0_246 = arith.constant 0 : index
      %c0_247 = arith.constant 0 : index
      %280 = vector.load %arg4[%c16, %c0_246, %c0_247] : memref<25x128x128xbf16, #tpu.memory_space<vmem>>, vector<1x128x128xbf16>
      %281 = vector.shape_cast %280 : vector<1x128x128xbf16> to vector<128x128xbf16>
      %cst_248 = arith.constant dense<0.000000e+00> : vector<8x128xf32>
      %282 = tpu.matmul %279, %281, %cst_248 {dimension_numbers = #tpu.dot_dimension_numbers<[1], [0], [0], [1], [0, 0, 1, 1], [], []>} : vector<8x128xbf16>, vector<128x128xbf16>, vector<8x128xf32> -> vector<8x128xf32>
      %283 = arith.addf %274, %282 : vector<8x128xf32>
      %c3_i32_249 = arith.constant 3 : i32
      %284 = arith.addi %129, %c3_i32_249 : i32
      %285 = arith.index_cast %284 : i32 to index
      %c2_250 = arith.constant 2 : index
      %c0_251 = arith.constant 0 : index
      %286 = vector.load %arg11[%285, %c2_250, %c0_251] : memref<12x12x128xf32, #tpu.memory_space<vmem>>, vector<1x8x128xf32>
      %287 = vector.shape_cast %286 : vector<1x8x128xf32> to vector<8x128xf32>
      %288 = arith.truncf %287 : vector<8x128xf32> to vector<8x128xbf16>
      %c17 = arith.constant 17 : index
      %c0_252 = arith.constant 0 : index
      %c0_253 = arith.constant 0 : index
      %289 = vector.load %arg4[%c17, %c0_252, %c0_253] : memref<25x128x128xbf16, #tpu.memory_space<vmem>>, vector<1x128x128xbf16>
      %290 = vector.shape_cast %289 : vector<1x128x128xbf16> to vector<128x128xbf16>
      %cst_254 = arith.constant dense<0.000000e+00> : vector<8x128xf32>
      %291 = tpu.matmul %288, %290, %cst_254 {dimension_numbers = #tpu.dot_dimension_numbers<[1], [0], [0], [1], [0, 0, 1, 1], [], []>} : vector<8x128xbf16>, vector<128x128xbf16>, vector<8x128xf32> -> vector<8x128xf32>
      %292 = arith.addf %283, %291 : vector<8x128xf32>
      %c3_i32_255 = arith.constant 3 : i32
      %293 = arith.addi %129, %c3_i32_255 : i32
      %294 = arith.index_cast %293 : i32 to index
      %c3_256 = arith.constant 3 : index
      %c0_257 = arith.constant 0 : index
      %295 = vector.load %arg11[%294, %c3_256, %c0_257] : memref<12x12x128xf32, #tpu.memory_space<vmem>>, vector<1x8x128xf32>
      %296 = vector.shape_cast %295 : vector<1x8x128xf32> to vector<8x128xf32>
      %297 = arith.truncf %296 : vector<8x128xf32> to vector<8x128xbf16>
      %c18 = arith.constant 18 : index
      %c0_258 = arith.constant 0 : index
      %c0_259 = arith.constant 0 : index
      %298 = vector.load %arg4[%c18, %c0_258, %c0_259] : memref<25x128x128xbf16, #tpu.memory_space<vmem>>, vector<1x128x128xbf16>
      %299 = vector.shape_cast %298 : vector<1x128x128xbf16> to vector<128x128xbf16>
      %cst_260 = arith.constant dense<0.000000e+00> : vector<8x128xf32>
      %300 = tpu.matmul %297, %299, %cst_260 {dimension_numbers = #tpu.dot_dimension_numbers<[1], [0], [0], [1], [0, 0, 1, 1], [], []>} : vector<8x128xbf16>, vector<128x128xbf16>, vector<8x128xf32> -> vector<8x128xf32>
      %301 = arith.addf %292, %300 : vector<8x128xf32>
      %c3_i32_261 = arith.constant 3 : i32
      %302 = arith.addi %129, %c3_i32_261 : i32
      %303 = arith.index_cast %302 : i32 to index
      %c4_262 = arith.constant 4 : index
      %c0_263 = arith.constant 0 : index
      %304 = vector.load %arg11[%303, %c4_262, %c0_263] : memref<12x12x128xf32, #tpu.memory_space<vmem>>, vector<1x8x128xf32>
      %305 = vector.shape_cast %304 : vector<1x8x128xf32> to vector<8x128xf32>
      %306 = arith.truncf %305 : vector<8x128xf32> to vector<8x128xbf16>
      %c19 = arith.constant 19 : index
      %c0_264 = arith.constant 0 : index
      %c0_265 = arith.constant 0 : index
      %307 = vector.load %arg4[%c19, %c0_264, %c0_265] : memref<25x128x128xbf16, #tpu.memory_space<vmem>>, vector<1x128x128xbf16>
      %308 = vector.shape_cast %307 : vector<1x128x128xbf16> to vector<128x128xbf16>
      %cst_266 = arith.constant dense<0.000000e+00> : vector<8x128xf32>
      %309 = tpu.matmul %306, %308, %cst_266 {dimension_numbers = #tpu.dot_dimension_numbers<[1], [0], [0], [1], [0, 0, 1, 1], [], []>} : vector<8x128xbf16>, vector<128x128xbf16>, vector<8x128xf32> -> vector<8x128xf32>
      %310 = arith.addf %301, %309 : vector<8x128xf32>
      %c4_i32_267 = arith.constant 4 : i32
      %311 = arith.addi %129, %c4_i32_267 : i32
      %312 = arith.index_cast %311 : i32 to index
      %c0_268 = arith.constant 0 : index
      %c0_269 = arith.constant 0 : index
      %313 = vector.load %arg11[%312, %c0_268, %c0_269] : memref<12x12x128xf32, #tpu.memory_space<vmem>>, vector<1x8x128xf32>
      %314 = vector.shape_cast %313 : vector<1x8x128xf32> to vector<8x128xf32>
      %315 = arith.truncf %314 : vector<8x128xf32> to vector<8x128xbf16>
      %c20 = arith.constant 20 : index
      %c0_270 = arith.constant 0 : index
      %c0_271 = arith.constant 0 : index
      %316 = vector.load %arg4[%c20, %c0_270, %c0_271] : memref<25x128x128xbf16, #tpu.memory_space<vmem>>, vector<1x128x128xbf16>
      %317 = vector.shape_cast %316 : vector<1x128x128xbf16> to vector<128x128xbf16>
      %cst_272 = arith.constant dense<0.000000e+00> : vector<8x128xf32>
      %318 = tpu.matmul %315, %317, %cst_272 {dimension_numbers = #tpu.dot_dimension_numbers<[1], [0], [0], [1], [0, 0, 1, 1], [], []>} : vector<8x128xbf16>, vector<128x128xbf16>, vector<8x128xf32> -> vector<8x128xf32>
      %319 = arith.addf %310, %318 : vector<8x128xf32>
      %c4_i32_273 = arith.constant 4 : i32
      %320 = arith.addi %129, %c4_i32_273 : i32
      %321 = arith.index_cast %320 : i32 to index
      %c1_274 = arith.constant 1 : index
      %c0_275 = arith.constant 0 : index
      %322 = vector.load %arg11[%321, %c1_274, %c0_275] : memref<12x12x128xf32, #tpu.memory_space<vmem>>, vector<1x8x128xf32>
      %323 = vector.shape_cast %322 : vector<1x8x128xf32> to vector<8x128xf32>
      %324 = arith.truncf %323 : vector<8x128xf32> to vector<8x128xbf16>
      %c21 = arith.constant 21 : index
      %c0_276 = arith.constant 0 : index
      %c0_277 = arith.constant 0 : index
      %325 = vector.load %arg4[%c21, %c0_276, %c0_277] : memref<25x128x128xbf16, #tpu.memory_space<vmem>>, vector<1x128x128xbf16>
      %326 = vector.shape_cast %325 : vector<1x128x128xbf16> to vector<128x128xbf16>
      %cst_278 = arith.constant dense<0.000000e+00> : vector<8x128xf32>
      %327 = tpu.matmul %324, %326, %cst_278 {dimension_numbers = #tpu.dot_dimension_numbers<[1], [0], [0], [1], [0, 0, 1, 1], [], []>} : vector<8x128xbf16>, vector<128x128xbf16>, vector<8x128xf32> -> vector<8x128xf32>
      %328 = arith.addf %319, %327 : vector<8x128xf32>
      %c4_i32_279 = arith.constant 4 : i32
      %329 = arith.addi %129, %c4_i32_279 : i32
      %330 = arith.index_cast %329 : i32 to index
      %c2_280 = arith.constant 2 : index
      %c0_281 = arith.constant 0 : index
      %331 = vector.load %arg11[%330, %c2_280, %c0_281] : memref<12x12x128xf32, #tpu.memory_space<vmem>>, vector<1x8x128xf32>
      %332 = vector.shape_cast %331 : vector<1x8x128xf32> to vector<8x128xf32>
      %333 = arith.truncf %332 : vector<8x128xf32> to vector<8x128xbf16>
      %c22 = arith.constant 22 : index
      %c0_282 = arith.constant 0 : index
      %c0_283 = arith.constant 0 : index
      %334 = vector.load %arg4[%c22, %c0_282, %c0_283] : memref<25x128x128xbf16, #tpu.memory_space<vmem>>, vector<1x128x128xbf16>
      %335 = vector.shape_cast %334 : vector<1x128x128xbf16> to vector<128x128xbf16>
      %cst_284 = arith.constant dense<0.000000e+00> : vector<8x128xf32>
      %336 = tpu.matmul %333, %335, %cst_284 {dimension_numbers = #tpu.dot_dimension_numbers<[1], [0], [0], [1], [0, 0, 1, 1], [], []>} : vector<8x128xbf16>, vector<128x128xbf16>, vector<8x128xf32> -> vector<8x128xf32>
      %337 = arith.addf %328, %336 : vector<8x128xf32>
      %c4_i32_285 = arith.constant 4 : i32
      %338 = arith.addi %129, %c4_i32_285 : i32
      %339 = arith.index_cast %338 : i32 to index
      %c3_286 = arith.constant 3 : index
      %c0_287 = arith.constant 0 : index
      %340 = vector.load %arg11[%339, %c3_286, %c0_287] : memref<12x12x128xf32, #tpu.memory_space<vmem>>, vector<1x8x128xf32>
      %341 = vector.shape_cast %340 : vector<1x8x128xf32> to vector<8x128xf32>
      %342 = arith.truncf %341 : vector<8x128xf32> to vector<8x128xbf16>
      %c23 = arith.constant 23 : index
      %c0_288 = arith.constant 0 : index
      %c0_289 = arith.constant 0 : index
      %343 = vector.load %arg4[%c23, %c0_288, %c0_289] : memref<25x128x128xbf16, #tpu.memory_space<vmem>>, vector<1x128x128xbf16>
      %344 = vector.shape_cast %343 : vector<1x128x128xbf16> to vector<128x128xbf16>
      %cst_290 = arith.constant dense<0.000000e+00> : vector<8x128xf32>
      %345 = tpu.matmul %342, %344, %cst_290 {dimension_numbers = #tpu.dot_dimension_numbers<[1], [0], [0], [1], [0, 0, 1, 1], [], []>} : vector<8x128xbf16>, vector<128x128xbf16>, vector<8x128xf32> -> vector<8x128xf32>
      %346 = arith.addf %337, %345 : vector<8x128xf32>
      %c4_i32_291 = arith.constant 4 : i32
      %347 = arith.addi %129, %c4_i32_291 : i32
      %348 = arith.index_cast %347 : i32 to index
      %c4_292 = arith.constant 4 : index
      %c0_293 = arith.constant 0 : index
      %349 = vector.load %arg11[%348, %c4_292, %c0_293] : memref<12x12x128xf32, #tpu.memory_space<vmem>>, vector<1x8x128xf32>
      %350 = vector.shape_cast %349 : vector<1x8x128xf32> to vector<8x128xf32>
      %351 = arith.truncf %350 : vector<8x128xf32> to vector<8x128xbf16>
      %c24 = arith.constant 24 : index
      %c0_294 = arith.constant 0 : index
      %c0_295 = arith.constant 0 : index
      %352 = vector.load %arg4[%c24, %c0_294, %c0_295] : memref<25x128x128xbf16, #tpu.memory_space<vmem>>, vector<1x128x128xbf16>
      %353 = vector.shape_cast %352 : vector<1x128x128xbf16> to vector<128x128xbf16>
      %cst_296 = arith.constant dense<0.000000e+00> : vector<8x128xf32>
      %354 = tpu.matmul %351, %353, %cst_296 {dimension_numbers = #tpu.dot_dimension_numbers<[1], [0], [0], [1], [0, 0, 1, 1], [], []>} : vector<8x128xbf16>, vector<128x128xbf16>, vector<8x128xf32> -> vector<8x128xf32>
      %355 = arith.addf %346, %354 : vector<8x128xf32>
      %356 = vector.broadcast %1 : vector<1x128xf32> to vector<8x128xf32>
      %357 = arith.addf %355, %356 : vector<8x128xf32>
      %cst_297 = arith.constant 0.000000e+00 : f32
      %358 = vector.broadcast %cst_297 : f32 to vector<8x128xf32>
      %359 = arith.maximumf %357, %358 : vector<8x128xf32>
      %c2_i32_298 = arith.constant 2 : i32
      %360 = arith.muli %c2_i32_298, %arg13 : i32
      %c1_i32_299 = arith.constant 1 : i32
      %361 = arith.addi %360, %c1_i32_299 : i32
      %cst_300 = arith.constant 0.000000e+00 : f32
      %362 = vector.broadcast %cst_300 : f32 to vector<8x128xf32>
      %c0_i32_301 = arith.constant 0 : i32
      %363 = arith.addi %361, %c0_i32_301 : i32
      %364 = arith.index_cast %363 : i32 to index
      %c0_302 = arith.constant 0 : index
      %c0_303 = arith.constant 0 : index
      %365 = vector.load %arg11[%364, %c0_302, %c0_303] : memref<12x12x128xf32, #tpu.memory_space<vmem>>, vector<1x8x128xf32>
      %366 = vector.shape_cast %365 : vector<1x8x128xf32> to vector<8x128xf32>
      %367 = arith.truncf %366 : vector<8x128xf32> to vector<8x128xbf16>
      %c0_304 = arith.constant 0 : index
      %c0_305 = arith.constant 0 : index
      %c0_306 = arith.constant 0 : index
      %368 = vector.load %arg4[%c0_304, %c0_305, %c0_306] : memref<25x128x128xbf16, #tpu.memory_space<vmem>>, vector<1x128x128xbf16>
      %369 = vector.shape_cast %368 : vector<1x128x128xbf16> to vector<128x128xbf16>
      %cst_307 = arith.constant dense<0.000000e+00> : vector<8x128xf32>
      %370 = tpu.matmul %367, %369, %cst_307 {dimension_numbers = #tpu.dot_dimension_numbers<[1], [0], [0], [1], [0, 0, 1, 1], [], []>} : vector<8x128xbf16>, vector<128x128xbf16>, vector<8x128xf32> -> vector<8x128xf32>
      %371 = arith.addf %362, %370 : vector<8x128xf32>
      %c0_i32_308 = arith.constant 0 : i32
      %372 = arith.addi %361, %c0_i32_308 : i32
      %373 = arith.index_cast %372 : i32 to index
      %c1_309 = arith.constant 1 : index
      %c0_310 = arith.constant 0 : index
      %374 = vector.load %arg11[%373, %c1_309, %c0_310] : memref<12x12x128xf32, #tpu.memory_space<vmem>>, vector<1x8x128xf32>
      %375 = vector.shape_cast %374 : vector<1x8x128xf32> to vector<8x128xf32>
      %376 = arith.truncf %375 : vector<8x128xf32> to vector<8x128xbf16>
      %c1_311 = arith.constant 1 : index
      %c0_312 = arith.constant 0 : index
      %c0_313 = arith.constant 0 : index
      %377 = vector.load %arg4[%c1_311, %c0_312, %c0_313] : memref<25x128x128xbf16, #tpu.memory_space<vmem>>, vector<1x128x128xbf16>
      %378 = vector.shape_cast %377 : vector<1x128x128xbf16> to vector<128x128xbf16>
      %cst_314 = arith.constant dense<0.000000e+00> : vector<8x128xf32>
      %379 = tpu.matmul %376, %378, %cst_314 {dimension_numbers = #tpu.dot_dimension_numbers<[1], [0], [0], [1], [0, 0, 1, 1], [], []>} : vector<8x128xbf16>, vector<128x128xbf16>, vector<8x128xf32> -> vector<8x128xf32>
      %380 = arith.addf %371, %379 : vector<8x128xf32>
      %c0_i32_315 = arith.constant 0 : i32
      %381 = arith.addi %361, %c0_i32_315 : i32
      %382 = arith.index_cast %381 : i32 to index
      %c2_316 = arith.constant 2 : index
      %c0_317 = arith.constant 0 : index
      %383 = vector.load %arg11[%382, %c2_316, %c0_317] : memref<12x12x128xf32, #tpu.memory_space<vmem>>, vector<1x8x128xf32>
      %384 = vector.shape_cast %383 : vector<1x8x128xf32> to vector<8x128xf32>
      %385 = arith.truncf %384 : vector<8x128xf32> to vector<8x128xbf16>
      %c2_318 = arith.constant 2 : index
      %c0_319 = arith.constant 0 : index
      %c0_320 = arith.constant 0 : index
      %386 = vector.load %arg4[%c2_318, %c0_319, %c0_320] : memref<25x128x128xbf16, #tpu.memory_space<vmem>>, vector<1x128x128xbf16>
      %387 = vector.shape_cast %386 : vector<1x128x128xbf16> to vector<128x128xbf16>
      %cst_321 = arith.constant dense<0.000000e+00> : vector<8x128xf32>
      %388 = tpu.matmul %385, %387, %cst_321 {dimension_numbers = #tpu.dot_dimension_numbers<[1], [0], [0], [1], [0, 0, 1, 1], [], []>} : vector<8x128xbf16>, vector<128x128xbf16>, vector<8x128xf32> -> vector<8x128xf32>
      %389 = arith.addf %380, %388 : vector<8x128xf32>
      %c0_i32_322 = arith.constant 0 : i32
      %390 = arith.addi %361, %c0_i32_322 : i32
      %391 = arith.index_cast %390 : i32 to index
      %c3_323 = arith.constant 3 : index
      %c0_324 = arith.constant 0 : index
      %392 = vector.load %arg11[%391, %c3_323, %c0_324] : memref<12x12x128xf32, #tpu.memory_space<vmem>>, vector<1x8x128xf32>
      %393 = vector.shape_cast %392 : vector<1x8x128xf32> to vector<8x128xf32>
      %394 = arith.truncf %393 : vector<8x128xf32> to vector<8x128xbf16>
      %c3_325 = arith.constant 3 : index
      %c0_326 = arith.constant 0 : index
      %c0_327 = arith.constant 0 : index
      %395 = vector.load %arg4[%c3_325, %c0_326, %c0_327] : memref<25x128x128xbf16, #tpu.memory_space<vmem>>, vector<1x128x128xbf16>
      %396 = vector.shape_cast %395 : vector<1x128x128xbf16> to vector<128x128xbf16>
      %cst_328 = arith.constant dense<0.000000e+00> : vector<8x128xf32>
      %397 = tpu.matmul %394, %396, %cst_328 {dimension_numbers = #tpu.dot_dimension_numbers<[1], [0], [0], [1], [0, 0, 1, 1], [], []>} : vector<8x128xbf16>, vector<128x128xbf16>, vector<8x128xf32> -> vector<8x128xf32>
      %398 = arith.addf %389, %397 : vector<8x128xf32>
      %c0_i32_329 = arith.constant 0 : i32
      %399 = arith.addi %361, %c0_i32_329 : i32
      %400 = arith.index_cast %399 : i32 to index
      %c4_330 = arith.constant 4 : index
      %c0_331 = arith.constant 0 : index
      %401 = vector.load %arg11[%400, %c4_330, %c0_331] : memref<12x12x128xf32, #tpu.memory_space<vmem>>, vector<1x8x128xf32>
      %402 = vector.shape_cast %401 : vector<1x8x128xf32> to vector<8x128xf32>
      %403 = arith.truncf %402 : vector<8x128xf32> to vector<8x128xbf16>
      %c4_332 = arith.constant 4 : index
      %c0_333 = arith.constant 0 : index
      %c0_334 = arith.constant 0 : index
      %404 = vector.load %arg4[%c4_332, %c0_333, %c0_334] : memref<25x128x128xbf16, #tpu.memory_space<vmem>>, vector<1x128x128xbf16>
      %405 = vector.shape_cast %404 : vector<1x128x128xbf16> to vector<128x128xbf16>
      %cst_335 = arith.constant dense<0.000000e+00> : vector<8x128xf32>
      %406 = tpu.matmul %403, %405, %cst_335 {dimension_numbers = #tpu.dot_dimension_numbers<[1], [0], [0], [1], [0, 0, 1, 1], [], []>} : vector<8x128xbf16>, vector<128x128xbf16>, vector<8x128xf32> -> vector<8x128xf32>
      %407 = arith.addf %398, %406 : vector<8x128xf32>
      %c1_i32_336 = arith.constant 1 : i32
      %408 = arith.addi %361, %c1_i32_336 : i32
      %409 = arith.index_cast %408 : i32 to index
      %c0_337 = arith.constant 0 : index
      %c0_338 = arith.constant 0 : index
      %410 = vector.load %arg11[%409, %c0_337, %c0_338] : memref<12x12x128xf32, #tpu.memory_space<vmem>>, vector<1x8x128xf32>
      %411 = vector.shape_cast %410 : vector<1x8x128xf32> to vector<8x128xf32>
      %412 = arith.truncf %411 : vector<8x128xf32> to vector<8x128xbf16>
      %c5_339 = arith.constant 5 : index
      %c0_340 = arith.constant 0 : index
      %c0_341 = arith.constant 0 : index
      %413 = vector.load %arg4[%c5_339, %c0_340, %c0_341] : memref<25x128x128xbf16, #tpu.memory_space<vmem>>, vector<1x128x128xbf16>
      %414 = vector.shape_cast %413 : vector<1x128x128xbf16> to vector<128x128xbf16>
      %cst_342 = arith.constant dense<0.000000e+00> : vector<8x128xf32>
      %415 = tpu.matmul %412, %414, %cst_342 {dimension_numbers = #tpu.dot_dimension_numbers<[1], [0], [0], [1], [0, 0, 1, 1], [], []>} : vector<8x128xbf16>, vector<128x128xbf16>, vector<8x128xf32> -> vector<8x128xf32>
      %416 = arith.addf %407, %415 : vector<8x128xf32>
      %c1_i32_343 = arith.constant 1 : i32
      %417 = arith.addi %361, %c1_i32_343 : i32
      %418 = arith.index_cast %417 : i32 to index
      %c1_344 = arith.constant 1 : index
      %c0_345 = arith.constant 0 : index
      %419 = vector.load %arg11[%418, %c1_344, %c0_345] : memref<12x12x128xf32, #tpu.memory_space<vmem>>, vector<1x8x128xf32>
      %420 = vector.shape_cast %419 : vector<1x8x128xf32> to vector<8x128xf32>
      %421 = arith.truncf %420 : vector<8x128xf32> to vector<8x128xbf16>
      %c6_346 = arith.constant 6 : index
      %c0_347 = arith.constant 0 : index
      %c0_348 = arith.constant 0 : index
      %422 = vector.load %arg4[%c6_346, %c0_347, %c0_348] : memref<25x128x128xbf16, #tpu.memory_space<vmem>>, vector<1x128x128xbf16>
      %423 = vector.shape_cast %422 : vector<1x128x128xbf16> to vector<128x128xbf16>
      %cst_349 = arith.constant dense<0.000000e+00> : vector<8x128xf32>
      %424 = tpu.matmul %421, %423, %cst_349 {dimension_numbers = #tpu.dot_dimension_numbers<[1], [0], [0], [1], [0, 0, 1, 1], [], []>} : vector<8x128xbf16>, vector<128x128xbf16>, vector<8x128xf32> -> vector<8x128xf32>
      %425 = arith.addf %416, %424 : vector<8x128xf32>
      %c1_i32_350 = arith.constant 1 : i32
      %426 = arith.addi %361, %c1_i32_350 : i32
      %427 = arith.index_cast %426 : i32 to index
      %c2_351 = arith.constant 2 : index
      %c0_352 = arith.constant 0 : index
      %428 = vector.load %arg11[%427, %c2_351, %c0_352] : memref<12x12x128xf32, #tpu.memory_space<vmem>>, vector<1x8x128xf32>
      %429 = vector.shape_cast %428 : vector<1x8x128xf32> to vector<8x128xf32>
      %430 = arith.truncf %429 : vector<8x128xf32> to vector<8x128xbf16>
      %c7_353 = arith.constant 7 : index
      %c0_354 = arith.constant 0 : index
      %c0_355 = arith.constant 0 : index
      %431 = vector.load %arg4[%c7_353, %c0_354, %c0_355] : memref<25x128x128xbf16, #tpu.memory_space<vmem>>, vector<1x128x128xbf16>
      %432 = vector.shape_cast %431 : vector<1x128x128xbf16> to vector<128x128xbf16>
      %cst_356 = arith.constant dense<0.000000e+00> : vector<8x128xf32>
      %433 = tpu.matmul %430, %432, %cst_356 {dimension_numbers = #tpu.dot_dimension_numbers<[1], [0], [0], [1], [0, 0, 1, 1], [], []>} : vector<8x128xbf16>, vector<128x128xbf16>, vector<8x128xf32> -> vector<8x128xf32>
      %434 = arith.addf %425, %433 : vector<8x128xf32>
      %c1_i32_357 = arith.constant 1 : i32
      %435 = arith.addi %361, %c1_i32_357 : i32
      %436 = arith.index_cast %435 : i32 to index
      %c3_358 = arith.constant 3 : index
      %c0_359 = arith.constant 0 : index
      %437 = vector.load %arg11[%436, %c3_358, %c0_359] : memref<12x12x128xf32, #tpu.memory_space<vmem>>, vector<1x8x128xf32>
      %438 = vector.shape_cast %437 : vector<1x8x128xf32> to vector<8x128xf32>
      %439 = arith.truncf %438 : vector<8x128xf32> to vector<8x128xbf16>
      %c8_360 = arith.constant 8 : index
      %c0_361 = arith.constant 0 : index
      %c0_362 = arith.constant 0 : index
      %440 = vector.load %arg4[%c8_360, %c0_361, %c0_362] : memref<25x128x128xbf16, #tpu.memory_space<vmem>>, vector<1x128x128xbf16>
      %441 = vector.shape_cast %440 : vector<1x128x128xbf16> to vector<128x128xbf16>
      %cst_363 = arith.constant dense<0.000000e+00> : vector<8x128xf32>
      %442 = tpu.matmul %439, %441, %cst_363 {dimension_numbers = #tpu.dot_dimension_numbers<[1], [0], [0], [1], [0, 0, 1, 1], [], []>} : vector<8x128xbf16>, vector<128x128xbf16>, vector<8x128xf32> -> vector<8x128xf32>
      %443 = arith.addf %434, %442 : vector<8x128xf32>
      %c1_i32_364 = arith.constant 1 : i32
      %444 = arith.addi %361, %c1_i32_364 : i32
      %445 = arith.index_cast %444 : i32 to index
      %c4_365 = arith.constant 4 : index
      %c0_366 = arith.constant 0 : index
      %446 = vector.load %arg11[%445, %c4_365, %c0_366] : memref<12x12x128xf32, #tpu.memory_space<vmem>>, vector<1x8x128xf32>
      %447 = vector.shape_cast %446 : vector<1x8x128xf32> to vector<8x128xf32>
      %448 = arith.truncf %447 : vector<8x128xf32> to vector<8x128xbf16>
      %c9_367 = arith.constant 9 : index
      %c0_368 = arith.constant 0 : index
      %c0_369 = arith.constant 0 : index
      %449 = vector.load %arg4[%c9_367, %c0_368, %c0_369] : memref<25x128x128xbf16, #tpu.memory_space<vmem>>, vector<1x128x128xbf16>
      %450 = vector.shape_cast %449 : vector<1x128x128xbf16> to vector<128x128xbf16>
      %cst_370 = arith.constant dense<0.000000e+00> : vector<8x128xf32>
      %451 = tpu.matmul %448, %450, %cst_370 {dimension_numbers = #tpu.dot_dimension_numbers<[1], [0], [0], [1], [0, 0, 1, 1], [], []>} : vector<8x128xbf16>, vector<128x128xbf16>, vector<8x128xf32> -> vector<8x128xf32>
      %452 = arith.addf %443, %451 : vector<8x128xf32>
      %c2_i32_371 = arith.constant 2 : i32
      %453 = arith.addi %361, %c2_i32_371 : i32
      %454 = arith.index_cast %453 : i32 to index
      %c0_372 = arith.constant 0 : index
      %c0_373 = arith.constant 0 : index
      %455 = vector.load %arg11[%454, %c0_372, %c0_373] : memref<12x12x128xf32, #tpu.memory_space<vmem>>, vector<1x8x128xf32>
      %456 = vector.shape_cast %455 : vector<1x8x128xf32> to vector<8x128xf32>
      %457 = arith.truncf %456 : vector<8x128xf32> to vector<8x128xbf16>
      %c10_374 = arith.constant 10 : index
      %c0_375 = arith.constant 0 : index
      %c0_376 = arith.constant 0 : index
      %458 = vector.load %arg4[%c10_374, %c0_375, %c0_376] : memref<25x128x128xbf16, #tpu.memory_space<vmem>>, vector<1x128x128xbf16>
      %459 = vector.shape_cast %458 : vector<1x128x128xbf16> to vector<128x128xbf16>
      %cst_377 = arith.constant dense<0.000000e+00> : vector<8x128xf32>
      %460 = tpu.matmul %457, %459, %cst_377 {dimension_numbers = #tpu.dot_dimension_numbers<[1], [0], [0], [1], [0, 0, 1, 1], [], []>} : vector<8x128xbf16>, vector<128x128xbf16>, vector<8x128xf32> -> vector<8x128xf32>
      %461 = arith.addf %452, %460 : vector<8x128xf32>
      %c2_i32_378 = arith.constant 2 : i32
      %462 = arith.addi %361, %c2_i32_378 : i32
      %463 = arith.index_cast %462 : i32 to index
      %c1_379 = arith.constant 1 : index
      %c0_380 = arith.constant 0 : index
      %464 = vector.load %arg11[%463, %c1_379, %c0_380] : memref<12x12x128xf32, #tpu.memory_space<vmem>>, vector<1x8x128xf32>
      %465 = vector.shape_cast %464 : vector<1x8x128xf32> to vector<8x128xf32>
      %466 = arith.truncf %465 : vector<8x128xf32> to vector<8x128xbf16>
      %c11_381 = arith.constant 11 : index
      %c0_382 = arith.constant 0 : index
      %c0_383 = arith.constant 0 : index
      %467 = vector.load %arg4[%c11_381, %c0_382, %c0_383] : memref<25x128x128xbf16, #tpu.memory_space<vmem>>, vector<1x128x128xbf16>
      %468 = vector.shape_cast %467 : vector<1x128x128xbf16> to vector<128x128xbf16>
      %cst_384 = arith.constant dense<0.000000e+00> : vector<8x128xf32>
      %469 = tpu.matmul %466, %468, %cst_384 {dimension_numbers = #tpu.dot_dimension_numbers<[1], [0], [0], [1], [0, 0, 1, 1], [], []>} : vector<8x128xbf16>, vector<128x128xbf16>, vector<8x128xf32> -> vector<8x128xf32>
      %470 = arith.addf %461, %469 : vector<8x128xf32>
      %c2_i32_385 = arith.constant 2 : i32
      %471 = arith.addi %361, %c2_i32_385 : i32
      %472 = arith.index_cast %471 : i32 to index
      %c2_386 = arith.constant 2 : index
      %c0_387 = arith.constant 0 : index
      %473 = vector.load %arg11[%472, %c2_386, %c0_387] : memref<12x12x128xf32, #tpu.memory_space<vmem>>, vector<1x8x128xf32>
      %474 = vector.shape_cast %473 : vector<1x8x128xf32> to vector<8x128xf32>
      %475 = arith.truncf %474 : vector<8x128xf32> to vector<8x128xbf16>
      %c12_388 = arith.constant 12 : index
      %c0_389 = arith.constant 0 : index
      %c0_390 = arith.constant 0 : index
      %476 = vector.load %arg4[%c12_388, %c0_389, %c0_390] : memref<25x128x128xbf16, #tpu.memory_space<vmem>>, vector<1x128x128xbf16>
      %477 = vector.shape_cast %476 : vector<1x128x128xbf16> to vector<128x128xbf16>
      %cst_391 = arith.constant dense<0.000000e+00> : vector<8x128xf32>
      %478 = tpu.matmul %475, %477, %cst_391 {dimension_numbers = #tpu.dot_dimension_numbers<[1], [0], [0], [1], [0, 0, 1, 1], [], []>} : vector<8x128xbf16>, vector<128x128xbf16>, vector<8x128xf32> -> vector<8x128xf32>
      %479 = arith.addf %470, %478 : vector<8x128xf32>
      %c2_i32_392 = arith.constant 2 : i32
      %480 = arith.addi %361, %c2_i32_392 : i32
      %481 = arith.index_cast %480 : i32 to index
      %c3_393 = arith.constant 3 : index
      %c0_394 = arith.constant 0 : index
      %482 = vector.load %arg11[%481, %c3_393, %c0_394] : memref<12x12x128xf32, #tpu.memory_space<vmem>>, vector<1x8x128xf32>
      %483 = vector.shape_cast %482 : vector<1x8x128xf32> to vector<8x128xf32>
      %484 = arith.truncf %483 : vector<8x128xf32> to vector<8x128xbf16>
      %c13_395 = arith.constant 13 : index
      %c0_396 = arith.constant 0 : index
      %c0_397 = arith.constant 0 : index
      %485 = vector.load %arg4[%c13_395, %c0_396, %c0_397] : memref<25x128x128xbf16, #tpu.memory_space<vmem>>, vector<1x128x128xbf16>
      %486 = vector.shape_cast %485 : vector<1x128x128xbf16> to vector<128x128xbf16>
      %cst_398 = arith.constant dense<0.000000e+00> : vector<8x128xf32>
      %487 = tpu.matmul %484, %486, %cst_398 {dimension_numbers = #tpu.dot_dimension_numbers<[1], [0], [0], [1], [0, 0, 1, 1], [], []>} : vector<8x128xbf16>, vector<128x128xbf16>, vector<8x128xf32> -> vector<8x128xf32>
      %488 = arith.addf %479, %487 : vector<8x128xf32>
      %c2_i32_399 = arith.constant 2 : i32
      %489 = arith.addi %361, %c2_i32_399 : i32
      %490 = arith.index_cast %489 : i32 to index
      %c4_400 = arith.constant 4 : index
      %c0_401 = arith.constant 0 : index
      %491 = vector.load %arg11[%490, %c4_400, %c0_401] : memref<12x12x128xf32, #tpu.memory_space<vmem>>, vector<1x8x128xf32>
      %492 = vector.shape_cast %491 : vector<1x8x128xf32> to vector<8x128xf32>
      %493 = arith.truncf %492 : vector<8x128xf32> to vector<8x128xbf16>
      %c14_402 = arith.constant 14 : index
      %c0_403 = arith.constant 0 : index
      %c0_404 = arith.constant 0 : index
      %494 = vector.load %arg4[%c14_402, %c0_403, %c0_404] : memref<25x128x128xbf16, #tpu.memory_space<vmem>>, vector<1x128x128xbf16>
      %495 = vector.shape_cast %494 : vector<1x128x128xbf16> to vector<128x128xbf16>
      %cst_405 = arith.constant dense<0.000000e+00> : vector<8x128xf32>
      %496 = tpu.matmul %493, %495, %cst_405 {dimension_numbers = #tpu.dot_dimension_numbers<[1], [0], [0], [1], [0, 0, 1, 1], [], []>} : vector<8x128xbf16>, vector<128x128xbf16>, vector<8x128xf32> -> vector<8x128xf32>
      %497 = arith.addf %488, %496 : vector<8x128xf32>
      %c3_i32_406 = arith.constant 3 : i32
      %498 = arith.addi %361, %c3_i32_406 : i32
      %499 = arith.index_cast %498 : i32 to index
      %c0_407 = arith.constant 0 : index
      %c0_408 = arith.constant 0 : index
      %500 = vector.load %arg11[%499, %c0_407, %c0_408] : memref<12x12x128xf32, #tpu.memory_space<vmem>>, vector<1x8x128xf32>
      %501 = vector.shape_cast %500 : vector<1x8x128xf32> to vector<8x128xf32>
      %502 = arith.truncf %501 : vector<8x128xf32> to vector<8x128xbf16>
      %c15_409 = arith.constant 15 : index
      %c0_410 = arith.constant 0 : index
      %c0_411 = arith.constant 0 : index
      %503 = vector.load %arg4[%c15_409, %c0_410, %c0_411] : memref<25x128x128xbf16, #tpu.memory_space<vmem>>, vector<1x128x128xbf16>
      %504 = vector.shape_cast %503 : vector<1x128x128xbf16> to vector<128x128xbf16>
      %cst_412 = arith.constant dense<0.000000e+00> : vector<8x128xf32>
      %505 = tpu.matmul %502, %504, %cst_412 {dimension_numbers = #tpu.dot_dimension_numbers<[1], [0], [0], [1], [0, 0, 1, 1], [], []>} : vector<8x128xbf16>, vector<128x128xbf16>, vector<8x128xf32> -> vector<8x128xf32>
      %506 = arith.addf %497, %505 : vector<8x128xf32>
      %c3_i32_413 = arith.constant 3 : i32
      %507 = arith.addi %361, %c3_i32_413 : i32
      %508 = arith.index_cast %507 : i32 to index
      %c1_414 = arith.constant 1 : index
      %c0_415 = arith.constant 0 : index
      %509 = vector.load %arg11[%508, %c1_414, %c0_415] : memref<12x12x128xf32, #tpu.memory_space<vmem>>, vector<1x8x128xf32>
      %510 = vector.shape_cast %509 : vector<1x8x128xf32> to vector<8x128xf32>
      %511 = arith.truncf %510 : vector<8x128xf32> to vector<8x128xbf16>
      %c16_416 = arith.constant 16 : index
      %c0_417 = arith.constant 0 : index
      %c0_418 = arith.constant 0 : index
      %512 = vector.load %arg4[%c16_416, %c0_417, %c0_418] : memref<25x128x128xbf16, #tpu.memory_space<vmem>>, vector<1x128x128xbf16>
      %513 = vector.shape_cast %512 : vector<1x128x128xbf16> to vector<128x128xbf16>
      %cst_419 = arith.constant dense<0.000000e+00> : vector<8x128xf32>
      %514 = tpu.matmul %511, %513, %cst_419 {dimension_numbers = #tpu.dot_dimension_numbers<[1], [0], [0], [1], [0, 0, 1, 1], [], []>} : vector<8x128xbf16>, vector<128x128xbf16>, vector<8x128xf32> -> vector<8x128xf32>
      %515 = arith.addf %506, %514 : vector<8x128xf32>
      %c3_i32_420 = arith.constant 3 : i32
      %516 = arith.addi %361, %c3_i32_420 : i32
      %517 = arith.index_cast %516 : i32 to index
      %c2_421 = arith.constant 2 : index
      %c0_422 = arith.constant 0 : index
      %518 = vector.load %arg11[%517, %c2_421, %c0_422] : memref<12x12x128xf32, #tpu.memory_space<vmem>>, vector<1x8x128xf32>
      %519 = vector.shape_cast %518 : vector<1x8x128xf32> to vector<8x128xf32>
      %520 = arith.truncf %519 : vector<8x128xf32> to vector<8x128xbf16>
      %c17_423 = arith.constant 17 : index
      %c0_424 = arith.constant 0 : index
      %c0_425 = arith.constant 0 : index
      %521 = vector.load %arg4[%c17_423, %c0_424, %c0_425] : memref<25x128x128xbf16, #tpu.memory_space<vmem>>, vector<1x128x128xbf16>
      %522 = vector.shape_cast %521 : vector<1x128x128xbf16> to vector<128x128xbf16>
      %cst_426 = arith.constant dense<0.000000e+00> : vector<8x128xf32>
      %523 = tpu.matmul %520, %522, %cst_426 {dimension_numbers = #tpu.dot_dimension_numbers<[1], [0], [0], [1], [0, 0, 1, 1], [], []>} : vector<8x128xbf16>, vector<128x128xbf16>, vector<8x128xf32> -> vector<8x128xf32>
      %524 = arith.addf %515, %523 : vector<8x128xf32>
      %c3_i32_427 = arith.constant 3 : i32
      %525 = arith.addi %361, %c3_i32_427 : i32
      %526 = arith.index_cast %525 : i32 to index
      %c3_428 = arith.constant 3 : index
      %c0_429 = arith.constant 0 : index
      %527 = vector.load %arg11[%526, %c3_428, %c0_429] : memref<12x12x128xf32, #tpu.memory_space<vmem>>, vector<1x8x128xf32>
      %528 = vector.shape_cast %527 : vector<1x8x128xf32> to vector<8x128xf32>
      %529 = arith.truncf %528 : vector<8x128xf32> to vector<8x128xbf16>
      %c18_430 = arith.constant 18 : index
      %c0_431 = arith.constant 0 : index
      %c0_432 = arith.constant 0 : index
      %530 = vector.load %arg4[%c18_430, %c0_431, %c0_432] : memref<25x128x128xbf16, #tpu.memory_space<vmem>>, vector<1x128x128xbf16>
      %531 = vector.shape_cast %530 : vector<1x128x128xbf16> to vector<128x128xbf16>
      %cst_433 = arith.constant dense<0.000000e+00> : vector<8x128xf32>
      %532 = tpu.matmul %529, %531, %cst_433 {dimension_numbers = #tpu.dot_dimension_numbers<[1], [0], [0], [1], [0, 0, 1, 1], [], []>} : vector<8x128xbf16>, vector<128x128xbf16>, vector<8x128xf32> -> vector<8x128xf32>
      %533 = arith.addf %524, %532 : vector<8x128xf32>
      %c3_i32_434 = arith.constant 3 : i32
      %534 = arith.addi %361, %c3_i32_434 : i32
      %535 = arith.index_cast %534 : i32 to index
      %c4_435 = arith.constant 4 : index
      %c0_436 = arith.constant 0 : index
      %536 = vector.load %arg11[%535, %c4_435, %c0_436] : memref<12x12x128xf32, #tpu.memory_space<vmem>>, vector<1x8x128xf32>
      %537 = vector.shape_cast %536 : vector<1x8x128xf32> to vector<8x128xf32>
      %538 = arith.truncf %537 : vector<8x128xf32> to vector<8x128xbf16>
      %c19_437 = arith.constant 19 : index
      %c0_438 = arith.constant 0 : index
      %c0_439 = arith.constant 0 : index
      %539 = vector.load %arg4[%c19_437, %c0_438, %c0_439] : memref<25x128x128xbf16, #tpu.memory_space<vmem>>, vector<1x128x128xbf16>
      %540 = vector.shape_cast %539 : vector<1x128x128xbf16> to vector<128x128xbf16>
      %cst_440 = arith.constant dense<0.000000e+00> : vector<8x128xf32>
      %541 = tpu.matmul %538, %540, %cst_440 {dimension_numbers = #tpu.dot_dimension_numbers<[1], [0], [0], [1], [0, 0, 1, 1], [], []>} : vector<8x128xbf16>, vector<128x128xbf16>, vector<8x128xf32> -> vector<8x128xf32>
      %542 = arith.addf %533, %541 : vector<8x128xf32>
      %c4_i32_441 = arith.constant 4 : i32
      %543 = arith.addi %361, %c4_i32_441 : i32
      %544 = arith.index_cast %543 : i32 to index
      %c0_442 = arith.constant 0 : index
      %c0_443 = arith.constant 0 : index
      %545 = vector.load %arg11[%544, %c0_442, %c0_443] : memref<12x12x128xf32, #tpu.memory_space<vmem>>, vector<1x8x128xf32>
      %546 = vector.shape_cast %545 : vector<1x8x128xf32> to vector<8x128xf32>
      %547 = arith.truncf %546 : vector<8x128xf32> to vector<8x128xbf16>
      %c20_444 = arith.constant 20 : index
      %c0_445 = arith.constant 0 : index
      %c0_446 = arith.constant 0 : index
      %548 = vector.load %arg4[%c20_444, %c0_445, %c0_446] : memref<25x128x128xbf16, #tpu.memory_space<vmem>>, vector<1x128x128xbf16>
      %549 = vector.shape_cast %548 : vector<1x128x128xbf16> to vector<128x128xbf16>
      %cst_447 = arith.constant dense<0.000000e+00> : vector<8x128xf32>
      %550 = tpu.matmul %547, %549, %cst_447 {dimension_numbers = #tpu.dot_dimension_numbers<[1], [0], [0], [1], [0, 0, 1, 1], [], []>} : vector<8x128xbf16>, vector<128x128xbf16>, vector<8x128xf32> -> vector<8x128xf32>
      %551 = arith.addf %542, %550 : vector<8x128xf32>
      %c4_i32_448 = arith.constant 4 : i32
      %552 = arith.addi %361, %c4_i32_448 : i32
      %553 = arith.index_cast %552 : i32 to index
      %c1_449 = arith.constant 1 : index
      %c0_450 = arith.constant 0 : index
      %554 = vector.load %arg11[%553, %c1_449, %c0_450] : memref<12x12x128xf32, #tpu.memory_space<vmem>>, vector<1x8x128xf32>
      %555 = vector.shape_cast %554 : vector<1x8x128xf32> to vector<8x128xf32>
      %556 = arith.truncf %555 : vector<8x128xf32> to vector<8x128xbf16>
      %c21_451 = arith.constant 21 : index
      %c0_452 = arith.constant 0 : index
      %c0_453 = arith.constant 0 : index
      %557 = vector.load %arg4[%c21_451, %c0_452, %c0_453] : memref<25x128x128xbf16, #tpu.memory_space<vmem>>, vector<1x128x128xbf16>
      %558 = vector.shape_cast %557 : vector<1x128x128xbf16> to vector<128x128xbf16>
      %cst_454 = arith.constant dense<0.000000e+00> : vector<8x128xf32>
      %559 = tpu.matmul %556, %558, %cst_454 {dimension_numbers = #tpu.dot_dimension_numbers<[1], [0], [0], [1], [0, 0, 1, 1], [], []>} : vector<8x128xbf16>, vector<128x128xbf16>, vector<8x128xf32> -> vector<8x128xf32>
      %560 = arith.addf %551, %559 : vector<8x128xf32>
      %c4_i32_455 = arith.constant 4 : i32
      %561 = arith.addi %361, %c4_i32_455 : i32
      %562 = arith.index_cast %561 : i32 to index
      %c2_456 = arith.constant 2 : index
      %c0_457 = arith.constant 0 : index
      %563 = vector.load %arg11[%562, %c2_456, %c0_457] : memref<12x12x128xf32, #tpu.memory_space<vmem>>, vector<1x8x128xf32>
      %564 = vector.shape_cast %563 : vector<1x8x128xf32> to vector<8x128xf32>
      %565 = arith.truncf %564 : vector<8x128xf32> to vector<8x128xbf16>
      %c22_458 = arith.constant 22 : index
      %c0_459 = arith.constant 0 : index
      %c0_460 = arith.constant 0 : index
      %566 = vector.load %arg4[%c22_458, %c0_459, %c0_460] : memref<25x128x128xbf16, #tpu.memory_space<vmem>>, vector<1x128x128xbf16>
      %567 = vector.shape_cast %566 : vector<1x128x128xbf16> to vector<128x128xbf16>
      %cst_461 = arith.constant dense<0.000000e+00> : vector<8x128xf32>
      %568 = tpu.matmul %565, %567, %cst_461 {dimension_numbers = #tpu.dot_dimension_numbers<[1], [0], [0], [1], [0, 0, 1, 1], [], []>} : vector<8x128xbf16>, vector<128x128xbf16>, vector<8x128xf32> -> vector<8x128xf32>
      %569 = arith.addf %560, %568 : vector<8x128xf32>
      %c4_i32_462 = arith.constant 4 : i32
      %570 = arith.addi %361, %c4_i32_462 : i32
      %571 = arith.index_cast %570 : i32 to index
      %c3_463 = arith.constant 3 : index
      %c0_464 = arith.constant 0 : index
      %572 = vector.load %arg11[%571, %c3_463, %c0_464] : memref<12x12x128xf32, #tpu.memory_space<vmem>>, vector<1x8x128xf32>
      %573 = vector.shape_cast %572 : vector<1x8x128xf32> to vector<8x128xf32>
      %574 = arith.truncf %573 : vector<8x128xf32> to vector<8x128xbf16>
      %c23_465 = arith.constant 23 : index
      %c0_466 = arith.constant 0 : index
      %c0_467 = arith.constant 0 : index
      %575 = vector.load %arg4[%c23_465, %c0_466, %c0_467] : memref<25x128x128xbf16, #tpu.memory_space<vmem>>, vector<1x128x128xbf16>
      %576 = vector.shape_cast %575 : vector<1x128x128xbf16> to vector<128x128xbf16>
      %cst_468 = arith.constant dense<0.000000e+00> : vector<8x128xf32>
      %577 = tpu.matmul %574, %576, %cst_468 {dimension_numbers = #tpu.dot_dimension_numbers<[1], [0], [0], [1], [0, 0, 1, 1], [], []>} : vector<8x128xbf16>, vector<128x128xbf16>, vector<8x128xf32> -> vector<8x128xf32>
      %578 = arith.addf %569, %577 : vector<8x128xf32>
      %c4_i32_469 = arith.constant 4 : i32
      %579 = arith.addi %361, %c4_i32_469 : i32
      %580 = arith.index_cast %579 : i32 to index
      %c4_470 = arith.constant 4 : index
      %c0_471 = arith.constant 0 : index
      %581 = vector.load %arg11[%580, %c4_470, %c0_471] : memref<12x12x128xf32, #tpu.memory_space<vmem>>, vector<1x8x128xf32>
      %582 = vector.shape_cast %581 : vector<1x8x128xf32> to vector<8x128xf32>
      %583 = arith.truncf %582 : vector<8x128xf32> to vector<8x128xbf16>
      %c24_472 = arith.constant 24 : index
      %c0_473 = arith.constant 0 : index
      %c0_474 = arith.constant 0 : index
      %584 = vector.load %arg4[%c24_472, %c0_473, %c0_474] : memref<25x128x128xbf16, #tpu.memory_space<vmem>>, vector<1x128x128xbf16>
      %585 = vector.shape_cast %584 : vector<1x128x128xbf16> to vector<128x128xbf16>
      %cst_475 = arith.constant dense<0.000000e+00> : vector<8x128xf32>
      %586 = tpu.matmul %583, %585, %cst_475 {dimension_numbers = #tpu.dot_dimension_numbers<[1], [0], [0], [1], [0, 0, 1, 1], [], []>} : vector<8x128xbf16>, vector<128x128xbf16>, vector<8x128xf32> -> vector<8x128xf32>
      %587 = arith.addf %578, %586 : vector<8x128xf32>
      %588 = vector.broadcast %1 : vector<1x128xf32> to vector<8x128xf32>
      %589 = arith.addf %587, %588 : vector<8x128xf32>
      %cst_476 = arith.constant 0.000000e+00 : f32
      %590 = vector.broadcast %cst_476 : f32 to vector<8x128xf32>
      %591 = arith.maximumf %589, %590 : vector<8x128xf32>
      %592 = arith.maximumf %359, %591 : vector<8x128xf32>
      %593 = vector.extract_strided_slice %592 {offsets = [0, 0], sizes = [1, 128], strides = [1, 1]} : vector<8x128xf32> to vector<1x128xf32>
      %594 = vector.extract_strided_slice %592 {offsets = [1, 0], sizes = [1, 128], strides = [1, 1]} : vector<8x128xf32> to vector<1x128xf32>
      %595 = arith.maximumf %593, %594 : vector<1x128xf32>
      %596 = arith.index_cast %arg13 : i32 to index
      %c0_477 = arith.constant 0 : index
      %c0_478 = arith.constant 0 : index
      %597 = vector.load %arg12[%596, %c0_477, %c0_478] : memref<4x4x128xf32, #tpu.memory_space<vmem>>, vector<1x1x128xf32>
      %598 = vector.shape_cast %597 : vector<1x1x128xf32> to vector<1x128xf32>
      %599 = vector.shape_cast %595 : vector<1x128xf32> to vector<1x1x128xf32>
      tpu.vector_store %arg12[%596, %c0_477, %c0_478], %599 {strides = array<i32>} : memref<4x4x128xf32, #tpu.memory_space<vmem>>, vector<1x1x128xf32>,
      %600 = vector.extract_strided_slice %592 {offsets = [2, 0], sizes = [1, 128], strides = [1, 1]} : vector<8x128xf32> to vector<1x128xf32>
      %601 = vector.extract_strided_slice %592 {offsets = [3, 0], sizes = [1, 128], strides = [1, 1]} : vector<8x128xf32> to vector<1x128xf32>
      %602 = arith.maximumf %600, %601 : vector<1x128xf32>
      %603 = arith.index_cast %arg13 : i32 to index
      %c1_479 = arith.constant 1 : index
      %c0_480 = arith.constant 0 : index
      %604 = vector.load %arg12[%603, %c1_479, %c0_480] : memref<4x4x128xf32, #tpu.memory_space<vmem>>, vector<1x1x128xf32>
      %605 = vector.shape_cast %604 : vector<1x1x128xf32> to vector<1x128xf32>
      %606 = vector.shape_cast %602 : vector<1x128xf32> to vector<1x1x128xf32>
      tpu.vector_store %arg12[%603, %c1_479, %c0_480], %606 {strides = array<i32>} : memref<4x4x128xf32, #tpu.memory_space<vmem>>, vector<1x1x128xf32>,
      %607 = vector.extract_strided_slice %592 {offsets = [4, 0], sizes = [1, 128], strides = [1, 1]} : vector<8x128xf32> to vector<1x128xf32>
      %608 = vector.extract_strided_slice %592 {offsets = [5, 0], sizes = [1, 128], strides = [1, 1]} : vector<8x128xf32> to vector<1x128xf32>
      %609 = arith.maximumf %607, %608 : vector<1x128xf32>
      %610 = arith.index_cast %arg13 : i32 to index
      %c2_481 = arith.constant 2 : index
      %c0_482 = arith.constant 0 : index
      %611 = vector.load %arg12[%610, %c2_481, %c0_482] : memref<4x4x128xf32, #tpu.memory_space<vmem>>, vector<1x1x128xf32>
      %612 = vector.shape_cast %611 : vector<1x1x128xf32> to vector<1x128xf32>
      %613 = vector.shape_cast %609 : vector<1x128xf32> to vector<1x1x128xf32>
      tpu.vector_store %arg12[%610, %c2_481, %c0_482], %613 {strides = array<i32>} : memref<4x4x128xf32, #tpu.memory_space<vmem>>, vector<1x1x128xf32>,
      %614 = vector.extract_strided_slice %592 {offsets = [6, 0], sizes = [1, 128], strides = [1, 1]} : vector<8x128xf32> to vector<1x128xf32>
      %615 = vector.extract_strided_slice %592 {offsets = [7, 0], sizes = [1, 128], strides = [1, 1]} : vector<8x128xf32> to vector<1x128xf32>
      %616 = arith.maximumf %614, %615 : vector<1x128xf32>
      %617 = arith.index_cast %arg13 : i32 to index
      %c3_483 = arith.constant 3 : index
      %c0_484 = arith.constant 0 : index
      %618 = vector.load %arg12[%617, %c3_483, %c0_484] : memref<4x4x128xf32, #tpu.memory_space<vmem>>, vector<1x1x128xf32>
      %619 = vector.shape_cast %618 : vector<1x1x128xf32> to vector<1x128xf32>
      %620 = vector.shape_cast %616 : vector<1x128xf32> to vector<1x1x128xf32>
      tpu.vector_store %arg12[%617, %c3_483, %c0_484], %620 {strides = array<i32>} : memref<4x4x128xf32, #tpu.memory_space<vmem>>, vector<1x1x128xf32>,
    }
    %c4_i32_6 = arith.constant 4 : i32
    %cst = arith.constant 0.000000e+00 : f32
    %4 = vector.broadcast %cst : f32 to vector<1x512xf32>
    %c0_7 = arith.constant 0 : index
    %c0_8 = arith.constant 0 : index
    %c0_9 = arith.constant 0 : index
    %5 = vector.load %arg12[%c0_7, %c0_8, %c0_9] : memref<4x4x128xf32, #tpu.memory_space<vmem>>, vector<1x1x128xf32>
    %6 = vector.shape_cast %5 : vector<1x1x128xf32> to vector<1x128xf32>
    %7 = arith.truncf %6 : vector<1x128xf32> to vector<1x128xbf16>
    %c0_10 = arith.constant 0 : index
    %c0_11 = arith.constant 0 : index
    %c0_12 = arith.constant 0 : index
    %c0_13 = arith.constant 0 : index
    %8 = vector.load %arg6[%c0_10, %c0_11, %c0_12, %c0_13] : memref<4x4x128x512xbf16, #tpu.memory_space<vmem>>, vector<1x1x128x512xbf16>
    %9 = vector.shape_cast %8 : vector<1x1x128x512xbf16> to vector<128x512xbf16>
    %cst_14 = arith.constant dense<0.000000e+00> : vector<1x512xf32>
    %10 = tpu.matmul %7, %9, %cst_14 {dimension_numbers = #tpu.dot_dimension_numbers<[1], [0], [0], [1], [0, 0, 1, 1], [], []>} : vector<1x128xbf16>, vector<128x512xbf16>, vector<1x512xf32> -> vector<1x512xf32>
    %11 = arith.addf %4, %10 : vector<1x512xf32>
    %c0_15 = arith.constant 0 : index
    %c1 = arith.constant 1 : index
    %c0_16 = arith.constant 0 : index
    %12 = vector.load %arg12[%c0_15, %c1, %c0_16] : memref<4x4x128xf32, #tpu.memory_space<vmem>>, vector<1x1x128xf32>
    %13 = vector.shape_cast %12 : vector<1x1x128xf32> to vector<1x128xf32>
    %14 = arith.truncf %13 : vector<1x128xf32> to vector<1x128xbf16>
    %c0_17 = arith.constant 0 : index
    %c1_18 = arith.constant 1 : index
    %c0_19 = arith.constant 0 : index
    %c0_20 = arith.constant 0 : index
    %15 = vector.load %arg6[%c0_17, %c1_18, %c0_19, %c0_20] : memref<4x4x128x512xbf16, #tpu.memory_space<vmem>>, vector<1x1x128x512xbf16>
    %16 = vector.shape_cast %15 : vector<1x1x128x512xbf16> to vector<128x512xbf16>
    %cst_21 = arith.constant dense<0.000000e+00> : vector<1x512xf32>
    %17 = tpu.matmul %14, %16, %cst_21 {dimension_numbers = #tpu.dot_dimension_numbers<[1], [0], [0], [1], [0, 0, 1, 1], [], []>} : vector<1x128xbf16>, vector<128x512xbf16>, vector<1x512xf32> -> vector<1x512xf32>
    %18 = arith.addf %11, %17 : vector<1x512xf32>
    %c0_22 = arith.constant 0 : index
    %c2 = arith.constant 2 : index
    %c0_23 = arith.constant 0 : index
    %19 = vector.load %arg12[%c0_22, %c2, %c0_23] : memref<4x4x128xf32, #tpu.memory_space<vmem>>, vector<1x1x128xf32>
    %20 = vector.shape_cast %19 : vector<1x1x128xf32> to vector<1x128xf32>
    %21 = arith.truncf %20 : vector<1x128xf32> to vector<1x128xbf16>
    %c0_24 = arith.constant 0 : index
    %c2_25 = arith.constant 2 : index
    %c0_26 = arith.constant 0 : index
    %c0_27 = arith.constant 0 : index
    %22 = vector.load %arg6[%c0_24, %c2_25, %c0_26, %c0_27] : memref<4x4x128x512xbf16, #tpu.memory_space<vmem>>, vector<1x1x128x512xbf16>
    %23 = vector.shape_cast %22 : vector<1x1x128x512xbf16> to vector<128x512xbf16>
    %cst_28 = arith.constant dense<0.000000e+00> : vector<1x512xf32>
    %24 = tpu.matmul %21, %23, %cst_28 {dimension_numbers = #tpu.dot_dimension_numbers<[1], [0], [0], [1], [0, 0, 1, 1], [], []>} : vector<1x128xbf16>, vector<128x512xbf16>, vector<1x512xf32> -> vector<1x512xf32>
    %25 = arith.addf %18, %24 : vector<1x512xf32>
    %c0_29 = arith.constant 0 : index
    %c3 = arith.constant 3 : index
    %c0_30 = arith.constant 0 : index
    %26 = vector.load %arg12[%c0_29, %c3, %c0_30] : memref<4x4x128xf32, #tpu.memory_space<vmem>>, vector<1x1x128xf32>
    %27 = vector.shape_cast %26 : vector<1x1x128xf32> to vector<1x128xf32>
    %28 = arith.truncf %27 : vector<1x128xf32> to vector<1x128xbf16>
    %c0_31 = arith.constant 0 : index
    %c3_32 = arith.constant 3 : index
    %c0_33 = arith.constant 0 : index
    %c0_34 = arith.constant 0 : index
    %29 = vector.load %arg6[%c0_31, %c3_32, %c0_33, %c0_34] : memref<4x4x128x512xbf16, #tpu.memory_space<vmem>>, vector<1x1x128x512xbf16>
    %30 = vector.shape_cast %29 : vector<1x1x128x512xbf16> to vector<128x512xbf16>
    %cst_35 = arith.constant dense<0.000000e+00> : vector<1x512xf32>
    %31 = tpu.matmul %28, %30, %cst_35 {dimension_numbers = #tpu.dot_dimension_numbers<[1], [0], [0], [1], [0, 0, 1, 1], [], []>} : vector<1x128xbf16>, vector<128x512xbf16>, vector<1x512xf32> -> vector<1x512xf32>
    %32 = arith.addf %25, %31 : vector<1x512xf32>
    %c1_36 = arith.constant 1 : index
    %c0_37 = arith.constant 0 : index
    %c0_38 = arith.constant 0 : index
    %33 = vector.load %arg12[%c1_36, %c0_37, %c0_38] : memref<4x4x128xf32, #tpu.memory_space<vmem>>, vector<1x1x128xf32>
    %34 = vector.shape_cast %33 : vector<1x1x128xf32> to vector<1x128xf32>
    %35 = arith.truncf %34 : vector<1x128xf32> to vector<1x128xbf16>
    %c1_39 = arith.constant 1 : index
    %c0_40 = arith.constant 0 : index
    %c0_41 = arith.constant 0 : index
    %c0_42 = arith.constant 0 : index
    %36 = vector.load %arg6[%c1_39, %c0_40, %c0_41, %c0_42] : memref<4x4x128x512xbf16, #tpu.memory_space<vmem>>, vector<1x1x128x512xbf16>
    %37 = vector.shape_cast %36 : vector<1x1x128x512xbf16> to vector<128x512xbf16>
    %cst_43 = arith.constant dense<0.000000e+00> : vector<1x512xf32>
    %38 = tpu.matmul %35, %37, %cst_43 {dimension_numbers = #tpu.dot_dimension_numbers<[1], [0], [0], [1], [0, 0, 1, 1], [], []>} : vector<1x128xbf16>, vector<128x512xbf16>, vector<1x512xf32> -> vector<1x512xf32>
    %39 = arith.addf %32, %38 : vector<1x512xf32>
    %c1_44 = arith.constant 1 : index
    %c1_45 = arith.constant 1 : index
    %c0_46 = arith.constant 0 : index
    %40 = vector.load %arg12[%c1_44, %c1_45, %c0_46] : memref<4x4x128xf32, #tpu.memory_space<vmem>>, vector<1x1x128xf32>
    %41 = vector.shape_cast %40 : vector<1x1x128xf32> to vector<1x128xf32>
    %42 = arith.truncf %41 : vector<1x128xf32> to vector<1x128xbf16>
    %c1_47 = arith.constant 1 : index
    %c1_48 = arith.constant 1 : index
    %c0_49 = arith.constant 0 : index
    %c0_50 = arith.constant 0 : index
    %43 = vector.load %arg6[%c1_47, %c1_48, %c0_49, %c0_50] : memref<4x4x128x512xbf16, #tpu.memory_space<vmem>>, vector<1x1x128x512xbf16>
    %44 = vector.shape_cast %43 : vector<1x1x128x512xbf16> to vector<128x512xbf16>
    %cst_51 = arith.constant dense<0.000000e+00> : vector<1x512xf32>
    %45 = tpu.matmul %42, %44, %cst_51 {dimension_numbers = #tpu.dot_dimension_numbers<[1], [0], [0], [1], [0, 0, 1, 1], [], []>} : vector<1x128xbf16>, vector<128x512xbf16>, vector<1x512xf32> -> vector<1x512xf32>
    %46 = arith.addf %39, %45 : vector<1x512xf32>
    %c1_52 = arith.constant 1 : index
    %c2_53 = arith.constant 2 : index
    %c0_54 = arith.constant 0 : index
    %47 = vector.load %arg12[%c1_52, %c2_53, %c0_54] : memref<4x4x128xf32, #tpu.memory_space<vmem>>, vector<1x1x128xf32>
    %48 = vector.shape_cast %47 : vector<1x1x128xf32> to vector<1x128xf32>
    %49 = arith.truncf %48 : vector<1x128xf32> to vector<1x128xbf16>
    %c1_55 = arith.constant 1 : index
    %c2_56 = arith.constant 2 : index
    %c0_57 = arith.constant 0 : index
    %c0_58 = arith.constant 0 : index
    %50 = vector.load %arg6[%c1_55, %c2_56, %c0_57, %c0_58] : memref<4x4x128x512xbf16, #tpu.memory_space<vmem>>, vector<1x1x128x512xbf16>
    %51 = vector.shape_cast %50 : vector<1x1x128x512xbf16> to vector<128x512xbf16>
    %cst_59 = arith.constant dense<0.000000e+00> : vector<1x512xf32>
    %52 = tpu.matmul %49, %51, %cst_59 {dimension_numbers = #tpu.dot_dimension_numbers<[1], [0], [0], [1], [0, 0, 1, 1], [], []>} : vector<1x128xbf16>, vector<128x512xbf16>, vector<1x512xf32> -> vector<1x512xf32>
    %53 = arith.addf %46, %52 : vector<1x512xf32>
    %c1_60 = arith.constant 1 : index
    %c3_61 = arith.constant 3 : index
    %c0_62 = arith.constant 0 : index
    %54 = vector.load %arg12[%c1_60, %c3_61, %c0_62] : memref<4x4x128xf32, #tpu.memory_space<vmem>>, vector<1x1x128xf32>
    %55 = vector.shape_cast %54 : vector<1x1x128xf32> to vector<1x128xf32>
    %56 = arith.truncf %55 : vector<1x128xf32> to vector<1x128xbf16>
    %c1_63 = arith.constant 1 : index
    %c3_64 = arith.constant 3 : index
    %c0_65 = arith.constant 0 : index
    %c0_66 = arith.constant 0 : index
    %57 = vector.load %arg6[%c1_63, %c3_64, %c0_65, %c0_66] : memref<4x4x128x512xbf16, #tpu.memory_space<vmem>>, vector<1x1x128x512xbf16>
    %58 = vector.shape_cast %57 : vector<1x1x128x512xbf16> to vector<128x512xbf16>
    %cst_67 = arith.constant dense<0.000000e+00> : vector<1x512xf32>
    %59 = tpu.matmul %56, %58, %cst_67 {dimension_numbers = #tpu.dot_dimension_numbers<[1], [0], [0], [1], [0, 0, 1, 1], [], []>} : vector<1x128xbf16>, vector<128x512xbf16>, vector<1x512xf32> -> vector<1x512xf32>
    %60 = arith.addf %53, %59 : vector<1x512xf32>
    %c2_68 = arith.constant 2 : index
    %c0_69 = arith.constant 0 : index
    %c0_70 = arith.constant 0 : index
    %61 = vector.load %arg12[%c2_68, %c0_69, %c0_70] : memref<4x4x128xf32, #tpu.memory_space<vmem>>, vector<1x1x128xf32>
    %62 = vector.shape_cast %61 : vector<1x1x128xf32> to vector<1x128xf32>
    %63 = arith.truncf %62 : vector<1x128xf32> to vector<1x128xbf16>
    %c2_71 = arith.constant 2 : index
    %c0_72 = arith.constant 0 : index
    %c0_73 = arith.constant 0 : index
    %c0_74 = arith.constant 0 : index
    %64 = vector.load %arg6[%c2_71, %c0_72, %c0_73, %c0_74] : memref<4x4x128x512xbf16, #tpu.memory_space<vmem>>, vector<1x1x128x512xbf16>
    %65 = vector.shape_cast %64 : vector<1x1x128x512xbf16> to vector<128x512xbf16>
    %cst_75 = arith.constant dense<0.000000e+00> : vector<1x512xf32>
    %66 = tpu.matmul %63, %65, %cst_75 {dimension_numbers = #tpu.dot_dimension_numbers<[1], [0], [0], [1], [0, 0, 1, 1], [], []>} : vector<1x128xbf16>, vector<128x512xbf16>, vector<1x512xf32> -> vector<1x512xf32>
    %67 = arith.addf %60, %66 : vector<1x512xf32>
    %c2_76 = arith.constant 2 : index
    %c1_77 = arith.constant 1 : index
    %c0_78 = arith.constant 0 : index
    %68 = vector.load %arg12[%c2_76, %c1_77, %c0_78] : memref<4x4x128xf32, #tpu.memory_space<vmem>>, vector<1x1x128xf32>
    %69 = vector.shape_cast %68 : vector<1x1x128xf32> to vector<1x128xf32>
    %70 = arith.truncf %69 : vector<1x128xf32> to vector<1x128xbf16>
    %c2_79 = arith.constant 2 : index
    %c1_80 = arith.constant 1 : index
    %c0_81 = arith.constant 0 : index
    %c0_82 = arith.constant 0 : index
    %71 = vector.load %arg6[%c2_79, %c1_80, %c0_81, %c0_82] : memref<4x4x128x512xbf16, #tpu.memory_space<vmem>>, vector<1x1x128x512xbf16>
    %72 = vector.shape_cast %71 : vector<1x1x128x512xbf16> to vector<128x512xbf16>
    %cst_83 = arith.constant dense<0.000000e+00> : vector<1x512xf32>
    %73 = tpu.matmul %70, %72, %cst_83 {dimension_numbers = #tpu.dot_dimension_numbers<[1], [0], [0], [1], [0, 0, 1, 1], [], []>} : vector<1x128xbf16>, vector<128x512xbf16>, vector<1x512xf32> -> vector<1x512xf32>
    %74 = arith.addf %67, %73 : vector<1x512xf32>
    %c2_84 = arith.constant 2 : index
    %c2_85 = arith.constant 2 : index
    %c0_86 = arith.constant 0 : index
    %75 = vector.load %arg12[%c2_84, %c2_85, %c0_86] : memref<4x4x128xf32, #tpu.memory_space<vmem>>, vector<1x1x128xf32>
    %76 = vector.shape_cast %75 : vector<1x1x128xf32> to vector<1x128xf32>
    %77 = arith.truncf %76 : vector<1x128xf32> to vector<1x128xbf16>
    %c2_87 = arith.constant 2 : index
    %c2_88 = arith.constant 2 : index
    %c0_89 = arith.constant 0 : index
    %c0_90 = arith.constant 0 : index
    %78 = vector.load %arg6[%c2_87, %c2_88, %c0_89, %c0_90] : memref<4x4x128x512xbf16, #tpu.memory_space<vmem>>, vector<1x1x128x512xbf16>
    %79 = vector.shape_cast %78 : vector<1x1x128x512xbf16> to vector<128x512xbf16>
    %cst_91 = arith.constant dense<0.000000e+00> : vector<1x512xf32>
    %80 = tpu.matmul %77, %79, %cst_91 {dimension_numbers = #tpu.dot_dimension_numbers<[1], [0], [0], [1], [0, 0, 1, 1], [], []>} : vector<1x128xbf16>, vector<128x512xbf16>, vector<1x512xf32> -> vector<1x512xf32>
    %81 = arith.addf %74, %80 : vector<1x512xf32>
    %c2_92 = arith.constant 2 : index
    %c3_93 = arith.constant 3 : index
    %c0_94 = arith.constant 0 : index
    %82 = vector.load %arg12[%c2_92, %c3_93, %c0_94] : memref<4x4x128xf32, #tpu.memory_space<vmem>>, vector<1x1x128xf32>
    %83 = vector.shape_cast %82 : vector<1x1x128xf32> to vector<1x128xf32>
    %84 = arith.truncf %83 : vector<1x128xf32> to vector<1x128xbf16>
    %c2_95 = arith.constant 2 : index
    %c3_96 = arith.constant 3 : index
    %c0_97 = arith.constant 0 : index
    %c0_98 = arith.constant 0 : index
    %85 = vector.load %arg6[%c2_95, %c3_96, %c0_97, %c0_98] : memref<4x4x128x512xbf16, #tpu.memory_space<vmem>>, vector<1x1x128x512xbf16>
    %86 = vector.shape_cast %85 : vector<1x1x128x512xbf16> to vector<128x512xbf16>
    %cst_99 = arith.constant dense<0.000000e+00> : vector<1x512xf32>
    %87 = tpu.matmul %84, %86, %cst_99 {dimension_numbers = #tpu.dot_dimension_numbers<[1], [0], [0], [1], [0, 0, 1, 1], [], []>} : vector<1x128xbf16>, vector<128x512xbf16>, vector<1x512xf32> -> vector<1x512xf32>
    %88 = arith.addf %81, %87 : vector<1x512xf32>
    %c3_100 = arith.constant 3 : index
    %c0_101 = arith.constant 0 : index
    %c0_102 = arith.constant 0 : index
    %89 = vector.load %arg12[%c3_100, %c0_101, %c0_102] : memref<4x4x128xf32, #tpu.memory_space<vmem>>, vector<1x1x128xf32>
    %90 = vector.shape_cast %89 : vector<1x1x128xf32> to vector<1x128xf32>
    %91 = arith.truncf %90 : vector<1x128xf32> to vector<1x128xbf16>
    %c3_103 = arith.constant 3 : index
    %c0_104 = arith.constant 0 : index
    %c0_105 = arith.constant 0 : index
    %c0_106 = arith.constant 0 : index
    %92 = vector.load %arg6[%c3_103, %c0_104, %c0_105, %c0_106] : memref<4x4x128x512xbf16, #tpu.memory_space<vmem>>, vector<1x1x128x512xbf16>
    %93 = vector.shape_cast %92 : vector<1x1x128x512xbf16> to vector<128x512xbf16>
    %cst_107 = arith.constant dense<0.000000e+00> : vector<1x512xf32>
    %94 = tpu.matmul %91, %93, %cst_107 {dimension_numbers = #tpu.dot_dimension_numbers<[1], [0], [0], [1], [0, 0, 1, 1], [], []>} : vector<1x128xbf16>, vector<128x512xbf16>, vector<1x512xf32> -> vector<1x512xf32>
    %95 = arith.addf %88, %94 : vector<1x512xf32>
    %c3_108 = arith.constant 3 : index
    %c1_109 = arith.constant 1 : index
    %c0_110 = arith.constant 0 : index
    %96 = vector.load %arg12[%c3_108, %c1_109, %c0_110] : memref<4x4x128xf32, #tpu.memory_space<vmem>>, vector<1x1x128xf32>
    %97 = vector.shape_cast %96 : vector<1x1x128xf32> to vector<1x128xf32>
    %98 = arith.truncf %97 : vector<1x128xf32> to vector<1x128xbf16>
    %c3_111 = arith.constant 3 : index
    %c1_112 = arith.constant 1 : index
    %c0_113 = arith.constant 0 : index
    %c0_114 = arith.constant 0 : index
    %99 = vector.load %arg6[%c3_111, %c1_112, %c0_113, %c0_114] : memref<4x4x128x512xbf16, #tpu.memory_space<vmem>>, vector<1x1x128x512xbf16>
    %100 = vector.shape_cast %99 : vector<1x1x128x512xbf16> to vector<128x512xbf16>
    %cst_115 = arith.constant dense<0.000000e+00> : vector<1x512xf32>
    %101 = tpu.matmul %98, %100, %cst_115 {dimension_numbers = #tpu.dot_dimension_numbers<[1], [0], [0], [1], [0, 0, 1, 1], [], []>} : vector<1x128xbf16>, vector<128x512xbf16>, vector<1x512xf32> -> vector<1x512xf32>
    %102 = arith.addf %95, %101 : vector<1x512xf32>
    %c3_116 = arith.constant 3 : index
    %c2_117 = arith.constant 2 : index
    %c0_118 = arith.constant 0 : index
    %103 = vector.load %arg12[%c3_116, %c2_117, %c0_118] : memref<4x4x128xf32, #tpu.memory_space<vmem>>, vector<1x1x128xf32>
    %104 = vector.shape_cast %103 : vector<1x1x128xf32> to vector<1x128xf32>
    %105 = arith.truncf %104 : vector<1x128xf32> to vector<1x128xbf16>
    %c3_119 = arith.constant 3 : index
    %c2_120 = arith.constant 2 : index
    %c0_121 = arith.constant 0 : index
    %c0_122 = arith.constant 0 : index
    %106 = vector.load %arg6[%c3_119, %c2_120, %c0_121, %c0_122] : memref<4x4x128x512xbf16, #tpu.memory_space<vmem>>, vector<1x1x128x512xbf16>
    %107 = vector.shape_cast %106 : vector<1x1x128x512xbf16> to vector<128x512xbf16>
    %cst_123 = arith.constant dense<0.000000e+00> : vector<1x512xf32>
    %108 = tpu.matmul %105, %107, %cst_123 {dimension_numbers = #tpu.dot_dimension_numbers<[1], [0], [0], [1], [0, 0, 1, 1], [], []>} : vector<1x128xbf16>, vector<128x512xbf16>, vector<1x512xf32> -> vector<1x512xf32>
    %109 = arith.addf %102, %108 : vector<1x512xf32>
    %c3_124 = arith.constant 3 : index
    %c3_125 = arith.constant 3 : index
    %c0_126 = arith.constant 0 : index
    %110 = vector.load %arg12[%c3_124, %c3_125, %c0_126] : memref<4x4x128xf32, #tpu.memory_space<vmem>>, vector<1x1x128xf32>
    %111 = vector.shape_cast %110 : vector<1x1x128xf32> to vector<1x128xf32>
    %112 = arith.truncf %111 : vector<1x128xf32> to vector<1x128xbf16>
    %c3_127 = arith.constant 3 : index
    %c3_128 = arith.constant 3 : index
    %c0_129 = arith.constant 0 : index
    %c0_130 = arith.constant 0 : index
    %113 = vector.load %arg6[%c3_127, %c3_128, %c0_129, %c0_130] : memref<4x4x128x512xbf16, #tpu.memory_space<vmem>>, vector<1x1x128x512xbf16>
    %114 = vector.shape_cast %113 : vector<1x1x128x512xbf16> to vector<128x512xbf16>
    %cst_131 = arith.constant dense<0.000000e+00> : vector<1x512xf32>
    %115 = tpu.matmul %112, %114, %cst_131 {dimension_numbers = #tpu.dot_dimension_numbers<[1], [0], [0], [1], [0, 0, 1, 1], [], []>} : vector<1x128xbf16>, vector<128x512xbf16>, vector<1x512xf32> -> vector<1x512xf32>
    %116 = arith.addf %109, %115 : vector<1x512xf32>
    %c0_132 = arith.constant 0 : index
    %c0_133 = arith.constant 0 : index
    %117 = vector.load %arg7[%c0_132, %c0_133] : memref<1x512xf32, #tpu.memory_space<vmem>>, vector<1x512xf32>
    %118 = arith.addf %116, %117 : vector<1x512xf32>
    %cst_134 = arith.constant 0.000000e+00 : f32
    %119 = vector.broadcast %cst_134 : f32 to vector<1x512xf32>
    %120 = arith.maximumf %118, %119 : vector<1x512xf32>
    %121 = arith.truncf %120 : vector<1x512xf32> to vector<1x512xbf16>
    %c0_135 = arith.constant 0 : index
    %c0_136 = arith.constant 0 : index
    %122 = vector.load %arg8[%c0_135, %c0_136] : memref<512x128xbf16, #tpu.memory_space<vmem>>, vector<512x128xbf16>
    %cst_137 = arith.constant dense<0.000000e+00> : vector<1x128xf32>
    %123 = tpu.matmul %121, %122, %cst_137 {dimension_numbers = #tpu.dot_dimension_numbers<[1], [0], [0], [1], [0, 0, 1, 1], [], []>} : vector<1x512xbf16>, vector<512x128xbf16>, vector<1x128xf32> -> vector<1x128xf32>
    %c0_138 = arith.constant 0 : index
    %c0_139 = arith.constant 0 : index
    %124 = vector.load %arg9[%c0_138, %c0_139] : memref<1x128xf32, #tpu.memory_space<vmem>>, vector<1x128xf32>
    %125 = arith.addf %123, %124 : vector<1x128xf32>
    %c0_140 = arith.constant 0 : index
    %c0_141 = arith.constant 0 : index
    %c0_142 = arith.constant 0 : index
    %126 = vector.load %arg10[%c0_140, %c0_141, %c0_142] : memref<1x1x128xf32, #tpu.memory_space<vmem>>, vector<1x1x128xf32>
    %127 = vector.shape_cast %126 : vector<1x1x128xf32> to vector<1x128xf32>
    %128 = vector.shape_cast %125 : vector<1x128xf32> to vector<1x1x128xf32>
    tpu.vector_store %arg10[%c0_140, %c0_141, %c0_142], %128 {strides = array<i32>} : memref<1x1x128xf32, #tpu.memory_space<vmem>>, vector<1x1x128xf32>,
    return
  }
  func.func @transform_0(%arg0: i32) -> (i32, i32, i32, i32) {
    %c0_i32 = arith.constant 0 : i32
    %c0_i32_0 = arith.constant 0 : i32
    %c0_i32_1 = arith.constant 0 : i32
    %c0_i32_2 = arith.constant 0 : i32
    return %arg0, %c0_i32, %c0_i32_0, %c0_i32_1 : i32, i32, i32, i32
  }
  func.func @transform_1(%arg0: i32) -> (i32, i32, i32) {
    %c0_i32 = arith.constant 0 : i32
    %c0_i32_0 = arith.constant 0 : i32
    %c0_i32_1 = arith.constant 0 : i32
    %c0_i32_2 = arith.constant 0 : i32
    return %c0_i32, %c0_i32_0, %c0_i32_1 : i32, i32, i32
  }
  func.func @transform_2(%arg0: i32) -> (i32, i32) {
    %c0_i32 = arith.constant 0 : i32
    %c0_i32_0 = arith.constant 0 : i32
    %c0_i32_1 = arith.constant 0 : i32
    return %c0_i32, %c0_i32_0 : i32, i32
  }
  func.func @transform_3(%arg0: i32) -> (i32, i32, i32) {
    %c0_i32 = arith.constant 0 : i32
    %c0_i32_0 = arith.constant 0 : i32
    %c0_i32_1 = arith.constant 0 : i32
    %c0_i32_2 = arith.constant 0 : i32
    return %c0_i32, %c0_i32_0, %c0_i32_1 : i32, i32, i32
  }
  func.func @transform_4(%arg0: i32) -> (i32, i32) {
    %c0_i32 = arith.constant 0 : i32
    %c0_i32_0 = arith.constant 0 : i32
    %c0_i32_1 = arith.constant 0 : i32
    return %c0_i32, %c0_i32_0 : i32, i32
  }
  func.func @transform_5(%arg0: i32) -> (i32, i32, i32, i32) {
    %c0_i32 = arith.constant 0 : i32
    %c0_i32_0 = arith.constant 0 : i32
    %c0_i32_1 = arith.constant 0 : i32
    %c0_i32_2 = arith.constant 0 : i32
    %c0_i32_3 = arith.constant 0 : i32
    return %c0_i32, %c0_i32_0, %c0_i32_1, %c0_i32_2 : i32, i32, i32, i32
  }
  func.func @transform_6(%arg0: i32) -> (i32, i32) {
    %c0_i32 = arith.constant 0 : i32
    %c0_i32_0 = arith.constant 0 : i32
    %c0_i32_1 = arith.constant 0 : i32
    return %c0_i32, %c0_i32_0 : i32, i32
  }
  func.func @transform_7(%arg0: i32) -> (i32, i32) {
    %c0_i32 = arith.constant 0 : i32
    %c0_i32_0 = arith.constant 0 : i32
    %c0_i32_1 = arith.constant 0 : i32
    return %c0_i32, %c0_i32_0 : i32, i32
  }
  func.func @transform_8(%arg0: i32) -> (i32, i32) {
    %c0_i32 = arith.constant 0 : i32
    %c0_i32_0 = arith.constant 0 : i32
    %c0_i32_1 = arith.constant 0 : i32
    return %c0_i32, %c0_i32_0 : i32, i32
  }
  func.func @transform_9(%arg0: i32) -> (i32, i32, i32) {
    %c0_i32 = arith.constant 0 : i32
    %c0_i32_0 = arith.constant 0 : i32
    %c0_i32_1 = arith.constant 0 : i32
    return %arg0, %c0_i32, %c0_i32_0 : i32, i32, i32
  }
}

</mosaic_0001>

<bundles_post_ra>
// kernel: lenet_forward.1
= control target key start
LH: loop header
LB: loop body
LE: loop exit
PB: predicated region body
PF: predicated region fallthrough
CT: control target
= control target key end

     0   :  { %s16816_s0 = inlined_call_operand.vmem [shape: f32[2,28,28,1], index: 0, kind: input, shape index: {}]   ;;  %s16817_s1 = inlined_call_operand.hbm [shape: f32[25,1,128], index: 1, kind: input, shape index: {}]   ;;  %s16818_s2 = inlined_call_operand.hbm [shape: f32[1,128], index: 2, kind: input, shape index: {}]   ;;  %s16819_s3 = inlined_call_operand.hbm [shape: bf16[25,128,128], index: 3, kind: input, shape index: {}]   ;;  %s16820_s4 = inlined_call_operand.hbm [shape: f32[1,128], index: 4, kind: input, shape index: {}]   ;;  %s16821_s5 = inlined_call_operand.hbm [shape: bf16[4,4,128,512], index: 5, kind: input, shape index: {}]   ;;  %s16822_s6 = inlined_call_operand.hbm [shape: f32[1,512], index: 6, kind: input, shape index: {}]   ;;  %s16823_s7 = inlined_call_operand.hbm [shape: bf16[512,128], index: 7, kind: input, shape index: {}]   ;;  %s16824_s8 = inlined_call_operand.hbm [shape: f32[1,128], index: 8, kind: input, shape index: {}]   ;;  %s16825_s9 = inlined_call_operand.hbm [shape: f32[2,1,128], index: 9, kind: output, shape index: {}]  }
   0x1   :  { %16872 = sst [smem:[#allocation58_spill]] %s16817_s1 }
   0x2   :  { %16873 = sst [smem:[#allocation59_spill]] %s16818_s2 }
   0x3   :  { %14 = vsyncpa [#allocation5], 0 }
   0x4   :  { %15 = vsyncpa [#allocation8], 0 }
   0x5   :  { %16 = vsyncpa [#allocation11], 0 }
   0x6   :  { %17 = vsyncpa [#allocation14], 0 }
   0x7   :  { %18 = vsyncpa [#allocation17], 0 }
   0x8   :  { %19 = vsyncpa [#allocation6], 0 }
   0x9   :  { %21 = vsyncpa [#allocation6 + $0x1], 0  ;;  %s14696_s30 = smov 0   ;;  %s14698_s10 = smov 0  }
   0xa   :  { %s14700_s11 = smov 0   ;;  %s14702_s12 = smov 0  }
   0xb LB: > { %s14717_s13 = sadd.s32 4294967295, %s14618_s12   ;;  %s10602_s14 = sadd.s32 4294967294, %s14618_s12   ;;  %s14618_s12 = sphi %s14702_s12, %s17038_s12   ;;  %s14614_s11 = sphi %s14700_s11, %s17037_s11   ;;  %s14610_s10 = sphi %s14698_s10, %s17036_s10   ;;  %s14606_s30 = sphi %s14696_s30, %s17035_s30  }
   0xc   : > { %s14721_s15 = sadd.s32 1, %s14618_s12   ;;  %s228_s16 = sadd.s32 1, %s14614_s11 }
   0xd   : > { %s225_s17 = ssub.s32 %s14618_s12, %s14721_s15  ;;  %p238_p0 = scmp.ne.s32.totalorder %s14614_s11, %s14610_s10 }
   0xe   : > { %p226_p1 = scmp.eq.s32.totalorder %s225_s17, 0  ;;  %p239_p2 = scmp.eq.s32.totalorder %s14717_s13, 1 }
   0xf   : > { %p244_p3 = scmp.ne.s32.totalorder %s14610_s10, %s14606_s30  ;;  %p245_p4 = scmp.eq.s32.totalorder %s10602_s14, 1 }
  0x10   : > { %s14732_s18 = scalar_select %p226_p1, %s14614_s11, %s228_s16  }
  0x11   : > { %p14734_p5 = por %p239_p2, %p238_p0  ;;  %p14738_p6 = por %p245_p4, %p244_p3 }
  0x12   : > { %p10603_p7 = scmp.ge.s32.totalorder %s14618_s12, 1  ;;  %p252_p8 = scmp.lt.s32.totalorder %s14618_s12, 3 }
  0x13   : > { %s16874_s19 = scalar_select %p14734_p5, 1, 0 }
  0x14   : > { %s16875_s20 = scalar_select %p14738_p6, 1, 0 }
  0x15   : > { %p16826_p9 = scmp.eq.s32.totalorder %s14717_s13, 0  ;;  %p14745_p10 = pnand %p10603_p7, %p252_p8 }
  0x16   : > { %s14628_s22 = smov [#allocation7]   ;;  %s14629_s24 = smov [#allocation10]  }
  0x17   : > { %s16876_s21 = scalar_select %p14745_p10, 1, 0 }
  0x18   : > { %s278_s23 = sshll.u32 %s14628_s22, 4  ;;  %p13009_p11 = pneg %p14745_p10  ;;  %s279_s23 = int_to_ptr.vmem [resolvable:$true] %s278_s23 }
  0x19   : > { %s302_s25 = sshll.u32 %s14629_s24, 4  ;;  %s14630_s27 = smov [#allocation13]   ;;  %s303_s25 = int_to_ptr.vmem [resolvable:$true] %s302_s25 }
  0x1a   : > { %p14753_p12 = pnand %p16826_p9, %p13009_p11  ;;  %s326_s28 = sshll.u32 %s14630_s27, 4  ;;  %s14757_s28 = int_to_ptr.vmem [resolvable:$true] %s326_s28 }
  0x1b   : > { %s14333_s14 = scalar_lea.vmem %s279_s23, 16  ;;  %s14340_s16 = scalar_lea.vmem %s279_s23, 32 }
  0x1c   : > { %p14761_p13 = pneg %p14753_p12  ;;  %p14334_p0 = scmp.ne.s32.totalorder %s279_s23, %s14333_s14 }
  0x1d   : > { %p14341_p3 = scmp.lt.s32.totalorder %s279_s23, %s279_s23  ;;  %p14342_p4 = scmp.lt.s32.totalorder %s14340_s16, %s14333_s14 }
  0x1e   : > { %p14336_p1 = pnand %p14334_p0, %p14761_p13 }
  0x1f   : > { %p14343_p7 = por %p14342_p4, %p14341_p3 }
  0x20   : > { %p14337_p2 = pneg %p14336_p1 }
  0x22   : > { %p14344_p8 = pnand %p14343_p7, %p14337_p2 }
  0x24   : > { %14347 = shalt.err (!%p14344_p8)
}
  0x25   : > { %s16879_s2 = sld [smem:[#allocation59_spill]]  ;;  %s14359_s24 = scalar_lea.vmem %s303_s25, 16 }
  0x26   : > { %p14360_p11 = scmp.ne.s32.totalorder %s303_s25, %s14359_s24  ;;  %s14366_s27 = scalar_lea.vmem %s303_s25, 32 }
  0x27   : > { %p14367_p0 = scmp.lt.s32.totalorder %s303_s25, %s303_s25  ;;  %p14368_p1 = scmp.lt.s32.totalorder %s14366_s27, %s14359_s24 }
  0x28   : > { %p14362_p9 = pnand %p14360_p11, %p14761_p13 }
  0x29   : > { %p14369_p5 = por %p14368_p1, %p14367_p0 }
  0x2a   : > { %p14363_p6 = pneg %p14362_p9 }
  0x2b   : > { %13015 = dma.hbm_to_vmem [thread:$0]  (!%p14753_p12), %s16879_s2, 16, %s279_s23, [#allocation8]  }
  0x2c   : > { %p14370_p10 = pnand %p14369_p5, %p14363_p6 }
  0x2e   : > { %14373 = shalt.err (!%p14370_p10)
}
  0x2f   : > { %13021 = dma.hbm_to_vmem [thread:$0]  (!%p14753_p12), %s16820_s4, 16, %s303_s25, [#allocation11]  }
  0x30   : > { %s14385_s23 = scalar_lea.vmem %s14757_s28, 64  ;;  %p14393_p4 = scmp.lt.s32.totalorder %s14757_s28, %s14757_s28 }
  0x31   : > { %p14386_p2 = scmp.ne.s32.totalorder %s14757_s28, %s14385_s23  ;;  %p14394_p7 = scmp.lt.s32.totalorder %s14385_s23, %s14385_s23 }
  0x33   : > { %p14388_p9 = pnand %p14386_p2, %p14761_p13  ;;  %p14395_p5 = por %p14394_p7, %p14393_p4 }
  0x35   : > { %p14389_p3 = pneg %p14388_p9 }
  0x37   : > { %p14396_p6 = pnand %p14395_p5, %p14389_p3 }
  0x39   : > { %14399 = shalt.err (!%p14396_p6)
}
  0x3a   : > { %13027 = dma.hbm_to_vmem [thread:$0]  (!%p14753_p12), %s16822_s6, 64, %s14757_s28, [#allocation14]  }
  0x3b   : > { %s14631_s25 = smov [#allocation4]  }
  0x3c   : > { %s264_s24 = sshll.u32 %s14631_s25, 4  ;;  %s265_s24 = int_to_ptr.vmem [resolvable:$true] %s264_s24 }
  0x3d   : > { %s14411_s27 = scalar_lea.vmem %s265_s24, 400  ;;  %s14418_s14 = scalar_lea.vmem %s265_s24, 416 }
  0x3e   : > { %p14412_p10 = scmp.ne.s32.totalorder %s265_s24, %s14411_s27  ;;  %p14419_p0 = scmp.lt.s32.totalorder %s265_s24, %s265_s24 }
  0x3f   : > { %p14420_p1 = scmp.lt.s32.totalorder %s14418_s14, %s14411_s27 }
  0x40   : > { %p14414_p8 = pnand %p14412_p10, %p14761_p13 }
  0x41   : > { %p14421_p2 = por %p14420_p1, %p14419_p0 }
  0x42   : > { %p14415_p11 = pneg %p14414_p8 }
  0x44   : > { %p14422_p9 = pnand %p14421_p2, %p14415_p11 }
  0x46   : > { %14425 = shalt.err (!%p14422_p9)
}
  0x47   : > { %s14632_s16 = smov 16   ;;  %s14633_s23 = smov 1  }
  0x48   : > { %s16880_s1 = sld [smem:[#allocation58_spill]]  ;;  %s14634_s22 = smov [#allocation9]  }
  0x49   : > { %s288_s25 = sshll.u32 %s14634_s22, 4  ;;  %s289_s25 = int_to_ptr.vmem [resolvable:$true] %s288_s25 }
  0x4a   : > { %s14437_s2 = scalar_lea.vmem %s289_s25, 25600  ;;  %p14445_p5 = scmp.lt.s32.totalorder %s289_s25, %s289_s25 }
  0x4b   : > { %p14438_p3 = scmp.ne.s32.totalorder %s289_s25, %s14437_s2  ;;  %p14446_p6 = scmp.lt.s32.totalorder %s14437_s2, %s14437_s2 }
  0x4d   : > { %p14440_p4 = pnand %p14438_p3, %p14761_p13  ;;  %p14447_p10 = por %p14446_p6, %p14445_p5 }
  0x4e   : > { %13012 = dma.hbm_to_vmem [thread:$0]  (!%p14753_p12), %s16880_s1, 400, %s265_s24, [#allocation5], %s14632_s16, %s14632_s16, %s14633_s23  }
  0x4f   : > { %p14441_p7 = pneg %p14440_p4 }
  0x51   : > { %p14448_p8 = pnand %p14447_p10, %p14441_p7 }
  0x53   : > { %14451 = shalt.err (!%p14448_p8)
}
  0x54   : > { %s16829_s27 = smov 64   ;;  %s16830_s14 = smov 4  }
  0x55   : > { %13018 = dma.hbm_to_vmem [thread:$0]  (!%p14753_p12), %s16819_s3, 25600, %s289_s25, [#allocation8], %s16829_s27, %s16829_s27, %s16830_s14  }
  0x56   : > { %s14637_s28 = smov [#allocation12]  }
  0x57   : > { %s312_s17 = sshll.u32 %s14637_s28, 4  ;;  %s313_s17 = int_to_ptr.vmem [resolvable:$true] %s312_s17 }
  0x58   : > { %s14463_s22 = scalar_lea.vmem %s313_s17, 65536  ;;  %p14471_p2 = scmp.lt.s32.totalorder %s313_s17, %s313_s17 }
  0x59   : > { %p14464_p11 = scmp.ne.s32.totalorder %s313_s17, %s14463_s22  ;;  %p14472_p9 = scmp.lt.s32.totalorder %s14463_s22, %s14463_s22 }
  0x5b   : > { %p14466_p0 = pnand %p14464_p11, %p14761_p13  ;;  %p14473_p3 = por %p14472_p9, %p14471_p2 }
  0x5d   : > { %p14467_p1 = pneg %p14466_p0 }
  0x5f   : > { %p14474_p4 = pnand %p14473_p3, %p14467_p1 }
  0x61   : > { %14477 = shalt.err (!%p14474_p4)
}
  0x62   : > { %s14638_s2 = smov 256   ;;  %s14639_s25 = smov [#allocation15]  }
  0x63   : > { %13024 = dma.hbm_to_vmem [thread:$0]  (!%p14753_p12), %s16821_s5, 65536, %s313_s17, [#allocation11], %s14638_s2, %s14638_s2, %s14632_s16  }
  0x64   : > { %s336_s23 = sshll.u32 %s14639_s25, 4  ;;  %s14640_s28 = smov [#allocation16]   ;;  %s337_s23 = int_to_ptr.vmem [resolvable:$true] %s336_s23 }
  0x65   : > { %s350_s27 = sshll.u32 %s14640_s28, 4  ;;  %s14489_s14 = scalar_lea.vmem %s337_s23, 4096  ;;  %s351_s27 = int_to_ptr.vmem [resolvable:$true] %s350_s27 }
  0x66   : > { %p14490_p7 = scmp.ne.s32.totalorder %s337_s23, %s14489_s14  ;;  %p14497_p10 = scmp.lt.s32.totalorder %s337_s23, %s337_s23 }
  0x67   : > { %p14498_p8 = scmp.lt.s32.totalorder %s14489_s14, %s14489_s14 }
  0x68   : > { %p14492_p5 = pnand %p14490_p7, %p14761_p13 }
  0x69   : > { %p14499_p11 = por %p14498_p8, %p14497_p10 }
  0x6a   : > { %p14493_p6 = pneg %p14492_p5 }
  0x6c   : > { %p14500_p0 = pnand %p14499_p11, %p14493_p6 }
  0x6e   : > { %14503 = shalt.err (!%p14500_p0)
}
  0x6f   : > { %s16881_s1 = smov 4   ;;  %s16882_s22 = smov 64  }
  0x70   : > { %13030 = dma.hbm_to_vmem [thread:$0]  (!%p14753_p12), %s16823_s7, 4096, %s337_s23, [#allocation14], %s16882_s22, %s16882_s22, %s16881_s1  }
  0x71   : > { %s14515_s2 = scalar_lea.vmem %s351_s27, 16  ;;  %s14522_s14 = scalar_lea.vmem %s351_s27, 32 }
  0x72   : > { %p14516_p1 = scmp.ne.s32.totalorder %s351_s27, %s14515_s2  ;;  %p14523_p3 = scmp.lt.s32.totalorder %s351_s27, %s351_s27 }
  0x73   : > { %p14524_p4 = scmp.lt.s32.totalorder %s14522_s14, %s14515_s2 }
  0x74   : > { %p14518_p2 = pnand %p14516_p1, %p14761_p13 }
  0x75   : > { %p14525_p7 = por %p14524_p4, %p14523_p3 }
  0x76   : > { %p14519_p9 = pneg %p14518_p2 }
  0x78   : > { %p14526_p5 = pnand %p14525_p7, %p14519_p9 }
  0x7a   : > { %14529 = shalt.err (!%p14526_p5)
}
  0x7b   : > { %13033 = dma.hbm_to_vmem [thread:$0]  (!%p14753_p12), %s16824_s8, 16, %s351_s27, [#allocation17]  }
  0x7c   : > { %p16883_p6 = scmp.ne.s32.totalorder %s16876_s21, 0 }
  0x7e   : > { %371 = sbr.rel (%p16883_p6) target bundleno = 2383 (0x94f), region = 56 }
  0x83   : > { %p16884_p10 = scmp.eq.s32.totalorder %s14717_s13, 0 }
  0x85   : > { %14581 = dma.done.wait (%p16884_p10), [#allocation5], 400   ;;  %p16885_p13 = pmov %p16884_p10 }
  0x86   : > { %p16886_p8 = pmov %p16884_p10 }
  0x87   : > { %14583 = vsyncadd (%p16885_p13), [#allocation5], 4294966896 }
  0x88   : > { %14585 = dma.done.wait (%p16886_p8), [#allocation8], 25616   ;;  %p16887_p11 = pmov %p16886_p8 }
  0x89   : > { %p16888_p0 = pmov %p16886_p8 }
  0x8a   : > { %14587 = vsyncadd (%p16887_p11), [#allocation8], 4294941680 }
  0x8b   : > { %14589 = dma.done.wait (%p16888_p0), [#allocation11], 65552   ;;  %p16889_p12 = pmov %p16888_p0 }
  0x8c   : > { %p16890_p1 = pmov %p16888_p0 }
  0x8d   : > { %14591 = vsyncadd (%p16889_p12), [#allocation11], 4294901744 }
  0x8e   : > { %14593 = dma.done.wait (%p16890_p1), [#allocation14], 4160   ;;  %p16891_p2 = pmov %p16888_p0 }
  0x8f   : > { %p16892_p9 = pmov %p16888_p0 }
  0x90   : > { %14595 = vsyncadd (%p16891_p2), [#allocation14], 4294963136 }
  0x91   : > { %14597 = dma.done.wait (%p16892_p9), [#allocation17], 16   ;;  %p16893_p3 = pmov %p16888_p0 }
  0x92   : > { %s432_s21 = sand.u32 1, %s14610_s10   ;;  %p434_p4 = scmp.lt.s32.totalorder %s14717_s13, 1  ;;  %v14865_v0 = vld [vmem:[#allocation7] ss:$0 sm:$0xff]  ;;  %v14867_v1 = vld [vmem:[#allocation10] ss:$0 sm:$0xff] }
  0x93   : > { %14599 = vsyncadd (%p16893_p3), [#allocation17], 4294967280  ;;  %16894 = vst [vmem:[#allocation25_spill] sm:$0xff] %v14865_v0  ;;  %s14871_s1 = scalar_lea.vmem [#allocation18], %s432_s21  ;;  %s14873_s22 = smov 0  }
  0x94   : > { %s435_s26 = scalar_select %p434_p4, %s14717_s13, 1  ;;  %16895 = vst [vmem:[#allocation26_spill] sm:$0xff] %v14867_v1 }
  0x96   : > { %s12974_s29 = smul.u32 896, %s435_s26 }
  0x98   : > { %s14863_s28 = scalar_lea.vmem %s16816_s0, %s12974_s29 }
  0x99 LB: >> { %v14641_v2 = vmov 0   ;;  %s11468_s16 = sshll.u32 %s14622_s22, 6  ;;  %v14906_v29 = vld [vmem:[#allocation4 + $0x1] ss:$0 sm:$0xff]  ;;  %v14912_v36 = vld [vmem:[#allocation4 + $0x2] ss:$0 sm:$0xff]  ;;  %s14622_s22 = sphi %s14873_s22, %s447_s22  }
  0x9a   : >> { %13121 = vset.pattern.permute.xlu1 %v14641_v2  ;;  %13120 = vset.pattern.permute.xlu0 %v14641_v2  ;;  %s14880_s17 = scalar_lea.vmem %s14863_s28, %s11468_s16  ;;  %vm504_vm0 = vcmask 1046528   ;;  %v14914_v38 = vld [vmem:[#allocation4] ss:$0 sm:$0xff]  ;;  %v14917_v43 = vld [vmem:[#allocation4 + $0x3] ss:$0 sm:$0xff]  ;;  %vm534_vm1 = vcmask 1045504  }
  0x9b   : >> { %v453_v3 = vld [vmem:[%s14880_s17 + $0x10] sm:$0xff]  ;;  %v451_v4 = vld [vmem:[%s14880_s17] sm:$0xff]  ;;  %v454_v5 = vld [vmem:[%s14880_s17 + $0x18] sm:$0xf]  ;;  %vm564_vm2 = vcmask 1044480   ;;  %vm594_vm3 = vcmask 1043456  }
  0x9c   : >> { %468 = vperm.xlu1 %13121, %v453_v3   ;;  %458 = vperm.xlu0 %13120, %v451_v4   ;;  %v452_v6 = vld [vmem:[%s14880_s17 + $0x8] sm:$0xff]  ;;  %v10632_v8 = vld [vmem:[%s14880_s17 + $0x20] sm:$0xff]  ;;  %v10635_v9 = vld [vmem:[%s14880_s17 + $0x38] sm:$0xf]  ;;  %s10681_s2 = sshll.u32 %s14622_s22, 4  ;;  %s447_s22 = sadd.s32 1, %s14622_s22  }
  0x9d   : >> { %v10633_v7 = vld [vmem:[%s14880_s17 + $0x28] sm:$0xff]  ;;  %v10634_v10 = vld [vmem:[%s14880_s17 + $0x30] sm:$0xff]  ;;  %v10643_v12 = vld [vmem:[%s14880_s17 + $0x40] sm:$0xff]  ;;  %s15937_s14 = scalar_lea.vmem [#allocation2], %s10681_s2  ;;  %p444_p7 = scmp.ge.s32.totalorder %s447_s22, 12  }
  0x9e   : >> { %v10644_v11 = vld [vmem:[%s14880_s17 + $0x48] sm:$0xff]  ;;  %v10646_v13 = vld [vmem:[%s14880_s17 + $0x58] sm:$0xf]  ;;  %v10645_v14 = vld [vmem:[%s14880_s17 + $0x50] sm:$0xff]  ;;  %s16012_s24 = smov (%p444_p7), 0  }
  0x9f   : >> { %v10655_v15 = vld [vmem:[%s14880_s17 + $0x68] sm:$0xff]  ;;  %v10654_v16 = vld [vmem:[%s14880_s17 + $0x60] sm:$0xff]  ;;  %v10657_v17 = vld [vmem:[%s14880_s17 + $0x78] sm:$0xf] }
  0xa0   : >> { %487 = vperm.xlu1 %13121, %v454_v5   ;;  %463 = vperm.xlu0 %13120, %v452_v6   ;;  %v10656_v18 = vld [vmem:[%s14880_s17 + $0x70] sm:$0xff]  ;;  %v10666_v19 = vld [vmem:[%s14880_s17 + $0x88] sm:$0xff]  ;;  %v10665_v20 = vld [vmem:[%s14880_s17 + $0x80] sm:$0xff] }
  0xa1   : >> { %v10668_v21 = vld [vmem:[%s14880_s17 + $0x98] sm:$0xf]  ;;  %v10667_v22 = vld [vmem:[%s14880_s17 + $0x90] sm:$0xff]  ;;  %v10678_v23 = vld [vmem:[%s14880_s17 + $0xa8] sm:$0xff] }
  0xa2   : >> { %v10677_v24 = vld [vmem:[%s14880_s17 + $0xa0] sm:$0xff]  ;;  %v10680_v25 = vld [vmem:[%s14880_s17 + $0xb8] sm:$0xf]  ;;  %v10679_v26 = vld [vmem:[%s14880_s17 + $0xb0] sm:$0xff] }
  0xa3   : >> { %v14927_v52 = vld [vmem:[#allocation4 + $0x4] ss:$0 sm:$0xff] }
  0xa4   : >> { %624 = vperm.xlu1 %13121, %v10633_v7   ;;  %619 = vperm.xlu0 %13120, %v10632_v8  }
  0xa8   : >> { %648 = vperm.xlu1 %13121, %v10635_v9   ;;  %629 = vperm.xlu0 %13120, %v10634_v10  }
  0xac   : >> { %781 = vperm.xlu1 %13121, %v10644_v11   ;;  %776 = vperm.xlu0 %13120, %v10643_v12  }
  0xb0   : >> { %805 = vperm.xlu1 %13121, %v10646_v13   ;;  %786 = vperm.xlu0 %13120, %v10645_v14  }
  0xb4   : >> { %938 = vperm.xlu1 %13121, %v10655_v15   ;;  %933 = vperm.xlu0 %13120, %v10654_v16  }
  0xb8   : >> { %962 = vperm.xlu1 %13121, %v10657_v17   ;;  %943 = vperm.xlu0 %13120, %v10656_v18   ;;  %v14941_v17 = vld [vmem:[#allocation4 + $0x6] ss:$0 sm:$0xff] }
  0xbc   : >> { %1095 = vperm.xlu1 %13121, %v10666_v19   ;;  %1090 = vperm.xlu0 %13120, %v10665_v20   ;;  %v14943_v20 = vld [vmem:[#allocation4 + $0x7] ss:$0 sm:$0xff] }
  0xc0   : >> { %1119 = vperm.xlu1 %13121, %v10668_v21   ;;  %1100 = vperm.xlu0 %13120, %v10667_v22  }
  0xc4   : >> { %1622 = vperm.xlu1 %13121, %v10678_v23   ;;  %1617 = vperm.xlu0 %13120, %v10677_v24  }
  0xc8   : >> { %1638 = vperm.xlu1 %13121, %v10680_v25   ;;  %1627 = vperm.xlu0 %13120, %v10679_v26   ;;  %v14947_v25 = vld [vmem:[#allocation4 + $0x5] ss:$0 sm:$0xff] }
 0x117   : >> { %v469_v27 = vpop.permute.xlu1 %468  ;;  %v459_v28 = vpop.permute.xlu0 %458 }
 0x118   : >> { %v498_v30 = vmul.f32 %v14906_v29, %v469_v27  ;;  %v496_v31 = vmul.f32 %v14906_v29, %v459_v28  ;;  %v528_v45 = vmul.f32 %v14912_v36, %v469_v27  ;;  %v526_v46 = vmul.f32 %v14912_v36, %v459_v28 }
 0x119   : >> { %v477_v49 = vmul.f32 %v14914_v38, %v459_v28  ;;  %v479_v53 = vmul.f32 %v14914_v38, %v469_v27  ;;  %v558_v54 = vmul.f32 %v14917_v43, %v469_v27  ;;  %v556_v63 = vmul.f32 %v14917_v43, %v459_v28 }
 0x11a   : >> { %v508_v39 = vrot.slane %v498_v30, 1  ;;  %v505_v40 = vrot.slane %v496_v31, 1  ;;  %v538_v61 = vrot.slane %v528_v45, 2  ;;  %v535_v62 = vrot.slane %v526_v46, 2  ;;  %v14950_v30 = vld [vmem:[#allocation4 + $0x8] ss:$0 sm:$0xff] }
 0x11b   : >> { %v488_v32 = vpop.permute.xlu1 %487  ;;  %v464_v33 = vpop.permute.xlu0 %463  ;;  %v588_v3 = vmul.f32 %v14927_v52, %v469_v27  ;;  %v568_v13 = vrot.slane %v558_v54, 3  ;;  %v565_v14 = vrot.slane %v556_v63, 3  ;;  %v586_v15 = vmul.f32 %v14927_v52, %v459_v28 }
 0x11c   : >> { %v499_v34 = vmul.f32 %v14906_v29, %v488_v32  ;;  %v497_v35 = vmul.f32 %v14906_v29, %v464_v33  ;;  %v527_v42 = vmul.f32 %v14912_v36, %v464_v33  ;;  %v529_v44 = vmul.f32 %v14912_v36, %v488_v32 }
 0x11d   : >> { %v478_v51 = vmul.f32 %v14914_v38, %v464_v33  ;;  %v557_v56 = vmul.f32 %v14917_v43, %v464_v33  ;;  %v559_v58 = vmul.f32 %v14917_v43, %v488_v32  ;;  %v589_v4 = vmul.f32 %v14927_v52, %v488_v32 }
 0x11e   : >> { %v510_v37 = vrot.slane %v499_v34, 1  ;;  %v506_v41 = vrot.slane %v497_v35, 1  ;;  %v536_v55 = vrot.slane %v527_v42, 2  ;;  %v540_v57 = vrot.slane %v529_v44, 2  ;;  %v14955_v35 = vld [vmem:[#allocation4 + $0x9] ss:$0 sm:$0xff] }
 0x11f   : >> { %v566_v7 = vrot.slane %v557_v56, 3  ;;  %v587_v8 = vmul.f32 %v14927_v52, %v464_v33  ;;  %v570_v10 = vrot.slane %v559_v58, 3  ;;  %v625_v18 = vpop.permute.xlu1 %624  ;;  %v600_v19 = vrot.slane %v589_v4, 4  ;;  %v620_v32 = vpop.permute.xlu0 %619 }
 0x120   : >> { %v507_v47 = vsel %vm504_vm0, %v505_v40, %v506_v41  ;;  %v509_v48 = vsel %vm504_vm0, %v506_v41, %v508_v39  ;;  %v511_v50 = vsel %vm504_vm0, %v508_v39, %v510_v37  ;;  %v537_v5 = vsel %vm534_vm1, %v535_v62, %v536_v55 }
 0x121   : >> { %v515_v59 = vadd.f32 %v507_v47, %v477_v49  ;;  %v516_v60 = vadd.f32 %v509_v48, %v478_v51  ;;  %v517_v2 = vadd.f32 %v511_v50, %v479_v53  ;;  %v539_v6 = vsel %vm534_vm1, %v536_v55, %v538_v61 }
 0x122   : >> { %v541_v9 = vsel %vm534_vm1, %v538_v61, %v540_v57  ;;  %v598_v21 = vrot.slane %v588_v3, 4  ;;  %v567_v22 = vsel %vm564_vm2, %v565_v14, %v566_v7  ;;  %v569_v23 = vsel %vm564_vm2, %v566_v7, %v568_v13 }
 0x123   : >> { %v545_v11 = vadd.f32 %v537_v5, %v515_v59  ;;  %v546_v12 = vadd.f32 %v539_v6, %v516_v60  ;;  %v547_v16 = vadd.f32 %v541_v9, %v517_v2  ;;  %v596_v24 = vrot.slane %v587_v8, 4  ;;  %v14990_v63 = vpop.permute.xlu0 %629 }
 0x124   : >> { %v571_v26 = vsel %vm564_vm2, %v568_v13, %v570_v10  ;;  %v14953_v31 = vmul.f32 %v14941_v17, %v625_v18  ;;  %v595_v33 = vrot.slane %v586_v15, 4  ;;  %v14958_v37 = vmul.f32 %v14943_v20, %v625_v18 }
 0x125   : >> { %v575_v27 = vadd.f32 %v567_v22, %v545_v11  ;;  %v576_v28 = vadd.f32 %v569_v23, %v546_v12  ;;  %v577_v34 = vadd.f32 %v571_v26, %v547_v16  ;;  %v601_v39 = vsel %vm594_vm3, %v598_v21, %v600_v19  ;;  %v649_v19 = vpop.permute.xlu1 %648 }
 0x126   : >> { %v639_v40 = vmul.f32 %v14947_v25, %v625_v18  ;;  %v597_v41 = vsel %vm594_vm3, %v595_v33, %v596_v24  ;;  %v599_v42 = vsel %vm594_vm3, %v596_v24, %v598_v21  ;;  %v14965_v44 = vmul.f32 %v14950_v30, %v625_v18 }
 0x127   : >> { %v657_v45 = vmul.f32 %v14941_v17, %v620_v32  ;;  %v605_v46 = vadd.f32 %v597_v41, %v575_v27  ;;  %v606_v47 = vadd.f32 %v599_v42, %v576_v28  ;;  %v666_v48 = vrot.slane %v14953_v31, 1 }
 0x128   : >> { %v14970_v49 = vmul.f32 %v14955_v35, %v625_v18  ;;  %v607_v50 = vadd.f32 %v601_v39, %v577_v34  ;;  %v695_v51 = vrot.slane %v14958_v37, 2  ;;  %v14974_v53 = vmul.f32 %v14906_v29, %v625_v18 }
 0x129   : >> { %v686_v54 = vmul.f32 %v14943_v20, %v620_v32  ;;  %v14978_v55 = vmul.f32 %v14914_v38, %v625_v18  ;;  %v14981_v56 = vmul.f32 %v14912_v36, %v625_v18  ;;  %v638_v57 = vmul.f32 %v14947_v25, %v620_v32 }
 0x12a   : >> { %v1254_v58 = vmul.f32 %v14906_v29, %v620_v32  ;;  %v724_v59 = vrot.slane %v14965_v44, 3  ;;  %v14987_v60 = vmul.f32 %v14917_v43, %v625_v18  ;;  %v665_v61 = vrot.slane %v657_v45, 1 }
 0x12b   : >> { %v715_v62 = vmul.f32 %v14950_v30, %v620_v32  ;;  %v642_v2 = vadd.f32 %v639_v40, %v606_v47  ;;  %v753_v3 = vrot.slane %v14970_v49, 4  ;;  %v14994_v4 = vmul.f32 %v14927_v52, %v625_v18 }
 0x12c   : >> { %v641_v5 = vadd.f32 %v638_v57, %v605_v46  ;;  %v1263_v6 = vrot.slane %v14974_v53, 1  ;;  %v694_v7 = vrot.slane %v686_v54, 2  ;;  %v14998_v8 = vmul.f32 %v14955_v35, %v620_v32 }
 0x12d   : >> { %v1275_v9 = vmul.f32 %v14912_v36, %v620_v32  ;;  %v1284_v10 = vrot.slane %v14981_v56, 2  ;;  %v1262_v11 = vrot.slane %v1254_v58, 1  ;;  %v1296_v12 = vmul.f32 %v14917_v43, %v620_v32 }
 0x12e   : >> { %v659_v13 = vmul.f32 %v14941_v17, %v14990_v63  ;;  %v1305_v14 = vrot.slane %v14987_v60, 3  ;;  %v667_v15 = vsel %vm504_vm0, %v665_v61, %v666_v48  ;;  %v723_v16 = vrot.slane %v715_v62, 3 }
 0x12f   : >> { %v15008_v18 = vmul.f32 %v14927_v52, %v620_v32  ;;  %v1326_v21 = vrot.slane %v14994_v4, 4  ;;  %v675_v22 = vadd.f32 %v667_v15, %v641_v5  ;;  %v688_v24 = vmul.f32 %v14943_v20, %v14990_v63 }
 0x130   : >> { %v668_v23 = vrot.slane %v659_v13, 1  ;;  %v696_v26 = vsel %vm534_vm1, %v694_v7, %v695_v51  ;;  %v752_v27 = vrot.slane %v14998_v8, 4  ;;  %v1248_v28 = vmul.f32 %v14914_v38, %v620_v32 }
 0x131   : >> { %v1283_v31 = vrot.slane %v1275_v9, 2  ;;  %v1264_v33 = vsel %vm504_vm0, %v1262_v11, %v1263_v6  ;;  %v1304_v34 = vrot.slane %v1296_v12, 3  ;;  %v660_v37 = vmul.f32 %v14941_v17, %v649_v19 }
 0x132   : >> { %v1256_v39 = vmul.f32 %v14906_v29, %v14990_v63  ;;  %v725_v40 = vsel %vm564_vm2, %v723_v16, %v724_v59  ;;  %v1325_v41 = vrot.slane %v15008_v18, 4  ;;  %v689_v42 = vmul.f32 %v14943_v20, %v649_v19 }
 0x133   : >> { %v1257_v45 = vmul.f32 %v14906_v29, %v649_v19  ;;  %v704_v32 = vadd.f32 %v696_v26, %v675_v22  ;;  %v669_v46 = vsel %vm504_vm0, %v666_v48, %v668_v23  ;;  %v697_v47 = vrot.slane %v688_v24, 2 }
 0x134   : >> { %v717_v53 = vmul.f32 %v14950_v30, %v14990_v63  ;;  %v1272_v54 = vadd.f32 %v1264_v33, %v1248_v28  ;;  %v1285_v57 = vsel %vm534_vm1, %v1283_v31, %v1284_v10  ;;  %v640_v58 = vmul.f32 %v14947_v25, %v14990_v63 }
 0x135   : >> { %v676_v61 = vadd.f32 %v669_v46, %v642_v2  ;;  %v15037_v29 = vsel %vm564_vm2, %v1304_v34, %v1305_v14  ;;  %v670_v62 = vrot.slane %v660_v37, 1  ;;  %v718_v48 = vmul.f32 %v14950_v30, %v649_v19 }
 0x136   : >> { %v1265_v5 = vrot.slane %v1256_v39, 1  ;;  %v15041_v7 = vmul.f32 %v14955_v35, %v649_v19  ;;  %v1267_v9 = vrot.slane %v1257_v45, 1  ;;  %v1278_v11 = vmul.f32 %v14912_v36, %v649_v19 }
 0x137   : >> { %v643_v12 = vadd.f32 %v640_v58, %v607_v50  ;;  %v698_v13 = vsel %vm534_vm1, %v695_v51, %v697_v47  ;;  %v726_v15 = vrot.slane %v717_v53, 3  ;;  %v15047_v2 = vmul.f32 %v14955_v35, %v14990_v63  ;;  %v15068_v53 = vld [vmem:[#allocation4 + $0xb] ss:$0 sm:$0xff] }
 0x138   : >> { %v1277_v16 = vmul.f32 %v14912_v36, %v14990_v63  ;;  %v1293_v22 = vadd.f32 %v1285_v57, %v1272_v54  ;;  %v699_v24 = vrot.slane %v689_v42, 2  ;;  %v1299_v26 = vmul.f32 %v14917_v43, %v649_v19  ;;  %v15070_v54 = vld [vmem:[#allocation4 + $0xc] ss:$0 sm:$0xff]  ;;  %v15072_v57 = vpop.permute.xlu1 %781 }
 0x139   : >> { %v705_v28 = vadd.f32 %v698_v13, %v676_v61  ;;  %v15053_v31 = vmul.f32 %v14927_v52, %v649_v19  ;;  %v671_v50 = vsel %vm504_vm0, %v668_v23, %v670_v62  ;;  %v1266_v51 = vsel %vm504_vm0, %v1263_v6, %v1265_v5  ;;  %v15088_v13 = vld [vmem:[#allocation4 + $0xd] ss:$0 sm:$0xff] }
 0x13a   : >> { %v1298_v33 = vmul.f32 %v14917_v43, %v14990_v63  ;;  %v728_v34 = vrot.slane %v718_v48, 3  ;;  %v757_v37 = vrot.slane %v15041_v7, 4  ;;  %v1288_v39 = vrot.slane %v1278_v11, 2  ;;  %v15080_v48 = vld [vmem:[#allocation4 + $0xa] ss:$0 sm:$0xff]  ;;  %v15083_v11 = vpop.permute.xlu0 %776 }
 0x13b   : >> { %v677_v36 = vadd.f32 %v671_v50, %v643_v12  ;;  %v727_v42 = vsel %vm564_vm2, %v724_v59, %v726_v15  ;;  %v755_v45 = vrot.slane %v15047_v2, 4  ;;  %v1268_v19 = vsel %vm504_vm0, %v1265_v5, %v1267_v9  ;;  %16896 = vst [vmem:[#allocation27_spill] sm:$0xff] %v15080_v48 }
 0x13c   : >> { %v1286_v46 = vrot.slane %v1277_v16, 2  ;;  %v1309_v23 = vrot.slane %v1299_v26, 3  ;;  %v1250_v6 = vmul.f32 %v14914_v38, %v14990_v63  ;;  %v1273_v43 = vadd.f32 %v1266_v51, %v14978_v55 }
 0x13d   : >> { %v734_v44 = vadd.f32 %v727_v42, %v705_v28  ;;  %v1330_v59 = vrot.slane %v15053_v31, 4  ;;  %v700_v58 = vsel %vm534_vm1, %v697_v47, %v699_v24  ;;  %v1307_v61 = vrot.slane %v1298_v33, 3 }
 0x13e   : >> { %v15078_v62 = vmul.f32 %v14927_v52, %v14990_v63  ;;  %v706_v38 = vadd.f32 %v700_v58, %v677_v36  ;;  %v729_v55 = vsel %vm564_vm2, %v726_v15, %v728_v34  ;;  %v1274_v5 = vadd.f32 %v1268_v19, %v1250_v6 }
 0x13f   : >> { %v733_v9 = vadd.f32 %v725_v40, %v704_v32  ;;  %v1287_v12 = vsel %vm534_vm1, %v1284_v10, %v1286_v46  ;;  %v756_v52 = vsel %vm594_vm3, %v753_v3, %v755_v45  ;;  %v15097_v63 = vmul.f32 %v15068_v53, %v15072_v57  ;;  %v15104_v10 = vld [vmem:[#allocation4 + $0xe] ss:$0 sm:$0xff] }
 0x140   : >> { %v15101_v40 = vmul.f32 %v15070_v54, %v15072_v57  ;;  %v1289_v56 = vsel %vm534_vm1, %v1286_v46, %v1288_v39  ;;  %v1294_v32 = vadd.f32 %v1287_v12, %v1273_v43  ;;  %v763_v47 = vadd.f32 %v756_v52, %v734_v44 }
 0x141   : >> { %v796_v15 = vmul.f32 %v15080_v48, %v15072_v57  ;;  %v1308_v16 = vsel %vm564_vm2, %v1305_v14, %v1307_v61  ;;  %v1328_v24 = vrot.slane %v15078_v62, 4  ;;  %v754_v26 = vsel %vm594_vm3, %v752_v27, %v753_v3 }
 0x142   : >> { %v814_v28 = vmul.f32 %v15068_v53, %v15083_v11  ;;  %v15119_v50 = vadd.f32 %v1289_v56, %v1274_v5  ;;  %v15122_v51 = vsel %vm564_vm2, %v1307_v61, %v1309_v23  ;;  %v15126_v60 = vmul.f32 %v15088_v13, %v15072_v57 }
 0x143   : >> { %v762_v14 = vadd.f32 %v754_v26, %v733_v9  ;;  %v823_v33 = vrot.slane %v15097_v63, 1  ;;  %v852_v49 = vrot.slane %v15101_v40, 2  ;;  %v15132_v3 = vmul.f32 %v15104_v10, %v15072_v57 }
 0x144   : >> { %v1314_v8 = vadd.f32 %v15037_v29, %v1293_v22  ;;  %v15135_v27 = vadd.f32 %v796_v15, %v763_v47  ;;  %v1315_v34 = vadd.f32 %v1308_v16, %v1294_v32  ;;  %v15139_v39 = vmul.f32 %v14941_v17, %v15072_v57  ;;  %v806_v32 = vpop.permute.xlu1 %805 }
 0x145   : >> { %v795_v36 = vmul.f32 %v15080_v48, %v15083_v11  ;;  %v1329_v42 = vsel %vm594_vm3, %v1326_v21, %v1328_v24  ;;  %v1339_v19 = vmul.f32 %v14947_v25, %v15072_v57  ;;  %v822_v29 = vrot.slane %v814_v28, 1  ;;  %v15183_v28 = vpop.permute.xlu0 %786 }
 0x146   : >> { %v843_v22 = vmul.f32 %v15070_v54, %v15083_v11  ;;  %v881_v46 = vrot.slane %v15126_v60, 3  ;;  %v1327_v23 = vsel %vm594_vm3, %v1325_v41, %v1326_v21  ;;  %v1344_v43 = vmul.f32 %v14941_v17, %v15083_v11 }
 0x147   : >> { %v798_v6 = vadd.f32 %v795_v36, %v762_v14  ;;  %v910_v44 = vrot.slane %v15132_v3, 4  ;;  %v15163_v58 = vmul.f32 %v14943_v20, %v15072_v57  ;;  %v15167_v61 = vmul.f32 %v14950_v30, %v15072_v57 }
 0x148   : >> { %v1335_v5 = vadd.f32 %v1327_v23, %v1314_v8  ;;  %v1336_v4 = vadd.f32 %v1329_v42, %v1315_v34  ;;  %v1353_v18 = vrot.slane %v15139_v39, 1  ;;  %v872_v21 = vmul.f32 %v15088_v13, %v15083_v11 }
 0x149   : >> { %v901_v41 = vmul.f32 %v15104_v10, %v15083_v11  ;;  %v824_v9 = vsel %vm504_vm0, %v822_v29, %v823_v33  ;;  %v851_v12 = vrot.slane %v843_v22, 2  ;;  %v1338_v52 = vmul.f32 %v14947_v25, %v15083_v11 }
 0x14a   : >> { %v1365_v56 = vmul.f32 %v14943_v20, %v15083_v11  ;;  %v832_v47 = vadd.f32 %v824_v9, %v798_v6  ;;  %v1352_v15 = vrot.slane %v1344_v43, 1  ;;  %v1386_v16 = vmul.f32 %v14950_v30, %v15083_v11 }
 0x14b   : >> { %v735_v26 = vadd.f32 %v729_v55, %v706_v38  ;;  %v1374_v14 = vrot.slane %v15163_v58, 2  ;;  %v1395_v8 = vrot.slane %v15167_v61, 3  ;;  %v15189_v34 = vmul.f32 %v14955_v35, %v15072_v57 }
 0x14c   : >> { %v1341_v36 = vadd.f32 %v1338_v52, %v1335_v5  ;;  %v880_v42 = vrot.slane %v872_v21, 3  ;;  %v909_v29 = vrot.slane %v901_v41, 4  ;;  %v817_v22 = vmul.f32 %v15068_v53, %v806_v32 }
 0x14d   : >> { %v758_v38 = vsel %vm594_vm3, %v755_v45, %v757_v37  ;;  %v853_v55 = vsel %vm534_vm1, %v851_v12, %v852_v49  ;;  %v1373_v23 = vrot.slane %v1365_v56, 2  ;;  %v816_v57 = vmul.f32 %v15068_v53, %v15183_v28 }
 0x14e   : >> { %v764_v6 = vadd.f32 %v758_v38, %v735_v26  ;;  %v861_v43 = vadd.f32 %v853_v55, %v832_v47  ;;  %v1354_v5 = vsel %vm504_vm0, %v1352_v15, %v1353_v18  ;;  %v1394_v21 = vrot.slane %v1386_v16, 3 }
 0x14f   : >> { %v15207_v7 = vmul.f32 %v14955_v35, %v15083_v11  ;;  %v15209_v2 = vadd.f32 %v1339_v19, %v1336_v4  ;;  %v1362_v37 = vadd.f32 %v1354_v5, %v1341_v36  ;;  %v846_v45 = vmul.f32 %v15070_v54, %v806_v32 }
 0x150   : >> { %v797_v41 = vmul.f32 %v15080_v48, %v15183_v28  ;;  %v827_v12 = vrot.slane %v817_v22, 1  ;;  %v825_v52 = vrot.slane %v816_v57, 1  ;;  %v845_v56 = vmul.f32 %v15070_v54, %v15183_v28 }
 0x151   : >> { %v882_v11 = vsel %vm564_vm2, %v880_v42, %v881_v46  ;;  %v911_v19 = vsel %vm594_vm3, %v909_v29, %v910_v44  ;;  %v875_v4 = vmul.f32 %v15088_v13, %v806_v32  ;;  %v1375_v16 = vsel %vm534_vm1, %v1373_v23, %v1374_v14 }
 0x152   : >> { %v800_v47 = vadd.f32 %v797_v41, %v764_v6  ;;  %v890_v15 = vadd.f32 %v882_v11, %v861_v43  ;;  %v15230_v26 = vsel %vm564_vm2, %v1394_v21, %v1395_v8  ;;  %v15233_v42 = vadd.f32 %v1375_v16, %v1362_v37 }
 0x153   : >> { %v856_v22 = vrot.slane %v846_v45, 2  ;;  %v1316_v29 = vadd.f32 %v15122_v51, %v15119_v50  ;;  %v874_v38 = vmul.f32 %v15088_v13, %v15183_v28  ;;  %v904_v55 = vmul.f32 %v15104_v10, %v806_v32 }
 0x154   : >> { %v826_v23 = vsel %vm504_vm0, %v823_v33, %v825_v52  ;;  %v828_v6 = vsel %vm504_vm0, %v825_v52, %v827_v12  ;;  %v854_v57 = vrot.slane %v845_v56, 2  ;;  %v885_v43 = vrot.slane %v875_v4, 3 }
 0x155   : >> { %v833_v5 = vadd.f32 %v826_v23, %v15135_v27  ;;  %v834_v21 = vadd.f32 %v828_v6, %v800_v47  ;;  %v1346_v37 = vmul.f32 %v14941_v17, %v15183_v28  ;;  %v1347_v50 = vmul.f32 %v14941_v17, %v806_v32  ;;  %v15296_v23 = vld [vmem:[#allocation4 + $0x11] ss:$0 sm:$0xff]  ;;  %v15298_v6 = vpop.permute.xlu0 %933 }
 0x156   : >> { %v15249_v51 = vmul.f32 %v14943_v20, %v806_v32  ;;  %v1331_v63 = vsel %vm594_vm3, %v1328_v24, %v1330_v59  ;;  %v903_v33 = vmul.f32 %v15104_v10, %v15183_v28  ;;  %v15259_v27 = vmul.f32 %v14950_v30, %v806_v32  ;;  %v15274_v24 = vpop.permute.xlu1 %938 }
 0x157   : >> { %v15262_v45 = vmul.f32 %v14955_v35, %v806_v32  ;;  %v1337_v41 = vadd.f32 %v1331_v63, %v1316_v29  ;;  %v883_v17 = vrot.slane %v874_v38, 3  ;;  %v15264_v12 = vadd.f32 %v911_v19, %v890_v15 }
 0x158   : >> { %16897 = vst [vmem:[#allocation28_spill] sm:$0xff] %v15249_v51  ;;  %16898 = vst [vmem:[#allocation29_spill] sm:$0xff] %v15259_v27  ;;  %v855_v31 = vsel %vm534_vm1, %v852_v49, %v854_v57  ;;  %v857_v62 = vsel %vm534_vm1, %v854_v57, %v856_v22  ;;  %v15272_v59 = vmul.f32 %v14943_v20, %v15183_v28  ;;  %v1355_v11 = vrot.slane %v1346_v37, 1  ;;  %v15279_v49 = vld [vmem:[#allocation4 + $0x10] ss:$0 sm:$0xff] }
 0x159   : >> { %16899 = vst [vmem:[#allocation30_spill] sm:$0xff] %v15262_v45  ;;  %v862_v52 = vadd.f32 %v855_v31, %v833_v5  ;;  %v863_v56 = vadd.f32 %v857_v62, %v834_v21  ;;  %v1340_v32 = vmul.f32 %v14947_v25, %v15183_v28  ;;  %v914_v19 = vrot.slane %v904_v55, 4  ;;  %v15315_v37 = vld [vmem:[#allocation4 + $0x13] ss:$0 sm:$0xff] }
 0x15a   : >> { %16900 = vst [vmem:[#allocation31_spill] sm:$0xff] %v15272_v59  ;;  %v1357_v4 = vrot.slane %v1347_v50, 1  ;;  %v912_v47 = vrot.slane %v903_v33, 4  ;;  %v884_v16 = vsel %vm564_vm2, %v881_v46, %v883_v17  ;;  %v886_v29 = vsel %vm564_vm2, %v883_v17, %v885_v43  ;;  %v15303_v43 = vld [vmem:[#allocation4 + $0x12] ss:$0 sm:$0xff]  ;;  %v963_v39 = vpop.permute.xlu1 %962 }
 0x15b   : >> { %v1343_v22 = vadd.f32 %v1340_v32, %v1337_v41  ;;  %v16832_v25 = vrot.slane %v15272_v59, 2  ;;  %v15290_v38 = vmul.f32 %v14950_v30, %v15183_v28  ;;  %v15294_v55 = vmul.f32 %v14955_v35, %v15183_v28 }
 0x15c   : >> { %v891_v60 = vadd.f32 %v884_v16, %v862_v52  ;;  %v892_v57 = vadd.f32 %v886_v29, %v863_v56  ;;  %v1356_v46 = vsel %vm504_vm0, %v1353_v18, %v1355_v11  ;;  %v15307_v30 = vmul.f32 %v15279_v49, %v15274_v24  ;;  %v15364_v16 = vpop.permute.xlu0 %943 }
 0x15d   : >> { %16901 = vst [vmem:[#allocation32_spill] sm:$0xff] %v15290_v38  ;;  %16902 = vst [vmem:[#allocation33_spill] sm:$0xff] %v15294_v55  ;;  %v913_v35 = vsel %vm594_vm3, %v910_v44, %v912_v47  ;;  %v915_v28 = vsel %vm594_vm3, %v912_v47, %v914_v19  ;;  %v1358_v5 = vsel %vm504_vm0, %v1355_v11, %v1357_v4  ;;  %v16831_v63 = vrot.slane %v15290_v38, 3 }
 0x15e   : >> { %v1363_v21 = vadd.f32 %v1356_v46, %v15209_v2  ;;  %v15317_v18 = vadd.f32 %v1358_v5, %v1343_v22  ;;  %v15321_v50 = vmul.f32 %v15296_v23, %v15274_v24  ;;  %v971_v3 = vmul.f32 %v15279_v49, %v15298_v6  ;;  %v15380_v46 = vpop.permute.xlu1 %1095 }
 0x15f   : >> { %v1000_v44 = vmul.f32 %v15296_v23, %v15298_v6  ;;  %v1377_v2 = vsel %vm534_vm1, %v1374_v14, %v16832_v25  ;;  %v16840_v33 = vrot.slane %v15294_v55, 4  ;;  %v15336_v41 = vmul.f32 %v15303_v43, %v15274_v24 }
 0x160   : >> { %16903 = vst [vmem:[#allocation34_spill] sm:$0xff] %v15317_v18  ;;  %v15338_v17 = vadd.f32 %v913_v35, %v891_v60  ;;  %v15340_v31 = vadd.f32 %v915_v28, %v892_v57  ;;  %v16833_v62 = vrot.slane %v15307_v30, 1  ;;  %v15345_v52 = vmul.f32 %v15315_v37, %v15274_v24  ;;  %v15432_v25 = vpop.permute.xlu0 %1090 }
 0x161   : >> { %v1384_v58 = vadd.f32 %v1377_v2, %v1363_v21  ;;  %v15349_v14 = vmul.f32 %v15068_v53, %v15274_v24  ;;  %v15353_v56 = vmul.f32 %v15070_v54, %v15274_v24  ;;  %v15357_v32 = vmul.f32 %v15303_v43, %v15298_v6 }
 0x162   : >> { %v16834_v11 = vrot.slane %v15321_v50, 2  ;;  %v979_v19 = vrot.slane %v971_v3, 1  ;;  %v1008_v4 = vrot.slane %v1000_v44, 2  ;;  %v15362_v47 = vmul.f32 %v15315_v37, %v15298_v6  ;;  %v15444_v29 = vpop.permute.xlu1 %1119 }
 0x163   : >> { %v1398_v22 = vsel %vm564_vm2, %v1395_v8, %v16831_v63  ;;  %v15374_v60 = vmul.f32 %v15068_v53, %v15298_v6  ;;  %v15378_v57 = vmul.f32 %v15070_v54, %v15298_v6  ;;  %v1429_v28 = vmul.f32 %v15080_v48, %v15274_v24  ;;  %16912 = vst [vmem:[#allocation43_spill] sm:$0xff] %v15444_v29 }
 0x164   : >> { %v15387_v61 = vmul.f32 %v15088_v13, %v15274_v24  ;;  %v15390_v8 = vmul.f32 %v15279_v49, %v963_v39  ;;  %v15397_v44 = vmul.f32 %v15080_v48, %v15298_v6  ;;  %v15402_v2 = vsel %vm504_vm0, %v979_v19, %v16833_v62 }
 0x165   : >> { %v15407_v20 = vsel %vm534_vm1, %v1008_v4, %v16834_v11  ;;  %v15412_v15 = vmul.f32 %v15088_v13, %v15298_v6  ;;  %v15417_v35 = vmul.f32 %v15296_v23, %v963_v39  ;;  %v15420_v19 = vmul.f32 %v15303_v43, %v963_v39 }
 0x166   : >> { %v15424_v4 = vmul.f32 %v15315_v37, %v963_v39  ;;  %v15427_v11 = vmul.f32 %v15068_v53, %v963_v39  ;;  %v15430_v63 = vmul.f32 %v15070_v54, %v963_v39  ;;  %v15435_v40 = vmul.f32 %v15088_v13, %v963_v39  ;;  %v15565_v59 = vpop.permute.xlu1 %1622 }
 0x167   : >> { %16904 = vst [vmem:[#allocation35_spill] sm:$0xff] %v15417_v35  ;;  %16905 = vst [vmem:[#allocation36_spill] sm:$0xff] %v15420_v19  ;;  %v15438_v3 = vmul.f32 %v15104_v10, %v963_v39  ;;  %v15442_v62 = vmul.f32 %v15068_v53, %v15364_v16  ;;  %v1405_v36 = vadd.f32 %v1398_v22, %v1384_v58  ;;  %v16914_v53 = vrot.slane %v15189_v34, 4 }
 0x168   : >> { %16906 = vst [vmem:[#allocation37_spill] sm:$0xff] %v15424_v4  ;;  %16907 = vst [vmem:[#allocation38_spill] sm:$0xff] %v15427_v11  ;;  %v15448_v21 = vmul.f32 %v15279_v49, %v15364_v16  ;;  %v15452_v5 = vmul.f32 %v15296_v23, %v15364_v16  ;;  %v15456_v9 = vmul.f32 %v15303_v43, %v15364_v16  ;;  %v15492_v4 = vpop.permute.xlu0 %1100 }
 0x169   : >> { %16908 = vst [vmem:[#allocation39_spill] sm:$0xff] %v15430_v63  ;;  %16909 = vst [vmem:[#allocation40_spill] sm:$0xff] %v15435_v40  ;;  %v1419_v39 = vsel %vm594_vm3, %v16914_v53, %v16840_v33  ;;  %v15467_v1 = vmul.f32 %v15315_v37, %v15364_v16  ;;  %v15473_v55 = vmul.f32 %v15070_v54, %v15364_v16  ;;  %v15479_v33 = vld [vmem:[#allocation4 + $0x14] ss:$0 sm:$0xff]  ;;  %v15495_v63 = vld [vmem:[#allocation4 + $0xf] ss:$0 sm:$0xff] }
 0x16a   : >> { %16910 = vst [vmem:[#allocation41_spill] sm:$0xff] %v15438_v3  ;;  %16911 = vst [vmem:[#allocation42_spill] sm:$0xff] %v15442_v62  ;;  %v1426_v48 = vadd.f32 %v1419_v39, %v1405_v36  ;;  %v15477_v53 = vmul.f32 %v15279_v49, %v15444_v29  ;;  %v15490_v11 = vmul.f32 %v15088_v13, %v15364_v16  ;;  %v16922_v3 = vrot.slane %v15442_v62, 1 }
 0x16b   : >> { %16913 = vst [vmem:[#allocation44_spill] sm:$0xff] %v15456_v9  ;;  %16915 = vst [vmem:[#allocation45_spill] sm:$0xff] %v15467_v1  ;;  %v15499_v36 = vmul.f32 %v15479_v33, %v15380_v46  ;;  %v15503_v58 = vmul.f32 %v15104_v10, %v15274_v24  ;;  %v15510_v22 = vmul.f32 %v15495_v63, %v15380_v46  ;;  %v16923_v40 = vrot.slane %v15349_v14, 1  ;;  %v15575_v9 = vld [vmem:[#allocation4 + $0x15] ss:$0 sm:$0xff] }
 0x16c   : >> { %16916 = vst [vmem:[#allocation46_spill] sm:$0xff] %v15473_v55  ;;  %16917 = vst [vmem:[#allocation47_spill] sm:$0xff] %v15477_v53  ;;  %v1432_v45 = vadd.f32 %v1429_v28, %v1426_v48  ;;  %v15514_v39 = vmul.f32 %v15279_v49, %v15380_v46  ;;  %v15523_v28 = vmul.f32 %v15104_v10, %v15364_v16  ;;  %v16930_v51 = vrot.slane %v15473_v55, 2 }
 0x16d   : >> { %16918 = vst [vmem:[#allocation48_spill] sm:$0xff] %v15479_v33  ;;  %16919 = vst [vmem:[#allocation49_spill] sm:$0xff] %v15490_v11  ;;  %v1446_v48 = vsel %vm504_vm0, %v16923_v40, %v16922_v3  ;;  %v15527_v13 = vmul.f32 %v15279_v49, %v15492_v4  ;;  %v15531_v0 = vmul.f32 %v15296_v23, %v15492_v4 }
 0x16e   : >> { %16920 = vst [vmem:[#allocation50_spill] sm:$0xff] %v15492_v4  ;;  %16921 = vst [vmem:[#allocation51_spill] sm:$0xff] %v15499_v36  ;;  %v15535_v54 = vmul.f32 %v15303_v43, %v15492_v4  ;;  %v15539_v53 = vmul.f32 %v15315_v37, %v15492_v4  ;;  %v952_v40 = vmul.f32 %v15495_v63, %v15298_v6 }
 0x16f   : >> { %16924 = vst [vmem:[#allocation52_spill] sm:$0xff] %v15523_v28  ;;  %16925 = vst [vmem:[#allocation53_spill] sm:$0xff] %v15527_v13  ;;  %v15546_v62 = vmul.f32 %v15296_v23, %v15380_v46  ;;  %v15550_v38 = vmul.f32 %v15303_v43, %v15380_v46  ;;  %v1453_v27 = vadd.f32 %v1446_v48, %v1432_v45  ;;  %v16931_v45 = vrot.slane %v15353_v56, 2 }
 0x170   : >> { %16926 = vst [vmem:[#allocation54_spill] sm:$0xff] %v15531_v0  ;;  %16927 = vst [vmem:[#allocation55_spill] sm:$0xff] %v15535_v54  ;;  %v15554_v29 = vmul.f32 %v15315_v37, %v15380_v46  ;;  %v15558_v18 = vmul.f32 %v15479_v33, %v15432_v25  ;;  %v15562_v3 = vmul.f32 %v15479_v33, %v15492_v4  ;;  %v15581_v4 = vld [vmem:[#allocation4 + $0x16] ss:$0 sm:$0xff]  ;;  %v16936_v1 = vrot.slane %v15527_v13, 1 }
 0x171   : >> { %16928 = vst [vmem:[#allocation56_spill] sm:$0xff] %v15539_v53  ;;  %v955_v19 = vadd.f32 %v952_v40, %v15264_v12  ;;  %v1467_v48 = vsel %vm534_vm1, %v16931_v45, %v16930_v51  ;;  %v16867_v51 = vrot.slane %v15514_v39, 1  ;;  %v15593_v40 = vmul.f32 %v15581_v4, %v15565_v59 }
 0x172   : >> { %16929 = vst [vmem:[#allocation57_spill] sm:$0xff] %v15562_v3  ;;  %v1474_v36 = vadd.f32 %v1467_v48, %v1453_v27  ;;  %v15589_v3 = vmul.f32 %v15575_v9, %v15565_v59  ;;  %v16933_v12 = vrot.slane %v15387_v61, 3  ;;  %v16934_v27 = vrot.slane %v15523_v28, 4 }
 0x173   : >> { %v989_v55 = vadd.f32 %v15402_v2, %v955_v19  ;;  %v16932_v19 = vrot.slane %v15490_v11, 3  ;;  %v16935_v48 = vrot.slane %v15503_v58, 4  ;;  %v1536_v33 = vsel %vm504_vm0, %v16867_v51, %v16936_v1 }
 0x174   : >> { %v16937_v11 = vrot.slane %v15531_v0, 2  ;;  %v16941_v1 = vrot.slane %v15539_v53, 4  ;;  %v16943_v51 = vrot.slane %v15189_v34, 4  ;;  %v16944_v0 = vrot.slane %v15207_v7, 4 }
 0x175   : >> { %v1018_v2 = vadd.f32 %v15407_v20, %v989_v55  ;;  %v1488_v45 = vsel %vm564_vm2, %v16933_v12, %v16932_v19  ;;  %v1509_v35 = vsel %vm594_vm3, %v16935_v48, %v16934_v27  ;;  %v1404_v20 = vadd.f32 %v15230_v26, %v15233_v42  ;;  %v15613_v55 = vld [vmem:[#allocation4 + $0x17] ss:$0 sm:$0xff] }
 0x176   : >> { %v16938_v12 = vrot.slane %v15546_v62, 2  ;;  %v16939_v27 = vrot.slane %v15535_v54, 3  ;;  %v16940_v48 = vrot.slane %v15550_v38, 3  ;;  %v16942_v26 = vrot.slane %v15554_v29, 4 }
 0x177   : >> { %v15643_v54 = vmul.f32 %v15613_v55, %v15565_v59  ;;  %v16952_v34 = vrot.slane %v15378_v57, 2 }
 0x178   : >> { %v15620_v19 = vsel %vm534_vm1, %v16938_v12, %v16937_v11  ;;  %v15627_v13 = vsel %vm564_vm2, %v16940_v48, %v16939_v27  ;;  %v15634_v42 = vsel %vm594_vm3, %v16942_v26, %v16941_v1  ;;  %v1417_v11 = vsel %vm594_vm3, %v16944_v0, %v16943_v51  ;;  %v15650_v1 = vld [vmem:[#allocation4 + $0x18] ss:$0 sm:$0xff] }
 0x179   : >> { %v1495_v12 = vadd.f32 %v1488_v45, %v1474_v36  ;;  %v16945_v27 = vrot.slane %v15336_v41, 3  ;;  %v16946_v48 = vrot.slane %v15357_v32, 3  ;;  %v1425_v28 = vadd.f32 %v1417_v11, %v1404_v20 }
 0x17a   : >> { %v1497_v0 = vmul.f32 %v15104_v10, %v15298_v6  ;;  %v15658_v36 = vmul.f32 %v15650_v1, %v15565_v59  ;;  %v1128_v32 = vmul.f32 %v15575_v9, %v15432_v25  ;;  %v15664_v51 = vmul.f32 %v15575_v9, %v15380_v46 }
 0x17b   : >> { %v1039_v53 = vsel %vm564_vm2, %v16946_v48, %v16945_v27  ;;  %v1431_v45 = vadd.f32 %v15397_v44, %v1425_v28  ;;  %v16947_v20 = vrot.slane %v15345_v52, 4  ;;  %v1157_v10 = vmul.f32 %v15581_v4, %v15432_v25 }
 0x17c   : >> { %v1047_v26 = vadd.f32 %v1039_v53, %v1018_v2  ;;  %v16948_v53 = vrot.slane %v15362_v47, 4  ;;  %v16949_v6 = vrot.slane %v15349_v14, 1  ;;  %v16950_v11 = vrot.slane %v15374_v60, 1 }
 0x17d   : >> { %v1484_v48 = vrot.slane %v15412_v15, 3  ;;  %v1516_v7 = vadd.f32 %v1509_v35, %v1495_v12  ;;  %v15683_v28 = vmul.f32 %v15581_v4, %v15380_v46  ;;  %v1505_v60 = vrot.slane %v1497_v0, 4 }
 0x17e   : >> { %v1068_v2 = vsel %vm594_vm3, %v16948_v53, %v16947_v20  ;;  %v1444_v27 = vsel %vm504_vm0, %v16950_v11, %v16949_v6  ;;  %v16951_v53 = vrot.slane %v15353_v56, 2  ;;  %v1524_v6 = vmul.f32 %v15279_v49, %v15432_v25 }
 0x17f   : >> { %v1452_v47 = vadd.f32 %v1444_v27, %v1431_v45  ;;  %v1076_v20 = vadd.f32 %v1068_v2, %v1047_v26  ;;  %v1136_v15 = vrot.slane %v1128_v32, 1  ;;  %v1137_v35 = vrot.slane %v15664_v51, 1  ;;  %v16998_v51 = vld [vmem:[#allocation37_spill] sm:$0xff] }
 0x180   : >> { %v1465_v14 = vsel %vm534_vm1, %v16952_v34, %v16951_v53  ;;  %v1186_v12 = vmul.f32 %v15613_v55, %v15432_v25  ;;  %v1165_v44 = vrot.slane %v1157_v10, 2  ;;  %v15697_v26 = vmul.f32 %v15613_v55, %v15380_v46 }
 0x181   : >> { %v1473_v11 = vadd.f32 %v1465_v14, %v1452_v47  ;;  %v16953_v56 = vrot.slane %v15387_v61, 3  ;;  %v1545_v34 = vmul.f32 %v15296_v23, %v15432_v25  ;;  %v1522_v49 = vadd.f32 %v15510_v22, %v1516_v7 }
 0x182   : >> { %v1166_v0 = vrot.slane %v15683_v28, 2  ;;  %v15708_v32 = vmul.f32 %v15650_v1, %v15432_v25  ;;  %v1112_v2 = vadd.f32 %v15558_v18, %v1076_v20  ;;  %v16954_v10 = vrot.slane %v15503_v58, 4 }
 0x183   : >> { %v1486_v57 = vsel %vm564_vm2, %v1484_v48, %v16953_v56  ;;  %v1532_v27 = vrot.slane %v1524_v6, 1  ;;  %v1566_v48 = vmul.f32 %v15303_v43, %v15432_v25  ;;  %v1713_v47 = vrot.slane %v15658_v36, 4 }
 0x184   : >> { %v1494_v45 = vadd.f32 %v1486_v57, %v1473_v11  ;;  %v1507_v61 = vsel %vm594_vm3, %v1505_v60, %v16954_v10  ;;  %v1518_v7 = vmul.f32 %v15495_v63, %v15432_v25  ;;  %v1587_v53 = vmul.f32 %v15315_v37, %v15432_v25  ;;  %v1618_v57 = vpop.permute.xlu0 %1617 }
 0x185   : >> { %v1194_v14 = vrot.slane %v1186_v12, 3  ;;  %v1195_v18 = vrot.slane %v15697_v26, 3  ;;  %v15724_v58 = vmul.f32 %v15650_v1, %v15380_v46  ;;  %v1553_v20 = vrot.slane %v1545_v34, 2 }
 0x186   : >> { %v1515_v22 = vadd.f32 %v1507_v61, %v1494_v45  ;;  %v1543_v60 = vadd.f32 %v1536_v33, %v1522_v49  ;;  %v1138_v6 = vsel %vm504_vm0, %v1136_v15, %v1137_v35  ;;  %v1167_v11 = vsel %vm534_vm1, %v1165_v44, %v1166_v0 }
 0x187   : >> { %v1146_v25 = vadd.f32 %v1138_v6, %v1112_v2  ;;  %v1223_v12 = vrot.slane %v15708_v32, 4  ;;  %v16955_v45 = vrot.slane %v15514_v39, 1  ;;  %v1574_v10 = vrot.slane %v1566_v48, 3 }
 0x188   : >> { %v1521_v56 = vadd.f32 %v1518_v7, %v1515_v22  ;;  %v1595_v33 = vrot.slane %v1587_v53, 4  ;;  %v953_v49 = vmul.f32 %v15495_v63, %v15274_v24  ;;  %v954_v15 = vmul.f32 %v15495_v63, %v15364_v16 }
 0x189   : >> { %v1534_v46 = vsel %vm504_vm0, %v1532_v27, %v16955_v45  ;;  %v1196_v44 = vsel %vm564_vm2, %v1194_v14, %v1195_v18  ;;  %v1224_v2 = vrot.slane %v15724_v58, 4  ;;  %v16956_v32 = vrot.slane %v15546_v62, 2 }
 0x18a   : >> { %v1542_v34 = vadd.f32 %v1534_v46, %v1521_v56  ;;  %v1641_v61 = vmul.f32 %v15575_v9, %v1618_v57  ;;  %v1564_v27 = vadd.f32 %v15620_v19, %v1543_v60  ;;  %v956_v24 = vadd.f32 %v953_v49, %v15338_v17 }
 0x18b   : >> { %v1555_v39 = vsel %vm534_vm1, %v1553_v20, %v16956_v32  ;;  %v957_v22 = vadd.f32 %v954_v15, %v15340_v31  ;;  %v1175_v7 = vadd.f32 %v1167_v11, %v1146_v25  ;;  %v16957_v53 = vrot.slane %v15550_v38, 3 }
 0x18c   : >> { %v1563_v48 = vadd.f32 %v1555_v39, %v1542_v34  ;;  %v1662_v6 = vmul.f32 %v15581_v4, %v1618_v57  ;;  %v16958_v62 = vrot.slane %v15448_v21, 1  ;;  %v16959_v20 = vrot.slane %v15307_v30, 1 }
 0x18d   : >> { %v1576_v14 = vsel %vm564_vm2, %v1574_v10, %v16957_v53  ;;  %v16960_v19 = vrot.slane %v15554_v29, 4  ;;  %v1683_v31 = vmul.f32 %v15613_v55, %v1618_v57  ;;  %v1649_v11 = vrot.slane %v1641_v61, 1 }
 0x18e   : >> { %v983_v56 = vsel %vm504_vm0, %v16959_v20, %v16958_v62  ;;  %v1584_v45 = vadd.f32 %v1576_v14, %v1563_v48  ;;  %v1704_v38 = vmul.f32 %v15650_v1, %v1618_v57  ;;  %v16961_v25 = vrot.slane %v15390_v8, 1  ;;  %v16969_v14 = vld [vmem:[#allocation50_spill] sm:$0xff] }
 0x18f   : >> { %v1597_v17 = vsel %vm594_vm3, %v1595_v33, %v16960_v19  ;;  %v990_v60 = vadd.f32 %v983_v56, %v956_v24  ;;  %v16962_v46 = vmov %v16958_v62  ;;  %v16963_v30 = vrot.slane %v15452_v5, 2  ;;  %v16965_v33 = vld [vmem:[#allocation48_spill] sm:$0xff] }
 0x190   : >> { %v985_v10 = vsel %vm504_vm0, %v16962_v46, %v16961_v25  ;;  %v16964_v34 = vrot.slane %v15321_v50, 2  ;;  %v1605_v49 = vadd.f32 %v1597_v17, %v1584_v45  ;;  %v1630_v15 = vmul.f32 %v16965_v33, %v1618_v57  ;;  %v16966_v24 = vld [vmem:[#allocation44_spill] sm:$0xff]  ;;  %v16974_v17 = vld [vmem:[#allocation45_spill] sm:$0xff] }
 0x191   : >> { %v991_v32 = vadd.f32 %v985_v10, %v957_v22  ;;  %v1585_v61 = vadd.f32 %v15627_v13, %v1564_v27  ;;  %v1670_v48 = vrot.slane %v1662_v6, 2  ;;  %v16967_v8 = vrot.slane %v16966_v24, 3  ;;  %v16971_v27 = vld [vmem:[#allocation35_spill] sm:$0xff] }
 0x192   : >> { %v1012_v29 = vsel %vm534_vm1, %v16964_v34, %v16963_v30  ;;  %v16968_v21 = vrot.slane %v15336_v41, 3  ;;  %v15784_v62 = vmul.f32 %v15575_v9, %v16969_v14  ;;  %v1204_v50 = vadd.f32 %v1196_v44, %v1175_v7 }
 0x193   : >> { %v1019_v39 = vadd.f32 %v1012_v29, %v990_v60  ;;  %v1633_v20 = vadd.f32 %v1630_v15, %v1605_v49  ;;  %v1691_v56 = vrot.slane %v1683_v31, 3  ;;  %v16970_v57 = vrot.slane %v15589_v3, 1  ;;  %v16978_v49 = vld [vmem:[#allocation51_spill] sm:$0xff] }
 0x194   : >> { %v1041_v53 = vsel %vm564_vm2, %v16968_v21, %v16967_v8  ;;  %v1712_v13 = vrot.slane %v1704_v38, 4  ;;  %v16972_v6 = vrot.slane %v16971_v27, 2  ;;  %v16973_v19 = vmov %v16963_v30 }
 0x195   : >> { %v1048_v45 = vadd.f32 %v1041_v53, %v1019_v39  ;;  %v1651_v22 = vsel %vm504_vm0, %v1649_v11, %v16970_v57  ;;  %v16975_v60 = vrot.slane %v16974_v17, 4  ;;  %v16976_v25 = vrot.slane %v15345_v52, 4  ;;  %v16984_v53 = vld [vmem:[#allocation36_spill] sm:$0xff] }
 0x196   : >> { %v1014_v41 = vsel %vm534_vm1, %v16973_v19, %v16972_v6  ;;  %v1225_v7 = vsel %vm594_vm3, %v1223_v12, %v1224_v2  ;;  %v1659_v31 = vadd.f32 %v1651_v22, %v1633_v20  ;;  %v1606_v38 = vadd.f32 %v15634_v42, %v1585_v61  ;;  %v16979_v12 = vld [vmem:[#allocation28_spill] sm:$0xff]  ;;  %v16988_v6 = vld [vmem:[#allocation43_spill] sm:$0xff] }
 0x197   : >> { %v1070_v44 = vsel %vm594_vm3, %v16976_v25, %v16975_v60  ;;  %v1020_v46 = vadd.f32 %v1014_v41, %v991_v32  ;;  %v16977_v10 = vrot.slane %v15593_v40, 2  ;;  %v1139_v30 = vrot.slane %v15784_v62, 1  ;;  %v16981_v32 = vld [vmem:[#allocation31_spill] sm:$0xff]  ;;  %v16989_v41 = vld [vmem:[#allocation29_spill] sm:$0xff] }
 0x198   : >> { %v1077_v11 = vadd.f32 %v1070_v44, %v1048_v45  ;;  %v15809_v52 = vmul.f32 %v15581_v4, %v16969_v14  ;;  %v1233_v34 = vadd.f32 %v1225_v7, %v1204_v50  ;;  %v16980_v39 = vrot.slane %v16979_v12, 2  ;;  %v16987_v45 = vld [vmem:[#allocation34_spill] sm:$0xff]  ;;  %v16996_v12 = vld [vmem:[#allocation33_spill] sm:$0xff] }
 0x199   : >> { %v1672_v5 = vsel %vm534_vm1, %v1670_v48, %v16977_v10  ;;  %v16982_v8 = vrot.slane %v16981_v32, 2  ;;  %v16983_v61 = vrot.slane %v15643_v54, 3  ;;  %v1714_v21 = vsel %vm594_vm3, %v1712_v13, %v1713_v47 }
 0x19a   : >> { %v1680_v29 = vadd.f32 %v1672_v5, %v1659_v31  ;;  %v1113_v15 = vadd.f32 %v16978_v49, %v1077_v11  ;;  %v16985_v62 = vrot.slane %v16984_v53, 3  ;;  %v16986_v50 = vrot.slane %v16966_v24, 3 }
 0x19b   : >> { %v1379_v42 = vsel %vm534_vm1, %v16982_v8, %v16980_v39  ;;  %v1693_v48 = vsel %vm564_vm2, %v1691_v56, %v16983_v61  ;;  %v1131_v19 = vmul.f32 %v15575_v9, %v16988_v6  ;;  %v16990_v60 = vrot.slane %v16989_v41, 3  ;;  %v16991_v56 = vld [vmem:[#allocation32_spill] sm:$0xff]  ;;  %v17002_v41 = vld [vmem:[#allocation38_spill] sm:$0xff] }
 0x19c   : >> { %v1043_v20 = vsel %vm564_vm2, %v16986_v50, %v16985_v62  ;;  %v1385_v57 = vadd.f32 %v1379_v42, %v16987_v45  ;;  %v1701_v22 = vadd.f32 %v1693_v48, %v1680_v29  ;;  %v16992_v25 = vrot.slane %v16991_v56, 3  ;;  %v16994_v29 = vld [vmem:[#allocation30_spill] sm:$0xff] }
 0x19d   : >> { %v1049_v27 = vadd.f32 %v1043_v20, %v1020_v46  ;;  %v1140_v13 = vsel %vm504_vm0, %v1137_v35, %v1139_v30  ;;  %v1168_v24 = vrot.slane %v15809_v52, 2  ;;  %v15842_v7 = vmul.f32 %v15613_v55, %v16969_v14  ;;  %v16993_v46 = vld [vmem:[#allocation25_spill] sm:$0xff] }
 0x19e   : >> { %v1400_v44 = vsel %vm564_vm2, %v16992_v25, %v16990_v60  ;;  %v1242_v11 = vadd.f32 %v16993_v46, %v1233_v34  ;;  %v1722_v10 = vadd.f32 %v1714_v21, %v1701_v22  ;;  %v1147_v5 = vadd.f32 %v1140_v13, %v1113_v15  ;;  %v17001_v34 = vld [vmem:[#allocation27_spill] sm:$0xff]  ;;  %v15879_v25 = vpop.permute.xlu0 %1627 }
 0x19f   : >> { %v1406_v31 = vadd.f32 %v1400_v44, %v1385_v57  ;;  %v16995_v49 = vrot.slane %v16994_v29, 4  ;;  %v16997_v39 = vrot.slane %v16996_v12, 4  ;;  %v16999_v8 = vrot.slane %v16998_v51, 4  ;;  %v17007_v29 = vld [vmem:[#allocation39_spill] sm:$0xff]  ;;  %v17009_v12 = vld [vmem:[#allocation46_spill] sm:$0xff] }
 0x1a0   : >> { %v17000_v35 = vrot.slane %v16974_v17, 4  ;;  %v15857_v61 = vmul.f32 %v15581_v4, %v16988_v6  ;;  %v1430_v15 = vmul.f32 %v17001_v34, %v15364_v16  ;;  %v1631_v21 = vmul.f32 %v16965_v33, %v15565_v59  ;;  %v17013_v34 = vld [vmem:[#allocation49_spill] sm:$0xff] }
 0x1a1   : >> { %v1421_v32 = vsel %vm594_vm3, %v16997_v39, %v16995_v49  ;;  %v1725_v53 = vadd.f32 %v16993_v46, %v1722_v10  ;;  %v1141_v50 = vrot.slane %v1131_v19, 1  ;;  %v1169_v17 = vsel %vm534_vm1, %v1166_v0, %v1168_v24 }
 0x1a2   : >> { %v1072_v42 = vsel %vm594_vm3, %v17000_v35, %v16999_v8  ;;  %v1427_v48 = vadd.f32 %v1421_v32, %v1406_v31  ;;  %v1197_v20 = vrot.slane %v15842_v7, 3  ;;  %v15872_v45 = vmul.f32 %v15650_v1, %v16969_v14 }
 0x1a3   : >> { %v1078_v62 = vadd.f32 %v1072_v42, %v1049_v27  ;;  %v1245_v57 = vmax.f32 %v1242_v11, 0.0  ;;  %v1728_v59 = vmax.f32 %v1725_v53, 0.0  ;;  %v1176_v22 = vadd.f32 %v1169_v17, %v1147_v5  ;;  %v17004_v27 = vld [vmem:[#allocation42_spill] sm:$0xff]  ;;  %v17006_v11 = vld [vmem:[#allocation57_spill] sm:$0xff] }
 0x1a4   : >> { %v1433_v16 = vadd.f32 %v1430_v15, %v1427_v48  ;;  %v17003_v60 = vrot.slane %v17002_v41, 1  ;;  %v17005_v19 = vrot.slane %v17004_v27, 1  ;;  %v1634_v28 = vadd.f32 %v1631_v21, %v1606_v38 }
 0x1a5   : >> { %v1170_v0 = vrot.slane %v15857_v61, 2  ;;  %v15884_v44 = vmul.f32 %v15613_v55, %v16988_v6  ;;  %v1731_v31 = vmax.f32 %v1245_v57, %v1728_v59  ;;  %v1114_v10 = vadd.f32 %v17006_v11, %v1078_v62  ;;  %v17011_v61 = vld [vmem:[#allocation40_spill] sm:$0xff] }
 0x1a6   : >> { %v1448_v56 = vsel %vm504_vm0, %v17005_v19, %v17003_v60  ;;  %v1142_v5 = vsel %vm504_vm0, %v1139_v30, %v1141_v50  ;;  %v17008_v49 = vrot.slane %v17007_v29, 2  ;;  %v17010_v39 = vrot.slane %v17009_v12, 2  ;;  %v17017_v50 = vld [vmem:[#allocation52_spill] sm:$0xff] }
 0x1a7   : >> { %v1454_v13 = vadd.f32 %v1448_v56, %v1433_v16  ;;  %v1198_v38 = vsel %vm564_vm2, %v1195_v18, %v1197_v20  ;;  %v1226_v51 = vrot.slane %v15872_v45, 4  ;;  %v15902_v35 = vmul.f32 %v15575_v9, %v15879_v25  ;;  %v17015_v18 = vld [vmem:[#allocation41_spill] sm:$0xff] }
 0x1a8   : >> { %v1469_v32 = vsel %vm534_vm1, %v17010_v39, %v17008_v49  ;;  %v1735_v30 = vrot.slane %v1731_v31, 1  ;;  %v1205_v42 = vadd.f32 %v1198_v38, %v1176_v22  ;;  %v17012_v48 = vrot.slane %v17011_v61, 3 }
 0x1a9   : >> { %v1475_v8 = vadd.f32 %v1469_v32, %v1454_v13  ;;  %v17014_v15 = vrot.slane %v17013_v34, 3  ;;  %v1548_v26 = vmul.f32 %v15296_v23, %v16988_v6  ;;  %v17016_v62 = vrot.slane %v17015_v18, 4 }
 0x1aa   : >> { %v17018_v17 = vrot.slane %v17017_v50, 4  ;;  %v1652_v57 = vrot.slane %v15902_v35, 1  ;;  %v15919_v59 = vmul.f32 %v15581_v4, %v15879_v25  ;;  %v1737_v22 = vmax.f32 %v1731_v31, %v1735_v30 }
 0x1ab   : >> { %v1490_v21 = vsel %vm564_vm2, %v17014_v15, %v17012_v48  ;;  %v1569_v41 = vmul.f32 %v15303_v43, %v16988_v6  ;;  %v15925_v23 = vmul.f32 %v15613_v55, %v15879_v25  ;;  %v15929_v60 = vmul.f32 %v15650_v1, %v15879_v25  ;;  %v1639_v43 = vpop.permute.xlu1 %1638 }
 0x1ac   : >> { %v1496_v53 = vadd.f32 %v1490_v21, %v1475_v8  ;;  %v1511_v16 = vsel %vm594_vm3, %v17018_v17, %v17016_v62  ;;  %v1520_v19 = vmul.f32 %v15495_v63, %v16969_v14  ;;  %v17019_v56 = vrot.slane %v15589_v3, 1  ;;  %1740 = vst [vmem:[%s15937_s14] sm:$0x1] %v1737_v22  ;;  %1741 = vst [vmem:[%s15937_s14 - $0x1] sm:$0x4] %v1737_v22  ;;  %v17021_v8 = vld [vmem:[#allocation47_spill] sm:$0xff] }
 0x1ad   : >> { %v1673_v31 = vrot.slane %v15919_v59, 2  ;;  %1742 = vst [vmem:[%s15937_s14 - $0x2] sm:$0x10] %v1737_v22  ;;  %1743 = vst [vmem:[%s15937_s14 - $0x3] sm:$0x40] %v1737_v22  ;;  %v1558_v11 = vrot.slane %v1548_v26, 2  ;;  %v1590_v63 = vmul.f32 %v15315_v37, %v16988_v6  ;;  %v1227_v29 = vsel %vm594_vm3, %v1224_v2, %v1226_v51 }
 0x1ae   : >> { %v1517_v27 = vadd.f32 %v1511_v16, %v1496_v53  ;;  %v1653_v13 = vsel %vm504_vm0, %v17019_v56, %v1652_v57  ;;  %v1694_v14 = vrot.slane %v15925_v23, 3  ;;  %v17020_v12 = vrot.slane %v15593_v40, 2  ;;  %v17023_v37 = vld [vmem:[#allocation53_spill] sm:$0xff]  ;;  %v17026_v26 = vld [vmem:[#allocation54_spill] sm:$0xff]  ;;  %v17028_v17 = vld [vmem:[#allocation55_spill] sm:$0xff] }
 0x1af   : >> { %v1660_v3 = vadd.f32 %v1653_v13, %v1634_v28  ;;  %v1715_v32 = vrot.slane %v15929_v60, 4  ;;  %v1234_v38 = vadd.f32 %v1227_v29, %v1205_v42  ;;  %v17022_v35 = vrot.slane %v17021_v8, 1 }
 0x1b0   : >> { %v1523_v49 = vadd.f32 %v1520_v19, %v1517_v27  ;;  %v1674_v39 = vsel %vm534_vm1, %v17020_v12, %v1673_v31  ;;  %v17024_v28 = vrot.slane %v17023_v37, 1  ;;  %v1579_v61 = vrot.slane %v1569_v41, 3 }
 0x1b1   : >> { %v1681_v48 = vadd.f32 %v1674_v39, %v1660_v3  ;;  %v1644_v58 = vmul.f32 %v15575_v9, %v1639_v43  ;;  %v1148_v34 = vadd.f32 %v1142_v5, %v1114_v10  ;;  %v17025_v15 = vrot.slane %v15643_v54, 3 }
 0x1b2   : >> { %v1538_v30 = vsel %vm504_vm0, %v17024_v28, %v17022_v35  ;;  %v1665_v21 = vmul.f32 %v15581_v4, %v1639_v43  ;;  %v17027_v42 = vrot.slane %v17026_v26, 2  ;;  %v1600_v18 = vrot.slane %v1590_v63, 4 }
 0x1b3   : >> { %v1544_v2 = vadd.f32 %v1538_v30, %v1523_v49  ;;  %v1695_v40 = vsel %vm564_vm2, %v17025_v15, %v1694_v14  ;;  %v1171_v50 = vsel %vm534_vm1, %v1168_v24, %v1170_v0  ;;  %v1199_v9 = vrot.slane %v15884_v44, 3  ;;  %v17030_v44 = vld [vmem:[#allocation56_spill] sm:$0xff] }
 0x1b4   : >> { %v1559_v53 = vsel %vm534_vm1, %v17027_v42, %v1558_v11  ;;  %v1702_v62 = vadd.f32 %v1695_v40, %v1681_v48  ;;  %v1716_v54 = vsel %vm594_vm3, %v1713_v47, %v1715_v32  ;;  %v1218_v4 = vmul.f32 %v15650_v1, %v16988_v6 }
 0x1b5   : >> { %v1565_v10 = vadd.f32 %v1559_v53, %v1544_v2  ;;  %v1243_v5 = vadd.f32 %v16993_v46, %v1234_v38  ;;  %v17029_v16 = vrot.slane %v17028_v17, 3  ;;  %v1177_v52 = vadd.f32 %v1171_v50, %v1148_v34 }
 0x1b6   : >> { %v1723_v22 = vadd.f32 %v1716_v54, %v1702_v62  ;;  %v1654_v24 = vrot.slane %v1644_v58, 1  ;;  %v1686_v0 = vmul.f32 %v15613_v55, %v1639_v43  ;;  %v17031_v23 = vrot.slane %v17030_v44, 4 }
 0x1b7   : >> { %v1580_v59 = vsel %vm564_vm2, %v17029_v16, %v1579_v61  ;;  %v1675_v60 = vrot.slane %v1665_v21, 2  ;;  %v1707_v6 = vmul.f32 %v15650_v1, %v1639_v43  ;;  %v1632_v19 = vmul.f32 %v16965_v33, %v15879_v25 }
 0x1b8   : >> { %v1586_v41 = vadd.f32 %v1580_v59, %v1565_v10  ;;  %v1601_v36 = vsel %vm594_vm3, %v17031_v23, %v1600_v18  ;;  %v1726_v47 = vadd.f32 %v16993_v46, %v1723_v22  ;;  %v1200_v56 = vsel %vm564_vm2, %v1197_v20, %v1199_v9 }
 0x1b9   : >> { %v1228_v13 = vrot.slane %v1218_v4, 4  ;;  %v1246_v11 = vmax.f32 %v1243_v5, 0.0  ;;  %v1206_v63 = vadd.f32 %v1200_v56, %v1177_v52  ;;  %v1696_v29 = vrot.slane %v1686_v0, 3 }
 0x1ba   : >> { %v1607_v27 = vadd.f32 %v1601_v36, %v1586_v41  ;;  %v1729_v55 = vmax.f32 %v1726_v47, 0.0  ;;  %v1655_v49 = vsel %vm504_vm0, %v1652_v57, %v1654_v24  ;;  %v1717_v12 = vrot.slane %v1707_v6, 4 }
 0x1bb   : >> { %v1229_v33 = vsel %vm594_vm3, %v1226_v51, %v1228_v13  ;;  %v1676_v7 = vsel %vm534_vm1, %v1673_v31, %v1675_v60  ;;  %v1697_v38 = vsel %vm564_vm2, %v1694_v14, %v1696_v29 }
 0x1bc   : >> { %v1635_v3 = vadd.f32 %v1632_v19, %v1607_v27  ;;  %v1732_v1 = vmax.f32 %v1246_v11, %v1729_v55  ;;  %v1235_v25 = vadd.f32 %v1229_v33, %v1206_v63  ;;  %v1718_v57 = vsel %vm594_vm3, %v1715_v32, %v1717_v12 }
 0x1be   : >> { %v1661_v43 = vadd.f32 %v1655_v49, %v1635_v3  ;;  %v1745_v20 = vrot.slane %v1732_v1, 1  ;;  %v1244_v45 = vadd.f32 %v16993_v46, %v1235_v25 }
 0x1c0   : >> { %v1682_v39 = vadd.f32 %v1676_v7, %v1661_v43  ;;  %v1747_v8 = vmax.f32 %v1732_v1, %v1745_v20  ;;  %v1247_v37 = vmax.f32 %v1244_v45, 0.0 }
 0x1c2   : >> { %v1703_v35 = vadd.f32 %v1697_v38, %v1682_v39  ;;  %1748 = vst [vmem:[%s15937_s14 + $0x4] sm:$0x1] %v1747_v8  ;;  %1749 = vst [vmem:[%s15937_s14 + $0x3] sm:$0x4] %v1747_v8 }
 0x1c3   : >> { %1750 = vst [vmem:[%s15937_s14 + $0x2] sm:$0x10] %v1747_v8  ;;  %1751 = vst [vmem:[%s15937_s14 + $0x1] sm:$0x40] %v1747_v8 }
 0x1c4   : >> { %v1724_v51 = vadd.f32 %v1718_v57, %v1703_v35 }
 0x1c6   : >> { %v1727_v31 = vadd.f32 %v16993_v46, %v1724_v51 }
 0x1c8   : >> { %v1730_v28 = vmax.f32 %v1727_v31, 0.0 }
 0x1ca   : >> { %v1733_v14 = vmax.f32 %v1247_v37, %v1730_v28 }
 0x1cc   : >> { %v1753_v30 = vrot.slane %v1733_v14, 1 }
 0x1cd   : > { %446 = sbr.rel (!%p444_p7) target bundleno = 153 (0x99), region = 218 }
 0x1ce   : >> { %v1755_v61 = vmax.f32 %v1733_v14, %v1753_v30 }
 0x1d0   : >> { %1756 = vst [vmem:[%s15937_s14 + $0x8] sm:$0x1] %v1755_v61  ;;  %1757 = vst [vmem:[%s15937_s14 + $0x7] sm:$0x4] %v1755_v61 }
 0x1d1   : >> { %1758 = vst [vmem:[%s15937_s14 + $0x6] sm:$0x10] %v1755_v61  ;;  %1759 = vst [vmem:[%s15937_s14 + $0x5] sm:$0x40] %v1755_v61 }
 0x1d2 LB: >> { %v13122_v32 = vld [vmem:[#allocation9 + $0x78] sm:$0xff]   ;;  %v14642_v48 = vmov 0.0   ;;  %v13124_v34 = vld [vmem:[#allocation9 + $0x70] sm:$0xff]   ;;  %vm14643_vm4 = vmmov 0   ;;  %v13126_v2 = vld [vmem:[#allocation9 + $0x68] sm:$0xff]   ;;  %s11474_s25 = sshll.u32 %s14626_s24, 5  ;;  %s14626_s24 = sphi %s16012_s24, %s1765_s24  }
 0x1d3   : >> { %11974 = vmatprep.subr.bf16.mxu0 %v14642_v48  ;;  %11994 = vmatprep.subr.bf16.mxu1 %v14642_v48  ;;  %v13123_v58 = vld [vmem:[#allocation9 + $0x38] sm:$0xff]   ;;  %v13125_v46 = vld [vmem:[#allocation9 + $0x30] sm:$0xff]   ;;  %v13127_v15 = vld [vmem:[#allocation9 + $0x28] sm:$0xff]   ;;  %s16036_s26 = scalar_lea.vmem [#allocation2], %s11474_s25  ;;  %s10920_s29 = sshll.u32 %s14626_s24, 2 }
 0x1d4   : >> { %11975 = vmatpush3.bf16.msra.mxu0 %v13122_v32  ;;  %11990 = vmatprep.mubr.msk.bf16.mxu0 %vm14643_vm4, %v14642_v48  ;;  %v13128_v40 = vld [vmem:[#allocation9 + $0x60] sm:$0xff]   ;;  %v13130_v26 = vld [vmem:[#allocation9 + $0x58] sm:$0xff]   ;;  %v13132_v53 = vld [vmem:[#allocation9 + $0x50] sm:$0xff]   ;;  %s5530_s27 = scalar_lea.vmem [#allocation3], %s10920_s29  ;;  %s1765_s24 = sadd.s32 1, %s14626_s24  }
 0x1d5   : >> { %11995 = vmatpush3.bf16.msra.mxu1 %v13123_v58  ;;  %11976 = vmatprep.subr.bf16.mxu0 %v14642_v48  ;;  %v13129_v21 = vld [vmem:[#allocation9 + $0x20] sm:$0xff]   ;;  %v13131_v42 = vld [vmem:[#allocation9 + $0x18] sm:$0xff]   ;;  %v13133_v18 = vld [vmem:[#allocation9 + $0x10] sm:$0xff]   ;;  %p1762_p5 = scmp.ge.s32.totalorder %s1765_s24, 4  }
 0x1d6   : >> { %11996 = vmatprep.subr.bf16.mxu1 %v14642_v48  ;;  %12010 = vmatprep.mubr.msk.bf16.mxu1 %vm14643_vm4, %v14642_v48  ;;  %v13134_v62 = vld [vmem:[#allocation9 + $0x48] sm:$0xff]   ;;  %v13136_v9 = vld [vmem:[#allocation9 + $0x40] sm:$0xff]   ;;  %v13138_v16 = vld [vmem:[#allocation9 + $0xb8] sm:$0xff]   ;;  %s11465_s23 = sshll.u32 (%p1762_p5), %s14717_s13, 4  ;;  %s10410_s28 = sshll.u32 (%p1762_p5), %s14871_s1, 4  ;;  %s10411_s28 = int_to_ptr.vmem [resolvable:$true] %s10410_s28 }
 0x1d7   : >> { %v13135_v50 = vld [vmem:[#allocation9 + $0x8] sm:$0xff]   ;;  %v13137_v10 = vld [vmem:[#allocation9] sm:$0xff]   ;;  %v13139_v59 = vld [vmem:[#allocation9 + $0xf8] sm:$0xff]   ;;  %s10408_s17 = scalar_lea.hbm (%p1762_p5), %s16825_s9, %s11465_s23  ;;  %s10398_s2 = scalar_lea.sflag (%p1762_p5), [#allocation6], %s432_s21 }
 0x1d8   : >> { %11977 = vmatpush3.bf16.msra.mxu0 %v13124_v34  ;;  %v1787_v54 = vld [vmem:[%s16036_s26 + $0x1] sm:$0xff]  ;;  %v13142_v41 = vld [vmem:[#allocation9 + $0xa8] sm:$0xff]   ;;  %v13144_v0 = vld [vmem:[#allocation9 + $0xa0] sm:$0xff]   ;;  %s14530_s14 = scalar_lea.vmem (%p1762_p5), %s10411_s28, 16  ;;  %p17033_p10 = scmp.ne.s32.totalorder (%p1762_p5), %s16874_s19, 0 }
 0x1d9   : >> { %11997 = vmatpush3.bf16.msra.mxu1 %v13125_v46  ;;  %11978 = vmatprep.subr.bf16.mxu0 %v14642_v48  ;;  %v1769_v4 = vld [vmem:[%s16036_s26] sm:$0xff]  ;;  %v1788_v5 = vpack.c.bf16 %v1787_v54, %v1787_v54  ;;  %v13143_v24 = vld [vmem:[#allocation9 + $0xe8] sm:$0xff]   ;;  %v13145_v44 = vld [vmem:[#allocation9 + $0xe0] sm:$0xff]   ;;  %p14531_p6 = scmp.ne.s32.totalorder (%p1762_p5), %s10411_s28, %s14530_s14  ;;  %s14645_s13 = smov (%p1762_p5), [#allocation18]  }
 0x1da   : >> { %11998 = vmatprep.subr.bf16.mxu1 %v14642_v48  ;;  %v1770_v17 = vpack.c.bf16 %v1769_v4, %v1769_v4  ;;  %v13140_v22 = vld [vmem:[#allocation9 + $0xb0] sm:$0xff]   ;;  %v13146_v23 = vld [vmem:[#allocation9 + $0x98] sm:$0xff]   ;;  %v13150_v6 = vld [vmem:[#allocation9 + $0x88] sm:$0xff]   ;;  %s14534_s24 = sshll.u32 (%p1762_p5), %s14645_s13, 4  ;;  %s14535_s24 = int_to_ptr.vmem [resolvable:$false] %s14534_s24 }
 0x1db   : >> { %v13141_v52 = vld [vmem:[#allocation9 + $0xf0] sm:$0xff]   ;;  %v13147_v36 = vld [vmem:[#allocation9 + $0xd8] sm:$0xff]   ;;  %v13151_v27 = vld [vmem:[#allocation9 + $0xc8] sm:$0xff]   ;;  %p14532_p13 = pnand (%p1762_p5), %p14531_p6, %p17033_p10  ;;  %s14536_s25 = scalar_lea.vmem (%p1762_p5), %s14535_s24, 32 }
 0x1dc   : >> { %11979 = vmatpush3.bf16.msra.mxu0 %v13126_v2  ;;  %v13148_v47 = vld [vmem:[#allocation9 + $0x90] sm:$0xff]   ;;  %v13152_v19 = vld [vmem:[#allocation9 + $0x80] sm:$0xff]   ;;  %v13154_v3 = vld [vmem:[#allocation9 + $0x138] sm:$0xff]   ;;  %p14537_p11 = scmp.lt.s32.totalorder (%p1762_p5), %s10411_s28, %s14535_s24  ;;  %p14538_p0 = scmp.lt.s32.totalorder (%p1762_p5), %s14536_s25, %s14530_s14 }
 0x1dd   : >> { %11999 = vmatpush3.bf16.msra.mxu1 %v13127_v15  ;;  %11980 = vmatprep.subr.bf16.mxu0 %v14642_v48  ;;  %v13149_v60 = vld [vmem:[#allocation9 + $0xd0] sm:$0xff]   ;;  %v13153_v56 = vld [vmem:[#allocation9 + $0xc0] sm:$0xff]   ;;  %v13155_v29 = vld [vmem:[#allocation9 + $0x178] sm:$0xff]   ;;  %p14533_p8 = pneg (%p1762_p5), %p14532_p13 }
 0x1de   : >> { %12000 = vmatprep.subr.bf16.mxu1 %v14642_v48  ;;  %v1982_v13 = vld [vmem:[%s16036_s26 + $0x2] sm:$0xff]  ;;  %v13158_v43 = vld [vmem:[#allocation9 + $0x128] sm:$0xff]   ;;  %v13160_v33 = vld [vmem:[#allocation9 + $0x120] sm:$0xff]   ;;  %p14539_p12 = por (%p1762_p5), %p14538_p0, %p14537_p11 }
 0x1df   : >> { %v2090_v11 = vld [vmem:[%s16036_s26 + $0x3] sm:$0xff]  ;;  %v1983_v55 = vpack.c.bf16 %v1982_v13, %v1982_v13  ;;  %v13159_v12 = vld [vmem:[#allocation9 + $0x168] sm:$0xff]   ;;  %v13161_v7 = vld [vmem:[#allocation9 + $0x160] sm:$0xff]  }
 0x1e0   : >> { %11981 = vmatpush3.bf16.msra.mxu0 %v13128_v40  ;;  %v2091_v63 = vpack.c.bf16 %v2090_v11, %v2090_v11  ;;  %v13156_v49 = vld [vmem:[#allocation9 + $0x130] sm:$0xff]   ;;  %v13162_v20 = vld [vmem:[#allocation9 + $0x118] sm:$0xff]   ;;  %v13166_v8 = vld [vmem:[#allocation9 + $0x108] sm:$0xff]   ;;  %p14540_p1 = pnand (%p1762_p5), %p14539_p12, %p14533_p8 }
 0x1e1   : >> { %12001 = vmatpush3.bf16.msra.mxu1 %v13129_v21  ;;  %11982 = vmatprep.subr.bf16.mxu0 %v14642_v48  ;;  %v13157_v1 = vld [vmem:[#allocation9 + $0x170] sm:$0xff]   ;;  %v13163_v25 = vld [vmem:[#allocation9 + $0x158] sm:$0xff]   ;;  %v13167_v35 = vld [vmem:[#allocation9 + $0x148] sm:$0xff]  }
 0x1e2   : >> { %12002 = vmatprep.subr.bf16.mxu1 %v14642_v48  ;;  %v13164_v39 = vld [vmem:[#allocation9 + $0x110] sm:$0xff]   ;;  %v13168_v57 = vld [vmem:[#allocation9 + $0x100] sm:$0xff]   ;;  %v2198_v51 = vld [vmem:[%s16036_s26 + $0x4] sm:$0xff] }
 0x1e3   : >> { %v13165_v38 = vld [vmem:[#allocation9 + $0x150] sm:$0xff]   ;;  %v13169_v45 = vld [vmem:[#allocation9 + $0x140] sm:$0xff]   ;;  %v2199_v37 = vpack.c.bf16 %v2198_v51, %v2198_v51  ;;  %v13170_v14 = vld [vmem:[#allocation9 + $0x1b8] sm:$0xff]  }
 0x1e4   : >> { %11983 = vmatpush3.bf16.msra.mxu0 %v13130_v26  ;;  %v10726_v31 = vld [vmem:[%s16036_s26 + $0x10] sm:$0xff]  ;;  %v13171_v30 = vld [vmem:[#allocation9 + $0x1f8] sm:$0xff]   ;;  %v13172_v61 = vld [vmem:[#allocation9 + $0x1b0] sm:$0xff]  }
 0x1e5   : >> { %12003 = vmatpush3.bf16.msra.mxu1 %v13131_v42  ;;  %11984 = vmatprep.subr.bf16.mxu0 %v14642_v48  ;;  %v16086_v28 = vpack.c.bf16 %v10726_v31, %v10726_v31  ;;  %v13173_v32 = vld [vmem:[#allocation9 + $0x1f0] sm:$0xff]   ;;  %v13174_v58 = vld [vmem:[#allocation9 + $0x1a8] sm:$0xff]   ;;  %v13176_v46 = vld [vmem:[#allocation9 + $0x1a0] sm:$0xff]  }
 0x1e6   : >> { %12004 = vmatprep.subr.bf16.mxu1 %v14642_v48  ;;  %v13175_v34 = vld [vmem:[#allocation9 + $0x1e8] sm:$0xff]   ;;  %v13177_v2 = vld [vmem:[#allocation9 + $0x1e0] sm:$0xff]   ;;  %v13178_v15 = vld [vmem:[#allocation9 + $0x198] sm:$0xff]  }
 0x1e7   : >> { %v13179_v40 = vld [vmem:[#allocation9 + $0x1d8] sm:$0xff]   ;;  %v13180_v21 = vld [vmem:[#allocation9 + $0x190] sm:$0xff]   ;;  %v13182_v42 = vld [vmem:[#allocation9 + $0x188] sm:$0xff]  }
 0x1e8   : >> { %11985 = vmatpush3.bf16.msra.mxu0 %v13132_v53  ;;  %v13181_v26 = vld [vmem:[#allocation9 + $0x1d0] sm:$0xff]   ;;  %v13183_v53 = vld [vmem:[#allocation9 + $0x1c8] sm:$0xff]   ;;  %v13186_v4 = vld [vmem:[#allocation9 + $0x238] sm:$0xff]  }
 0x1e9   : >> { %12005 = vmatpush3.bf16.msra.mxu1 %v13133_v18  ;;  %11986 = vmatprep.subr.bf16.mxu0 %v14642_v48  ;;  %v13184_v18 = vld [vmem:[#allocation9 + $0x180] sm:$0xff]   ;;  %v13202_v13 = vld [vmem:[#allocation9 + $0x2b8] sm:$0xff]  }
 0x1ea   : >> { %12006 = vmatprep.subr.bf16.mxu1 %v14642_v48  ;;  %v13218_v51 = vld [vmem:[#allocation9 + $0x338] sm:$0xff]  }
 0x1ec   : >> { %11987 = vmatpush3.bf16.msra.mxu0 %v13134_v62  ;;  %v13185_v62 = vld [vmem:[#allocation9 + $0x1c0] sm:$0xff]  }
 0x1ed   : >> { %12007 = vmatpush3.bf16.msra.mxu1 %v13135_v50  ;;  %11988 = vmatprep.subr.bf16.mxu0 %v14642_v48  ;;  %v10735_v50 = vld [vmem:[%s16036_s26 + $0x11] sm:$0xff] }
 0x1ee   : >> { %12008 = vmatprep.subr.bf16.mxu1 %v14642_v48 }
 0x1f0   : >> { %11989 = vmatpush3.bf16.msra.mxu0 %v13136_v9  ;;  %v10744_v9 = vld [vmem:[%s16036_s26 + $0x12] sm:$0xff] }
 0x1f1   : >> { %12009 = vmatpush3.bf16.msra.mxu1 %v13137_v10  ;;  %12014 = vmatprep.subr.bf16.mxu0 %v14642_v48  ;;  %v16111_v10 = vpack.c.bf16 %v10735_v50, %v10735_v50  ;;  %v16113_v54 = vpack.c.bf16 %v10744_v9, %v10744_v9 }
 0x1f2   : >> { %12034 = vmatprep.subr.bf16.mxu1 %v14642_v48 }
 0x1f3   : >> { %11991 = vmatmul.mubr.bf16.vlgmr.msra.gmra.mxu0 %v1788_v5  ;;  %v13187_v5 = vld [vmem:[#allocation9 + $0x278] sm:$0xff]  }
 0x1f4   : >> { %12011 = vmatmul.mubr.bf16.vlgmr.msra.gmra.mxu1 %v1770_v17  ;;  %12015 = vmatpush3.bf16.msra.mxu0 %v13138_v16  ;;  %v13188_v17 = vld [vmem:[#allocation9 + $0x230] sm:$0xff]  }
 0x1f5   : >> { %12035 = vmatpush3.bf16.msra.mxu1 %v13139_v59  ;;  %12016 = vmatprep.subr.bf16.mxu0 %v14642_v48  ;;  %v13189_v16 = vld [vmem:[#allocation9 + $0x270] sm:$0xff]   ;;  %v13190_v59 = vld [vmem:[#allocation9 + $0x228] sm:$0xff]  }
 0x1f6   : >> { %12036 = vmatprep.subr.bf16.mxu1 %v14642_v48  ;;  %12030 = vmatprep.mubr.msk.bf16.mxu0 %vm14643_vm4, %v14642_v48 }
 0x1f7   : >> { %12050 = vmatprep.mubr.msk.bf16.mxu1 %vm14643_vm4, %v14642_v48 }
 0x1f8   : >> { %12017 = vmatpush3.bf16.msra.mxu0 %v13140_v22  ;;  %v13191_v22 = vld [vmem:[#allocation9 + $0x268] sm:$0xff]  }
 0x1f9   : >> { %12037 = vmatpush3.bf16.msra.mxu1 %v13141_v52  ;;  %12018 = vmatprep.subr.bf16.mxu0 %v14642_v48  ;;  %v13192_v52 = vld [vmem:[#allocation9 + $0x220] sm:$0xff]  }
 0x1fa   : >> { %12038 = vmatprep.subr.bf16.mxu1 %v14642_v48 }
 0x1fc   : >> { %12019 = vmatpush3.bf16.msra.mxu0 %v13142_v41  ;;  %v13193_v41 = vld [vmem:[#allocation9 + $0x260] sm:$0xff]  }
 0x1fd   : >> { %12039 = vmatpush3.bf16.msra.mxu1 %v13143_v24  ;;  %12020 = vmatprep.subr.bf16.mxu0 %v14642_v48  ;;  %v13194_v24 = vld [vmem:[#allocation9 + $0x218] sm:$0xff]  }
 0x1fe   : >> { %12040 = vmatprep.subr.bf16.mxu1 %v14642_v48 }
 0x200   : >> { %12021 = vmatpush3.bf16.msra.mxu0 %v13144_v0  ;;  %v13195_v0 = vld [vmem:[#allocation9 + $0x258] sm:$0xff]  }
 0x201   : >> { %12041 = vmatpush3.bf16.msra.mxu1 %v13145_v44  ;;  %12022 = vmatprep.subr.bf16.mxu0 %v14642_v48  ;;  %v13196_v44 = vld [vmem:[#allocation9 + $0x210] sm:$0xff]  }
 0x202   : >> { %12042 = vmatprep.subr.bf16.mxu1 %v14642_v48 }
 0x204   : >> { %12023 = vmatpush3.bf16.msra.mxu0 %v13146_v23  ;;  %v13197_v23 = vld [vmem:[#allocation9 + $0x250] sm:$0xff]  }
 0x205   : >> { %12043 = vmatpush3.bf16.msra.mxu1 %v13147_v36  ;;  %12024 = vmatprep.subr.bf16.mxu0 %v14642_v48  ;;  %v13198_v36 = vld [vmem:[#allocation9 + $0x208] sm:$0xff]  }
 0x206   : >> { %12044 = vmatprep.subr.bf16.mxu1 %v14642_v48 }
 0x208   : >> { %12025 = vmatpush3.bf16.msra.mxu0 %v13148_v47  ;;  %v13199_v47 = vld [vmem:[#allocation9 + $0x248] sm:$0xff]  }
 0x209   : >> { %12045 = vmatpush3.bf16.msra.mxu1 %v13149_v60  ;;  %12026 = vmatprep.subr.bf16.mxu0 %v14642_v48  ;;  %v13200_v60 = vld [vmem:[#allocation9 + $0x200] sm:$0xff]  }
 0x20a   : >> { %12046 = vmatprep.subr.bf16.mxu1 %v14642_v48 }
 0x20c   : >> { %12027 = vmatpush3.bf16.msra.mxu0 %v13150_v6  ;;  %v10753_v6 = vld [vmem:[%s16036_s26 + $0x13] sm:$0xff] }
 0x20d   : >> { %12047 = vmatpush3.bf16.msra.mxu1 %v13151_v27  ;;  %12028 = vmatprep.subr.bf16.mxu0 %v14642_v48  ;;  %v13201_v27 = vld [vmem:[#allocation9 + $0x240] sm:$0xff]  }
 0x20e   : >> { %12048 = vmatprep.subr.bf16.mxu1 %v14642_v48 }
 0x210   : >> { %12029 = vmatpush3.bf16.msra.mxu0 %v13152_v19  ;;  %v10762_v19 = vld [vmem:[%s16036_s26 + $0x14] sm:$0xff] }
 0x211   : >> { %12049 = vmatpush3.bf16.msra.mxu1 %v13153_v56  ;;  %12054 = vmatprep.subr.bf16.mxu0 %v14642_v48  ;;  %v16139_v56 = vpack.c.bf16 %v10753_v6, %v10753_v6  ;;  %v16141_v11 = vpack.c.bf16 %v10762_v19, %v10762_v19  ;;  %v13240_v6 = vld [vmem:[#allocation9 + $0x3a0] sm:$0xff]   ;;  %v13242_v19 = vld [vmem:[#allocation9 + $0x398] sm:$0xff]  }
 0x212   : >> { %12074 = vmatprep.subr.bf16.mxu1 %v14642_v48 }
 0x213   : >> { %12031 = vmatmul.mubr.bf16.vlgmr.msra.gmra.mxu0 %v1983_v55  ;;  %v13203_v55 = vld [vmem:[#allocation9 + $0x2f8] sm:$0xff]  }
 0x214   : >> { %12051 = vmatmul.mubr.bf16.vlgmr.msra.gmra.mxu1 %v2091_v63  ;;  %12055 = vmatpush3.bf16.msra.mxu0 %v13154_v3  ;;  %v13204_v63 = vld [vmem:[#allocation9 + $0x2b0] sm:$0xff]  }
 0x215   : >> { %12075 = vmatpush3.bf16.msra.mxu1 %v13155_v29  ;;  %12056 = vmatprep.subr.bf16.mxu0 %v14642_v48  ;;  %v13205_v3 = vld [vmem:[#allocation9 + $0x2f0] sm:$0xff]   ;;  %v13206_v29 = vld [vmem:[#allocation9 + $0x2a8] sm:$0xff]  }
 0x216   : >> { %12076 = vmatprep.subr.bf16.mxu1 %v14642_v48  ;;  %12070 = vmatprep.mubr.msk.bf16.mxu0 %vm14643_vm4, %v14642_v48 }
 0x217   : >> { %12090 = vmatprep.mubr.msk.bf16.mxu1 %vm14643_vm4, %v14642_v48 }
 0x218   : >> { %12057 = vmatpush3.bf16.msra.mxu0 %v13156_v49  ;;  %v13207_v49 = vld [vmem:[#allocation9 + $0x2e8] sm:$0xff]  }
 0x219   : >> { %12077 = vmatpush3.bf16.msra.mxu1 %v13157_v1  ;;  %12058 = vmatprep.subr.bf16.mxu0 %v14642_v48  ;;  %v13208_v1 = vld [vmem:[#allocation9 + $0x2a0] sm:$0xff]  }
 0x21a   : >> { %12078 = vmatprep.subr.bf16.mxu1 %v14642_v48 }
 0x21c   : >> { %12059 = vmatpush3.bf16.msra.mxu0 %v13158_v43  ;;  %v13209_v43 = vld [vmem:[#allocation9 + $0x2e0] sm:$0xff]  }
 0x21d   : >> { %12079 = vmatpush3.bf16.msra.mxu1 %v13159_v12  ;;  %12060 = vmatprep.subr.bf16.mxu0 %v14642_v48  ;;  %v13210_v12 = vld [vmem:[#allocation9 + $0x298] sm:$0xff]  }
 0x21e   : >> { %12080 = vmatprep.subr.bf16.mxu1 %v14642_v48 }
 0x220   : >> { %12061 = vmatpush3.bf16.msra.mxu0 %v13160_v33  ;;  %v13211_v33 = vld [vmem:[#allocation9 + $0x2d8] sm:$0xff]  }
 0x221   : >> { %12081 = vmatpush3.bf16.msra.mxu1 %v13161_v7  ;;  %12062 = vmatprep.subr.bf16.mxu0 %v14642_v48  ;;  %v13212_v7 = vld [vmem:[#allocation9 + $0x290] sm:$0xff]  }
 0x222   : >> { %12082 = vmatprep.subr.bf16.mxu1 %v14642_v48 }
 0x224   : >> { %12063 = vmatpush3.bf16.msra.mxu0 %v13162_v20  ;;  %v13213_v20 = vld [vmem:[#allocation9 + $0x2d0] sm:$0xff]  }
 0x225   : >> { %12083 = vmatpush3.bf16.msra.mxu1 %v13163_v25  ;;  %12064 = vmatprep.subr.bf16.mxu0 %v14642_v48  ;;  %v13214_v25 = vld [vmem:[#allocation9 + $0x288] sm:$0xff]  }
 0x226   : >> { %12084 = vmatprep.subr.bf16.mxu1 %v14642_v48 }
 0x228   : >> { %12065 = vmatpush3.bf16.msra.mxu0 %v13164_v39  ;;  %v13215_v39 = vld [vmem:[#allocation9 + $0x2c8] sm:$0xff]  }
 0x229   : >> { %12085 = vmatpush3.bf16.msra.mxu1 %v13165_v38  ;;  %12066 = vmatprep.subr.bf16.mxu0 %v14642_v48  ;;  %v13216_v38 = vld [vmem:[#allocation9 + $0x280] sm:$0xff]  }
 0x22a   : >> { %12086 = vmatprep.subr.bf16.mxu1 %v14642_v48 }
 0x22c   : >> { %12067 = vmatpush3.bf16.msra.mxu0 %v13166_v8  ;;  %v10773_v8 = vld [vmem:[%s16036_s26 + $0x20] sm:$0xff] }
 0x22d   : >> { %12087 = vmatpush3.bf16.msra.mxu1 %v13167_v35  ;;  %12068 = vmatprep.subr.bf16.mxu0 %v14642_v48  ;;  %v13217_v35 = vld [vmem:[#allocation9 + $0x2c0] sm:$0xff]  }
 0x22e   : >> { %12088 = vmatprep.subr.bf16.mxu1 %v14642_v48 }
 0x230   : >> { %12069 = vmatpush3.bf16.msra.mxu0 %v13168_v57  ;;  %v10782_v57 = vld [vmem:[%s16036_s26 + $0x21] sm:$0xff] }
 0x231   : >> { %12089 = vmatpush3.bf16.msra.mxu1 %v13169_v45  ;;  %12094 = vmatprep.subr.bf16.mxu0 %v14642_v48  ;;  %v16167_v45 = vpack.c.bf16 %v10773_v8, %v10773_v8  ;;  %v16169_v31 = vpack.c.bf16 %v10782_v57, %v10782_v57 }
 0x232   : >> { %12114 = vmatprep.subr.bf16.mxu1 %v14642_v48 }
 0x233   : >> { %12071 = vmatmul.mubr.bf16.vlgmr.msra.gmra.mxu0 %v2199_v37  ;;  %v13219_v37 = vld [vmem:[#allocation9 + $0x378] sm:$0xff]  }
 0x234   : >> { %12091 = vmatmul.mubr.bf16.vlgmr.msra.gmra.mxu1 %v16086_v28  ;;  %12095 = vmatpush3.bf16.msra.mxu0 %v13170_v14  ;;  %v13220_v14 = vld [vmem:[#allocation9 + $0x330] sm:$0xff]  }
 0x235   : >> { %12115 = vmatpush3.bf16.msra.mxu1 %v13171_v30  ;;  %12096 = vmatprep.subr.bf16.mxu0 %v14642_v48  ;;  %v13221_v30 = vld [vmem:[#allocation9 + $0x370] sm:$0xff]  }
 0x236   : >> { %12116 = vmatprep.subr.bf16.mxu1 %v14642_v48  ;;  %12110 = vmatprep.mubr.msk.bf16.mxu0 %vm14643_vm4, %v14642_v48 }
 0x237   : >> { %12130 = vmatprep.mubr.msk.bf16.mxu1 %vm14643_vm4, %v14642_v48 }
 0x238   : >> { %12097 = vmatpush3.bf16.msra.mxu0 %v13172_v61  ;;  %v13222_v61 = vld [vmem:[#allocation9 + $0x328] sm:$0xff]  }
 0x239   : >> { %12117 = vmatpush3.bf16.msra.mxu1 %v13173_v32  ;;  %12098 = vmatprep.subr.bf16.mxu0 %v14642_v48  ;;  %v13223_v32 = vld [vmem:[#allocation9 + $0x368] sm:$0xff]  }
 0x23a   : >> { %12118 = vmatprep.subr.bf16.mxu1 %v14642_v48 }
 0x23c   : >> { %12099 = vmatpush3.bf16.msra.mxu0 %v13174_v58  ;;  %v13224_v58 = vld [vmem:[#allocation9 + $0x320] sm:$0xff]  }
 0x23d   : >> { %12119 = vmatpush3.bf16.msra.mxu1 %v13175_v34  ;;  %12100 = vmatprep.subr.bf16.mxu0 %v14642_v48  ;;  %v13225_v34 = vld [vmem:[#allocation9 + $0x360] sm:$0xff]  }
 0x23e   : >> { %12120 = vmatprep.subr.bf16.mxu1 %v14642_v48 }
 0x240   : >> { %12101 = vmatpush3.bf16.msra.mxu0 %v13176_v46  ;;  %v13226_v46 = vld [vmem:[#allocation9 + $0x318] sm:$0xff]  }
 0x241   : >> { %12121 = vmatpush3.bf16.msra.mxu1 %v13177_v2  ;;  %12102 = vmatprep.subr.bf16.mxu0 %v14642_v48  ;;  %v13227_v2 = vld [vmem:[#allocation9 + $0x358] sm:$0xff]  }
 0x242   : >> { %12122 = vmatprep.subr.bf16.mxu1 %v14642_v48 }
 0x244   : >> { %12103 = vmatpush3.bf16.msra.mxu0 %v13178_v15  ;;  %v13228_v15 = vld [vmem:[#allocation9 + $0x310] sm:$0xff]  }
 0x245   : >> { %12123 = vmatpush3.bf16.msra.mxu1 %v13179_v40  ;;  %12104 = vmatprep.subr.bf16.mxu0 %v14642_v48  ;;  %v13229_v40 = vld [vmem:[#allocation9 + $0x350] sm:$0xff]  }
 0x246   : >> { %12124 = vmatprep.subr.bf16.mxu1 %v14642_v48 }
 0x248   : >> { %12105 = vmatpush3.bf16.msra.mxu0 %v13180_v21  ;;  %v13230_v21 = vld [vmem:[#allocation9 + $0x308] sm:$0xff]  }
 0x249   : >> { %12125 = vmatpush3.bf16.msra.mxu1 %v13181_v26  ;;  %12106 = vmatprep.subr.bf16.mxu0 %v14642_v48  ;;  %v13231_v26 = vld [vmem:[#allocation9 + $0x348] sm:$0xff]  }
 0x24a   : >> { %12126 = vmatprep.subr.bf16.mxu1 %v14642_v48 }
 0x24c   : >> { %12107 = vmatpush3.bf16.msra.mxu0 %v13182_v42  ;;  %v13232_v42 = vld [vmem:[#allocation9 + $0x300] sm:$0xff]  }
 0x24d   : >> { %12127 = vmatpush3.bf16.msra.mxu1 %v13183_v53  ;;  %12108 = vmatprep.subr.bf16.mxu0 %v14642_v48  ;;  %v10791_v53 = vld [vmem:[%s16036_s26 + $0x22] sm:$0xff] }
 0x24e   : >> { %12128 = vmatprep.subr.bf16.mxu1 %v14642_v48  ;;  %v16195_v50 = vpack.c.bf16 %v10791_v53, %v10791_v53  ;;  %v13262_v53 = vld [vmem:[#allocation9 + $0x408] sm:$0xff]  }
 0x250   : >> { %12109 = vmatpush3.bf16.msra.mxu0 %v13184_v18  ;;  %v13233_v18 = vld [vmem:[#allocation9 + $0x340] sm:$0xff]  }
 0x251   : >> { %12129 = vmatpush3.bf16.msra.mxu1 %v13185_v62  ;;  %12134 = vmatprep.subr.bf16.mxu0 %v14642_v48  ;;  %v10800_v62 = vld [vmem:[%s16036_s26 + $0x23] sm:$0xff] }
 0x252   : >> { %12154 = vmatprep.subr.bf16.mxu1 %v14642_v48  ;;  %v16197_v9 = vpack.c.bf16 %v10800_v62, %v10800_v62  ;;  %v13264_v62 = vld [vmem:[#allocation9 + $0x400] sm:$0xff]  }
 0x253   : >> { %12111 = vmatmul.mubr.bf16.vlgmr.msra.gmra.mxu0 %v16111_v10 }
 0x254   : >> { %12131 = vmatmul.mubr.bf16.vlgmr.msra.gmra.mxu1 %v16113_v54  ;;  %12135 = vmatpush3.bf16.msra.mxu0 %v13186_v4  ;;  %v13234_v4 = vld [vmem:[#allocation9 + $0x3b8] sm:$0xff]  }
 0x255   : >> { %12155 = vmatpush3.bf16.msra.mxu1 %v13187_v5  ;;  %12136 = vmatprep.subr.bf16.mxu0 %v14642_v48  ;;  %v13235_v5 = vld [vmem:[#allocation9 + $0x3f8] sm:$0xff]  }
 0x256   : >> { %12156 = vmatprep.subr.bf16.mxu1 %v14642_v48  ;;  %12150 = vmatprep.mubr.msk.bf16.mxu0 %vm14643_vm4, %v14642_v48 }
 0x257   : >> { %12170 = vmatprep.mubr.msk.bf16.mxu1 %vm14643_vm4, %v14642_v48 }
 0x258   : >> { %12137 = vmatpush3.bf16.msra.mxu0 %v13188_v17 }
 0x259   : >> { %12157 = vmatpush3.bf16.msra.mxu1 %v13189_v16  ;;  %12138 = vmatprep.subr.bf16.mxu0 %v14642_v48 }
 0x25a   : >> { %12158 = vmatprep.subr.bf16.mxu1 %v14642_v48 }
 0x25c   : >> { %12139 = vmatpush3.bf16.msra.mxu0 %v13190_v59  ;;  %v13236_v59 = vld [vmem:[#allocation9 + $0x3b0] sm:$0xff]  }
 0x25d   : >> { %12159 = vmatpush3.bf16.msra.mxu1 %v13191_v22  ;;  %12140 = vmatprep.subr.bf16.mxu0 %v14642_v48 }
 0x25e   : >> { %12160 = vmatprep.subr.bf16.mxu1 %v14642_v48 }
 0x260   : >> { %12141 = vmatpush3.bf16.msra.mxu0 %v13192_v52 }
 0x261   : >> { %12161 = vmatpush3.bf16.msra.mxu1 %v13193_v41  ;;  %12142 = vmatprep.subr.bf16.mxu0 %v14642_v48  ;;  %v13237_v41 = vld [vmem:[#allocation9 + $0x3f0] sm:$0xff]  }
 0x262   : >> { %12162 = vmatprep.subr.bf16.mxu1 %v14642_v48 }
 0x264   : >> { %12143 = vmatpush3.bf16.msra.mxu0 %v13194_v24 }
 0x265   : >> { %12163 = vmatpush3.bf16.msra.mxu1 %v13195_v0  ;;  %12144 = vmatprep.subr.bf16.mxu0 %v14642_v48 }
 0x266   : >> { %12164 = vmatprep.subr.bf16.mxu1 %v14642_v48 }
 0x268   : >> { %12145 = vmatpush3.bf16.msra.mxu0 %v13196_v44 }
 0x269   : >> { %12165 = vmatpush3.bf16.msra.mxu1 %v13197_v23  ;;  %12146 = vmatprep.subr.bf16.mxu0 %v14642_v48  ;;  %v13238_v23 = vld [vmem:[#allocation9 + $0x3a8] sm:$0xff]  }
 0x26a   : >> { %12166 = vmatprep.subr.bf16.mxu1 %v14642_v48 }
 0x26c   : >> { %12147 = vmatpush3.bf16.msra.mxu0 %v13198_v36 }
 0x26d   : >> { %12167 = vmatpush3.bf16.msra.mxu1 %v13199_v47  ;;  %12148 = vmatprep.subr.bf16.mxu0 %v14642_v48  ;;  %v13239_v47 = vld [vmem:[#allocation9 + $0x3e8] sm:$0xff]  }
 0x26e   : >> { %12168 = vmatprep.subr.bf16.mxu1 %v14642_v48 }
 0x270   : >> { %12149 = vmatpush3.bf16.msra.mxu0 %v13200_v60 }
 0x271   : >> { %12169 = vmatpush3.bf16.msra.mxu1 %v13201_v27  ;;  %12174 = vmatprep.subr.bf16.mxu0 %v14642_v48  ;;  %v13241_v27 = vld [vmem:[#allocation9 + $0x3e0] sm:$0xff]  }
 0x272   : >> { %12194 = vmatprep.subr.bf16.mxu1 %v14642_v48 }
 0x273   : >> { %12151 = vmatmul.mubr.bf16.vlgmr.msra.gmra.mxu0 %v16139_v56 }
 0x274   : >> { %12171 = vmatmul.mubr.bf16.vlgmr.msra.gmra.mxu1 %v16141_v11  ;;  %12175 = vmatpush3.bf16.msra.mxu0 %v13202_v13  ;;  %v13243_v13 = vld [vmem:[#allocation9 + $0x3d8] sm:$0xff]  }
 0x275   : >> { %12195 = vmatpush3.bf16.msra.mxu1 %v13203_v55  ;;  %12176 = vmatprep.subr.bf16.mxu0 %v14642_v48  ;;  %v13244_v55 = vld [vmem:[#allocation9 + $0x390] sm:$0xff]  }
 0x276   : >> { %12196 = vmatprep.subr.bf16.mxu1 %v14642_v48  ;;  %12190 = vmatprep.mubr.msk.bf16.mxu0 %vm14643_vm4, %v14642_v48 }
 0x277   : >> { %12210 = vmatprep.mubr.msk.bf16.mxu1 %vm14643_vm4, %v14642_v48 }
 0x278   : >> { %12177 = vmatpush3.bf16.msra.mxu0 %v13204_v63  ;;  %v13245_v63 = vld [vmem:[#allocation9 + $0x3d0] sm:$0xff]  }
 0x279   : >> { %12197 = vmatpush3.bf16.msra.mxu1 %v13205_v3  ;;  %12178 = vmatprep.subr.bf16.mxu0 %v14642_v48  ;;  %v13246_v3 = vld [vmem:[#allocation9 + $0x388] sm:$0xff]  }
 0x27a   : >> { %12198 = vmatprep.subr.bf16.mxu1 %v14642_v48 }
 0x27c   : >> { %12179 = vmatpush3.bf16.msra.mxu0 %v13206_v29  ;;  %v13247_v29 = vld [vmem:[#allocation9 + $0x3c8] sm:$0xff]  }
 0x27d   : >> { %12199 = vmatpush3.bf16.msra.mxu1 %v13207_v49  ;;  %12180 = vmatprep.subr.bf16.mxu0 %v14642_v48  ;;  %v13248_v49 = vld [vmem:[#allocation9 + $0x380] sm:$0xff]  }
 0x27e   : >> { %12200 = vmatprep.subr.bf16.mxu1 %v14642_v48 }
 0x280   : >> { %12181 = vmatpush3.bf16.msra.mxu0 %v13208_v1  ;;  %v10809_v1 = vld [vmem:[%s16036_s26 + $0x24] sm:$0xff] }
 0x281   : >> { %12201 = vmatpush3.bf16.msra.mxu1 %v13209_v43  ;;  %12182 = vmatprep.subr.bf16.mxu0 %v14642_v48  ;;  %v13249_v43 = vld [vmem:[#allocation9 + $0x3c0] sm:$0xff]  }
 0x282   : >> { %12202 = vmatprep.subr.bf16.mxu1 %v14642_v48 }
 0x284   : >> { %12183 = vmatpush3.bf16.msra.mxu0 %v13210_v12  ;;  %v10820_v12 = vld [vmem:[%s16036_s26 + $0x30] sm:$0xff] }
 0x285   : >> { %12203 = vmatpush3.bf16.msra.mxu1 %v13211_v33  ;;  %12184 = vmatprep.subr.bf16.mxu0 %v14642_v48  ;;  %v16223_v33 = vpack.c.bf16 %v10809_v1, %v10809_v1  ;;  %v13275_v1 = vld [vmem:[#allocation9 + $0x4d8] sm:$0xff]  }
 0x286   : >> { %12204 = vmatprep.subr.bf16.mxu1 %v14642_v48 }
 0x288   : >> { %12185 = vmatpush3.bf16.msra.mxu0 %v13212_v7  ;;  %v16225_v7 = vpack.c.bf16 %v10820_v12, %v10820_v12  ;;  %v13277_v12 = vld [vmem:[#allocation9 + $0x4d0] sm:$0xff]  }
 0x289   : >> { %12205 = vmatpush3.bf16.msra.mxu1 %v13213_v20  ;;  %12186 = vmatprep.subr.bf16.mxu0 %v14642_v48  ;;  %v13250_v20 = vld [vmem:[#allocation9 + $0x438] sm:$0xff]  }
 0x28a   : >> { %12206 = vmatprep.subr.bf16.mxu1 %v14642_v48 }
 0x28c   : >> { %12187 = vmatpush3.bf16.msra.mxu0 %v13214_v25  ;;  %v13251_v25 = vld [vmem:[#allocation9 + $0x478] sm:$0xff]  }
 0x28d   : >> { %12207 = vmatpush3.bf16.msra.mxu1 %v13215_v39  ;;  %12188 = vmatprep.subr.bf16.mxu0 %v14642_v48 }
 0x28e   : >> { %12208 = vmatprep.subr.bf16.mxu1 %v14642_v48 }
 0x290   : >> { %12189 = vmatpush3.bf16.msra.mxu0 %v13216_v38 }
 0x291   : >> { %12209 = vmatpush3.bf16.msra.mxu1 %v13217_v35  ;;  %12214 = vmatprep.subr.bf16.mxu0 %v14642_v48  ;;  %v13252_v35 = vld [vmem:[#allocation9 + $0x430] sm:$0xff]  }
 0x292   : >> { %12234 = vmatprep.subr.bf16.mxu1 %v14642_v48 }
 0x293   : >> { %12191 = vmatmul.mubr.bf16.vlgmr.msra.gmra.mxu0 %v16167_v45 }
 0x294   : >> { %12211 = vmatmul.mubr.bf16.vlgmr.msra.gmra.mxu1 %v16169_v31  ;;  %12215 = vmatpush3.bf16.msra.mxu0 %v13218_v51  ;;  %v13253_v51 = vld [vmem:[#allocation9 + $0x470] sm:$0xff]  }
 0x295   : >> { %12235 = vmatpush3.bf16.msra.mxu1 %v13219_v37  ;;  %12216 = vmatprep.subr.bf16.mxu0 %v14642_v48 }
 0x296   : >> { %12236 = vmatprep.subr.bf16.mxu1 %v14642_v48  ;;  %12230 = vmatprep.mubr.msk.bf16.mxu0 %vm14643_vm4, %v14642_v48 }
 0x297   : >> { %12250 = vmatprep.mubr.msk.bf16.mxu1 %vm14643_vm4, %v14642_v48 }
 0x298   : >> { %12217 = vmatpush3.bf16.msra.mxu0 %v13220_v14 }
 0x299   : >> { %12237 = vmatpush3.bf16.msra.mxu1 %v13221_v30  ;;  %12218 = vmatprep.subr.bf16.mxu0 %v14642_v48 }
 0x29a   : >> { %12238 = vmatprep.subr.bf16.mxu1 %v14642_v48 }
 0x29c   : >> { %12219 = vmatpush3.bf16.msra.mxu0 %v13222_v61 }
 0x29d   : >> { %12239 = vmatpush3.bf16.msra.mxu1 %v13223_v32  ;;  %12220 = vmatprep.subr.bf16.mxu0 %v14642_v48  ;;  %v13254_v32 = vld [vmem:[#allocation9 + $0x428] sm:$0xff]  }
 0x29e   : >> { %12240 = vmatprep.subr.bf16.mxu1 %v14642_v48 }
 0x2a0   : >> { %12221 = vmatpush3.bf16.msra.mxu0 %v13224_v58 }
 0x2a1   : >> { %12241 = vmatpush3.bf16.msra.mxu1 %v13225_v34  ;;  %12222 = vmatprep.subr.bf16.mxu0 %v14642_v48  ;;  %v13255_v34 = vld [vmem:[#allocation9 + $0x468] sm:$0xff]  }
 0x2a2   : >> { %12242 = vmatprep.subr.bf16.mxu1 %v14642_v48 }
 0x2a4   : >> { %12223 = vmatpush3.bf16.msra.mxu0 %v13226_v46 }
 0x2a5   : >> { %12243 = vmatpush3.bf16.msra.mxu1 %v13227_v2  ;;  %12224 = vmatprep.subr.bf16.mxu0 %v14642_v48  ;;  %v13256_v2 = vld [vmem:[#allocation9 + $0x420] sm:$0xff]  }
 0x2a6   : >> { %12244 = vmatprep.subr.bf16.mxu1 %v14642_v48 }
 0x2a8   : >> { %12225 = vmatpush3.bf16.msra.mxu0 %v13228_v15  ;;  %v13257_v15 = vld [vmem:[#allocation9 + $0x460] sm:$0xff]  }
 0x2a9   : >> { %12245 = vmatpush3.bf16.msra.mxu1 %v13229_v40  ;;  %12226 = vmatprep.subr.bf16.mxu0 %v14642_v48  ;;  %v13258_v40 = vld [vmem:[#allocation9 + $0x418] sm:$0xff]  }
 0x2aa   : >> { %12246 = vmatprep.subr.bf16.mxu1 %v14642_v48 }
 0x2ac   : >> { %12227 = vmatpush3.bf16.msra.mxu0 %v13230_v21  ;;  %v13259_v21 = vld [vmem:[#allocation9 + $0x458] sm:$0xff]  }
 0x2ad   : >> { %12247 = vmatpush3.bf16.msra.mxu1 %v13231_v26  ;;  %12228 = vmatprep.subr.bf16.mxu0 %v14642_v48  ;;  %v13260_v26 = vld [vmem:[#allocation9 + $0x410] sm:$0xff]  }
 0x2ae   : >> { %12248 = vmatprep.subr.bf16.mxu1 %v14642_v48 }
 0x2b0   : >> { %12229 = vmatpush3.bf16.msra.mxu0 %v13232_v42  ;;  %v13261_v42 = vld [vmem:[#allocation9 + $0x450] sm:$0xff]  }
 0x2b1   : >> { %12249 = vmatpush3.bf16.msra.mxu1 %v13233_v18  ;;  %12254 = vmatprep.subr.bf16.mxu0 %v14642_v48  ;;  %v13263_v18 = vld [vmem:[#allocation9 + $0x448] sm:$0xff]  }
 0x2b2   : >> { %12274 = vmatprep.subr.bf16.mxu1 %v14642_v48 }
 0x2b3   : >> { %v1888_v17 = vpop.f32.mrf.mxu0  ;;  %12231 = vmatmul.mubr.bf16.vlgmr.msra.gmra.mxu0 %v16195_v50 }
 0x2b4   : >> { %v1976_v16 = vpop.f32.mrf.mxu1  ;;  %12251 = vmatmul.mubr.bf16.vlgmr.msra.gmra.mxu1 %v16197_v9  ;;  %12255 = vmatpush3.bf16.msra.mxu0 %v13234_v4  ;;  %v10829_v4 = vld [vmem:[%s16036_s26 + $0x31] sm:$0xff] }
 0x2b5   : >> { %v1977_v22 = vadd.f32 %v1976_v16, %v1888_v17  ;;  %12275 = vmatpush3.bf16.msra.mxu1 %v13235_v5  ;;  %v11992_v52 = vpop.f32.mrf.mxu0  ;;  %12256 = vmatprep.subr.bf16.mxu0 %v14642_v48  ;;  %v13265_v5 = vld [vmem:[#allocation9 + $0x440] sm:$0xff]   ;;  %v16251_v16 = vpack.c.bf16 %v10829_v4, %v10829_v4 }
 0x2b6   : >> { %v12012_v24 = vpop.f32.mrf.mxu1  ;;  %12276 = vmatprep.subr.bf16.mxu1 %v14642_v48  ;;  %12270 = vmatprep.mubr.msk.bf16.mxu0 %vm14643_vm4, %v14642_v48  ;;  %v10838_v17 = vld [vmem:[%s16036_s26 + $0x32] sm:$0xff]  ;;  %v13267_v52 = vld [vmem:[#allocation9 + $0x4f8] sm:$0xff]  }
 0x2b7   : >> { %v1891_v0 = vpop.f32.mrf.mxu0  ;;  %12290 = vmatprep.mubr.msk.bf16.mxu1 %vm14643_vm4, %v14642_v48  ;;  %v13289_v4 = vld [vmem:[#allocation9 + $0x560] sm:$0xff]  }
 0x2b8   : >> { %v1979_v44 = vpop.f32.mrf.mxu1  ;;  %12257 = vmatpush3.bf16.msra.mxu0 %v13236_v59  ;;  %v16253_v59 = vpack.c.bf16 %v10838_v17, %v10838_v17  ;;  %v13291_v17 = vld [vmem:[#allocation9 + $0x558] sm:$0xff]  }
 0x2b9   : >> { %12277 = vmatpush3.bf16.msra.mxu1 %v13237_v41  ;;  %v11993_v36 = vpop.f32.mrf.mxu0  ;;  %12258 = vmatprep.subr.bf16.mxu0 %v14642_v48  ;;  %v13268_v44 = vld [vmem:[#allocation9 + $0x4b0] sm:$0xff]  }
 0x2ba   : >> { %v12013_v60 = vpop.f32.mrf.mxu1  ;;  %12278 = vmatprep.subr.bf16.mxu1 %v14642_v48  ;;  %v13269_v36 = vld [vmem:[#allocation9 + $0x4f0] sm:$0xff]  }
 0x2bc   : >> { %12259 = vmatpush3.bf16.msra.mxu0 %v13238_v23 }
 0x2bd   : >> { %12279 = vmatpush3.bf16.msra.mxu1 %v13239_v47  ;;  %12260 = vmatprep.subr.bf16.mxu0 %v14642_v48 }
 0x2be   : >> { %12280 = vmatprep.subr.bf16.mxu1 %v14642_v48 }
 0x2c0   : >> { %12261 = vmatpush3.bf16.msra.mxu0 %v13240_v6 }
 0x2c1   : >> { %12281 = vmatpush3.bf16.msra.mxu1 %v13241_v27  ;;  %12262 = vmatprep.subr.bf16.mxu0 %v14642_v48 }
 0x2c2   : >> { %12282 = vmatprep.subr.bf16.mxu1 %v14642_v48 }
 0x2c4   : >> { %12263 = vmatpush3.bf16.msra.mxu0 %v13242_v19  ;;  %v13270_v19 = vld [vmem:[#allocation9 + $0x4a8] sm:$0xff]  }
 0x2c5   : >> { %12283 = vmatpush3.bf16.msra.mxu1 %v13243_v13  ;;  %12264 = vmatprep.subr.bf16.mxu0 %v14642_v48 }
 0x2c6   : >> { %12284 = vmatprep.subr.bf16.mxu1 %v14642_v48 }
 0x2c8   : >> { %12265 = vmatpush3.bf16.msra.mxu0 %v13244_v55  ;;  %v13271_v55 = vld [vmem:[#allocation9 + $0x4e8] sm:$0xff]  }
 0x2c9   : >> { %12285 = vmatpush3.bf16.msra.mxu1 %v13245_v63  ;;  %12266 = vmatprep.subr.bf16.mxu0 %v14642_v48 }
 0x2ca   : >> { %12286 = vmatprep.subr.bf16.mxu1 %v14642_v48 }
 0x2cc   : >> { %12267 = vmatpush3.bf16.msra.mxu0 %v13246_v3  ;;  %v13272_v3 = vld [vmem:[#allocation9 + $0x4a0] sm:$0xff]  }
 0x2cd   : >> { %12287 = vmatpush3.bf16.msra.mxu1 %v13247_v29  ;;  %12268 = vmatprep.subr.bf16.mxu0 %v14642_v48  ;;  %v13273_v29 = vld [vmem:[#allocation9 + $0x4e0] sm:$0xff]  }
 0x2ce   : >> { %12288 = vmatprep.subr.bf16.mxu1 %v14642_v48 }
 0x2d0   : >> { %12269 = vmatpush3.bf16.msra.mxu0 %v13248_v49  ;;  %v13274_v49 = vld [vmem:[#allocation9 + $0x498] sm:$0xff]  }
 0x2d1   : >> { %12289 = vmatpush3.bf16.msra.mxu1 %v13249_v43  ;;  %12294 = vmatprep.subr.bf16.mxu0 %v14642_v48  ;;  %v13276_v43 = vld [vmem:[#allocation9 + $0x490] sm:$0xff]  }
 0x2d2   : >> { %12314 = vmatprep.subr.bf16.mxu1 %v14642_v48 }
 0x2d3   : >> { %v2083_v39 = vpop.f32.mrf.mxu0  ;;  %12271 = vmatmul.mubr.bf16.vlgmr.msra.gmra.mxu0 %v16223_v33 }
 0x2d4   : >> { %v2089_v38 = vadd.f32 %v2083_v39, %v1977_v22  ;;  %v2191_v8 = vpop.f32.mrf.mxu1  ;;  %12291 = vmatmul.mubr.bf16.vlgmr.msra.gmra.mxu1 %v16225_v7  ;;  %12295 = vmatpush3.bf16.msra.mxu0 %v13250_v20  ;;  %v13266_v22 = vld [vmem:[#allocation9 + $0x4b8] sm:$0xff]   ;;  %v13278_v20 = vld [vmem:[#allocation9 + $0x488] sm:$0xff]   ;;  %v13280_v39 = vld [vmem:[#allocation9 + $0x480] sm:$0xff]  }
 0x2d5   : >> { %12315 = vmatpush3.bf16.msra.mxu1 %v13251_v25  ;;  %v12032_v57 = vpop.f32.mrf.mxu0  ;;  %12296 = vmatprep.subr.bf16.mxu0 %v14642_v48  ;;  %v13279_v25 = vld [vmem:[#allocation9 + $0x4c8] sm:$0xff]  }
 0x2d6   : >> { %v2197_v37 = vadd.f32 %v2191_v8, %v2089_v38  ;;  %v12052_v14 = vpop.f32.mrf.mxu1  ;;  %12316 = vmatprep.subr.bf16.mxu1 %v14642_v48  ;;  %12310 = vmatprep.mubr.msk.bf16.mxu0 %vm14643_vm4, %v14642_v48  ;;  %v10847_v38 = vld [vmem:[%s16036_s26 + $0x33] sm:$0xff] }
 0x2d7   : >> { %v2086_v30 = vpop.f32.mrf.mxu0  ;;  %12330 = vmatprep.mubr.msk.bf16.mxu1 %vm14643_vm4, %v14642_v48  ;;  %v13281_v8 = vld [vmem:[#allocation9 + $0x4c0] sm:$0xff]   ;;  %v16279_v57 = vpack.c.bf16 %v10847_v38, %v10847_v38  ;;  %v13283_v14 = vld [vmem:[#allocation9 + $0x578] sm:$0xff]  }
 0x2d8   : >> { %v2194_v61 = vpop.f32.mrf.mxu1  ;;  %12297 = vmatpush3.bf16.msra.mxu0 %v13252_v35  ;;  %v10856_v35 = vld [vmem:[%s16036_s26 + $0x34] sm:$0xff] }
 0x2d9   : >> { %12317 = vmatpush3.bf16.msra.mxu1 %v13253_v51  ;;  %v12033_v58 = vpop.f32.mrf.mxu0  ;;  %12298 = vmatprep.subr.bf16.mxu0 %v14642_v48  ;;  %v16281_v51 = vpack.c.bf16 %v10856_v35, %v10856_v35  ;;  %v13305_v35 = vld [vmem:[#allocation9 + $0x5e0] sm:$0xff]  }
 0x2da   : >> { %v12053_v46 = vpop.f32.mrf.mxu1  ;;  %12318 = vmatprep.subr.bf16.mxu1 %v14642_v48  ;;  %v13284_v58 = vld [vmem:[#allocation9 + $0x530] sm:$0xff]  }
 0x2db   : >> { %v13285_v46 = vld [vmem:[#allocation9 + $0x570] sm:$0xff]  }
 0x2dc   : >> { %12299 = vmatpush3.bf16.msra.mxu0 %v13254_v32 }
 0x2dd   : >> { %12319 = vmatpush3.bf16.msra.mxu1 %v13255_v34  ;;  %12300 = vmatprep.subr.bf16.mxu0 %v14642_v48 }
 0x2de   : >> { %12320 = vmatprep.subr.bf16.mxu1 %v14642_v48 }
 0x2e0   : >> { %12301 = vmatpush3.bf16.msra.mxu0 %v13256_v2 }
 0x2e1   : >> { %12321 = vmatpush3.bf16.msra.mxu1 %v13257_v15  ;;  %12302 = vmatprep.subr.bf16.mxu0 %v14642_v48 }
 0x2e2   : >> { %12322 = vmatprep.subr.bf16.mxu1 %v14642_v48 }
 0x2e4   : >> { %12303 = vmatpush3.bf16.msra.mxu0 %v13258_v40 }
 0x2e5   : >> { %12323 = vmatpush3.bf16.msra.mxu1 %v13259_v21  ;;  %12304 = vmatprep.subr.bf16.mxu0 %v14642_v48 }
 0x2e6   : >> { %12324 = vmatprep.subr.bf16.mxu1 %v14642_v48 }
 0x2e8   : >> { %12305 = vmatpush3.bf16.msra.mxu0 %v13260_v26  ;;  %v13286_v26 = vld [vmem:[#allocation9 + $0x528] sm:$0xff]  }
 0x2e9   : >> { %12325 = vmatpush3.bf16.msra.mxu1 %v13261_v42  ;;  %12306 = vmatprep.subr.bf16.mxu0 %v14642_v48 }
 0x2ea   : >> { %12326 = vmatprep.subr.bf16.mxu1 %v14642_v48 }
 0x2ec   : >> { %12307 = vmatpush3.bf16.msra.mxu0 %v13262_v53  ;;  %v13287_v53 = vld [vmem:[#allocation9 + $0x568] sm:$0xff]  }
 0x2ed   : >> { %12327 = vmatpush3.bf16.msra.mxu1 %v13263_v18  ;;  %12308 = vmatprep.subr.bf16.mxu0 %v14642_v48 }
 0x2ee   : >> { %12328 = vmatprep.subr.bf16.mxu1 %v14642_v48 }
 0x2f0   : >> { %12309 = vmatpush3.bf16.msra.mxu0 %v13264_v62  ;;  %v13288_v62 = vld [vmem:[#allocation9 + $0x520] sm:$0xff]  }
 0x2f1   : >> { %12329 = vmatpush3.bf16.msra.mxu1 %v13265_v5  ;;  %12334 = vmatprep.subr.bf16.mxu0 %v14642_v48  ;;  %v13290_v5 = vld [vmem:[#allocation9 + $0x518] sm:$0xff]  }
 0x2f2   : >> { %12354 = vmatprep.subr.bf16.mxu1 %v14642_v48 }
 0x2f3   : >> { %v2299_v41 = vpop.f32.mrf.mxu0  ;;  %12311 = vmatmul.mubr.bf16.vlgmr.msra.gmra.mxu0 %v16251_v16 }
 0x2f4   : >> { %v2305_v24 = vadd.f32 %v2299_v41, %v2197_v37  ;;  %v2410_v0 = vpop.f32.mrf.mxu1  ;;  %12331 = vmatmul.mubr.bf16.vlgmr.msra.gmra.mxu1 %v16253_v59  ;;  %12335 = vmatpush3.bf16.msra.mxu0 %v13266_v22  ;;  %v13282_v37 = vld [vmem:[#allocation9 + $0x538] sm:$0xff]   ;;  %v13292_v22 = vld [vmem:[#allocation9 + $0x510] sm:$0xff]   ;;  %v13294_v41 = vld [vmem:[#allocation9 + $0x508] sm:$0xff]  }
 0x2f5   : >> { %12355 = vmatpush3.bf16.msra.mxu1 %v13267_v52  ;;  %v12072_v23 = vpop.f32.mrf.mxu0  ;;  %12336 = vmatprep.subr.bf16.mxu0 %v14642_v48  ;;  %v13293_v52 = vld [vmem:[#allocation9 + $0x550] sm:$0xff]  }
 0x2f6   : >> { %v2416_v47 = vadd.f32 %v2410_v0, %v2305_v24  ;;  %v12092_v60 = vpop.f32.mrf.mxu1  ;;  %12356 = vmatprep.subr.bf16.mxu1 %v14642_v48  ;;  %12350 = vmatprep.mubr.msk.bf16.mxu0 %vm14643_vm4, %v14642_v48  ;;  %v13295_v24 = vld [vmem:[#allocation9 + $0x548] sm:$0xff]   ;;  %v13296_v0 = vld [vmem:[#allocation9 + $0x500] sm:$0xff]  }
 0x2f7   : >> { %v2302_v6 = vpop.f32.mrf.mxu0  ;;  %12370 = vmatprep.mubr.msk.bf16.mxu1 %vm14643_vm4, %v14642_v48  ;;  %v13297_v23 = vld [vmem:[#allocation9 + $0x540] sm:$0xff]  }
 0x2f8   : >> { %v2413_v27 = vpop.f32.mrf.mxu1  ;;  %12337 = vmatpush3.bf16.msra.mxu0 %v13268_v44  ;;  %v10867_v44 = vld [vmem:[%s16036_s26 + $0x40] sm:$0xff] }
 0x2f9   : >> { %12357 = vmatpush3.bf16.msra.mxu1 %v13269_v36  ;;  %v12073_v13 = vpop.f32.mrf.mxu0  ;;  %12338 = vmatprep.subr.bf16.mxu0 %v14642_v48  ;;  %v10876_v36 = vld [vmem:[%s16036_s26 + $0x41] sm:$0xff] }
 0x2fa   : >> { %v12093_v63 = vpop.f32.mrf.mxu1  ;;  %12358 = vmatprep.subr.bf16.mxu1 %v14642_v48  ;;  %v16309_v60 = vpack.c.bf16 %v10876_v36, %v10876_v36  ;;  %v13298_v6 = vld [vmem:[#allocation9 + $0x5b8] sm:$0xff]   ;;  %v13317_v36 = vld [vmem:[#allocation9 + $0x620] sm:$0xff]  }
 0x2fb   : >> { %v13299_v27 = vld [vmem:[#allocation9 + $0x5f8] sm:$0xff]   ;;  %v13300_v63 = vld [vmem:[#allocation9 + $0x5b0] sm:$0xff]  }
 0x2fc   : >> { %12339 = vmatpush3.bf16.msra.mxu0 %v13270_v19 }
 0x2fd   : >> { %12359 = vmatpush3.bf16.msra.mxu1 %v13271_v55  ;;  %12340 = vmatprep.subr.bf16.mxu0 %v14642_v48 }
 0x2fe   : >> { %12360 = vmatprep.subr.bf16.mxu1 %v14642_v48 }
 0x300   : >> { %12341 = vmatpush3.bf16.msra.mxu0 %v13272_v3 }
 0x301   : >> { %12361 = vmatpush3.bf16.msra.mxu1 %v13273_v29  ;;  %12342 = vmatprep.subr.bf16.mxu0 %v14642_v48  ;;  %v13301_v29 = vld [vmem:[#allocation9 + $0x5f0] sm:$0xff]  }
 0x302   : >> { %12362 = vmatprep.subr.bf16.mxu1 %v14642_v48 }
 0x304   : >> { %12343 = vmatpush3.bf16.msra.mxu0 %v13274_v49 }
 0x305   : >> { %12363 = vmatpush3.bf16.msra.mxu1 %v13275_v1  ;;  %12344 = vmatprep.subr.bf16.mxu0 %v14642_v48 }
 0x306   : >> { %12364 = vmatprep.subr.bf16.mxu1 %v14642_v48 }
 0x308   : >> { %12345 = vmatpush3.bf16.msra.mxu0 %v13276_v43 }
 0x309   : >> { %12365 = vmatpush3.bf16.msra.mxu1 %v13277_v12  ;;  %12346 = vmatprep.subr.bf16.mxu0 %v14642_v48 }
 0x30a   : >> { %12366 = vmatprep.subr.bf16.mxu1 %v14642_v48 }
 0x30c   : >> { %12347 = vmatpush3.bf16.msra.mxu0 %v13278_v20  ;;  %v13302_v20 = vld [vmem:[#allocation9 + $0x5a8] sm:$0xff]  }
 0x30d   : >> { %12367 = vmatpush3.bf16.msra.mxu1 %v13279_v25  ;;  %12348 = vmatprep.subr.bf16.mxu0 %v14642_v48 }
 0x30e   : >> { %12368 = vmatprep.subr.bf16.mxu1 %v14642_v48 }
 0x310   : >> { %12349 = vmatpush3.bf16.msra.mxu0 %v13280_v39  ;;  %v13303_v39 = vld [vmem:[#allocation9 + $0x5e8] sm:$0xff]  }
 0x311   : >> { %12369 = vmatpush3.bf16.msra.mxu1 %v13281_v8  ;;  %12374 = vmatprep.subr.bf16.mxu0 %v14642_v48  ;;  %v13304_v8 = vld [vmem:[#allocation9 + $0x5a0] sm:$0xff]  }
 0x312   : >> { %12394 = vmatprep.subr.bf16.mxu1 %v14642_v48 }
 0x313   : >> { %v2518_v30 = vpop.f32.mrf.mxu0  ;;  %12351 = vmatmul.mubr.bf16.vlgmr.msra.gmra.mxu0 %v16279_v57 }
 0x314   : >> { %v2524_v61 = vadd.f32 %v2518_v30, %v2416_v47  ;;  %v2626_v32 = vpop.f32.mrf.mxu1  ;;  %12371 = vmatmul.mubr.bf16.vlgmr.msra.gmra.mxu1 %v16281_v51  ;;  %12375 = vmatpush3.bf16.msra.mxu0 %v13282_v37  ;;  %v16307_v47 = vpack.c.bf16 %v10867_v44, %v10867_v44  ;;  %v13306_v37 = vld [vmem:[#allocation9 + $0x598] sm:$0xff]   ;;  %v13308_v30 = vld [vmem:[#allocation9 + $0x590] sm:$0xff]  }
 0x315   : >> { %12395 = vmatpush3.bf16.msra.mxu1 %v13283_v14  ;;  %v12112_v34 = vpop.f32.mrf.mxu0  ;;  %12376 = vmatprep.subr.bf16.mxu0 %v14642_v48  ;;  %v13307_v14 = vld [vmem:[#allocation9 + $0x5d8] sm:$0xff]  }
 0x316   : >> { %v2632_v2 = vadd.f32 %v2626_v32, %v2524_v61  ;;  %v12132_v15 = vpop.f32.mrf.mxu1  ;;  %12396 = vmatprep.subr.bf16.mxu1 %v14642_v48  ;;  %12390 = vmatprep.mubr.msk.bf16.mxu0 %vm14643_vm4, %v14642_v48  ;;  %v13309_v61 = vld [vmem:[#allocation9 + $0x5d0] sm:$0xff]   ;;  %v13310_v32 = vld [vmem:[#allocation9 + $0x588] sm:$0xff]   ;;  %v13312_v34 = vld [vmem:[#allocation9 + $0x580] sm:$0xff]  }
 0x317   : >> { %v2521_v40 = vpop.f32.mrf.mxu0  ;;  %12410 = vmatprep.mubr.msk.bf16.mxu1 %vm14643_vm4, %v14642_v48  ;;  %v10894_v15 = vld [vmem:[%s16036_s26 + $0x43] sm:$0xff] }
 0x318   : >> { %v2629_v21 = vpop.f32.mrf.mxu1  ;;  %12377 = vmatpush3.bf16.msra.mxu0 %v13284_v58  ;;  %v13311_v58 = vld [vmem:[#allocation9 + $0x5c8] sm:$0xff]  }
 0x319   : >> { %12397 = vmatpush3.bf16.msra.mxu1 %v13285_v46  ;;  %v12113_v42 = vpop.f32.mrf.mxu0  ;;  %12378 = vmatprep.subr.bf16.mxu0 %v14642_v48  ;;  %v10885_v46 = vld [vmem:[%s16036_s26 + $0x42] sm:$0xff]  ;;  %v16337_v21 = vpack.c.bf16 %v10894_v15, %v10894_v15  ;;  %v13336_v15 = vld [vmem:[#allocation9 + $0x20] sm:$0xff]  }
 0x31a   : >> { %v12133_v18 = vpop.f32.mrf.mxu1  ;;  %12398 = vmatprep.subr.bf16.mxu1 %v14642_v48  ;;  %v16335_v40 = vpack.c.bf16 %v10885_v46, %v10885_v46  ;;  %v13334_v46 = vld [vmem:[#allocation9 + $0x28] sm:$0xff]  }
 0x31c   : >> { %12379 = vmatpush3.bf16.msra.mxu0 %v13286_v26  ;;  %v13314_v26 = vld [vmem:[#allocation9 + $0x638] sm:$0xff]  }
 0x31d   : >> { %12399 = vmatpush3.bf16.msra.mxu1 %v13287_v53  ;;  %12380 = vmatprep.subr.bf16.mxu0 %v14642_v48 }
 0x31e   : >> { %12400 = vmatprep.subr.bf16.mxu1 %v14642_v48 }
 0x320   : >> { %12381 = vmatpush3.bf16.msra.mxu0 %v13288_v62  ;;  %v13315_v62 = vld [vmem:[#allocation9 + $0x630] sm:$0xff]  }
 0x321   : >> { %12401 = vmatpush3.bf16.msra.mxu1 %v13289_v4  ;;  %12382 = vmatprep.subr.bf16.mxu0 %v14642_v48  ;;  %v13322_v4 = vld [vmem:[#allocation9 + $0x78] sm:$0xff]  }
 0x322   : >> { %12402 = vmatprep.subr.bf16.mxu1 %v14642_v48 }
 0x324   : >> { %12383 = vmatpush3.bf16.msra.mxu0 %v13290_v5 }
 0x325   : >> { %12403 = vmatpush3.bf16.msra.mxu1 %v13291_v17  ;;  %12384 = vmatprep.subr.bf16.mxu0 %v14642_v48 }
 0x326   : >> { %12404 = vmatprep.subr.bf16.mxu1 %v14642_v48 }
 0x328   : >> { %12385 = vmatpush3.bf16.msra.mxu0 %v13292_v22 }
 0x329   : >> { %12405 = vmatpush3.bf16.msra.mxu1 %v13293_v52  ;;  %12386 = vmatprep.subr.bf16.mxu0 %v14642_v48 }
 0x32a   : >> { %12406 = vmatprep.subr.bf16.mxu1 %v14642_v48 }
 0x32c   : >> { %12387 = vmatpush3.bf16.msra.mxu0 %v13294_v41 }
 0x32d   : >> { %12407 = vmatpush3.bf16.msra.mxu1 %v13295_v24  ;;  %12388 = vmatprep.subr.bf16.mxu0 %v14642_v48  ;;  %v13316_v24 = vld [vmem:[#allocation9 + $0x628] sm:$0xff]  }
 0x32e   : >> { %12408 = vmatprep.subr.bf16.mxu1 %v14642_v48 }
 0x330   : >> { %12389 = vmatpush3.bf16.msra.mxu0 %v13296_v0  ;;  %v13323_v0 = vld [vmem:[#allocation9 + $0x70] sm:$0xff]  }
 0x331   : >> { %12409 = vmatpush3.bf16.msra.mxu1 %v13297_v23  ;;  %12414 = vmatprep.subr.bf16.mxu0 %v14642_v48 }
 0x332   : >> { %12434 = vmatprep.subr.bf16.mxu1 %v14642_v48 }
 0x333   : >> { %v2734_v19 = vpop.f32.mrf.mxu0  ;;  %12391 = vmatmul.mubr.bf16.vlgmr.msra.gmra.mxu0 %v16307_v47 }
 0x334   : >> { %v2740_v13 = vadd.f32 %v2734_v19, %v2632_v2  ;;  %v2842_v55 = vpop.f32.mrf.mxu1  ;;  %12411 = vmatmul.mubr.bf16.vlgmr.msra.gmra.mxu1 %v16309_v60  ;;  %12415 = vmatpush3.bf16.msra.mxu0 %v13298_v6  ;;  %v13313_v2 = vld [vmem:[#allocation9 + $0x5c0] sm:$0xff]   ;;  %v13324_v6 = vld [vmem:[#allocation9 + $0x68] sm:$0xff]  }
 0x335   : >> { %12435 = vmatpush3.bf16.msra.mxu1 %v13299_v27  ;;  %v12152_v3 = vpop.f32.mrf.mxu0  ;;  %12416 = vmatprep.subr.bf16.mxu0 %v14642_v48  ;;  %v13318_v27 = vld [vmem:[#allocation9 + $0x618] sm:$0xff]   ;;  %v13325_v19 = vld [vmem:[#allocation9 + $0x60] sm:$0xff]  }
 0x336   : >> { %v2848_v49 = vadd.f32 %v2842_v55, %v2740_v13  ;;  %v12172_v1 = vpop.f32.mrf.mxu1  ;;  %12436 = vmatprep.subr.bf16.mxu1 %v14642_v48  ;;  %12430 = vmatprep.mubr.msk.bf16.mxu0 %vm14643_vm4, %v14642_v48  ;;  %v13319_v13 = vld [vmem:[#allocation9 + $0x610] sm:$0xff]   ;;  %v13326_v55 = vld [vmem:[#allocation9 + $0x58] sm:$0xff]  }
 0x337   : >> { %v2737_v43 = vpop.f32.mrf.mxu0  ;;  %12450 = vmatprep.mubr.msk.bf16.mxu1 %vm14643_vm4, %v14642_v48  ;;  %v13327_v3 = vld [vmem:[#allocation9 + $0x50] sm:$0xff]   ;;  %v13328_v1 = vld [vmem:[#allocation9 + $0x48] sm:$0xff]  }
 0x338   : >> { %v2845_v12 = vpop.f32.mrf.mxu1  ;;  %12417 = vmatpush3.bf16.msra.mxu0 %v13300_v63  ;;  %v13320_v63 = vld [vmem:[#allocation9 + $0x608] sm:$0xff]  }
 0x339   : >> { %12437 = vmatpush3.bf16.msra.mxu1 %v13301_v29  ;;  %v12153_v25 = vpop.f32.mrf.mxu0  ;;  %12418 = vmatprep.subr.bf16.mxu0 %v14642_v48  ;;  %v13321_v29 = vld [vmem:[#allocation9 + $0x600] sm:$0xff]  }
 0x33a   : >> { %v12173_v38 = vpop.f32.mrf.mxu1  ;;  %12438 = vmatprep.subr.bf16.mxu1 %v14642_v48  ;;  %v13329_v12 = vld [vmem:[#allocation9 + $0x40] sm:$0xff]  }
 0x33b   : >> { %v13330_v38 = vld [vmem:[#allocation9 + $0x38] sm:$0xff]  }
 0x33c   : >> { %12419 = vmatpush3.bf16.msra.mxu0 %v13302_v20 }
 0x33d   : >> { %12439 = vmatpush3.bf16.msra.mxu1 %v13303_v39  ;;  %12420 = vmatprep.subr.bf16.mxu0 %v14642_v48 }
 0x33e   : >> { %12440 = vmatprep.subr.bf16.mxu1 %v14642_v48 }
 0x340   : >> { %12421 = vmatpush3.bf16.msra.mxu0 %v13304_v8  ;;  %v13331_v8 = vld [vmem:[#allocation9 + $0xb8] sm:$0xff]  }
 0x341   : >> { %12441 = vmatpush3.bf16.msra.mxu1 %v13305_v35  ;;  %12422 = vmatprep.subr.bf16.mxu0 %v14642_v48 }
 0x342   : >> { %12442 = vmatprep.subr.bf16.mxu1 %v14642_v48 }
 0x344   : >> { %12423 = vmatpush3.bf16.msra.mxu0 %v13306_v37 }
 0x345   : >> { %12443 = vmatpush3.bf16.msra.mxu1 %v13307_v14  ;;  %12424 = vmatprep.subr.bf16.mxu0 %v14642_v48 }
 0x346   : >> { %12444 = vmatprep.subr.bf16.mxu1 %v14642_v48 }
 0x348   : >> { %12425 = vmatpush3.bf16.msra.mxu0 %v13308_v30 }
 0x349   : >> { %12445 = vmatpush3.bf16.msra.mxu1 %v13309_v61  ;;  %12426 = vmatprep.subr.bf16.mxu0 %v14642_v48 }
 0x34a   : >> { %12446 = vmatprep.subr.bf16.mxu1 %v14642_v48 }
 0x34c   : >> { %12427 = vmatpush3.bf16.msra.mxu0 %v13310_v32  ;;  %v13333_v32 = vld [vmem:[#allocation9 + $0xb0] sm:$0xff]  }
 0x34d   : >> { %12447 = vmatpush3.bf16.msra.mxu1 %v13311_v58  ;;  %12428 = vmatprep.subr.bf16.mxu0 %v14642_v48 }
 0x34e   : >> { %12448 = vmatprep.subr.bf16.mxu1 %v14642_v48 }
 0x350   : >> { %12429 = vmatpush3.bf16.msra.mxu0 %v13312_v34 }
 0x351   : >> { %12449 = vmatpush3.bf16.msra.mxu1 %v13313_v2  ;;  %12454 = vmatprep.subr.bf16.mxu0 %v14642_v48  ;;  %v13335_v2 = vld [vmem:[#allocation9 + $0xa8] sm:$0xff]  }
 0x352   : >> { %12474 = vmatprep.subr.bf16.mxu1 %v14642_v48 }
 0x353   : >> { %v2953_v42 = vpop.f32.mrf.mxu0  ;;  %12431 = vmatmul.mubr.bf16.vlgmr.msra.gmra.mxu0 %v16335_v40 }
 0x354   : >> { %v2959_v53 = vadd.f32 %v2953_v42, %v2848_v49  ;;  %v3061_v18 = vpop.f32.mrf.mxu1  ;;  %12451 = vmatmul.mubr.bf16.vlgmr.msra.gmra.mxu1 %v16337_v21  ;;  %12455 = vmatpush3.bf16.msra.mxu0 %v13314_v26  ;;  %v10903_v49 = vld [vmem:[%s16036_s26 + $0x44] sm:$0xff]  ;;  %v13337_v26 = vld [vmem:[#allocation9 + $0xa0] sm:$0xff]  }
 0x355   : >> { %12475 = vmatpush3.bf16.msra.mxu1 %v13322_v4  ;;  %v12192_v5 = vpop.f32.mrf.mxu0  ;;  %12456 = vmatprep.subr.bf16.mxu0 %v14642_v48  ;;  %v16362_v43 = vpack.c.bf16 %v10903_v49, %v10903_v49  ;;  %v13338_v42 = vld [vmem:[#allocation9 + $0x18] sm:$0xff]   ;;  %v13342_v4 = vld [vmem:[#allocation9 + $0x8] sm:$0xff]   ;;  %v13353_v49 = vld [vmem:[#allocation9 + $0x120] sm:$0xff]  }
 0x356   : >> { %v3067_v17 = vadd.f32 %v3061_v18, %v2959_v53  ;;  %v12212_v22 = vpop.f32.mrf.mxu1  ;;  %12476 = vmatprep.subr.bf16.mxu1 %v14642_v48  ;;  %12470 = vmatprep.mubr.msk.bf16.mxu0 %vm14643_vm4, %v14642_v48  ;;  %v13339_v53 = vld [vmem:[#allocation9 + $0x98] sm:$0xff]   ;;  %v13340_v18 = vld [vmem:[#allocation9 + $0x10] sm:$0xff]   ;;  %v13343_v5 = vld [vmem:[#allocation9 + $0x88] sm:$0xff]  }
 0x357   : >> { %v2956_v52 = vpop.f32.mrf.mxu0  ;;  %12490 = vmatprep.mubr.msk.bf16.mxu1 %vm14643_vm4, %v14642_v48  ;;  %v13345_v22 = vld [vmem:[#allocation9 + $0x80] sm:$0xff]  }
 0x358   : >> { %v3064_v41 = vpop.f32.mrf.mxu1  ;;  %12457 = vmatpush3.bf16.msra.mxu0 %v13315_v62  ;;  %v13341_v62 = vld [vmem:[#allocation9 + $0x90] sm:$0xff]  }
 0x359   : >> { %12477 = vmatpush3.bf16.msra.mxu1 %v13323_v0  ;;  %v12193_v44 = vpop.f32.mrf.mxu0  ;;  %12458 = vmatprep.subr.bf16.mxu0 %v14642_v48  ;;  %v13346_v0 = vld [vmem:[#allocation9 + $0xf8] sm:$0xff]  }
 0x35a   : >> { %v12213_v23 = vpop.f32.mrf.mxu1  ;;  %12478 = vmatprep.subr.bf16.mxu1 %v14642_v48  ;;  %v13347_v44 = vld [vmem:[#allocation9 + $0x138] sm:$0xff]  }
 0x35c   : >> { %12459 = vmatpush3.bf16.msra.mxu0 %v13316_v24 }
 0x35d   : >> { %12479 = vmatpush3.bf16.msra.mxu1 %v13324_v6  ;;  %12460 = vmatprep.subr.bf16.mxu0 %v14642_v48 }
 0x35e   : >> { %12480 = vmatprep.subr.bf16.mxu1 %v14642_v48 }
 0x360   : >> { %12461 = vmatpush3.bf16.msra.mxu0 %v13317_v36 }
 0x361   : >> { %12481 = vmatpush3.bf16.msra.mxu1 %v13325_v19  ;;  %12462 = vmatprep.subr.bf16.mxu0 %v14642_v48  ;;  %v13349_v19 = vld [vmem:[#allocation9 + $0x130] sm:$0xff]  }
 0x362   : >> { %12482 = vmatprep.subr.bf16.mxu1 %v14642_v48 }
 0x364   : >> { %12463 = vmatpush3.bf16.msra.mxu0 %v13318_v27 }
 0x365   : >> { %12483 = vmatpush3.bf16.msra.mxu1 %v13326_v55  ;;  %12464 = vmatprep.subr.bf16.mxu0 %v14642_v48 }
 0x366   : >> { %12484 = vmatprep.subr.bf16.mxu1 %v14642_v48 }
 0x368   : >> { %12465 = vmatpush3.bf16.msra.mxu0 %v13319_v13 }
 0x369   : >> { %12485 = vmatpush3.bf16.msra.mxu1 %v13327_v3  ;;  %12466 = vmatprep.subr.bf16.mxu0 %v14642_v48  ;;  %v13351_v3 = vld [vmem:[#allocation9 + $0x128] sm:$0xff]  }
 0x36a   : >> { %12486 = vmatprep.subr.bf16.mxu1 %v14642_v48 }
 0x36c   : >> { %12467 = vmatpush3.bf16.msra.mxu0 %v13320_v63  ;;  %v13350_v63 = vld [vmem:[#allocation9 + $0xe8] sm:$0xff]  }
 0x36d   : >> { %12487 = vmatpush3.bf16.msra.mxu1 %v13328_v1  ;;  %12468 = vmatprep.subr.bf16.mxu0 %v14642_v48  ;;  %v13354_v1 = vld [vmem:[#allocation9 + $0xd8] sm:$0xff]  }
 0x36e   : >> { %12488 = vmatprep.subr.bf16.mxu1 %v14642_v48 }
 0x370   : >> { %12469 = vmatpush3.bf16.msra.mxu0 %v13321_v29  ;;  %v13352_v29 = vld [vmem:[#allocation9 + $0xe0] sm:$0xff]  }
 0x371   : >> { %12489 = vmatpush3.bf16.msra.mxu1 %v13329_v12  ;;  %12494 = vmatprep.subr.bf16.mxu0 %v14642_v48  ;;  %v13355_v12 = vld [vmem:[#allocation9 + $0x118] sm:$0xff]  }
 0x372   : >> { %12514 = vmatprep.subr.bf16.mxu1 %v14642_v48 }
 0x373   : >> { %v3169_v20 = vpop.f32.mrf.mxu0  ;;  %12471 = vmatmul.mubr.bf16.vlgmr.msra.gmra.mxu0 %v16362_v43 }
 0x374   : >> { %v3175_v25 = vadd.f32 %v3169_v20, %v3067_v17  ;;  %v3277_v39 = vpop.f32.mrf.mxu1  ;;  %12491 = vmatmul.mubr.bf16.vlgmr.msra.gmra.mxu1 %v16111_v10  ;;  %12495 = vmatpush3.bf16.msra.mxu0 %v13330_v38  ;;  %v13332_v10 = vld [vmem:[#allocation9 + $0x30] sm:$0xff]   ;;  %v13344_v17 = vld [vmem:[#allocation9] sm:$0xff]   ;;  %v13359_v38 = vld [vmem:[#allocation9 + $0x108] sm:$0xff]  }
 0x375   : >> { %12515 = vmatpush3.bf16.msra.mxu1 %v13331_v8  ;;  %v12232_v35 = vpop.f32.mrf.mxu0  ;;  %12496 = vmatprep.subr.bf16.mxu0 %v14642_v48  ;;  %v13356_v20 = vld [vmem:[#allocation9 + $0xd0] sm:$0xff]   ;;  %v13360_v8 = vld [vmem:[#allocation9 + $0xc0] sm:$0xff]  }
 0x376   : >> { %v3283_v37 = vadd.f32 %v3277_v39, %v3175_v25  ;;  %v12252_v14 = vpop.f32.mrf.mxu1  ;;  %12516 = vmatprep.subr.bf16.mxu1 %v14642_v48  ;;  %12510 = vmatprep.mubr.msk.bf16.mxu0 %vm14643_vm4, %v14642_v48  ;;  %v13357_v25 = vld [vmem:[#allocation9 + $0x110] sm:$0xff]   ;;  %v13358_v39 = vld [vmem:[#allocation9 + $0xc8] sm:$0xff]   ;;  %v13361_v35 = vld [vmem:[#allocation9 + $0x100] sm:$0xff]  }
 0x377   : >> { %v3172_v30 = vpop.f32.mrf.mxu0  ;;  %12530 = vmatprep.mubr.msk.bf16.mxu1 %vm14643_vm4, %v14642_v48 }
 0x378   : >> { %v3280_v61 = vpop.f32.mrf.mxu1  ;;  %12497 = vmatpush3.bf16.msra.mxu0 %v13332_v10  ;;  %v13363_v10 = vld [vmem:[#allocation9 + $0x1b8] sm:$0xff]  }
 0x379   : >> { %12517 = vmatpush3.bf16.msra.mxu1 %v13333_v32  ;;  %v12233_v58 = vpop.f32.mrf.mxu0  ;;  %12498 = vmatprep.subr.bf16.mxu0 %v14642_v48  ;;  %v13362_v61 = vld [vmem:[#allocation9 + $0x178] sm:$0xff]  }
 0x37a   : >> { %v12253_v34 = vpop.f32.mrf.mxu1  ;;  %12518 = vmatprep.subr.bf16.mxu1 %v14642_v48 }
 0x37c   : >> { %12499 = vmatpush3.bf16.msra.mxu0 %v13334_v46 }
 0x37d   : >> { %12519 = vmatpush3.bf16.msra.mxu1 %v13335_v2  ;;  %12500 = vmatprep.subr.bf16.mxu0 %v14642_v48  ;;  %v13365_v2 = vld [vmem:[#allocation9 + $0x1b0] sm:$0xff]  }
 0x37e   : >> { %12520 = vmatprep.subr.bf16.mxu1 %v14642_v48 }
 0x380   : >> { %12501 = vmatpush3.bf16.msra.mxu0 %v13336_v15 }
 0x381   : >> { %12521 = vmatpush3.bf16.msra.mxu1 %v13337_v26  ;;  %12502 = vmatprep.subr.bf16.mxu0 %v14642_v48 }
 0x382   : >> { %12522 = vmatprep.subr.bf16.mxu1 %v14642_v48 }
 0x384   : >> { %12503 = vmatpush3.bf16.msra.mxu0 %v13338_v42  ;;  %v13366_v42 = vld [vmem:[#allocation9 + $0x168] sm:$0xff]  }
 0x385   : >> { %12523 = vmatpush3.bf16.msra.mxu1 %v13339_v53  ;;  %12504 = vmatprep.subr.bf16.mxu0 %v14642_v48  ;;  %v13367_v53 = vld [vmem:[#allocation9 + $0x1a8] sm:$0xff]  }
 0x386   : >> { %12524 = vmatprep.subr.bf16.mxu1 %v14642_v48 }
 0x388   : >> { %12505 = vmatpush3.bf16.msra.mxu0 %v13340_v18  ;;  %v13368_v18 = vld [vmem:[#allocation9 + $0x160] sm:$0xff]  }
 0x389   : >> { %12525 = vmatpush3.bf16.msra.mxu1 %v13341_v62  ;;  %12506 = vmatprep.subr.bf16.mxu0 %v14642_v48  ;;  %v13369_v62 = vld [vmem:[#allocation9 + $0x1a0] sm:$0xff]  }
 0x38a   : >> { %12526 = vmatprep.subr.bf16.mxu1 %v14642_v48 }
 0x38c   : >> { %12507 = vmatpush3.bf16.msra.mxu0 %v13342_v4  ;;  %v13370_v4 = vld [vmem:[#allocation9 + $0x158] sm:$0xff]  }
 0x38d   : >> { %12527 = vmatpush3.bf16.msra.mxu1 %v13343_v5  ;;  %12508 = vmatprep.subr.bf16.mxu0 %v14642_v48  ;;  %v13371_v5 = vld [vmem:[#allocation9 + $0x198] sm:$0xff]  }
 0x38e   : >> { %12528 = vmatprep.subr.bf16.mxu1 %v14642_v48 }
 0x390   : >> { %12509 = vmatpush3.bf16.msra.mxu0 %v13344_v17  ;;  %v13372_v17 = vld [vmem:[#allocation9 + $0x150] sm:$0xff]  }
 0x391   : >> { %12529 = vmatpush3.bf16.msra.mxu1 %v13345_v22  ;;  %12534 = vmatprep.subr.bf16.mxu0 %v14642_v48  ;;  %v13373_v22 = vld [vmem:[#allocation9 + $0x190] sm:$0xff]  }
 0x392   : >> { %12554 = vmatprep.subr.bf16.mxu1 %v14642_v48 }
 0x393   : >> { %v3385_v52 = vpop.f32.mrf.mxu0  ;;  %12511 = vmatmul.mubr.bf16.vlgmr.msra.gmra.mxu0 %v16086_v28 }
 0x394   : >> { %v3391_v41 = vadd.f32 %v3385_v52, %v3283_v37  ;;  %v3496_v24 = vpop.f32.mrf.mxu1  ;;  %12531 = vmatmul.mubr.bf16.vlgmr.msra.gmra.mxu1 %v16113_v54  ;;  %12535 = vmatpush3.bf16.msra.mxu0 %v13346_v0  ;;  %v13348_v54 = vld [vmem:[#allocation9 + $0xf0] sm:$0xff]   ;;  %v13374_v52 = vld [vmem:[#allocation9 + $0x148] sm:$0xff]   ;;  %v13377_v0 = vld [vmem:[#allocation9 + $0x180] sm:$0xff]  }
 0x395   : >> { %12555 = vmatpush3.bf16.msra.mxu1 %v13347_v44  ;;  %v12272_v23 = vpop.f32.mrf.mxu0  ;;  %12536 = vmatprep.subr.bf16.mxu0 %v14642_v48 }
 0x396   : >> { %v3502_v36 = vadd.f32 %v3496_v24, %v3391_v41  ;;  %v12292_v6 = vpop.f32.mrf.mxu1  ;;  %12556 = vmatprep.subr.bf16.mxu1 %v14642_v48  ;;  %12550 = vmatprep.mubr.msk.bf16.mxu0 %vm14643_vm4, %v14642_v48  ;;  %v13375_v41 = vld [vmem:[#allocation9 + $0x188] sm:$0xff]   ;;  %v13376_v24 = vld [vmem:[#allocation9 + $0x140] sm:$0xff]  }
 0x397   : >> { %v3388_v27 = vpop.f32.mrf.mxu0  ;;  %12570 = vmatprep.mubr.msk.bf16.mxu1 %vm14643_vm4, %v14642_v48  ;;  %v13378_v6 = vld [vmem:[#allocation9 + $0x1f8] sm:$0xff]  }
 0x398   : >> { %v3499_v28 = vpop.f32.mrf.mxu1  ;;  %12537 = vmatpush3.bf16.msra.mxu0 %v13348_v54  ;;  %v13379_v27 = vld [vmem:[#allocation9 + $0x238] sm:$0xff]  }
 0x399   : >> { %12557 = vmatpush3.bf16.msra.mxu1 %v13349_v19  ;;  %v12273_v13 = vpop.f32.mrf.mxu0  ;;  %12538 = vmatprep.subr.bf16.mxu0 %v14642_v48 }
 0x39a   : >> { %v12293_v55 = vpop.f32.mrf.mxu1  ;;  %12558 = vmatprep.subr.bf16.mxu1 %v14642_v48 }
 0x39b   : >> { %v13381_v55 = vld [vmem:[#allocation9 + $0x230] sm:$0xff]  }
 0x39c   : >> { %12539 = vmatpush3.bf16.msra.mxu0 %v13350_v63 }
 0x39d   : >> { %12559 = vmatpush3.bf16.msra.mxu1 %v13351_v3  ;;  %12540 = vmatprep.subr.bf16.mxu0 %v14642_v48 }
 0x39e   : >> { %12560 = vmatprep.subr.bf16.mxu1 %v14642_v48 }
 0x3a0   : >> { %12541 = vmatpush3.bf16.msra.mxu0 %v13352_v29  ;;  %v13382_v29 = vld [vmem:[#allocation9 + $0x1e8] sm:$0xff]  }
 0x3a1   : >> { %12561 = vmatpush3.bf16.msra.mxu1 %v13353_v49  ;;  %12542 = vmatprep.subr.bf16.mxu0 %v14642_v48  ;;  %v13383_v49 = vld [vmem:[#allocation9 + $0x228] sm:$0xff]  }
 0x3a2   : >> { %12562 = vmatprep.subr.bf16.mxu1 %v14642_v48 }
 0x3a4   : >> { %12543 = vmatpush3.bf16.msra.mxu0 %v13354_v1  ;;  %v13384_v1 = vld [vmem:[#allocation9 + $0x1e0] sm:$0xff]  }
 0x3a5   : >> { %12563 = vmatpush3.bf16.msra.mxu1 %v13355_v12  ;;  %12544 = vmatprep.subr.bf16.mxu0 %v14642_v48  ;;  %v13385_v12 = vld [vmem:[#allocation9 + $0x220] sm:$0xff]  }
 0x3a6   : >> { %12564 = vmatprep.subr.bf16.mxu1 %v14642_v48 }
 0x3a8   : >> { %12545 = vmatpush3.bf16.msra.mxu0 %v13356_v20  ;;  %v13386_v20 = vld [vmem:[#allocation9 + $0x1d8] sm:$0xff]  }
 0x3a9   : >> { %12565 = vmatpush3.bf16.msra.mxu1 %v13357_v25  ;;  %12546 = vmatprep.subr.bf16.mxu0 %v14642_v48  ;;  %v13387_v25 = vld [vmem:[#allocation9 + $0x218] sm:$0xff]  }
 0x3aa   : >> { %12566 = vmatprep.subr.bf16.mxu1 %v14642_v48 }
 0x3ac   : >> { %12547 = vmatpush3.bf16.msra.mxu0 %v13358_v39  ;;  %v13388_v39 = vld [vmem:[#allocation9 + $0x1d0] sm:$0xff]  }
 0x3ad   : >> { %12567 = vmatpush3.bf16.msra.mxu1 %v13359_v38  ;;  %12548 = vmatprep.subr.bf16.mxu0 %v14642_v48  ;;  %v13389_v38 = vld [vmem:[#allocation9 + $0x210] sm:$0xff]  }
 0x3ae   : >> { %12568 = vmatprep.subr.bf16.mxu1 %v14642_v48 }
 0x3b0   : >> { %12549 = vmatpush3.bf16.msra.mxu0 %v13360_v8  ;;  %v13390_v8 = vld [vmem:[#allocation9 + $0x1c8] sm:$0xff]  }
 0x3b1   : >> { %12569 = vmatpush3.bf16.msra.mxu1 %v13361_v35  ;;  %12574 = vmatprep.subr.bf16.mxu0 %v14642_v48  ;;  %v13391_v35 = vld [vmem:[#allocation9 + $0x208] sm:$0xff]  }
 0x3b2   : >> { %12594 = vmatprep.subr.bf16.mxu1 %v14642_v48 }
 0x3b3   : >> { %v3604_v37 = vpop.f32.mrf.mxu0  ;;  %12551 = vmatmul.mubr.bf16.vlgmr.msra.gmra.mxu0 %v16139_v56 }
 0x3b4   : >> { %v3610_v14 = vadd.f32 %v3604_v37, %v3502_v36  ;;  %v3712_v30 = vpop.f32.mrf.mxu1  ;;  %12571 = vmatmul.mubr.bf16.vlgmr.msra.gmra.mxu1 %v16141_v11  ;;  %12575 = vmatpush3.bf16.msra.mxu0 %v13362_v61  ;;  %v13364_v11 = vld [vmem:[#allocation9 + $0x170] sm:$0xff]   ;;  %v13392_v37 = vld [vmem:[#allocation9 + $0x1c0] sm:$0xff]  }
 0x3b5   : >> { %12595 = vmatpush3.bf16.msra.mxu1 %v13363_v10  ;;  %v12312_v32 = vpop.f32.mrf.mxu0  ;;  %12576 = vmatprep.subr.bf16.mxu0 %v14642_v48 }
 0x3b6   : >> { %v3718_v58 = vadd.f32 %v3712_v30, %v3610_v14  ;;  %v12332_v34 = vpop.f32.mrf.mxu1  ;;  %12596 = vmatprep.subr.bf16.mxu1 %v14642_v48  ;;  %12590 = vmatprep.mubr.msk.bf16.mxu0 %vm14643_vm4, %v14642_v48  ;;  %v13393_v14 = vld [vmem:[#allocation9 + $0x200] sm:$0xff]   ;;  %v13394_v32 = vld [vmem:[#allocation9 + $0x278] sm:$0xff]  }
 0x3b7   : >> { %v3607_v46 = vpop.f32.mrf.mxu0  ;;  %12610 = vmatprep.mubr.msk.bf16.mxu1 %vm14643_vm4, %v14642_v48 }
 0x3b8   : >> { %v3715_v56 = vpop.f32.mrf.mxu1  ;;  %12577 = vmatpush3.bf16.msra.mxu0 %v13364_v11 }
 0x3b9   : >> { %12597 = vmatpush3.bf16.msra.mxu1 %v13365_v2  ;;  %v12313_v15 = vpop.f32.mrf.mxu0  ;;  %12578 = vmatprep.subr.bf16.mxu0 %v14642_v48  ;;  %v13397_v2 = vld [vmem:[#allocation9 + $0x2b0] sm:$0xff]  }
 0x3ba   : >> { %v12333_v26 = vpop.f32.mrf.mxu1  ;;  %12598 = vmatprep.subr.bf16.mxu1 %v14642_v48 }
 0x3bc   : >> { %12579 = vmatpush3.bf16.msra.mxu0 %v13366_v42  ;;  %v13398_v42 = vld [vmem:[#allocation9 + $0x268] sm:$0xff]  }
 0x3bd   : >> { %12599 = vmatpush3.bf16.msra.mxu1 %v13367_v53  ;;  %12580 = vmatprep.subr.bf16.mxu0 %v14642_v48  ;;  %v13399_v53 = vld [vmem:[#allocation9 + $0x2a8] sm:$0xff]  }
 0x3be   : >> { %12600 = vmatprep.subr.bf16.mxu1 %v14642_v48 }
 0x3c0   : >> { %12581 = vmatpush3.bf16.msra.mxu0 %v13368_v18  ;;  %v13400_v18 = vld [vmem:[#allocation9 + $0x260] sm:$0xff]  }
 0x3c1   : >> { %12601 = vmatpush3.bf16.msra.mxu1 %v13369_v62  ;;  %12582 = vmatprep.subr.bf16.mxu0 %v14642_v48  ;;  %v13401_v62 = vld [vmem:[#allocation9 + $0x2a0] sm:$0xff]  }
 0x3c2   : >> { %12602 = vmatprep.subr.bf16.mxu1 %v14642_v48 }
 0x3c4   : >> { %12583 = vmatpush3.bf16.msra.mxu0 %v13370_v4  ;;  %v13402_v4 = vld [vmem:[#allocation9 + $0x258] sm:$0xff]  }
 0x3c5   : >> { %12603 = vmatpush3.bf16.msra.mxu1 %v13371_v5  ;;  %12584 = vmatprep.subr.bf16.mxu0 %v14642_v48  ;;  %v13403_v5 = vld [vmem:[#allocation9 + $0x298] sm:$0xff]  }
 0x3c6   : >> { %12604 = vmatprep.subr.bf16.mxu1 %v14642_v48 }
 0x3c8   : >> { %12585 = vmatpush3.bf16.msra.mxu0 %v13372_v17  ;;  %v13404_v17 = vld [vmem:[#allocation9 + $0x250] sm:$0xff]  }
 0x3c9   : >> { %12605 = vmatpush3.bf16.msra.mxu1 %v13373_v22  ;;  %12586 = vmatprep.subr.bf16.mxu0 %v14642_v48  ;;  %v13405_v22 = vld [vmem:[#allocation9 + $0x290] sm:$0xff]  }
 0x3ca   : >> { %12606 = vmatprep.subr.bf16.mxu1 %v14642_v48 }
 0x3cc   : >> { %12587 = vmatpush3.bf16.msra.mxu0 %v13374_v52  ;;  %v13406_v52 = vld [vmem:[#allocation9 + $0x248] sm:$0xff]  }
 0x3cd   : >> { %12607 = vmatpush3.bf16.msra.mxu1 %v13375_v41  ;;  %12588 = vmatprep.subr.bf16.mxu0 %v14642_v48  ;;  %v13407_v41 = vld [vmem:[#allocation9 + $0x288] sm:$0xff]  }
 0x3ce   : >> { %12608 = vmatprep.subr.bf16.mxu1 %v14642_v48 }
 0x3d0   : >> { %12589 = vmatpush3.bf16.msra.mxu0 %v13376_v24  ;;  %v13408_v24 = vld [vmem:[#allocation9 + $0x240] sm:$0xff]  }
 0x3d1   : >> { %12609 = vmatpush3.bf16.msra.mxu1 %v13377_v0  ;;  %12614 = vmatprep.subr.bf16.mxu0 %v14642_v48  ;;  %v13409_v0 = vld [vmem:[#allocation9 + $0x280] sm:$0xff]  }
 0x3d2   : >> { %12634 = vmatprep.subr.bf16.mxu1 %v14642_v48 }
 0x3d3   : >> { %v3820_v44 = vpop.f32.mrf.mxu0  ;;  %12591 = vmatmul.mubr.bf16.vlgmr.msra.gmra.mxu0 %v16167_v45 }
 0x3d4   : >> { %v3826_v23 = vadd.f32 %v3820_v44, %v3718_v58  ;;  %v3928_v36 = vpop.f32.mrf.mxu1  ;;  %12611 = vmatmul.mubr.bf16.vlgmr.msra.gmra.mxu1 %v16169_v31  ;;  %12615 = vmatpush3.bf16.msra.mxu0 %v13378_v6  ;;  %v13380_v31 = vld [vmem:[#allocation9 + $0x1f0] sm:$0xff]   ;;  %v13395_v58 = vld [vmem:[#allocation9 + $0x2b8] sm:$0xff]  }
 0x3d5   : >> { %12635 = vmatpush3.bf16.msra.mxu1 %v13379_v27  ;;  %v12352_v28 = vpop.f32.mrf.mxu0  ;;  %12616 = vmatprep.subr.bf16.mxu0 %v14642_v48  ;;  %v13410_v6 = vld [vmem:[#allocation9 + $0x2f8] sm:$0xff]  }
 0x3d6   : >> { %v3934_v54 = vadd.f32 %v3928_v36, %v3826_v23  ;;  %v12372_v19 = vpop.f32.mrf.mxu1  ;;  %12636 = vmatprep.subr.bf16.mxu1 %v14642_v48  ;;  %12630 = vmatprep.mubr.msk.bf16.mxu0 %vm14643_vm4, %v14642_v48  ;;  %v13411_v27 = vld [vmem:[#allocation9 + $0x338] sm:$0xff]  }
 0x3d7   : >> { %v3823_v13 = vpop.f32.mrf.mxu0  ;;  %12650 = vmatprep.mubr.msk.bf16.mxu1 %vm14643_vm4, %v14642_v48 }
 0x3d8   : >> { %v3931_v45 = vpop.f32.mrf.mxu1  ;;  %12617 = vmatpush3.bf16.msra.mxu0 %v13380_v31 }
 0x3d9   : >> { %12637 = vmatpush3.bf16.msra.mxu1 %v13381_v55  ;;  %v12353_v63 = vpop.f32.mrf.mxu0  ;;  %12618 = vmatprep.subr.bf16.mxu0 %v14642_v48  ;;  %v13413_v45 = vld [vmem:[#allocation9 + $0x330] sm:$0xff]  }
 0x3da   : >> { %v12373_v3 = vpop.f32.mrf.mxu1  ;;  %12638 = vmatprep.subr.bf16.mxu1 %v14642_v48  ;;  %v13414_v63 = vld [vmem:[#allocation9 + $0x2e8] sm:$0xff]  }
 0x3db   : >> { %v13415_v3 = vld [vmem:[#allocation9 + $0x328] sm:$0xff]  }
 0x3dc   : >> { %12619 = vmatpush3.bf16.msra.mxu0 %v13382_v29  ;;  %v13416_v29 = vld [vmem:[#allocation9 + $0x2e0] sm:$0xff]  }
 0x3dd   : >> { %12639 = vmatpush3.bf16.msra.mxu1 %v13383_v49  ;;  %12620 = vmatprep.subr.bf16.mxu0 %v14642_v48  ;;  %v13417_v49 = vld [vmem:[#allocation9 + $0x320] sm:$0xff]  }
 0x3de   : >> { %12640 = vmatprep.subr.bf16.mxu1 %v14642_v48 }
 0x3e0   : >> { %12621 = vmatpush3.bf16.msra.mxu0 %v13384_v1  ;;  %v13418_v1 = vld [vmem:[#allocation9 + $0x2d8] sm:$0xff]  }
 0x3e1   : >> { %12641 = vmatpush3.bf16.msra.mxu1 %v13385_v12  ;;  %12622 = vmatprep.subr.bf16.mxu0 %v14642_v48  ;;  %v13419_v12 = vld [vmem:[#allocation9 + $0x318] sm:$0xff]  }
 0x3e2   : >> { %12642 = vmatprep.subr.bf16.mxu1 %v14642_v48 }
 0x3e4   : >> { %12623 = vmatpush3.bf16.msra.mxu0 %v13386_v20  ;;  %v13420_v20 = vld [vmem:[#allocation9 + $0x2d0] sm:$0xff]  }
 0x3e5   : >> { %12643 = vmatpush3.bf16.msra.mxu1 %v13387_v25  ;;  %12624 = vmatprep.subr.bf16.mxu0 %v14642_v48  ;;  %v13421_v25 = vld [vmem:[#allocation9 + $0x310] sm:$0xff]  }
 0x3e6   : >> { %12644 = vmatprep.subr.bf16.mxu1 %v14642_v48 }
 0x3e8   : >> { %12625 = vmatpush3.bf16.msra.mxu0 %v13388_v39  ;;  %v13422_v39 = vld [vmem:[#allocation9 + $0x2c8] sm:$0xff]  }
 0x3e9   : >> { %12645 = vmatpush3.bf16.msra.mxu1 %v13389_v38  ;;  %12626 = vmatprep.subr.bf16.mxu0 %v14642_v48  ;;  %v13423_v38 = vld [vmem:[#allocation9 + $0x308] sm:$0xff]  }
 0x3ea   : >> { %12646 = vmatprep.subr.bf16.mxu1 %v14642_v48 }
 0x3ec   : >> { %12627 = vmatpush3.bf16.msra.mxu0 %v13390_v8  ;;  %v13424_v8 = vld [vmem:[#allocation9 + $0x2c0] sm:$0xff]  }
 0x3ed   : >> { %12647 = vmatpush3.bf16.msra.mxu1 %v13391_v35  ;;  %12628 = vmatprep.subr.bf16.mxu0 %v14642_v48  ;;  %v13425_v35 = vld [vmem:[#allocation9 + $0x300] sm:$0xff]  }
 0x3ee   : >> { %12648 = vmatprep.subr.bf16.mxu1 %v14642_v48 }
 0x3f0   : >> { %12629 = vmatpush3.bf16.msra.mxu0 %v13392_v37 }
 0x3f1   : >> { %12649 = vmatpush3.bf16.msra.mxu1 %v13393_v14  ;;  %12654 = vmatprep.subr.bf16.mxu0 %v14642_v48 }
 0x3f2   : >> { %12674 = vmatprep.subr.bf16.mxu1 %v14642_v48 }
 0x3f3   : >> { %v4039_v30 = vpop.f32.mrf.mxu0  ;;  %12631 = vmatmul.mubr.bf16.vlgmr.msra.gmra.mxu0 %v16195_v50 }
 0x3f4   : >> { %v4045_v61 = vadd.f32 %v4039_v30, %v3934_v54  ;;  %v4147_v10 = vpop.f32.mrf.mxu1  ;;  %12651 = vmatmul.mubr.bf16.vlgmr.msra.gmra.mxu1 %v16197_v9  ;;  %12655 = vmatpush3.bf16.msra.mxu0 %v13394_v32  ;;  %v13396_v9 = vld [vmem:[#allocation9 + $0x270] sm:$0xff]  }
 0x3f5   : >> { %12675 = vmatpush3.bf16.msra.mxu1 %v13395_v58  ;;  %v12392_v34 = vpop.f32.mrf.mxu0  ;;  %12656 = vmatprep.subr.bf16.mxu0 %v14642_v48 }
 0x3f6   : >> { %v4153_v46 = vadd.f32 %v4147_v10, %v4045_v61  ;;  %v12412_v56 = vpop.f32.mrf.mxu1  ;;  %12676 = vmatprep.subr.bf16.mxu1 %v14642_v48  ;;  %12670 = vmatprep.mubr.msk.bf16.mxu0 %vm14643_vm4, %v14642_v48  ;;  %v13426_v61 = vld [vmem:[#allocation9 + $0x378] sm:$0xff]  }
 0x3f7   : >> { %v4042_v11 = vpop.f32.mrf.mxu0  ;;  %12690 = vmatprep.mubr.msk.bf16.mxu1 %vm14643_vm4, %v14642_v48  ;;  %v13427_v10 = vld [vmem:[#allocation9 + $0x3b8] sm:$0xff]  }
 0x3f8   : >> { %v4150_v50 = vpop.f32.mrf.mxu1  ;;  %12657 = vmatpush3.bf16.msra.mxu0 %v13396_v9  ;;  %v13431_v9 = vld [vmem:[#allocation9 + $0x3a8] sm:$0xff]  }
 0x3f9   : >> { %12677 = vmatpush3.bf16.msra.mxu1 %v13397_v2  ;;  %v12393_v15 = vpop.f32.mrf.mxu0  ;;  %12658 = vmatprep.subr.bf16.mxu0 %v14642_v48  ;;  %v13430_v50 = vld [vmem:[#allocation9 + $0x368] sm:$0xff]   ;;  %v13432_v2 = vld [vmem:[#allocation9 + $0x360] sm:$0xff]  }
 0x3fa   : >> { %v12413_v26 = vpop.f32.mrf.mxu1  ;;  %12678 = vmatprep.subr.bf16.mxu1 %v14642_v48  ;;  %v13433_v15 = vld [vmem:[#allocation9 + $0x3a0] sm:$0xff]  }
 0x3fb   : >> { %v13434_v26 = vld [vmem:[#allocation9 + $0x358] sm:$0xff]  }
 0x3fc   : >> { %12659 = vmatpush3.bf16.msra.mxu0 %v13398_v42  ;;  %v13435_v42 = vld [vmem:[#allocation9 + $0x398] sm:$0xff]  }
 0x3fd   : >> { %12679 = vmatpush3.bf16.msra.mxu1 %v13399_v53  ;;  %12660 = vmatprep.subr.bf16.mxu0 %v14642_v48  ;;  %v13436_v53 = vld [vmem:[#allocation9 + $0x350] sm:$0xff]  }
 0x3fe   : >> { %12680 = vmatprep.subr.bf16.mxu1 %v14642_v48 }
 0x400   : >> { %12661 = vmatpush3.bf16.msra.mxu0 %v13400_v18  ;;  %v13437_v18 = vld [vmem:[#allocation9 + $0x390] sm:$0xff]  }
 0x401   : >> { %12681 = vmatpush3.bf16.msra.mxu1 %v13401_v62  ;;  %12662 = vmatprep.subr.bf16.mxu0 %v14642_v48  ;;  %v13438_v62 = vld [vmem:[#allocation9 + $0x348] sm:$0xff]  }
 0x402   : >> { %12682 = vmatprep.subr.bf16.mxu1 %v14642_v48 }
 0x404   : >> { %12663 = vmatpush3.bf16.msra.mxu0 %v13402_v4  ;;  %v13439_v4 = vld [vmem:[#allocation9 + $0x388] sm:$0xff]  }
 0x405   : >> { %12683 = vmatpush3.bf16.msra.mxu1 %v13403_v5  ;;  %12664 = vmatprep.subr.bf16.mxu0 %v14642_v48  ;;  %v13440_v5 = vld [vmem:[#allocation9 + $0x340] sm:$0xff]  }
 0x406   : >> { %12684 = vmatprep.subr.bf16.mxu1 %v14642_v48 }
 0x408   : >> { %12665 = vmatpush3.bf16.msra.mxu0 %v13404_v17  ;;  %v13441_v17 = vld [vmem:[#allocation9 + $0x380] sm:$0xff]  }
 0x409   : >> { %12685 = vmatpush3.bf16.msra.mxu1 %v13405_v22  ;;  %12666 = vmatprep.subr.bf16.mxu0 %v14642_v48 }
 0x40a   : >> { %12686 = vmatprep.subr.bf16.mxu1 %v14642_v48 }
 0x40c   : >> { %12667 = vmatpush3.bf16.msra.mxu0 %v13406_v52 }
 0x40d   : >> { %12687 = vmatpush3.bf16.msra.mxu1 %v13407_v41  ;;  %12668 = vmatprep.subr.bf16.mxu0 %v14642_v48 }
 0x40e   : >> { %12688 = vmatprep.subr.bf16.mxu1 %v14642_v48 }
 0x410   : >> { %12669 = vmatpush3.bf16.msra.mxu0 %v13408_v24  ;;  %v13442_v24 = vld [vmem:[#allocation9 + $0x3f8] sm:$0xff]  }
 0x411   : >> { %12689 = vmatpush3.bf16.msra.mxu1 %v13409_v0  ;;  %12694 = vmatprep.subr.bf16.mxu0 %v14642_v48  ;;  %v13443_v0 = vld [vmem:[#allocation9 + $0x438] sm:$0xff]  }
 0x412   : >> { %12714 = vmatprep.subr.bf16.mxu1 %v14642_v48 }
 0x413   : >> { %v4255_v44 = vpop.f32.mrf.mxu0  ;;  %12671 = vmatmul.mubr.bf16.vlgmr.msra.gmra.mxu0 %v16223_v33 }
 0x414   : >> { %v4261_v23 = vadd.f32 %v4255_v44, %v4153_v46  ;;  %v4363_v36 = vpop.f32.mrf.mxu1  ;;  %12691 = vmatmul.mubr.bf16.vlgmr.msra.gmra.mxu1 %v16225_v7  ;;  %12695 = vmatpush3.bf16.msra.mxu0 %v13410_v6  ;;  %v13412_v7 = vld [vmem:[#allocation9 + $0x2f0] sm:$0xff]  }
 0x415   : >> { %12715 = vmatpush3.bf16.msra.mxu1 %v13411_v27  ;;  %v12432_v28 = vpop.f32.mrf.mxu0  ;;  %12696 = vmatprep.subr.bf16.mxu0 %v14642_v48  ;;  %v13428_v46 = vld [vmem:[#allocation9 + $0x370] sm:$0xff]  }
 0x416   : >> { %v4369_v54 = vadd.f32 %v4363_v36, %v4261_v23  ;;  %v12452_v19 = vpop.f32.mrf.mxu1  ;;  %12716 = vmatprep.subr.bf16.mxu1 %v14642_v48  ;;  %12710 = vmatprep.mubr.msk.bf16.mxu0 %vm14643_vm4, %v14642_v48  ;;  %v13445_v27 = vld [vmem:[#allocation9 + $0x430] sm:$0xff]  }
 0x417   : >> { %v4258_v13 = vpop.f32.mrf.mxu0  ;;  %12730 = vmatprep.mubr.msk.bf16.mxu1 %vm14643_vm4, %v14642_v48  ;;  %v13446_v19 = vld [vmem:[#allocation9 + $0x3e8] sm:$0xff]  }
 0x418   : >> { %v4366_v33 = vpop.f32.mrf.mxu1  ;;  %12697 = vmatpush3.bf16.msra.mxu0 %v13412_v7  ;;  %v13447_v13 = vld [vmem:[#allocation9 + $0x428] sm:$0xff]   ;;  %v13449_v7 = vld [vmem:[#allocation9 + $0x420] sm:$0xff]  }
 0x419   : >> { %12717 = vmatpush3.bf16.msra.mxu1 %v13413_v45  ;;  %v12433_v31 = vpop.f32.mrf.mxu0  ;;  %12698 = vmatprep.subr.bf16.mxu0 %v14642_v48  ;;  %v13448_v33 = vld [vmem:[#allocation9 + $0x3e0] sm:$0xff]   ;;  %v13450_v45 = vld [vmem:[#allocation9 + $0x3d8] sm:$0xff]  }
 0x41a   : >> { %v12453_v55 = vpop.f32.mrf.mxu1  ;;  %12718 = vmatprep.subr.bf16.mxu1 %v14642_v48  ;;  %v13451_v31 = vld [vmem:[#allocation9 + $0x418] sm:$0xff]  }
 0x41b   : >> { %v13452_v55 = vld [vmem:[#allocation9 + $0x3d0] sm:$0xff]  }
 0x41c   : >> { %12699 = vmatpush3.bf16.msra.mxu0 %v13414_v63  ;;  %v13453_v63 = vld [vmem:[#allocation9 + $0x410] sm:$0xff]  }
 0x41d   : >> { %12719 = vmatpush3.bf16.msra.mxu1 %v13415_v3  ;;  %12700 = vmatprep.subr.bf16.mxu0 %v14642_v48  ;;  %v13454_v3 = vld [vmem:[#allocation9 + $0x3c8] sm:$0xff]  }
 0x41e   : >> { %12720 = vmatprep.subr.bf16.mxu1 %v14642_v48 }
 0x420   : >> { %12701 = vmatpush3.bf16.msra.mxu0 %v13416_v29  ;;  %v13455_v29 = vld [vmem:[#allocation9 + $0x408] sm:$0xff]  }
 0x421   : >> { %12721 = vmatpush3.bf16.msra.mxu1 %v13417_v49  ;;  %12702 = vmatprep.subr.bf16.mxu0 %v14642_v48  ;;  %v13456_v49 = vld [vmem:[#allocation9 + $0x3c0] sm:$0xff]  }
 0x422   : >> { %12722 = vmatprep.subr.bf16.mxu1 %v14642_v48 }
 0x424   : >> { %12703 = vmatpush3.bf16.msra.mxu0 %v13418_v1  ;;  %v13457_v1 = vld [vmem:[#allocation9 + $0x400] sm:$0xff]  }
 0x425   : >> { %12723 = vmatpush3.bf16.msra.mxu1 %v13419_v12  ;;  %12704 = vmatprep.subr.bf16.mxu0 %v14642_v48 }
 0x426   : >> { %12724 = vmatprep.subr.bf16.mxu1 %v14642_v48 }
 0x428   : >> { %12705 = vmatpush3.bf16.msra.mxu0 %v13420_v20 }
 0x429   : >> { %12725 = vmatpush3.bf16.msra.mxu1 %v13421_v25  ;;  %12706 = vmatprep.subr.bf16.mxu0 %v14642_v48 }
 0x42a   : >> { %12726 = vmatprep.subr.bf16.mxu1 %v14642_v48 }
 0x42c   : >> { %12707 = vmatpush3.bf16.msra.mxu0 %v13422_v39  ;;  %v13458_v39 = vld [vmem:[#allocation9 + $0x478] sm:$0xff]  }
 0x42d   : >> { %12727 = vmatpush3.bf16.msra.mxu1 %v13423_v38  ;;  %12708 = vmatprep.subr.bf16.mxu0 %v14642_v48  ;;  %v13459_v38 = vld [vmem:[#allocation9 + $0x4b8] sm:$0xff]  }
 0x42e   : >> { %12728 = vmatprep.subr.bf16.mxu1 %v14642_v48 }
 0x430   : >> { %12709 = vmatpush3.bf16.msra.mxu0 %v13424_v8 }
 0x431   : >> { %12729 = vmatpush3.bf16.msra.mxu1 %v13425_v35  ;;  %12734 = vmatprep.subr.bf16.mxu0 %v14642_v48 }
 0x432   : >> { %12754 = vmatprep.subr.bf16.mxu1 %v14642_v48 }
 0x433   : >> { %v4471_v37 = vpop.f32.mrf.mxu0  ;;  %12711 = vmatmul.mubr.bf16.vlgmr.msra.gmra.mxu0 %v16251_v16 }
 0x434   : >> { %v16499_v14 = vadd.f32 %v4471_v37, %v4369_v54  ;;  %v4520_v30 = vpop.f32.mrf.mxu1  ;;  %12731 = vmatmul.mubr.bf16.vlgmr.msra.gmra.mxu1 %v16253_v59  ;;  %12735 = vmatpush3.bf16.msra.mxu0 %v13426_v61  ;;  %v13429_v59 = vld [vmem:[#allocation9 + $0x3b0] sm:$0xff]  }
 0x435   : >> { %12755 = vmatpush3.bf16.msra.mxu1 %v13427_v10  ;;  %v12472_v32 = vpop.f32.mrf.mxu0  ;;  %12736 = vmatprep.subr.bf16.mxu0 %v14642_v48  ;;  %v13461_v61 = vld [vmem:[#allocation9 + $0x4b0] sm:$0xff]  }
 0x436   : >> { %v12492_v58 = vpop.f32.mrf.mxu1  ;;  %12756 = vmatprep.subr.bf16.mxu1 %v14642_v48  ;;  %12750 = vmatprep.mubr.msk.bf16.mxu0 %vm14643_vm4, %v14642_v48 }
 0x437   : >> { %v4474_v34 = vpop.f32.mrf.mxu0  ;;  %12770 = vmatprep.mubr.msk.bf16.mxu1 %vm14643_vm4, %v14642_v48  ;;  %v13462_v58 = vld [vmem:[#allocation9 + $0x468] sm:$0xff]  }
 0x438   : >> { %v4523_v16 = vpop.f32.mrf.mxu1  ;;  %12737 = vmatpush3.bf16.msra.mxu0 %v13428_v46  ;;  %v13463_v34 = vld [vmem:[#allocation9 + $0x4a8] sm:$0xff]   ;;  %v13465_v46 = vld [vmem:[#allocation9 + $0x4a0] sm:$0xff]  }
 0x439   : >> { %12757 = vmatpush3.bf16.msra.mxu1 %v13429_v59  ;;  %v12473_v56 = vpop.f32.mrf.mxu0  ;;  %12738 = vmatprep.subr.bf16.mxu0 %v14642_v48  ;;  %v13464_v16 = vld [vmem:[#allocation9 + $0x460] sm:$0xff]   ;;  %v13466_v59 = vld [vmem:[#allocation9 + $0x458] sm:$0xff]  }
 0x43a   : >> { %v12493_v11 = vpop.f32.mrf.mxu1  ;;  %12758 = vmatprep.subr.bf16.mxu1 %v14642_v48  ;;  %v13467_v56 = vld [vmem:[#allocation9 + $0x498] sm:$0xff]  }
 0x43b   : >> { %v13468_v11 = vld [vmem:[#allocation9 + $0x450] sm:$0xff]  }
 0x43c   : >> { %12739 = vmatpush3.bf16.msra.mxu0 %v13430_v50  ;;  %v13469_v50 = vld [vmem:[#allocation9 + $0x490] sm:$0xff]  }
 0x43d   : >> { %12759 = vmatpush3.bf16.msra.mxu1 %v13431_v9  ;;  %12740 = vmatprep.subr.bf16.mxu0 %v14642_v48  ;;  %v13470_v9 = vld [vmem:[#allocation9 + $0x448] sm:$0xff]  }
 0x43e   : >> { %12760 = vmatprep.subr.bf16.mxu1 %v14642_v48 }
 0x440   : >> { %12741 = vmatpush3.bf16.msra.mxu0 %v13432_v2  ;;  %v13471_v2 = vld [vmem:[#allocation9 + $0x488] sm:$0xff]  }
 0x441   : >> { %12761 = vmatpush3.bf16.msra.mxu1 %v13433_v15  ;;  %12742 = vmatprep.subr.bf16.mxu0 %v14642_v48  ;;  %v13472_v15 = vld [vmem:[#allocation9 + $0x440] sm:$0xff]  }
 0x442   : >> { %12762 = vmatprep.subr.bf16.mxu1 %v14642_v48 }
 0x444   : >> { %12743 = vmatpush3.bf16.msra.mxu0 %v13434_v26  ;;  %v13473_v26 = vld [vmem:[#allocation9 + $0x480] sm:$0xff]  }
 0x445   : >> { %12763 = vmatpush3.bf16.msra.mxu1 %v13435_v42  ;;  %12744 = vmatprep.subr.bf16.mxu0 %v14642_v48 }
 0x446   : >> { %12764 = vmatprep.subr.bf16.mxu1 %v14642_v48 }
 0x448   : >> { %12745 = vmatpush3.bf16.msra.mxu0 %v13436_v53 }
 0x449   : >> { %12765 = vmatpush3.bf16.msra.mxu1 %v13437_v18  ;;  %12746 = vmatprep.subr.bf16.mxu0 %v14642_v48 }
 0x44a   : >> { %12766 = vmatprep.subr.bf16.mxu1 %v14642_v48 }
 0x44c   : >> { %12747 = vmatpush3.bf16.msra.mxu0 %v13438_v62  ;;  %v13474_v62 = vld [vmem:[#allocation9 + $0x4f8] sm:$0xff]  }
 0x44d   : >> { %12767 = vmatpush3.bf16.msra.mxu1 %v13439_v4  ;;  %12748 = vmatprep.subr.bf16.mxu0 %v14642_v48  ;;  %v13475_v4 = vld [vmem:[#allocation9 + $0x538] sm:$0xff]  }
 0x44e   : >> { %12768 = vmatprep.subr.bf16.mxu1 %v14642_v48 }
 0x450   : >> { %12749 = vmatpush3.bf16.msra.mxu0 %v13440_v5 }
 0x451   : >> { %12769 = vmatpush3.bf16.msra.mxu1 %v13441_v17  ;;  %12774 = vmatprep.subr.bf16.mxu0 %v14642_v48 }
 0x452   : >> { %12794 = vmatprep.subr.bf16.mxu1 %v14642_v48 }
 0x453   : >> { %v4560_v22 = vpop.f32.mrf.mxu0  ;;  %12751 = vmatmul.mubr.bf16.vlgmr.msra.gmra.mxu0 %v16279_v57 }
 0x454   : >> { %v4561_v52 = vadd.f32 %v4560_v22, %v4520_v30  ;;  %v4600_v41 = vpop.f32.mrf.mxu1  ;;  %12771 = vmatmul.mubr.bf16.vlgmr.msra.gmra.mxu1 %v16281_v51  ;;  %12775 = vmatpush3.bf16.msra.mxu0 %v13442_v24  ;;  %v13444_v51 = vld [vmem:[#allocation9 + $0x3f0] sm:$0xff]  }
 0x455   : >> { %12795 = vmatpush3.bf16.msra.mxu1 %v13443_v0  ;;  %v12512_v44 = vpop.f32.mrf.mxu0  ;;  %12776 = vmatprep.subr.bf16.mxu0 %v14642_v48 }
 0x456   : >> { %v4606_v23 = vadd.f32 %v4600_v41, %v4561_v52  ;;  %v12532_v36 = vpop.f32.mrf.mxu1  ;;  %12796 = vmatprep.subr.bf16.mxu1 %v14642_v48  ;;  %12790 = vmatprep.mubr.msk.bf16.mxu0 %vm14643_vm4, %v14642_v48  ;;  %v13477_v41 = vld [vmem:[#allocation9 + $0x530] sm:$0xff]   ;;  %v13478_v44 = vld [vmem:[#allocation9 + $0x4e8] sm:$0xff]  }
 0x457   : >> { %v4563_v6 = vpop.f32.mrf.mxu0  ;;  %12810 = vmatprep.mubr.msk.bf16.mxu1 %vm14643_vm4, %v14642_v48  ;;  %v13480_v36 = vld [vmem:[#allocation9 + $0x4e0] sm:$0xff]  }
 0x458   : >> { %v4603_v57 = vpop.f32.mrf.mxu1  ;;  %12777 = vmatpush3.bf16.msra.mxu0 %v13444_v51  ;;  %v13481_v6 = vld [vmem:[#allocation9 + $0x520] sm:$0xff]   ;;  %v13483_v51 = vld [vmem:[#allocation9 + $0x518] sm:$0xff]  }
 0x459   : >> { %12797 = vmatpush3.bf16.msra.mxu1 %v13445_v27  ;;  %v12513_v28 = vpop.f32.mrf.mxu0  ;;  %12778 = vmatprep.subr.bf16.mxu0 %v14642_v48  ;;  %v13482_v57 = vld [vmem:[#allocation9 + $0x4d8] sm:$0xff]   ;;  %v13484_v27 = vld [vmem:[#allocation9 + $0x4d0] sm:$0xff]  }
 0x45a   : >> { %v12533_v54 = vpop.f32.mrf.mxu1  ;;  %12798 = vmatprep.subr.bf16.mxu1 %v14642_v48  ;;  %v13485_v28 = vld [vmem:[#allocation9 + $0x510] sm:$0xff]  }
 0x45b   : >> { %v13486_v54 = vld [vmem:[#allocation9 + $0x4c8] sm:$0xff]  }
 0x45c   : >> { %12779 = vmatpush3.bf16.msra.mxu0 %v13446_v19  ;;  %v13487_v19 = vld [vmem:[#allocation9 + $0x508] sm:$0xff]  }
 0x45d   : >> { %12799 = vmatpush3.bf16.msra.mxu1 %v13447_v13  ;;  %12780 = vmatprep.subr.bf16.mxu0 %v14642_v48  ;;  %v10915_v13 = vld [vmem:[%s16036_s26 + $0x50] sm:$0xff] }
 0x45e   : >> { %12800 = vmatprep.subr.bf16.mxu1 %v14642_v48 }
 0x460   : >> { %12781 = vmatpush3.bf16.msra.mxu0 %v13448_v33  ;;  %v13488_v33 = vld [vmem:[#allocation9 + $0x4c0] sm:$0xff]  }
 0x461   : >> { %12801 = vmatpush3.bf16.msra.mxu1 %v13449_v7  ;;  %12782 = vmatprep.subr.bf16.mxu0 %v14642_v48  ;;  %v5308_v7 = vpack.c.bf16 %v10915_v13, %v10915_v13 }
 0x462   : >> { %12802 = vmatprep.subr.bf16.mxu1 %v14642_v48 }
 0x464   : >> { %12783 = vmatpush3.bf16.msra.mxu0 %v13450_v45  ;;  %v13489_v45 = vld [vmem:[#allocation9 + $0x500] sm:$0xff]  }
 0x465   : >> { %12803 = vmatpush3.bf16.msra.mxu1 %v13451_v31  ;;  %12784 = vmatprep.subr.bf16.mxu0 %v14642_v48 }
 0x466   : >> { %12804 = vmatprep.subr.bf16.mxu1 %v14642_v48 }
 0x468   : >> { %12785 = vmatpush3.bf16.msra.mxu0 %v13452_v55 }
 0x469   : >> { %12805 = vmatpush3.bf16.msra.mxu1 %v13453_v63  ;;  %12786 = vmatprep.subr.bf16.mxu0 %v14642_v48 }
 0x46a   : >> { %12806 = vmatprep.subr.bf16.mxu1 %v14642_v48 }
 0x46c   : >> { %12787 = vmatpush3.bf16.msra.mxu0 %v13454_v3  ;;  %v13490_v3 = vld [vmem:[#allocation9 + $0x578] sm:$0xff]  }
 0x46d   : >> { %12807 = vmatpush3.bf16.msra.mxu1 %v13455_v29  ;;  %12788 = vmatprep.subr.bf16.mxu0 %v14642_v48  ;;  %v13491_v29 = vld [vmem:[#allocation9 + $0x5b8] sm:$0xff]  }
 0x46e   : >> { %12808 = vmatprep.subr.bf16.mxu1 %v14642_v48 }
 0x470   : >> { %12789 = vmatpush3.bf16.msra.mxu0 %v13456_v49 }
 0x471   : >> { %12809 = vmatpush3.bf16.msra.mxu1 %v13457_v1  ;;  %12814 = vmatprep.subr.bf16.mxu0 %v14642_v48 }
 0x472   : >> { %12834 = vmatprep.subr.bf16.mxu1 %v14642_v48 }
 0x473   : >> { %v4641_v12 = vpop.f32.mrf.mxu0  ;;  %12791 = vmatmul.mubr.bf16.vlgmr.msra.gmra.mxu0 %v16307_v47 }
 0x474   : >> { %v4647_v20 = vadd.f32 %v4641_v12, %v4606_v23  ;;  %v4682_v25 = vpop.f32.mrf.mxu1  ;;  %12811 = vmatmul.mubr.bf16.vlgmr.msra.gmra.mxu1 %v16309_v60  ;;  %12815 = vmatpush3.bf16.msra.mxu0 %v13458_v39  ;;  %v13460_v60 = vld [vmem:[#allocation9 + $0x470] sm:$0xff]   ;;  %v13479_v23 = vld [vmem:[#allocation9 + $0x528] sm:$0xff]  }
 0x475   : >> { %12835 = vmatpush3.bf16.msra.mxu1 %v13459_v38  ;;  %v12552_v8 = vpop.f32.mrf.mxu0  ;;  %12816 = vmatprep.subr.bf16.mxu0 %v14642_v48  ;;  %v13493_v39 = vld [vmem:[#allocation9 + $0x5b0] sm:$0xff]  }
 0x476   : >> { %v4688_v35 = vadd.f32 %v4682_v25, %v4647_v20  ;;  %v12572_v37 = vpop.f32.mrf.mxu1  ;;  %12836 = vmatprep.subr.bf16.mxu1 %v14642_v48  ;;  %12830 = vmatprep.mubr.msk.bf16.mxu0 %vm14643_vm4, %v14642_v48  ;;  %v13492_v25 = vld [vmem:[#allocation9 + $0x570] sm:$0xff]  }
 0x477   : >> { %v4644_v30 = vpop.f32.mrf.mxu0  ;;  %12850 = vmatprep.mubr.msk.bf16.mxu1 %vm14643_vm4, %v14642_v48  ;;  %v13495_v37 = vld [vmem:[#allocation9 + $0x5a8] sm:$0xff]  }
 0x478   : >> { %v4685_v47 = vpop.f32.mrf.mxu1  ;;  %12817 = vmatpush3.bf16.msra.mxu0 %v13460_v60  ;;  %v13496_v30 = vld [vmem:[#allocation9 + $0x560] sm:$0xff]   ;;  %v13498_v60 = vld [vmem:[#allocation9 + $0x558] sm:$0xff]  }
 0x479   : >> { %12837 = vmatpush3.bf16.msra.mxu1 %v13461_v61  ;;  %v12553_v10 = vpop.f32.mrf.mxu0  ;;  %12818 = vmatprep.subr.bf16.mxu0 %v14642_v48  ;;  %v13497_v47 = vld [vmem:[#allocation9 + $0x5a0] sm:$0xff]   ;;  %v13499_v61 = vld [vmem:[#allocation9 + $0x598] sm:$0xff]  }
 0x47a   : >> { %v12573_v32 = vpop.f32.mrf.mxu1  ;;  %12838 = vmatprep.subr.bf16.mxu1 %v14642_v48  ;;  %v13500_v10 = vld [vmem:[#allocation9 + $0x550] sm:$0xff]  }
 0x47b   : >> { %v13501_v32 = vld [vmem:[#allocation9 + $0x590] sm:$0xff]  }
 0x47c   : >> { %12819 = vmatpush3.bf16.msra.mxu0 %v13462_v58  ;;  %v13502_v58 = vld [vmem:[#allocation9 + $0x548] sm:$0xff]  }
 0x47d   : >> { %12839 = vmatpush3.bf16.msra.mxu1 %v13463_v34  ;;  %12820 = vmatprep.subr.bf16.mxu0 %v14642_v48  ;;  %v10916_v34 = vld [vmem:[%s16036_s26 + $0x51] sm:$0xff] }
 0x47e   : >> { %12840 = vmatprep.subr.bf16.mxu1 %v14642_v48 }
 0x480   : >> { %12821 = vmatpush3.bf16.msra.mxu0 %v13464_v16  ;;  %v13503_v16 = vld [vmem:[#allocation9 + $0x588] sm:$0xff]  }
 0x481   : >> { %12841 = vmatpush3.bf16.msra.mxu1 %v13465_v46  ;;  %12822 = vmatprep.subr.bf16.mxu0 %v14642_v48  ;;  %v10917_v46 = vld [vmem:[%s16036_s26 + $0x52] sm:$0xff] }
 0x482   : >> { %12842 = vmatprep.subr.bf16.mxu1 %v14642_v48 }
 0x484   : >> { %12823 = vmatpush3.bf16.msra.mxu0 %v13466_v59  ;;  %v5351_v59 = vpack.c.bf16 %v10916_v34, %v10916_v34 }
 0x485   : >> { %12843 = vmatpush3.bf16.msra.mxu1 %v13467_v56  ;;  %12824 = vmatprep.subr.bf16.mxu0 %v14642_v48  ;;  %v13504_v56 = vld [vmem:[#allocation9 + $0x540] sm:$0xff]  }
 0x486   : >> { %12844 = vmatprep.subr.bf16.mxu1 %v14642_v48 }
 0x488   : >> { %12825 = vmatpush3.bf16.msra.mxu0 %v13468_v11  ;;  %v5394_v11 = vpack.c.bf16 %v10917_v46, %v10917_v46 }
 0x489   : >> { %12845 = vmatpush3.bf16.msra.mxu1 %v13469_v50  ;;  %12826 = vmatprep.subr.bf16.mxu0 %v14642_v48  ;;  %v13505_v50 = vld [vmem:[#allocation9 + $0x580] sm:$0xff]  }
 0x48a   : >> { %12846 = vmatprep.subr.bf16.mxu1 %v14642_v48 }
 0x48c   : >> { %12827 = vmatpush3.bf16.msra.mxu0 %v13470_v9 }
 0x48d   : >> { %12847 = vmatpush3.bf16.msra.mxu1 %v13471_v2  ;;  %12828 = vmatprep.subr.bf16.mxu0 %v14642_v48 }
 0x48e   : >> { %12848 = vmatprep.subr.bf16.mxu1 %v14642_v48 }
 0x490   : >> { %12829 = vmatpush3.bf16.msra.mxu0 %v13472_v15 }
 0x491   : >> { %12849 = vmatpush3.bf16.msra.mxu1 %v13473_v26  ;;  %12854 = vmatprep.subr.bf16.mxu0 %v14642_v48  ;;  %v13506_v26 = vld [vmem:[#allocation9 + $0x5f8] sm:$0xff]  }
 0x492   : >> { %12874 = vmatprep.subr.bf16.mxu1 %v14642_v48 }
 0x493   : >> { %v4723_v42 = vpop.f32.mrf.mxu0  ;;  %12831 = vmatmul.mubr.bf16.vlgmr.msra.gmra.mxu0 %v16335_v40 }
 0x494   : >> { %v4729_v53 = vadd.f32 %v4723_v42, %v4688_v35  ;;  %v4764_v18 = vpop.f32.mrf.mxu1  ;;  %12851 = vmatmul.mubr.bf16.vlgmr.msra.gmra.mxu1 %v16337_v21  ;;  %12855 = vmatpush3.bf16.msra.mxu0 %v13474_v62  ;;  %v13476_v21 = vld [vmem:[#allocation9 + $0x4f0] sm:$0xff]   ;;  %v13494_v35 = vld [vmem:[#allocation9 + $0x568] sm:$0xff]   ;;  %v13507_v42 = vld [vmem:[#allocation9 + $0x638] sm:$0xff]  }
 0x495   : >> { %12875 = vmatpush3.bf16.msra.mxu1 %v13475_v4  ;;  %v12592_v5 = vpop.f32.mrf.mxu0  ;;  %12856 = vmatprep.subr.bf16.mxu0 %v14642_v48 }
 0x496   : >> { %v4770_v17 = vadd.f32 %v4764_v18, %v4729_v53  ;;  %v12612_v22 = vpop.f32.mrf.mxu1  ;;  %12876 = vmatprep.subr.bf16.mxu1 %v14642_v48  ;;  %12870 = vmatprep.mubr.msk.bf16.mxu0 %vm14643_vm4, %v14642_v48 }
 0x497   : >> { %v4726_v52 = vpop.f32.mrf.mxu0  ;;  %12890 = vmatprep.mubr.msk.bf16.mxu1 %vm14643_vm4, %v14642_v48  ;;  %v13509_v22 = vld [vmem:[#allocation9 + $0x630] sm:$0xff]  }
 0x498   : >> { %v4767_v40 = vpop.f32.mrf.mxu1  ;;  %12857 = vmatpush3.bf16.msra.mxu0 %v13476_v21  ;;  %v13510_v21 = vld [vmem:[#allocation9 + $0x5e8] sm:$0xff]  }
 0x499   : >> { %12877 = vmatpush3.bf16.msra.mxu1 %v13477_v41  ;;  %v12593_v24 = vpop.f32.mrf.mxu0  ;;  %12858 = vmatprep.subr.bf16.mxu0 %v14642_v48  ;;  %v13511_v41 = vld [vmem:[#allocation9 + $0x628] sm:$0xff]  }
 0x49a   : >> { %v12613_v0 = vpop.f32.mrf.mxu1  ;;  %12878 = vmatprep.subr.bf16.mxu1 %v14642_v48  ;;  %v13512_v24 = vld [vmem:[#allocation9 + $0x5e0] sm:$0xff]  }
 0x49b   : >> { %v13513_v0 = vld [vmem:[#allocation9 + $0x620] sm:$0xff]  }
 0x49c   : >> { %12859 = vmatpush3.bf16.msra.mxu0 %v13478_v44  ;;  %v13514_v44 = vld [vmem:[#allocation9 + $0x5d8] sm:$0xff]  }
 0x49d   : >> { %12879 = vmatpush3.bf16.msra.mxu1 %v13479_v23  ;;  %12860 = vmatprep.subr.bf16.mxu0 %v14642_v48  ;;  %v13515_v23 = vld [vmem:[#allocation9 + $0x618] sm:$0xff]  }
 0x49e   : >> { %12880 = vmatprep.subr.bf16.mxu1 %v14642_v48 }
 0x4a0   : >> { %12861 = vmatpush3.bf16.msra.mxu0 %v13480_v36  ;;  %v13516_v36 = vld [vmem:[#allocation9 + $0x5d0] sm:$0xff]  }
 0x4a1   : >> { %12881 = vmatpush3.bf16.msra.mxu1 %v13481_v6  ;;  %12862 = vmatprep.subr.bf16.mxu0 %v14642_v48  ;;  %v13517_v6 = vld [vmem:[#allocation9 + $0x610] sm:$0xff]  }
 0x4a2   : >> { %12882 = vmatprep.subr.bf16.mxu1 %v14642_v48 }
 0x4a4   : >> { %12863 = vmatpush3.bf16.msra.mxu0 %v13482_v57  ;;  %v13518_v57 = vld [vmem:[#allocation9 + $0x5c8] sm:$0xff]  }
 0x4a5   : >> { %12883 = vmatpush3.bf16.msra.mxu1 %v13483_v51  ;;  %12864 = vmatprep.subr.bf16.mxu0 %v14642_v48  ;;  %v10918_v51 = vld [vmem:[%s16036_s26 + $0x53] sm:$0xff] }
 0x4a6   : >> { %12884 = vmatprep.subr.bf16.mxu1 %v14642_v48 }
 0x4a8   : >> { %12865 = vmatpush3.bf16.msra.mxu0 %v13484_v27  ;;  %v13519_v27 = vld [vmem:[#allocation9 + $0x608] sm:$0xff]  }
 0x4a9   : >> { %12885 = vmatpush3.bf16.msra.mxu1 %v13485_v28  ;;  %12866 = vmatprep.subr.bf16.mxu0 %v14642_v48  ;;  %v10919_v28 = vld [vmem:[%s16036_s26 + $0x54] sm:$0xff] }
 0x4aa   : >> { %12886 = vmatprep.subr.bf16.mxu1 %v14642_v48  ;;  %v5480_v13 = vpack.c.bf16 %v10919_v28, %v10919_v28 }
 0x4ac   : >> { %12867 = vmatpush3.bf16.msra.mxu0 %v13486_v54  ;;  %v5437_v54 = vpack.c.bf16 %v10918_v51, %v10918_v51 }
 0x4ad   : >> { %12887 = vmatpush3.bf16.msra.mxu1 %v13487_v19  ;;  %12868 = vmatprep.subr.bf16.mxu0 %v14642_v48  ;;  %v13520_v19 = vld [vmem:[#allocation9 + $0x5c0] sm:$0xff]  }
 0x4ae   : >> { %12888 = vmatprep.subr.bf16.mxu1 %v14642_v48 }
 0x4b0   : >> { %12869 = vmatpush3.bf16.msra.mxu0 %v13488_v33  ;;  %v13521_v33 = vld [vmem:[#allocation9 + $0x600] sm:$0xff]  }
 0x4b1   : >> { %12889 = vmatpush3.bf16.msra.mxu1 %v13489_v45  ;;  %12894 = vmatprep.subr.bf16.mxu0 %v14642_v48 }
 0x4b2   : >> { %12914 = vmatprep.subr.bf16.mxu1 %v14642_v48 }
 0x4b3   : >> { %v4805_v31 = vpop.f32.mrf.mxu0  ;;  %12871 = vmatmul.mubr.bf16.vlgmr.msra.gmra.mxu0 %v16362_v43 }
 0x4b4   : >> { %v4811_v55 = vadd.f32 %v4805_v31, %v4770_v17  ;;  %v4846_v63 = vpop.f32.mrf.mxu1  ;;  %12891 = vmatmul.mubr.bf16.vlgmr.msra.gmra.mxu1 %v5308_v7  ;;  %12895 = vmatpush3.bf16.msra.mxu0 %v13490_v3  ;;  %v13508_v17 = vld [vmem:[#allocation9 + $0x5f0] sm:$0xff]  }
 0x4b5   : >> { %12915 = vmatpush3.bf16.msra.mxu1 %v13491_v29  ;;  %v12632_v49 = vpop.f32.mrf.mxu0  ;;  %12896 = vmatprep.subr.bf16.mxu0 %v14642_v48 }
 0x4b6   : >> { %v4852_v1 = vadd.f32 %v4846_v63, %v4811_v55  ;;  %v12652_v12 = vpop.f32.mrf.mxu1  ;;  %12916 = vmatprep.subr.bf16.mxu1 %v14642_v48  ;;  %12910 = vmatprep.mubr.msk.bf16.mxu0 %vm14643_vm4, %v14642_v48 }
 0x4b7   : >> { %v4808_v20 = vpop.f32.mrf.mxu0  ;;  %12930 = vmatprep.mubr.msk.bf16.mxu1 %vm14643_vm4, %v14642_v48 }
 0x4b8   : >> { %v4849_v43 = vpop.f32.mrf.mxu1  ;;  %12897 = vmatpush3.bf16.msra.mxu0 %v13492_v25 }
 0x4b9   : >> { %12917 = vmatpush3.bf16.msra.mxu1 %v13493_v39  ;;  %v12633_v38 = vpop.f32.mrf.mxu0  ;;  %12898 = vmatprep.subr.bf16.mxu0 %v14642_v48 }
 0x4ba   : >> { %v12653_v8 = vpop.f32.mrf.mxu1  ;;  %12918 = vmatprep.subr.bf16.mxu1 %v14642_v48 }
 0x4bc   : >> { %12899 = vmatpush3.bf16.msra.mxu0 %v13494_v35 }
 0x4bd   : >> { %12919 = vmatpush3.bf16.msra.mxu1 %v13495_v37  ;;  %12900 = vmatprep.subr.bf16.mxu0 %v14642_v48 }
 0x4be   : >> { %12920 = vmatprep.subr.bf16.mxu1 %v14642_v48 }
 0x4c0   : >> { %12901 = vmatpush3.bf16.msra.mxu0 %v13496_v30 }
 0x4c1   : >> { %12921 = vmatpush3.bf16.msra.mxu1 %v13497_v47  ;;  %12902 = vmatprep.subr.bf16.mxu0 %v14642_v48 }
 0x4c2   : >> { %12922 = vmatprep.subr.bf16.mxu1 %v14642_v48 }
 0x4c4   : >> { %12903 = vmatpush3.bf16.msra.mxu0 %v13498_v60 }
 0x4c5   : >> { %12923 = vmatpush3.bf16.msra.mxu1 %v13499_v61  ;;  %12904 = vmatprep.subr.bf16.mxu0 %v14642_v48 }
 0x4c6   : >> { %12924 = vmatprep.subr.bf16.mxu1 %v14642_v48 }
 0x4c8   : >> { %12905 = vmatpush3.bf16.msra.mxu0 %v13500_v10 }
 0x4c9   : >> { %12925 = vmatpush3.bf16.msra.mxu1 %v13501_v32  ;;  %12906 = vmatprep.subr.bf16.mxu0 %v14642_v48 }
 0x4ca   : >> { %12926 = vmatprep.subr.bf16.mxu1 %v14642_v48 }
 0x4cc   : >> { %12907 = vmatpush3.bf16.msra.mxu0 %v13502_v58 }
 0x4cd   : >> { %12927 = vmatpush3.bf16.msra.mxu1 %v13503_v16  ;;  %12908 = vmatprep.subr.bf16.mxu0 %v14642_v48 }
 0x4ce   : >> { %12928 = vmatprep.subr.bf16.mxu1 %v14642_v48 }
 0x4d0   : >> { %12909 = vmatpush3.bf16.msra.mxu0 %v13504_v56 }
 0x4d1   : >> { %12929 = vmatpush3.bf16.msra.mxu1 %v13505_v50  ;;  %12934 = vmatprep.subr.bf16.mxu0 %v14642_v48 }
 0x4d2   : >> { %12954 = vmatprep.subr.bf16.mxu1 %v14642_v48 }
 0x4d3   : >> { %v4887_v9 = vpop.f32.mrf.mxu0  ;;  %12911 = vmatmul.mubr.bf16.vlgmr.msra.gmra.mxu0 %v5351_v59 }
 0x4d4   : >> { %v4893_v2 = vadd.f32 %v4887_v9, %v4852_v1  ;;  %v4928_v15 = vpop.f32.mrf.mxu1  ;;  %12931 = vmatmul.mubr.bf16.vlgmr.msra.gmra.mxu1 %v5394_v11  ;;  %12935 = vmatpush3.bf16.msra.mxu0 %v13506_v26 }
 0x4d5   : >> { %12955 = vmatpush3.bf16.msra.mxu1 %v13507_v42  ;;  %v12672_v53 = vpop.f32.mrf.mxu0  ;;  %12936 = vmatprep.subr.bf16.mxu0 %v14642_v48 }
 0x4d6   : >> { %v4934_v18 = vadd.f32 %v4928_v15, %v4893_v2  ;;  %v12692_v62 = vpop.f32.mrf.mxu1  ;;  %12956 = vmatprep.subr.bf16.mxu1 %v14642_v48  ;;  %12950 = vmatprep.mubr.msk.bf16.mxu0 %vm14643_vm4, %v14642_v48 }
 0x4d7   : >> { %v4890_v4 = vpop.f32.mrf.mxu0  ;;  %12970 = vmatprep.mubr.msk.bf16.mxu1 %vm14643_vm4, %v14642_v48 }
 0x4d8   : >> { %v4931_v5 = vpop.f32.mrf.mxu1  ;;  %12937 = vmatpush3.bf16.msra.mxu0 %v13508_v17 }
 0x4d9   : >> { %12957 = vmatpush3.bf16.msra.mxu1 %v13509_v22  ;;  %v12673_v52 = vpop.f32.mrf.mxu0  ;;  %12938 = vmatprep.subr.bf16.mxu0 %v14642_v48 }
 0x4da   : >> { %v12693_v40 = vpop.f32.mrf.mxu1  ;;  %12958 = vmatprep.subr.bf16.mxu1 %v14642_v48 }
 0x4dc   : >> { %12939 = vmatpush3.bf16.msra.mxu0 %v13510_v21 }
 0x4dd   : >> { %12959 = vmatpush3.bf16.msra.mxu1 %v13511_v41  ;;  %12940 = vmatprep.subr.bf16.mxu0 %v14642_v48 }
 0x4de   : >> { %12960 = vmatprep.subr.bf16.mxu1 %v14642_v48 }
 0x4e0   : >> { %12941 = vmatpush3.bf16.msra.mxu0 %v13512_v24 }
 0x4e1   : >> { %12961 = vmatpush3.bf16.msra.mxu1 %v13513_v0  ;;  %12942 = vmatprep.subr.bf16.mxu0 %v14642_v48 }
 0x4e2   : >> { %12962 = vmatprep.subr.bf16.mxu1 %v14642_v48 }
 0x4e4   : >> { %12943 = vmatpush3.bf16.msra.mxu0 %v13514_v44 }
 0x4e5   : >> { %12963 = vmatpush3.bf16.msra.mxu1 %v13515_v23  ;;  %12944 = vmatprep.subr.bf16.mxu0 %v14642_v48 }
 0x4e6   : >> { %12964 = vmatprep.subr.bf16.mxu1 %v14642_v48 }
 0x4e8   : >> { %12945 = vmatpush3.bf16.msra.mxu0 %v13516_v36 }
 0x4e9   : >> { %12965 = vmatpush3.bf16.msra.mxu1 %v13517_v6  ;;  %12946 = vmatprep.subr.bf16.mxu0 %v14642_v48 }
 0x4ea   : >> { %12966 = vmatprep.subr.bf16.mxu1 %v14642_v48 }
 0x4ec   : >> { %12947 = vmatpush3.bf16.msra.mxu0 %v13518_v57 }
 0x4ed   : >> { %12967 = vmatpush3.bf16.msra.mxu1 %v13519_v27  ;;  %12948 = vmatprep.subr.bf16.mxu0 %v14642_v48 }
 0x4ee   : >> { %12968 = vmatprep.subr.bf16.mxu1 %v14642_v48 }
 0x4f0   : >> { %12949 = vmatpush3.bf16.msra.mxu0 %v13520_v19 }
 0x4f1   : >> { %12969 = vmatpush3.bf16.msra.mxu1 %v13521_v33 }
 0x4f3   : >> { %v4969_v7 = vpop.f32.mrf.mxu0  ;;  %12951 = vmatmul.mubr.bf16.vlgmr.msra.gmra.mxu0 %v5437_v54 }
 0x4f4   : >> { %v4975_v45 = vadd.f32 %v4969_v7, %v4934_v18  ;;  %v5010_v31 = vpop.f32.mrf.mxu1  ;;  %12971 = vmatmul.mubr.bf16.vlgmr.msra.gmra.mxu1 %v5480_v13 }
 0x4f5   : >> { %v12712_v55 = vpop.f32.mrf.mxu0 }
 0x4f6   : >> { %v5016_v63 = vadd.f32 %v5010_v31, %v4975_v45  ;;  %v12732_v3 = vpop.f32.mrf.mxu1  ;;  %v17032_v45 = vld [vmem:[#allocation26_spill] sm:$0xff] }
 0x4f7   : >> { %v4972_v29 = vpop.f32.mrf.mxu0  ;;  %v4484_v31 = vadd.f32 %v17032_v45, %v16499_v14  ;;  %v13522_v14 = vld [vmem:[#allocation12 + $0x1e4] ss:$16 sps:$4 sm:$0xff] (%p1762_p5)  }
 0x4f8   : >> { %v5013_v49 = vpop.f32.mrf.mxu1  ;;  %5764 = vmatprep.subr.bf16.mxu0 (%p1762_p5), %v13522_v14  ;;  %v13617_v14 = vld [vmem:[#allocation12 + $0xc] ss:$16 sps:$4 sm:$0xff] (%p1762_p5)  }
 0x4f9   : >> { %v12713_v1 = vpop.f32.mrf.mxu0 }
 0x4fa   : >> { %v12733_v12 = vpop.f32.mrf.mxu1 }
 0x4fb   : >> { %v4485_v12 = vmax.f32 %v4484_v31, 0.0  ;;  %v13596_v31 = vld [vmem:[#allocation12 + $0x64] ss:$16 sps:$4 sm:$0xff] (%p1762_p5)  }
 0x513   : >> { %v5051_v20 = vpop.f32.mrf.mxu0 }
 0x514   : >> { %v5057_v48 = vadd.f32 %v5051_v20, %v5016_v63  ;;  %v5092_v43 = vpop.f32.mrf.mxu1 }
 0x515   : >> { %v12752_v25 = vpop.f32.mrf.mxu0 }
 0x516   : >> { %v5098_v39 = vadd.f32 %v5092_v43, %v5057_v48  ;;  %v12772_v38 = vpop.f32.mrf.mxu1 }
 0x517   : >> { %v5054_v8 = vpop.f32.mrf.mxu0  ;;  %v13524_v38 = vld [vmem:[#allocation12 + $0x1ec] ss:$16 sps:$4 sm:$0xff] (%p1762_p5)  }
 0x518   : >> { %v5095_v35 = vpop.f32.mrf.mxu1  ;;  %v14644_v8 = vmov (%p1762_p5), 0   ;;  %5805 = vmatprep.subr.bf16.mxu1 (%p1762_p5), %v13524_v38  ;;  %v13612_v38 = vld [vmem:[#allocation12] ss:$16 sps:$4 sm:$0xff] (%p1762_p5)  }
 0x519   : >> { %v12753_v37 = vpop.f32.mrf.mxu0  ;;  %5796 = vmatprep.mubr.bf16.mxu0 (%p1762_p5), %v14644_v8  ;;  %5837 = vmatprep.mubr.bf16.mxu1 (%p1762_p5), %v14644_v8  ;;  %v13526_v35 = vld [vmem:[#allocation12 + $0x1e0] ss:$16 sps:$4 sm:$0xff] (%p1762_p5)  }
 0x51a   : >> { %v12773_v30 = vpop.f32.mrf.mxu1  ;;  %v13527_v37 = vld [vmem:[#allocation12 + $0x1e8] ss:$16 sps:$4 sm:$0xff] (%p1762_p5)   ;;  %5765 = vmatpush1.bf16.msra.mxu0 (%p1762_p5), %v13526_v35 }
 0x51b   : > { %v13528_v30 = vld [vmem:[#allocation12 + $0x1c4] ss:$16 sps:$4 sm:$0xff] (%p1762_p5)   ;;  %5806 = vmatpush1.bf16.msra.mxu1 (%p1762_p5), %v13527_v37  ;;  %v13615_v35 = vld [vmem:[#allocation12 + $0x8] ss:$16 sps:$4 sm:$0xff] (%p1762_p5)  }
 0x51c   : > { %5766 = vmatprep.subr.bf16.mxu0 (%p1762_p5), %v13528_v30  ;;  %v13620_v30 = vld [vmem:[#allocation12 + $0x2e4] ss:$16 sps:$4 sm:$0xff] (%p1762_p5)  }
 0x533   : >> { %v5133_v47 = vpop.f32.mrf.mxu0 }
 0x534   : >> { %v5139_v60 = vadd.f32 %v5133_v47, %v5098_v39  ;;  %v5174_v61 = vpop.f32.mrf.mxu1  ;;  %v13530_v47 = vld [vmem:[#allocation12 + $0x1cc] ss:$16 sps:$4 sm:$0xff] (%p1762_p5)  }
 0x535   : >> { %v12792_v10 = vpop.f32.mrf.mxu0  ;;  %5807 = vmatprep.subr.bf16.mxu1 (%p1762_p5), %v13530_v47  ;;  %v13623_v47 = vld [vmem:[#allocation12 + $0x2ec] ss:$16 sps:$4 sm:$0xff] (%p1762_p5)  }
 0x536   : >> { %v5180_v32 = vadd.f32 %v5174_v61, %v5139_v60  ;;  %v12812_v58 = vpop.f32.mrf.mxu1  ;;  %v13532_v60 = vld [vmem:[#allocation12 + $0x1c0] ss:$16 sps:$4 sm:$0xff] (%p1762_p5)   ;;  %v13533_v61 = vld [vmem:[#allocation12 + $0x1c8] ss:$16 sps:$4 sm:$0xff] (%p1762_p5)   ;;  %v13534_v10 = vld [vmem:[#allocation12 + $0x1a4] ss:$16 sps:$4 sm:$0xff] (%p1762_p5)  }
 0x537   : >> { %v5136_v34 = vpop.f32.mrf.mxu0  ;;  %v13538_v58 = vld [vmem:[#allocation12 + $0x1a0] ss:$16 sps:$4 sm:$0xff] (%p1762_p5)   ;;  %5767 = vmatpush1.bf16.msra.mxu0 (%p1762_p5), %v13532_v60  ;;  %5808 = vmatpush1.bf16.msra.mxu1 (%p1762_p5), %v13533_v61 }
 0x538   : >> { %v5177_v16 = vpop.f32.mrf.mxu1  ;;  %v13539_v34 = vld [vmem:[#allocation12 + $0x1a8] ss:$16 sps:$4 sm:$0xff] (%p1762_p5)   ;;  %5768 = vmatprep.subr.bf16.mxu0 (%p1762_p5), %v13534_v10  ;;  %v13618_v61 = vld [vmem:[#allocation12 + $0x2e0] ss:$16 sps:$4 sm:$0xff] (%p1762_p5)  }
 0x539   : >> { %v12793_v46 = vpop.f32.mrf.mxu0  ;;  %v13540_v16 = vld [vmem:[#allocation12 + $0x184] ss:$16 sps:$4 sm:$0xff] (%p1762_p5)   ;;  %v13621_v10 = vld [vmem:[#allocation12 + $0x2e8] ss:$16 sps:$4 sm:$0xff] (%p1762_p5)  }
 0x53a   : >> { %v12813_v59 = vpop.f32.mrf.mxu1  ;;  %v13542_v46 = vld [vmem:[#allocation12 + $0x18c] ss:$16 sps:$4 sm:$0xff] (%p1762_p5)  }
 0x53b   : > { %v13544_v59 = vld [vmem:[#allocation12 + $0x180] ss:$16 sps:$4 sm:$0xff] (%p1762_p5)   ;;  %5769 = vmatpush1.bf16.msra.mxu0 (%p1762_p5), %v13538_v58  ;;  %v13629_v58 = vld [vmem:[#allocation12 + $0x2cc] ss:$16 sps:$4 sm:$0xff] (%p1762_p5)  }
 0x53c   : > { %5770 = vmatprep.subr.bf16.mxu0 (%p1762_p5), %v13540_v16  ;;  %v13627_v16 = vld [vmem:[#allocation12 + $0x2c8] ss:$16 sps:$4 sm:$0xff] (%p1762_p5)  }
 0x53f   : > { %5771 = vmatpush1.bf16.msra.mxu0 (%p1762_p5), %v13544_v59  ;;  %v13635_v59 = vld [vmem:[#allocation12 + $0x2ac] ss:$16 sps:$4 sm:$0xff] (%p1762_p5)  }
 0x553   : >> { %v5215_v56 = vpop.f32.mrf.mxu0 }
 0x554   : >> { %v5221_v11 = vadd.f32 %v5215_v56, %v5180_v32  ;;  %v5256_v50 = vpop.f32.mrf.mxu1  ;;  %v13536_v32 = vld [vmem:[#allocation12 + $0x1ac] ss:$16 sps:$4 sm:$0xff] (%p1762_p5)   ;;  %v13545_v56 = vld [vmem:[#allocation12 + $0x188] ss:$16 sps:$4 sm:$0xff] (%p1762_p5)  }
 0x555   : >> { %v12832_v9 = vpop.f32.mrf.mxu0  ;;  %5809 = vmatprep.subr.bf16.mxu1 (%p1762_p5), %v13536_v32  ;;  %v13626_v32 = vld [vmem:[#allocation12 + $0x2c4] ss:$16 sps:$4 sm:$0xff] (%p1762_p5)  }
 0x556   : >> { %v5262_v2 = vadd.f32 %v5256_v50, %v5221_v11  ;;  %v12852_v15 = vpop.f32.mrf.mxu1  ;;  %5810 = vmatpush1.bf16.msra.mxu1 (%p1762_p5), %v13539_v34  ;;  %v13546_v11 = vld [vmem:[#allocation12 + $0x164] ss:$16 sps:$4 sm:$0xff] (%p1762_p5)   ;;  %v13548_v50 = vld [vmem:[#allocation12 + $0x16c] ss:$16 sps:$4 sm:$0xff] (%p1762_p5)   ;;  %v13550_v9 = vld [vmem:[#allocation12 + $0x160] ss:$16 sps:$4 sm:$0xff] (%p1762_p5)  }
 0x557   : >> { %v5218_v26 = vpop.f32.mrf.mxu0  ;;  %5811 = vmatprep.subr.bf16.mxu1 (%p1762_p5), %v13542_v46  ;;  %v13552_v15 = vld [vmem:[#allocation12 + $0x144] ss:$16 sps:$4 sm:$0xff] (%p1762_p5)   ;;  %5772 = vmatprep.subr.bf16.mxu0 (%p1762_p5), %v13546_v11  ;;  %v13624_v34 = vld [vmem:[#allocation12 + $0x2c0] ss:$16 sps:$4 sm:$0xff] (%p1762_p5)   ;;  %v13633_v11 = vld [vmem:[#allocation12 + $0x2a8] ss:$16 sps:$4 sm:$0xff] (%p1762_p5)  }
 0x558   : >> { %v5259_v42 = vpop.f32.mrf.mxu1  ;;  %v13554_v26 = vld [vmem:[#allocation12 + $0x14c] ss:$16 sps:$4 sm:$0xff] (%p1762_p5)   ;;  %5773 = vmatpush1.bf16.msra.mxu0 (%p1762_p5), %v13550_v9  ;;  %v13632_v46 = vld [vmem:[#allocation12 + $0x2a4] ss:$16 sps:$4 sm:$0xff] (%p1762_p5)  }
 0x559   : >> { %v12833_v53 = vpop.f32.mrf.mxu0  ;;  %v13556_v42 = vld [vmem:[#allocation12 + $0x140] ss:$16 sps:$4 sm:$0xff] (%p1762_p5)   ;;  %5774 = vmatprep.subr.bf16.mxu0 (%p1762_p5), %v13552_v15  ;;  %v13641_v9 = vld [vmem:[#allocation12 + $0x28c] ss:$16 sps:$4 sm:$0xff] (%p1762_p5)   ;;  %v13639_v15 = vld [vmem:[#allocation12 + $0x288] ss:$16 sps:$4 sm:$0xff] (%p1762_p5)  }
 0x55a   : >> { %v12853_v18 = vpop.f32.mrf.mxu1  ;;  %5812 = vmatpush1.bf16.msra.mxu1 (%p1762_p5), %v13545_v56  ;;  %v13557_v53 = vld [vmem:[#allocation12 + $0x148] ss:$16 sps:$4 sm:$0xff] (%p1762_p5)   ;;  %v13630_v56 = vld [vmem:[#allocation12 + $0x2a0] ss:$16 sps:$4 sm:$0xff] (%p1762_p5)  }
 0x55b   : > { %5813 = vmatprep.subr.bf16.mxu1 (%p1762_p5), %v13548_v50  ;;  %v13558_v18 = vld [vmem:[#allocation12 + $0x124] ss:$16 sps:$4 sm:$0xff] (%p1762_p5)  }
 0x55c   : > { %5775 = vmatpush1.bf16.msra.mxu0 (%p1762_p5), %v13556_v42  ;;  %v13638_v50 = vld [vmem:[#allocation12 + $0x284] ss:$16 sps:$4 sm:$0xff] (%p1762_p5)   ;;  %v13647_v42 = vld [vmem:[#allocation12 + $0x26c] ss:$16 sps:$4 sm:$0xff] (%p1762_p5)  }
 0x55d   : > { %5776 = vmatprep.subr.bf16.mxu0 (%p1762_p5), %v13558_v18  ;;  %v13645_v18 = vld [vmem:[#allocation12 + $0x268] ss:$16 sps:$4 sm:$0xff] (%p1762_p5)  }
 0x573   : >> { %v5297_v62 = vpop.f32.mrf.mxu0 }
 0x574   : >> { %v5343_v4 = vpop.f32.mrf.mxu1  ;;  %v5303_v51 = vadd.f32 %v5297_v62, %v5262_v2  ;;  %v13551_v2 = vld [vmem:[#allocation12 + $0x168] ss:$16 sps:$4 sm:$0xff] (%p1762_p5)   ;;  %v13560_v62 = vld [vmem:[#allocation12 + $0x12c] ss:$16 sps:$4 sm:$0xff] (%p1762_p5)  }
 0x575   : >> { %v12872_v5 = vpop.f32.mrf.mxu0  ;;  %5814 = vmatpush1.bf16.msra.mxu1 (%p1762_p5), %v13551_v2  ;;  %v13636_v2 = vld [vmem:[#allocation12 + $0x280] ss:$16 sps:$4 sm:$0xff] (%p1762_p5)  }
 0x576   : >> { %v12892_v17 = vpop.f32.mrf.mxu1  ;;  %v5349_v27 = vadd.f32 %v5343_v4, %v5303_v51  ;;  %5815 = vmatprep.subr.bf16.mxu1 (%p1762_p5), %v13554_v26  ;;  %v13562_v4 = vld [vmem:[#allocation12 + $0x120] ss:$16 sps:$4 sm:$0xff] (%p1762_p5)   ;;  %v13563_v5 = vld [vmem:[#allocation12 + $0x128] ss:$16 sps:$4 sm:$0xff] (%p1762_p5)   ;;  %v13644_v26 = vld [vmem:[#allocation12 + $0x264] ss:$16 sps:$4 sm:$0xff] (%p1762_p5)  }
 0x577   : >> { %v5300_v22 = vpop.f32.mrf.mxu0  ;;  %v13564_v17 = vld [vmem:[#allocation12 + $0x104] ss:$16 sps:$4 sm:$0xff] (%p1762_p5)   ;;  %5777 = vmatpush1.bf16.msra.mxu0 (%p1762_p5), %v13562_v4  ;;  %v13579_v51 = vld [vmem:[#allocation12 + $0xc8] ss:$16 sps:$4 sm:$0xff] (%p1762_p5)   ;;  %v13653_v4 = vld [vmem:[#allocation12 + $0x24c] ss:$16 sps:$4 sm:$0xff] (%p1762_p5)  }
 0x578   : >> { %v5346_v52 = vpop.f32.mrf.mxu1  ;;  %v13566_v22 = vld [vmem:[#allocation12 + $0x10c] ss:$16 sps:$4 sm:$0xff] (%p1762_p5)   ;;  %5778 = vmatprep.subr.bf16.mxu0 (%p1762_p5), %v13564_v17  ;;  %v13651_v17 = vld [vmem:[#allocation12 + $0x248] ss:$16 sps:$4 sm:$0xff] (%p1762_p5)  }
 0x579   : >> { %v12873_v40 = vpop.f32.mrf.mxu0  ;;  %5816 = vmatpush1.bf16.msra.mxu1 (%p1762_p5), %v13557_v53  ;;  %v13568_v52 = vld [vmem:[#allocation12 + $0x100] ss:$16 sps:$4 sm:$0xff] (%p1762_p5)  }
 0x57a   : >> { %v12893_v21 = vpop.f32.mrf.mxu1  ;;  %5817 = vmatprep.subr.bf16.mxu1 (%p1762_p5), %v13560_v62  ;;  %v13569_v40 = vld [vmem:[#allocation12 + $0x108] ss:$16 sps:$4 sm:$0xff] (%p1762_p5)   ;;  %v13642_v53 = vld [vmem:[#allocation12 + $0x260] ss:$16 sps:$4 sm:$0xff] (%p1762_p5)   ;;  %v13650_v62 = vld [vmem:[#allocation12 + $0x244] ss:$16 sps:$4 sm:$0xff] (%p1762_p5)  }
 0x57b   : > { %5779 = vmatpush1.bf16.msra.mxu0 (%p1762_p5), %v13568_v52  ;;  %v13659_v52 = vld [vmem:[#allocation12 + $0x22c] ss:$16 sps:$4 sm:$0xff] (%p1762_p5)  }
 0x57d   : > { %5818 = vmatpush1.bf16.msra.mxu1 (%p1762_p5), %v13563_v5  ;;  %v13648_v5 = vld [vmem:[#allocation12 + $0x240] ss:$16 sps:$4 sm:$0xff] (%p1762_p5)  }
 0x57e   : > { %5819 = vmatprep.subr.bf16.mxu1 (%p1762_p5), %v13566_v22  ;;  %v13656_v22 = vld [vmem:[#allocation12 + $0x224] ss:$16 sps:$4 sm:$0xff] (%p1762_p5)  }
 0x581   : > { %5820 = vmatpush1.bf16.msra.mxu1 (%p1762_p5), %v13569_v40  ;;  %v13654_v40 = vld [vmem:[#allocation12 + $0x220] ss:$16 sps:$4 sm:$0xff] (%p1762_p5)  }
 0x593   : >> { %v5386_v41 = vpop.f32.mrf.mxu0 }
 0x594   : >> { %v5429_v24 = vpop.f32.mrf.mxu1  ;;  %v5392_v28 = vadd.f32 %v5386_v41, %v5349_v27  ;;  %v13572_v41 = vld [vmem:[#allocation12 + $0xe4] ss:$16 sps:$4 sm:$0xff] (%p1762_p5)  }
 0x595   : >> { %v12912_v0 = vpop.f32.mrf.mxu0  ;;  %6006 = vmatprep.subr.bf16.mxu0 (%p1762_p5), %v13572_v41  ;;  %v13584_v27 = vld [vmem:[#allocation12 + $0xa4] ss:$16 sps:$4 sm:$0xff] (%p1762_p5)  }
 0x596   : >> { %v12932_v44 = vpop.f32.mrf.mxu1  ;;  %v5435_v54 = vadd.f32 %v5429_v24, %v5392_v28  ;;  %v13575_v24 = vld [vmem:[#allocation12 + $0xec] ss:$16 sps:$4 sm:$0xff] (%p1762_p5)   ;;  %v13662_v41 = vld [vmem:[#allocation12 + $0x204] ss:$16 sps:$4 sm:$0xff] (%p1762_p5)  }
 0x597   : >> { %v5389_v23 = vpop.f32.mrf.mxu0  ;;  %v13570_v44 = vld [vmem:[#allocation12 + $0xe0] ss:$16 sps:$4 sm:$0xff] (%p1762_p5)   ;;  %6047 = vmatprep.subr.bf16.mxu1 (%p1762_p5), %v13575_v24  ;;  %v13587_v28 = vld [vmem:[#allocation12 + $0xac] ss:$16 sps:$4 sm:$0xff] (%p1762_p5)  }
 0x598   : >> { %v5432_v36 = vpop.f32.mrf.mxu1  ;;  %v13573_v23 = vld [vmem:[#allocation12 + $0xe8] ss:$16 sps:$4 sm:$0xff] (%p1762_p5)   ;;  %v13665_v24 = vld [vmem:[#allocation12 + $0x20c] ss:$16 sps:$4 sm:$0xff] (%p1762_p5)  }
 0x599   : >> { %v12913_v6 = vpop.f32.mrf.mxu0  ;;  %v13578_v36 = vld [vmem:[#allocation12 + $0xc4] ss:$16 sps:$4 sm:$0xff] (%p1762_p5)  }
 0x59a   : >> { %v12933_v57 = vpop.f32.mrf.mxu1  ;;  %v13581_v6 = vld [vmem:[#allocation12 + $0xcc] ss:$16 sps:$4 sm:$0xff] (%p1762_p5)  }
 0x59b   : > { %v13576_v57 = vld [vmem:[#allocation12 + $0xc0] ss:$16 sps:$4 sm:$0xff] (%p1762_p5)  }
 0x5b3   : >> { %v5472_v19 = vpop.f32.mrf.mxu0 }
 0x5b4   : >> { %v5478_v13 = vadd.f32 %v5472_v19, %v5435_v54  ;;  %v5515_v33 = vpop.f32.mrf.mxu1  ;;  %v13582_v54 = vld [vmem:[#allocation12 + $0xa0] ss:$16 sps:$4 sm:$0xff] (%p1762_p5)   ;;  %v13585_v19 = vld [vmem:[#allocation12 + $0xa8] ss:$16 sps:$4 sm:$0xff] (%p1762_p5)  }
 0x5b5   : >> { %v12952_v7 = vpop.f32.mrf.mxu0 }
 0x5b6   : >> { %v5521_v55 = vadd.f32 %v5515_v33, %v5478_v13  ;;  %v12972_v63 = vpop.f32.mrf.mxu1  ;;  %v13590_v13 = vld [vmem:[#allocation12 + $0x84] ss:$16 sps:$4 sm:$0xff] (%p1762_p5)   ;;  %v13593_v33 = vld [vmem:[#allocation12 + $0x8c] ss:$16 sps:$4 sm:$0xff] (%p1762_p5)   ;;  %v13588_v7 = vld [vmem:[#allocation12 + $0x80] ss:$16 sps:$4 sm:$0xff] (%p1762_p5)  }
 0x5b7   : >> { %v5475_v3 = vpop.f32.mrf.mxu0  ;;  %v13594_v63 = vld [vmem:[#allocation12 + $0x60] ss:$16 sps:$4 sm:$0xff] (%p1762_p5)  }
 0x5b8   : >> { %v5522_v29 = vadd.f32 %v17032_v45, %v5521_v55  ;;  %v5518_v49 = vpop.f32.mrf.mxu1  ;;  %v13591_v45 = vld [vmem:[#allocation12 + $0x88] ss:$16 sps:$4 sm:$0xff] (%p1762_p5)   ;;  %v13599_v55 = vld [vmem:[#allocation12 + $0x6c] ss:$16 sps:$4 sm:$0xff] (%p1762_p5)  }
 0x5b9   : >> { %v12953_v1 = vpop.f32.mrf.mxu0  ;;  %v13597_v3 = vld [vmem:[#allocation12 + $0x68] ss:$16 sps:$4 sm:$0xff] (%p1762_p5)   ;;  %v13605_v49 = vld [vmem:[#allocation12 + $0x4c] ss:$16 sps:$4 sm:$0xff] (%p1762_p5)  }
 0x5ba   : >> { %v5523_v20 = vmax.f32 %v5522_v29, 0.0  ;;  %v12973_v48 = vpop.f32.mrf.mxu1  ;;  %v13602_v29 = vld [vmem:[#allocation12 + $0x44] ss:$16 sps:$4 sm:$0xff] (%p1762_p5)   ;;  %v13600_v1 = vld [vmem:[#allocation12 + $0x40] ss:$16 sps:$4 sm:$0xff] (%p1762_p5)  }
 0x5bb   : > { %v13611_v48 = vld [vmem:[#allocation12 + $0x2c] ss:$16 sps:$4 sm:$0xff] (%p1762_p5)  }
 0x5bc   : >> { %v5524_v43 = vmax.f32 %v4485_v12, %v5523_v20  ;;  %v13603_v12 = vld [vmem:[#allocation12 + $0x48] ss:$16 sps:$4 sm:$0xff] (%p1762_p5)   ;;  %v13608_v20 = vld [vmem:[#allocation12 + $0x24] ss:$16 sps:$4 sm:$0xff] (%p1762_p5)  }
 0x5be   : >> { %v5526_v25 = vrot.slane %v5524_v43, 1 }
 0x5bf   : > { %1764 = sbr.rel (!%p1762_p5) target bundleno = 466 (0x1d2), region = 229 }
 0x5c0   : >> { %v5528_v39 = vmax.f32 %v5524_v43, %v5526_v25  ;;  %v13606_v43 = vld [vmem:[#allocation12 + $0x20] ss:$16 sps:$4 sm:$0xff] (%p1762_p5)   ;;  %v13609_v25 = vld [vmem:[#allocation12 + $0x28] ss:$16 sps:$4 sm:$0xff] (%p1762_p5)  }
 0x5c2   : >> { %5531 = vst [vmem:[%s5530_s27] sm:$0x1] %v5528_v39  ;;  %5532 = vst [vmem:[%s5530_s27 - $0x1] sm:$0x4] %v5528_v39 }
 0x5c3   : >> { %5533 = vst [vmem:[%s5530_s27 - $0x2] sm:$0x10] %v5528_v39  ;;  %5534 = vst [vmem:[%s5530_s27 - $0x3] sm:$0x40] %v5528_v39  ;;  %v13614_v39 = vld [vmem:[#allocation12 + $0x4] ss:$16 sps:$4 sm:$0xff] (%p1762_p5)  }
 0x5ca   : > { %v5569_v21 = vld [vmem:[#allocation3 + $0x1] sm:$0x1]  ;;  %v5535_v37 = vld [vmem:[#allocation3] sm:$0x1] }
 0x5cb   : > { %v5570_v0 = vpack.c.bf16 %v5569_v21, %v5569_v21  ;;  %v5536_v60 = vpack.c.bf16 %v5535_v37, %v5535_v37  ;;  %v13657_v21 = vld [vmem:[#allocation12 + $0x228] ss:$16 sps:$4 sm:$0xff]  }
 0x5cc   : > { %v13705_v37 = vld [vmem:[#allocation12 + $0x328] ss:$16 sps:$4 sm:$0xff]  }
 0x5cd   : > { %5797 = vmatmul.mubr.bf16.vlgmr.msra.gmra.mxu0 %v5570_v0  ;;  %5838 = vmatmul.mubr.bf16.vlgmr.msra.gmra.mxu1 %v5570_v0  ;;  %v13660_v0 = vld [vmem:[#allocation12 + $0x200] ss:$16 sps:$4 sm:$0xff]  }
 0x5ce   : > { %6007 = vmatpush1.bf16.msra.mxu0 %v13570_v44  ;;  %6048 = vmatpush1.bf16.msra.mxu1 %v13573_v23  ;;  %v13663_v44 = vld [vmem:[#allocation12 + $0x208] ss:$16 sps:$4 sm:$0xff]   ;;  %v6088_v23 = vld [vmem:[#allocation3 + $0x2] sm:$0x1] }
 0x5cf   : > { %6008 = vmatprep.subr.bf16.mxu0 %v13578_v36  ;;  %6049 = vmatprep.subr.bf16.mxu1 %v13581_v6  ;;  %v13668_v36 = vld [vmem:[#allocation12 + $0x3e4] ss:$16 sps:$4 sm:$0xff]   ;;  %v13671_v6 = vld [vmem:[#allocation12 + $0x3ec] ss:$16 sps:$4 sm:$0xff]  }
 0x5d0   : > { %6038 = vmatprep.mubr.bf16.mxu0 %v14644_v8  ;;  %6079 = vmatprep.mubr.bf16.mxu1 %v14644_v8 }
 0x5d2   : > { %6009 = vmatpush1.bf16.msra.mxu0 %v13576_v57  ;;  %6050 = vmatpush1.bf16.msra.mxu1 %v13579_v51  ;;  %v6089_v57 = vpack.c.bf16 %v6088_v23, %v6088_v23  ;;  %v13666_v51 = vld [vmem:[#allocation12 + $0x3e0] ss:$16 sps:$4 sm:$0xff]   ;;  %v13753_v23 = vld [vmem:[#allocation12 + $0x428] ss:$16 sps:$4 sm:$0xff]  }
 0x5d3   : > { %6010 = vmatprep.subr.bf16.mxu0 %v13584_v27  ;;  %6051 = vmatprep.subr.bf16.mxu1 %v13587_v28  ;;  %v13669_v27 = vld [vmem:[#allocation12 + $0x3e8] ss:$16 sps:$4 sm:$0xff]   ;;  %v13674_v28 = vld [vmem:[#allocation12 + $0x3c4] ss:$16 sps:$4 sm:$0xff]  }
 0x5d6   : > { %6011 = vmatpush1.bf16.msra.mxu0 %v13582_v54  ;;  %6052 = vmatpush1.bf16.msra.mxu1 %v13585_v19  ;;  %v13677_v54 = vld [vmem:[#allocation12 + $0x3cc] ss:$16 sps:$4 sm:$0xff]   ;;  %v13672_v19 = vld [vmem:[#allocation12 + $0x3c0] ss:$16 sps:$4 sm:$0xff]  }
 0x5d7   : > { %6012 = vmatprep.subr.bf16.mxu0 %v13590_v13  ;;  %6053 = vmatprep.subr.bf16.mxu1 %v13593_v33  ;;  %v13675_v13 = vld [vmem:[#allocation12 + $0x3c8] ss:$16 sps:$4 sm:$0xff]   ;;  %v13680_v33 = vld [vmem:[#allocation12 + $0x3a4] ss:$16 sps:$4 sm:$0xff]  }
 0x5da   : > { %6013 = vmatpush1.bf16.msra.mxu0 %v13588_v7  ;;  %6054 = vmatpush1.bf16.msra.mxu1 %v13591_v45  ;;  %v13683_v7 = vld [vmem:[#allocation12 + $0x3ac] ss:$16 sps:$4 sm:$0xff]   ;;  %v13678_v45 = vld [vmem:[#allocation12 + $0x3a0] ss:$16 sps:$4 sm:$0xff]  }
 0x5db   : > { %6014 = vmatprep.subr.bf16.mxu0 %v13596_v31  ;;  %6055 = vmatprep.subr.bf16.mxu1 %v13599_v55  ;;  %v13681_v31 = vld [vmem:[#allocation12 + $0x3a8] ss:$16 sps:$4 sm:$0xff]   ;;  %v13686_v55 = vld [vmem:[#allocation12 + $0x384] ss:$16 sps:$4 sm:$0xff]  }
 0x5de   : > { %6015 = vmatpush1.bf16.msra.mxu0 %v13594_v63  ;;  %6056 = vmatpush1.bf16.msra.mxu1 %v13597_v3  ;;  %v13689_v63 = vld [vmem:[#allocation12 + $0x38c] ss:$16 sps:$4 sm:$0xff]   ;;  %v13684_v3 = vld [vmem:[#allocation12 + $0x380] ss:$16 sps:$4 sm:$0xff]  }
 0x5df   : > { %6016 = vmatprep.subr.bf16.mxu0 %v13602_v29  ;;  %6057 = vmatprep.subr.bf16.mxu1 %v13605_v49  ;;  %v13687_v29 = vld [vmem:[#allocation12 + $0x388] ss:$16 sps:$4 sm:$0xff]   ;;  %v13692_v49 = vld [vmem:[#allocation12 + $0x364] ss:$16 sps:$4 sm:$0xff]  }
 0x5e2   : > { %6017 = vmatpush1.bf16.msra.mxu0 %v13600_v1  ;;  %6058 = vmatpush1.bf16.msra.mxu1 %v13603_v12  ;;  %v13695_v1 = vld [vmem:[#allocation12 + $0x36c] ss:$16 sps:$4 sm:$0xff]   ;;  %v13690_v12 = vld [vmem:[#allocation12 + $0x360] ss:$16 sps:$4 sm:$0xff]  }
 0x5e3   : > { %6018 = vmatprep.subr.bf16.mxu0 %v13608_v20  ;;  %6059 = vmatprep.subr.bf16.mxu1 %v13611_v48  ;;  %v13693_v20 = vld [vmem:[#allocation12 + $0x368] ss:$16 sps:$4 sm:$0xff]   ;;  %v13698_v48 = vld [vmem:[#allocation12 + $0x344] ss:$16 sps:$4 sm:$0xff]  }
 0x5e6   : > { %6019 = vmatpush1.bf16.msra.mxu0 %v13606_v43  ;;  %6060 = vmatpush1.bf16.msra.mxu1 %v13609_v25  ;;  %v13701_v43 = vld [vmem:[#allocation12 + $0x34c] ss:$16 sps:$4 sm:$0xff]   ;;  %v13696_v25 = vld [vmem:[#allocation12 + $0x340] ss:$16 sps:$4 sm:$0xff]  }
 0x5e7   : > { %6020 = vmatprep.subr.bf16.mxu0 %v13614_v39  ;;  %6061 = vmatprep.subr.bf16.mxu1 %v13617_v14  ;;  %v13699_v39 = vld [vmem:[#allocation12 + $0x348] ss:$16 sps:$4 sm:$0xff]   ;;  %v13704_v14 = vld [vmem:[#allocation12 + $0x324] ss:$16 sps:$4 sm:$0xff]  }
 0x5ea   : > { %6021 = vmatpush1.bf16.msra.mxu0 %v13612_v38  ;;  %6062 = vmatpush1.bf16.msra.mxu1 %v13615_v35  ;;  %v13707_v38 = vld [vmem:[#allocation12 + $0x32c] ss:$16 sps:$4 sm:$0xff]   ;;  %v13702_v35 = vld [vmem:[#allocation12 + $0x320] ss:$16 sps:$4 sm:$0xff]  }
 0x5eb   : > { %6283 = vmatprep.subr.bf16.mxu0 %v13620_v30  ;;  %6324 = vmatprep.subr.bf16.mxu1 %v13623_v47  ;;  %v13710_v30 = vld [vmem:[#allocation12 + $0x304] ss:$16 sps:$4 sm:$0xff]   ;;  %v13713_v47 = vld [vmem:[#allocation12 + $0x30c] ss:$16 sps:$4 sm:$0xff]  }
 0x5ed   : > { %6039 = vmatmul.mubr.bf16.vlgmr.msra.gmra.mxu0 %v5536_v60  ;;  %6080 = vmatmul.mubr.bf16.vlgmr.msra.gmra.mxu1 %v5536_v60  ;;  %v13708_v60 = vld [vmem:[#allocation12 + $0x300] ss:$16 sps:$4 sm:$0xff]  }
 0x5ee   : > { %6284 = vmatpush1.bf16.msra.mxu0 %v13618_v61  ;;  %6325 = vmatpush1.bf16.msra.mxu1 %v13621_v10  ;;  %v13711_v61 = vld [vmem:[#allocation12 + $0x308] ss:$16 sps:$4 sm:$0xff]   ;;  %v6369_v10 = vld [vmem:[#allocation3 + $0x3] sm:$0x1] }
 0x5ef   : > { %6285 = vmatprep.subr.bf16.mxu0 %v13626_v32  ;;  %6326 = vmatprep.subr.bf16.mxu1 %v13629_v58  ;;  %v13716_v32 = vld [vmem:[#allocation12 + $0x4e4] ss:$16 sps:$4 sm:$0xff]   ;;  %v13719_v58 = vld [vmem:[#allocation12 + $0x4ec] ss:$16 sps:$4 sm:$0xff]  }
 0x5f0   : > { %6315 = vmatprep.mubr.bf16.mxu0 %v14644_v8  ;;  %6356 = vmatprep.mubr.bf16.mxu1 %v14644_v8 }
 0x5f2   : > { %6286 = vmatpush1.bf16.msra.mxu0 %v13624_v34  ;;  %6327 = vmatpush1.bf16.msra.mxu1 %v13627_v16  ;;  %v6370_v34 = vpack.c.bf16 %v6369_v10, %v6369_v10  ;;  %v13714_v16 = vld [vmem:[#allocation12 + $0x4e0] ss:$16 sps:$4 sm:$0xff]   ;;  %v13801_v10 = vld [vmem:[#allocation12 + $0x528] ss:$16 sps:$4 sm:$0xff]  }
 0x5f3   : > { %6287 = vmatprep.subr.bf16.mxu0 %v13632_v46  ;;  %6328 = vmatprep.subr.bf16.mxu1 %v13635_v59  ;;  %v13717_v46 = vld [vmem:[#allocation12 + $0x4e8] ss:$16 sps:$4 sm:$0xff]   ;;  %v13722_v59 = vld [vmem:[#allocation12 + $0x4c4] ss:$16 sps:$4 sm:$0xff]  }
 0x5f6   : > { %6288 = vmatpush1.bf16.msra.mxu0 %v13630_v56  ;;  %6329 = vmatpush1.bf16.msra.mxu1 %v13633_v11  ;;  %v13725_v56 = vld [vmem:[#allocation12 + $0x4cc] ss:$16 sps:$4 sm:$0xff]   ;;  %v13720_v11 = vld [vmem:[#allocation12 + $0x4c0] ss:$16 sps:$4 sm:$0xff]  }
 0x5f7   : > { %6289 = vmatprep.subr.bf16.mxu0 %v13638_v50  ;;  %6330 = vmatprep.subr.bf16.mxu1 %v13641_v9  ;;  %v13723_v50 = vld [vmem:[#allocation12 + $0x4c8] ss:$16 sps:$4 sm:$0xff]   ;;  %v13728_v9 = vld [vmem:[#allocation12 + $0x4a4] ss:$16 sps:$4 sm:$0xff]  }
 0x5fa   : > { %6290 = vmatpush1.bf16.msra.mxu0 %v13636_v2  ;;  %6331 = vmatpush1.bf16.msra.mxu1 %v13639_v15  ;;  %v13731_v2 = vld [vmem:[#allocation12 + $0x4ac] ss:$16 sps:$4 sm:$0xff]   ;;  %v13726_v15 = vld [vmem:[#allocation12 + $0x4a0] ss:$16 sps:$4 sm:$0xff]  }
 0x5fb   : > { %6291 = vmatprep.subr.bf16.mxu0 %v13644_v26  ;;  %6332 = vmatprep.subr.bf16.mxu1 %v13647_v42  ;;  %v13729_v26 = vld [vmem:[#allocation12 + $0x4a8] ss:$16 sps:$4 sm:$0xff]   ;;  %v13734_v42 = vld [vmem:[#allocation12 + $0x484] ss:$16 sps:$4 sm:$0xff]  }
 0x5fe   : > { %6292 = vmatpush1.bf16.msra.mxu0 %v13642_v53  ;;  %6333 = vmatpush1.bf16.msra.mxu1 %v13645_v18  ;;  %v13737_v53 = vld [vmem:[#allocation12 + $0x48c] ss:$16 sps:$4 sm:$0xff]   ;;  %v13732_v18 = vld [vmem:[#allocation12 + $0x480] ss:$16 sps:$4 sm:$0xff]  }
 0x5ff   : > { %6293 = vmatprep.subr.bf16.mxu0 %v13650_v62  ;;  %6334 = vmatprep.subr.bf16.mxu1 %v13653_v4  ;;  %v13735_v62 = vld [vmem:[#allocation12 + $0x488] ss:$16 sps:$4 sm:$0xff]   ;;  %v13740_v4 = vld [vmem:[#allocation12 + $0x464] ss:$16 sps:$4 sm:$0xff]  }
 0x602   : > { %6294 = vmatpush1.bf16.msra.mxu0 %v13648_v5  ;;  %6335 = vmatpush1.bf16.msra.mxu1 %v13651_v17  ;;  %v13743_v5 = vld [vmem:[#allocation12 + $0x46c] ss:$16 sps:$4 sm:$0xff]   ;;  %v13738_v17 = vld [vmem:[#allocation12 + $0x460] ss:$16 sps:$4 sm:$0xff]  }
 0x603   : > { %6295 = vmatprep.subr.bf16.mxu0 %v13656_v22  ;;  %6336 = vmatprep.subr.bf16.mxu1 %v13659_v52  ;;  %v13741_v22 = vld [vmem:[#allocation12 + $0x468] ss:$16 sps:$4 sm:$0xff]   ;;  %v13746_v52 = vld [vmem:[#allocation12 + $0x444] ss:$16 sps:$4 sm:$0xff]  }
 0x606   : > { %6296 = vmatpush1.bf16.msra.mxu0 %v13654_v40  ;;  %6337 = vmatpush1.bf16.msra.mxu1 %v13657_v21  ;;  %v13749_v40 = vld [vmem:[#allocation12 + $0x44c] ss:$16 sps:$4 sm:$0xff]   ;;  %v13744_v21 = vld [vmem:[#allocation12 + $0x440] ss:$16 sps:$4 sm:$0xff]  }
 0x607   : > { %6297 = vmatprep.subr.bf16.mxu0 %v13662_v41  ;;  %6338 = vmatprep.subr.bf16.mxu1 %v13665_v24  ;;  %v13747_v41 = vld [vmem:[#allocation12 + $0x448] ss:$16 sps:$4 sm:$0xff]   ;;  %v13752_v24 = vld [vmem:[#allocation12 + $0x424] ss:$16 sps:$4 sm:$0xff]  }
 0x60a   : > { %6298 = vmatpush1.bf16.msra.mxu0 %v13660_v0  ;;  %6339 = vmatpush1.bf16.msra.mxu1 %v13663_v44  ;;  %v13755_v0 = vld [vmem:[#allocation12 + $0x42c] ss:$16 sps:$4 sm:$0xff]   ;;  %v13750_v44 = vld [vmem:[#allocation12 + $0x420] ss:$16 sps:$4 sm:$0xff]  }
 0x60b   : > { %6564 = vmatprep.subr.bf16.mxu0 %v13668_v36  ;;  %6605 = vmatprep.subr.bf16.mxu1 %v13671_v6  ;;  %v13758_v36 = vld [vmem:[#allocation12 + $0x404] ss:$16 sps:$4 sm:$0xff]   ;;  %v13761_v6 = vld [vmem:[#allocation12 + $0x40c] ss:$16 sps:$4 sm:$0xff]  }
 0x60d   : > { %6316 = vmatmul.mubr.bf16.vlgmr.msra.gmra.mxu0 %v6089_v57  ;;  %6357 = vmatmul.mubr.bf16.vlgmr.msra.gmra.mxu1 %v6089_v57  ;;  %v13756_v57 = vld [vmem:[#allocation12 + $0x400] ss:$16 sps:$4 sm:$0xff]  }
 0x60e   : > { %6565 = vmatpush1.bf16.msra.mxu0 %v13666_v51  ;;  %6606 = vmatpush1.bf16.msra.mxu1 %v13669_v27  ;;  %v13759_v51 = vld [vmem:[#allocation12 + $0x408] ss:$16 sps:$4 sm:$0xff]   ;;  %v6651_v27 = vld [vmem:[#allocation3 + $0x4] sm:$0x1] }
 0x60f   : > { %6566 = vmatprep.subr.bf16.mxu0 %v13674_v28  ;;  %6607 = vmatprep.subr.bf16.mxu1 %v13677_v54  ;;  %v13764_v28 = vld [vmem:[#allocation12 + $0x5e4] ss:$16 sps:$4 sm:$0xff]   ;;  %v13767_v54 = vld [vmem:[#allocation12 + $0x5ec] ss:$16 sps:$4 sm:$0xff]  }
 0x610   : > { %6596 = vmatprep.mubr.bf16.mxu0 %v14644_v8  ;;  %6637 = vmatprep.mubr.bf16.mxu1 %v14644_v8 }
 0x612   : > { %6567 = vmatpush1.bf16.msra.mxu0 %v13672_v19  ;;  %6608 = vmatpush1.bf16.msra.mxu1 %v13675_v13  ;;  %v6652_v19 = vpack.c.bf16 %v6651_v27, %v6651_v27  ;;  %v13762_v13 = vld [vmem:[#allocation12 + $0x5e0] ss:$16 sps:$4 sm:$0xff]   ;;  %v13849_v27 = vld [vmem:[#allocation12 + $0x628] ss:$16 sps:$4 sm:$0xff]  }
 0x613   : > { %6568 = vmatprep.subr.bf16.mxu0 %v13680_v33  ;;  %6609 = vmatprep.subr.bf16.mxu1 %v13683_v7  ;;  %v13765_v33 = vld [vmem:[#allocation12 + $0x5e8] ss:$16 sps:$4 sm:$0xff]   ;;  %v13770_v7 = vld [vmem:[#allocation12 + $0x5c4] ss:$16 sps:$4 sm:$0xff]  }
 0x616   : > { %6569 = vmatpush1.bf16.msra.mxu0 %v13678_v45  ;;  %6610 = vmatpush1.bf16.msra.mxu1 %v13681_v31  ;;  %v13773_v45 = vld [vmem:[#allocation12 + $0x5cc] ss:$16 sps:$4 sm:$0xff]   ;;  %v13768_v31 = vld [vmem:[#allocation12 + $0x5c0] ss:$16 sps:$4 sm:$0xff]  }
 0x617   : > { %6570 = vmatprep.subr.bf16.mxu0 %v13686_v55  ;;  %6611 = vmatprep.subr.bf16.mxu1 %v13689_v63  ;;  %v13771_v55 = vld [vmem:[#allocation12 + $0x5c8] ss:$16 sps:$4 sm:$0xff]   ;;  %v13776_v63 = vld [vmem:[#allocation12 + $0x5a4] ss:$16 sps:$4 sm:$0xff]  }
 0x61a   : > { %6571 = vmatpush1.bf16.msra.mxu0 %v13684_v3  ;;  %6612 = vmatpush1.bf16.msra.mxu1 %v13687_v29  ;;  %v13779_v3 = vld [vmem:[#allocation12 + $0x5ac] ss:$16 sps:$4 sm:$0xff]   ;;  %v13774_v29 = vld [vmem:[#allocation12 + $0x5a0] ss:$16 sps:$4 sm:$0xff]  }
 0x61b   : > { %6572 = vmatprep.subr.bf16.mxu0 %v13692_v49  ;;  %6613 = vmatprep.subr.bf16.mxu1 %v13695_v1  ;;  %v13777_v49 = vld [vmem:[#allocation12 + $0x5a8] ss:$16 sps:$4 sm:$0xff]   ;;  %v13782_v1 = vld [vmem:[#allocation12 + $0x584] ss:$16 sps:$4 sm:$0xff]  }
 0x61e   : > { %6573 = vmatpush1.bf16.msra.mxu0 %v13690_v12  ;;  %6614 = vmatpush1.bf16.msra.mxu1 %v13693_v20  ;;  %v13785_v12 = vld [vmem:[#allocation12 + $0x58c] ss:$16 sps:$4 sm:$0xff]   ;;  %v13780_v20 = vld [vmem:[#allocation12 + $0x580] ss:$16 sps:$4 sm:$0xff]  }
 0x61f   : > { %6574 = vmatprep.subr.bf16.mxu0 %v13698_v48  ;;  %6615 = vmatprep.subr.bf16.mxu1 %v13701_v43  ;;  %v13783_v48 = vld [vmem:[#allocation12 + $0x588] ss:$16 sps:$4 sm:$0xff]   ;;  %v13788_v43 = vld [vmem:[#allocation12 + $0x564] ss:$16 sps:$4 sm:$0xff]  }
 0x622   : > { %6575 = vmatpush1.bf16.msra.mxu0 %v13696_v25  ;;  %6616 = vmatpush1.bf16.msra.mxu1 %v13699_v39  ;;  %v13791_v25 = vld [vmem:[#allocation12 + $0x56c] ss:$16 sps:$4 sm:$0xff]   ;;  %v13786_v39 = vld [vmem:[#allocation12 + $0x560] ss:$16 sps:$4 sm:$0xff]  }
 0x623   : > { %6576 = vmatprep.subr.bf16.mxu0 %v13704_v14  ;;  %6617 = vmatprep.subr.bf16.mxu1 %v13707_v38  ;;  %v13789_v14 = vld [vmem:[#allocation12 + $0x568] ss:$16 sps:$4 sm:$0xff]   ;;  %v13794_v38 = vld [vmem:[#allocation12 + $0x544] ss:$16 sps:$4 sm:$0xff]  }
 0x626   : > { %6577 = vmatpush1.bf16.msra.mxu0 %v13702_v35  ;;  %6618 = vmatpush1.bf16.msra.mxu1 %v13705_v37  ;;  %v13797_v35 = vld [vmem:[#allocation12 + $0x54c] ss:$16 sps:$4 sm:$0xff]   ;;  %v13792_v37 = vld [vmem:[#allocation12 + $0x540] ss:$16 sps:$4 sm:$0xff]  }
 0x627   : > { %6578 = vmatprep.subr.bf16.mxu0 %v13710_v30  ;;  %6619 = vmatprep.subr.bf16.mxu1 %v13713_v47  ;;  %v13795_v30 = vld [vmem:[#allocation12 + $0x548] ss:$16 sps:$4 sm:$0xff]   ;;  %v13800_v47 = vld [vmem:[#allocation12 + $0x524] ss:$16 sps:$4 sm:$0xff]  }
 0x62a   : > { %6579 = vmatpush1.bf16.msra.mxu0 %v13708_v60  ;;  %6620 = vmatpush1.bf16.msra.mxu1 %v13711_v61  ;;  %v13803_v60 = vld [vmem:[#allocation12 + $0x52c] ss:$16 sps:$4 sm:$0xff]   ;;  %v13798_v61 = vld [vmem:[#allocation12 + $0x520] ss:$16 sps:$4 sm:$0xff]  }
 0x62b   : > { %6846 = vmatprep.subr.bf16.mxu0 %v13716_v32  ;;  %6887 = vmatprep.subr.bf16.mxu1 %v13719_v58  ;;  %v13806_v32 = vld [vmem:[#allocation12 + $0x504] ss:$16 sps:$4 sm:$0xff]   ;;  %v13809_v58 = vld [vmem:[#allocation12 + $0x50c] ss:$16 sps:$4 sm:$0xff]  }
 0x62d   : > { %6597 = vmatmul.mubr.bf16.vlgmr.msra.gmra.mxu0 %v6370_v34  ;;  %6638 = vmatmul.mubr.bf16.vlgmr.msra.gmra.mxu1 %v6370_v34  ;;  %v13804_v34 = vld [vmem:[#allocation12 + $0x500] ss:$16 sps:$4 sm:$0xff]  }
 0x62e   : > { %6847 = vmatpush1.bf16.msra.mxu0 %v13714_v16  ;;  %6888 = vmatpush1.bf16.msra.mxu1 %v13717_v46  ;;  %v13807_v16 = vld [vmem:[#allocation12 + $0x508] ss:$16 sps:$4 sm:$0xff]   ;;  %v6932_v46 = vld [vmem:[#allocation3 + $0x5] sm:$0x1] }
 0x62f   : > { %6848 = vmatprep.subr.bf16.mxu0 %v13722_v59  ;;  %6889 = vmatprep.subr.bf16.mxu1 %v13725_v56  ;;  %v13812_v59 = vld [vmem:[#allocation12 + $0x6e4] ss:$16 sps:$4 sm:$0xff]   ;;  %v13815_v56 = vld [vmem:[#allocation12 + $0x6ec] ss:$16 sps:$4 sm:$0xff]  }
 0x630   : > { %6878 = vmatprep.mubr.bf16.mxu0 %v14644_v8  ;;  %6919 = vmatprep.mubr.bf16.mxu1 %v14644_v8 }
 0x632   : > { %6849 = vmatpush1.bf16.msra.mxu0 %v13720_v11  ;;  %6890 = vmatpush1.bf16.msra.mxu1 %v13723_v50  ;;  %v6933_v11 = vpack.c.bf16 %v6932_v46, %v6932_v46  ;;  %v13810_v50 = vld [vmem:[#allocation12 + $0x6e0] ss:$16 sps:$4 sm:$0xff]   ;;  %v13885_v46 = vld [vmem:[#allocation12 + $0x768] ss:$16 sps:$4 sm:$0xff]  }
 0x633   : > { %6850 = vmatprep.subr.bf16.mxu0 %v13728_v9  ;;  %6891 = vmatprep.subr.bf16.mxu1 %v13731_v2  ;;  %v13813_v9 = vld [vmem:[#allocation12 + $0x6e8] ss:$16 sps:$4 sm:$0xff]   ;;  %v13818_v2 = vld [vmem:[#allocation12 + $0x6c4] ss:$16 sps:$4 sm:$0xff]  }
 0x636   : > { %6851 = vmatpush1.bf16.msra.mxu0 %v13726_v15  ;;  %6892 = vmatpush1.bf16.msra.mxu1 %v13729_v26  ;;  %v13821_v15 = vld [vmem:[#allocation12 + $0x6cc] ss:$16 sps:$4 sm:$0xff]   ;;  %v13816_v26 = vld [vmem:[#allocation12 + $0x6c0] ss:$16 sps:$4 sm:$0xff]  }
 0x637   : > { %6852 = vmatprep.subr.bf16.mxu0 %v13734_v42  ;;  %6893 = vmatprep.subr.bf16.mxu1 %v13737_v53  ;;  %v13819_v42 = vld [vmem:[#allocation12 + $0x6c8] ss:$16 sps:$4 sm:$0xff]   ;;  %v13824_v53 = vld [vmem:[#allocation12 + $0x6a4] ss:$16 sps:$4 sm:$0xff]  }
 0x63a   : > { %6853 = vmatpush1.bf16.msra.mxu0 %v13732_v18  ;;  %6894 = vmatpush1.bf16.msra.mxu1 %v13735_v62  ;;  %v13827_v18 = vld [vmem:[#allocation12 + $0x6ac] ss:$16 sps:$4 sm:$0xff]   ;;  %v13822_v62 = vld [vmem:[#allocation12 + $0x6a0] ss:$16 sps:$4 sm:$0xff]  }
 0x63b   : > { %6854 = vmatprep.subr.bf16.mxu0 %v13740_v4  ;;  %6895 = vmatprep.subr.bf16.mxu1 %v13743_v5  ;;  %v13825_v4 = vld [vmem:[#allocation12 + $0x6a8] ss:$16 sps:$4 sm:$0xff]   ;;  %v13830_v5 = vld [vmem:[#allocation12 + $0x684] ss:$16 sps:$4 sm:$0xff]  }
 0x63e   : > { %6855 = vmatpush1.bf16.msra.mxu0 %v13738_v17  ;;  %6896 = vmatpush1.bf16.msra.mxu1 %v13741_v22  ;;  %v13833_v17 = vld [vmem:[#allocation12 + $0x68c] ss:$16 sps:$4 sm:$0xff]   ;;  %v13828_v22 = vld [vmem:[#allocation12 + $0x680] ss:$16 sps:$4 sm:$0xff]  }
 0x63f   : > { %6856 = vmatprep.subr.bf16.mxu0 %v13746_v52  ;;  %6897 = vmatprep.subr.bf16.mxu1 %v13749_v40  ;;  %v13831_v52 = vld [vmem:[#allocation12 + $0x688] ss:$16 sps:$4 sm:$0xff]   ;;  %v13836_v40 = vld [vmem:[#allocation12 + $0x664] ss:$16 sps:$4 sm:$0xff]  }
 0x642   : > { %6857 = vmatpush1.bf16.msra.mxu0 %v13744_v21  ;;  %6898 = vmatpush1.bf16.msra.mxu1 %v13747_v41  ;;  %v13839_v21 = vld [vmem:[#allocation12 + $0x66c] ss:$16 sps:$4 sm:$0xff]   ;;  %v13834_v41 = vld [vmem:[#allocation12 + $0x660] ss:$16 sps:$4 sm:$0xff]  }
 0x643   : > { %6858 = vmatprep.subr.bf16.mxu0 %v13752_v24  ;;  %6899 = vmatprep.subr.bf16.mxu1 %v13755_v0  ;;  %v13837_v24 = vld [vmem:[#allocation12 + $0x668] ss:$16 sps:$4 sm:$0xff]   ;;  %v13842_v0 = vld [vmem:[#allocation12 + $0x644] ss:$16 sps:$4 sm:$0xff]  }
 0x646   : > { %6859 = vmatpush1.bf16.msra.mxu0 %v13750_v44  ;;  %6900 = vmatpush1.bf16.msra.mxu1 %v13753_v23  ;;  %v13845_v44 = vld [vmem:[#allocation12 + $0x64c] ss:$16 sps:$4 sm:$0xff]   ;;  %v13840_v23 = vld [vmem:[#allocation12 + $0x640] ss:$16 sps:$4 sm:$0xff]  }
 0x647   : > { %6860 = vmatprep.subr.bf16.mxu0 %v13758_v36  ;;  %6901 = vmatprep.subr.bf16.mxu1 %v13761_v6  ;;  %v13843_v36 = vld [vmem:[#allocation12 + $0x648] ss:$16 sps:$4 sm:$0xff]   ;;  %v13848_v6 = vld [vmem:[#allocation12 + $0x624] ss:$16 sps:$4 sm:$0xff]  }
 0x64a   : > { %6861 = vmatpush1.bf16.msra.mxu0 %v13756_v57  ;;  %6902 = vmatpush1.bf16.msra.mxu1 %v13759_v51  ;;  %v13851_v57 = vld [vmem:[#allocation12 + $0x62c] ss:$16 sps:$4 sm:$0xff]   ;;  %v13846_v51 = vld [vmem:[#allocation12 + $0x620] ss:$16 sps:$4 sm:$0xff]  }
 0x64b   : > { %7127 = vmatprep.subr.bf16.mxu0 %v13764_v28  ;;  %7168 = vmatprep.subr.bf16.mxu1 %v13767_v54  ;;  %v13854_v28 = vld [vmem:[#allocation12 + $0x604] ss:$16 sps:$4 sm:$0xff]   ;;  %v13857_v54 = vld [vmem:[#allocation12 + $0x60c] ss:$16 sps:$4 sm:$0xff]  }
 0x64d   : > { %6879 = vmatmul.mubr.bf16.vlgmr.msra.gmra.mxu0 %v6652_v19  ;;  %6920 = vmatmul.mubr.bf16.vlgmr.msra.gmra.mxu1 %v6652_v19  ;;  %v13852_v19 = vld [vmem:[#allocation12 + $0x600] ss:$16 sps:$4 sm:$0xff]  }
 0x64e   : > { %7128 = vmatpush1.bf16.msra.mxu0 %v13762_v13  ;;  %7169 = vmatpush1.bf16.msra.mxu1 %v13765_v33  ;;  %v13855_v13 = vld [vmem:[#allocation12 + $0x608] ss:$16 sps:$4 sm:$0xff]  }
 0x64f   : > { %7129 = vmatprep.subr.bf16.mxu0 %v13770_v7  ;;  %7170 = vmatprep.subr.bf16.mxu1 %v13773_v45  ;;  %v7213_v33 = vld [vmem:[#allocation3 + $0x6] sm:$0x1]  ;;  %v13860_v7 = vld [vmem:[#allocation12 + $0x7e4] ss:$16 sps:$4 sm:$0xff]   ;;  %v13863_v45 = vld [vmem:[#allocation12 + $0x7ec] ss:$16 sps:$4 sm:$0xff]  }
 0x650   : > { %7159 = vmatprep.mubr.bf16.mxu0 %v14644_v8  ;;  %7200 = vmatprep.mubr.bf16.mxu1 %v14644_v8 }
 0x652   : > { %7130 = vmatpush1.bf16.msra.mxu0 %v13768_v31  ;;  %7171 = vmatpush1.bf16.msra.mxu1 %v13771_v55  ;;  %v7214_v31 = vpack.c.bf16 %v7213_v33, %v7213_v33  ;;  %v13858_v55 = vld [vmem:[#allocation12 + $0x7e0] ss:$16 sps:$4 sm:$0xff]  }
 0x653   : > { %7131 = vmatprep.subr.bf16.mxu0 %v13776_v63  ;;  %7172 = vmatprep.subr.bf16.mxu1 %v13779_v3  ;;  %v13861_v63 = vld [vmem:[#allocation12 + $0x7e8] ss:$16 sps:$4 sm:$0xff]   ;;  %v13866_v3 = vld [vmem:[#allocation12 + $0x7c4] ss:$16 sps:$4 sm:$0xff]  }
 0x656   : > { %7132 = vmatpush1.bf16.msra.mxu0 %v13774_v29  ;;  %7173 = vmatpush1.bf16.msra.mxu1 %v13777_v49  ;;  %v13869_v29 = vld [vmem:[#allocation12 + $0x7cc] ss:$16 sps:$4 sm:$0xff]  }
 0x657   : > { %7133 = vmatprep.subr.bf16.mxu0 %v13782_v1  ;;  %7174 = vmatprep.subr.bf16.mxu1 %v13785_v12  ;;  %v13864_v12 = vld [vmem:[#allocation12 + $0x7c0] ss:$16 sps:$4 sm:$0xff]  }
 0x65a   : > { %7134 = vmatpush1.bf16.msra.mxu0 %v13780_v20  ;;  %7175 = vmatpush1.bf16.msra.mxu1 %v13783_v48  ;;  %v13867_v20 = vld [vmem:[#allocation12 + $0x7c8] ss:$16 sps:$4 sm:$0xff]  }
 0x65b   : > { %7135 = vmatprep.subr.bf16.mxu0 %v13788_v43  ;;  %7176 = vmatprep.subr.bf16.mxu1 %v13791_v25  ;;  %v13872_v25 = vld [vmem:[#allocation12 + $0x7a4] ss:$16 sps:$4 sm:$0xff]  }
 0x65e   : > { %7136 = vmatpush1.bf16.msra.mxu0 %v13786_v39  ;;  %7177 = vmatpush1.bf16.msra.mxu1 %v13789_v14  ;;  %v13875_v39 = vld [vmem:[#allocation12 + $0x7ac] ss:$16 sps:$4 sm:$0xff]  }
 0x65f   : > { %7137 = vmatprep.subr.bf16.mxu0 %v13794_v38  ;;  %7178 = vmatprep.subr.bf16.mxu1 %v13797_v35  ;;  %v13870_v35 = vld [vmem:[#allocation12 + $0x7a0] ss:$16 sps:$4 sm:$0xff]  }
 0x662   : > { %7138 = vmatpush1.bf16.msra.mxu0 %v13792_v37  ;;  %7179 = vmatpush1.bf16.msra.mxu1 %v13795_v30  ;;  %v13873_v37 = vld [vmem:[#allocation12 + $0x7a8] ss:$16 sps:$4 sm:$0xff]  }
 0x663   : > { %7139 = vmatprep.subr.bf16.mxu0 %v13800_v47  ;;  %7180 = vmatprep.subr.bf16.mxu1 %v13803_v60  ;;  %v13878_v60 = vld [vmem:[#allocation12 + $0x784] ss:$16 sps:$4 sm:$0xff]  }
 0x666   : > { %7140 = vmatpush1.bf16.msra.mxu0 %v13798_v61  ;;  %7181 = vmatpush1.bf16.msra.mxu1 %v13801_v10  ;;  %v13881_v61 = vld [vmem:[#allocation12 + $0x78c] ss:$16 sps:$4 sm:$0xff]   ;;  %v13876_v10 = vld [vmem:[#allocation12 + $0x780] ss:$16 sps:$4 sm:$0xff]  }
 0x667   : > { %7141 = vmatprep.subr.bf16.mxu0 %v13806_v32  ;;  %7182 = vmatprep.subr.bf16.mxu1 %v13809_v58  ;;  %v13879_v32 = vld [vmem:[#allocation12 + $0x788] ss:$16 sps:$4 sm:$0xff]   ;;  %v13884_v58 = vld [vmem:[#allocation12 + $0x764] ss:$16 sps:$4 sm:$0xff]  }
 0x66a   : > { %7142 = vmatpush1.bf16.msra.mxu0 %v13804_v34  ;;  %7183 = vmatpush1.bf16.msra.mxu1 %v13807_v16  ;;  %v13887_v34 = vld [vmem:[#allocation12 + $0x76c] ss:$16 sps:$4 sm:$0xff]   ;;  %v13882_v16 = vld [vmem:[#allocation12 + $0x760] ss:$16 sps:$4 sm:$0xff]  }
 0x66b   : > { %7408 = vmatprep.subr.bf16.mxu0 %v13812_v59  ;;  %7449 = vmatprep.subr.bf16.mxu1 %v13815_v56  ;;  %v13890_v59 = vld [vmem:[#allocation12 + $0x744] ss:$16 sps:$4 sm:$0xff]   ;;  %v13893_v56 = vld [vmem:[#allocation12 + $0x74c] ss:$16 sps:$4 sm:$0xff]  }
 0x66d   : > { %7160 = vmatmul.mubr.bf16.vlgmr.msra.gmra.mxu0 %v6933_v11  ;;  %7201 = vmatmul.mubr.bf16.vlgmr.msra.gmra.mxu1 %v6933_v11  ;;  %v13888_v11 = vld [vmem:[#allocation12 + $0x740] ss:$16 sps:$4 sm:$0xff]  }
 0x66e   : > { %7409 = vmatpush1.bf16.msra.mxu0 %v13810_v50  ;;  %7450 = vmatpush1.bf16.msra.mxu1 %v13813_v9  ;;  %v13891_v50 = vld [vmem:[#allocation12 + $0x748] ss:$16 sps:$4 sm:$0xff]   ;;  %v13896_v9 = vld [vmem:[#allocation12 + $0x724] ss:$16 sps:$4 sm:$0xff]  }
 0x66f   : > { %7410 = vmatprep.subr.bf16.mxu0 %v13818_v2  ;;  %7451 = vmatprep.subr.bf16.mxu1 %v13821_v15  ;;  %v13899_v2 = vld [vmem:[#allocation12 + $0x72c] ss:$16 sps:$4 sm:$0xff]   ;;  %v13894_v15 = vld [vmem:[#allocation12 + $0x720] ss:$16 sps:$4 sm:$0xff]  }
 0x670   : > { %7440 = vmatprep.mubr.bf16.mxu0 %v14644_v8  ;;  %7481 = vmatprep.mubr.bf16.mxu1 %v14644_v8 }
 0x672   : > { %7411 = vmatpush1.bf16.msra.mxu0 %v13816_v26  ;;  %7452 = vmatpush1.bf16.msra.mxu1 %v13819_v42  ;;  %v13897_v26 = vld [vmem:[#allocation12 + $0x728] ss:$16 sps:$4 sm:$0xff]   ;;  %v13902_v42 = vld [vmem:[#allocation12 + $0x704] ss:$16 sps:$4 sm:$0xff]  }
 0x673   : > { %7412 = vmatprep.subr.bf16.mxu0 %v13824_v53  ;;  %7453 = vmatprep.subr.bf16.mxu1 %v13827_v18  ;;  %v13905_v53 = vld [vmem:[#allocation12 + $0x70c] ss:$16 sps:$4 sm:$0xff]   ;;  %v13900_v18 = vld [vmem:[#allocation12 + $0x700] ss:$16 sps:$4 sm:$0xff]  }
 0x676   : > { %7413 = vmatpush1.bf16.msra.mxu0 %v13822_v62  ;;  %7454 = vmatpush1.bf16.msra.mxu1 %v13825_v4  ;;  %v13903_v62 = vld [vmem:[#allocation12 + $0x708] ss:$16 sps:$4 sm:$0xff]  }
 0x677   : > { %7414 = vmatprep.subr.bf16.mxu0 %v13830_v5  ;;  %7455 = vmatprep.subr.bf16.mxu1 %v13833_v17  ;;  %v7494_v4 = vld [vmem:[#allocation3 + $0x7] sm:$0x1]  ;;  %v13908_v5 = vld [vmem:[#allocation12 + $0x8e4] ss:$16 sps:$4 sm:$0xff]   ;;  %v13911_v17 = vld [vmem:[#allocation12 + $0x8ec] ss:$16 sps:$4 sm:$0xff]  }
 0x67a   : > { %7415 = vmatpush1.bf16.msra.mxu0 %v13828_v22  ;;  %7456 = vmatpush1.bf16.msra.mxu1 %v13831_v52  ;;  %v7495_v22 = vpack.c.bf16 %v7494_v4, %v7494_v4  ;;  %v13906_v52 = vld [vmem:[#allocation12 + $0x8e0] ss:$16 sps:$4 sm:$0xff]   ;;  %v13971_v4 = vld [vmem:[#allocation12 + $0x9ac] ss:$16 sps:$4 sm:$0xff]  }
 0x67b   : > { %7416 = vmatprep.subr.bf16.mxu0 %v13836_v40  ;;  %7457 = vmatprep.subr.bf16.mxu1 %v13839_v21  ;;  %v13909_v40 = vld [vmem:[#allocation12 + $0x8e8] ss:$16 sps:$4 sm:$0xff]   ;;  %v13914_v21 = vld [vmem:[#allocation12 + $0x8c4] ss:$16 sps:$4 sm:$0xff]  }
 0x67e   : > { %7417 = vmatpush1.bf16.msra.mxu0 %v13834_v41  ;;  %7458 = vmatpush1.bf16.msra.mxu1 %v13837_v24  ;;  %v13917_v41 = vld [vmem:[#allocation12 + $0x8cc] ss:$16 sps:$4 sm:$0xff]  }
 0x67f   : > { %7418 = vmatprep.subr.bf16.mxu0 %v13842_v0  ;;  %7459 = vmatprep.subr.bf16.mxu1 %v13845_v44  ;;  %v13912_v44 = vld [vmem:[#allocation12 + $0x8c0] ss:$16 sps:$4 sm:$0xff]  }
 0x682   : > { %7419 = vmatpush1.bf16.msra.mxu0 %v13840_v23  ;;  %7460 = vmatpush1.bf16.msra.mxu1 %v13843_v36  ;;  %v13915_v23 = vld [vmem:[#allocation12 + $0x8c8] ss:$16 sps:$4 sm:$0xff]  }
 0x683   : > { %7420 = vmatprep.subr.bf16.mxu0 %v13848_v6  ;;  %7461 = vmatprep.subr.bf16.mxu1 %v13851_v57  ;;  %v13920_v57 = vld [vmem:[#allocation12 + $0x8a4] ss:$16 sps:$4 sm:$0xff]  }
 0x686   : > { %7421 = vmatpush1.bf16.msra.mxu0 %v13846_v51  ;;  %7462 = vmatpush1.bf16.msra.mxu1 %v13849_v27 }
 0x687   : > { %7422 = vmatprep.subr.bf16.mxu0 %v13854_v28  ;;  %7463 = vmatprep.subr.bf16.mxu1 %v13857_v54  ;;  %v13923_v28 = vld [vmem:[#allocation12 + $0x8ac] ss:$16 sps:$4 sm:$0xff]  }
 0x68a   : > { %7423 = vmatpush1.bf16.msra.mxu0 %v13852_v19  ;;  %7464 = vmatpush1.bf16.msra.mxu1 %v13855_v13 }
 0x68b   : > { %7689 = vmatprep.subr.bf16.mxu0 %v13860_v7  ;;  %7730 = vmatprep.subr.bf16.mxu1 %v13863_v45  ;;  %v13918_v7 = vld [vmem:[#allocation12 + $0x8a0] ss:$16 sps:$4 sm:$0xff]   ;;  %v13921_v45 = vld [vmem:[#allocation12 + $0x8a8] ss:$16 sps:$4 sm:$0xff]  }
 0x68d   : > { %v16653_v49 = vpop.f32.mrf.mxu0  ;;  %v16655_v1 = vpop.f32.mrf.mxu1  ;;  %7441 = vmatmul.mubr.bf16.vlgmr.msra.gmra.mxu0 %v7214_v31  ;;  %7482 = vmatmul.mubr.bf16.vlgmr.msra.gmra.mxu1 %v7214_v31  ;;  %v13926_v31 = vld [vmem:[#allocation12 + $0x884] ss:$16 sps:$4 sm:$0xff]  }
 0x68e   : > { %7690 = vmatpush1.bf16.msra.mxu0 %v13858_v55  ;;  %7731 = vmatpush1.bf16.msra.mxu1 %v13861_v63 }
 0x68f   : > { %v16657_v48 = vpop.f32.mrf.mxu0  ;;  %v16659_v43 = vpop.f32.mrf.mxu1  ;;  %7691 = vmatprep.subr.bf16.mxu0 %v13866_v3  ;;  %7732 = vmatprep.subr.bf16.mxu1 %v13869_v29  ;;  %v13929_v3 = vld [vmem:[#allocation12 + $0x88c] ss:$16 sps:$4 sm:$0xff]   ;;  %v13924_v29 = vld [vmem:[#allocation12 + $0x880] ss:$16 sps:$4 sm:$0xff]  }
 0x690   : > { %7721 = vmatprep.mubr.bf16.mxu0 %v14644_v8  ;;  %7762 = vmatprep.mubr.bf16.mxu1 %v14644_v8 }
 0x691   : > { %v5802_v14 = vpop.f32.mrf.mxu0  ;;  %v5843_v38 = vpop.f32.mrf.mxu1 }
 0x692   : > { %7692 = vmatpush1.bf16.msra.mxu0 %v13864_v12  ;;  %7733 = vmatpush1.bf16.msra.mxu1 %v13867_v20  ;;  %v13935_v12 = vld [vmem:[#allocation12 + $0x86c] ss:$16 sps:$4 sm:$0xff]   ;;  %v13930_v20 = vld [vmem:[#allocation12 + $0x860] ss:$16 sps:$4 sm:$0xff]   ;;  %v13939_v14 = vld [vmem:[#allocation12 + $0x848] ss:$16 sps:$4 sm:$0xff]  }
 0x693   : > { %v5803_v30 = vpop.f32.mrf.mxu0  ;;  %v5844_v47 = vpop.f32.mrf.mxu1  ;;  %7693 = vmatprep.subr.bf16.mxu0 %v13872_v25  ;;  %7734 = vmatprep.subr.bf16.mxu1 %v13875_v39  ;;  %v13941_v25 = vld [vmem:[#allocation12 + $0x84c] ss:$16 sps:$4 sm:$0xff]   ;;  %v13936_v39 = vld [vmem:[#allocation12 + $0x840] ss:$16 sps:$4 sm:$0xff]   ;;  %v13944_v38 = vld [vmem:[#allocation12 + $0x824] ss:$16 sps:$4 sm:$0xff]  }
 0x694   : > { %v13945_v30 = vld [vmem:[#allocation12 + $0x828] ss:$16 sps:$4 sm:$0xff]   ;;  %v13950_v47 = vld [vmem:[#allocation12 + $0x804] ss:$16 sps:$4 sm:$0xff]  }
 0x696   : > { %7694 = vmatpush1.bf16.msra.mxu0 %v13870_v35  ;;  %7735 = vmatpush1.bf16.msra.mxu1 %v13873_v37  ;;  %v13947_v35 = vld [vmem:[#allocation12 + $0x82c] ss:$16 sps:$4 sm:$0xff]   ;;  %v13942_v37 = vld [vmem:[#allocation12 + $0x820] ss:$16 sps:$4 sm:$0xff]  }
 0x697   : > { %7695 = vmatprep.subr.bf16.mxu0 %v13878_v60  ;;  %7736 = vmatprep.subr.bf16.mxu1 %v13881_v61  ;;  %v13953_v60 = vld [vmem:[#allocation12 + $0x80c] ss:$16 sps:$4 sm:$0xff]   ;;  %v13948_v61 = vld [vmem:[#allocation12 + $0x800] ss:$16 sps:$4 sm:$0xff]  }
 0x69a   : > { %7696 = vmatpush1.bf16.msra.mxu0 %v13876_v10  ;;  %7737 = vmatpush1.bf16.msra.mxu1 %v13879_v32  ;;  %v13951_v10 = vld [vmem:[#allocation12 + $0x808] ss:$16 sps:$4 sm:$0xff]  }
 0x69b   : > { %7697 = vmatprep.subr.bf16.mxu0 %v13884_v58  ;;  %7738 = vmatprep.subr.bf16.mxu1 %v13887_v34  ;;  %v7776_v32 = vld [vmem:[#allocation3 + $0x8] sm:$0x1]  ;;  %v13956_v58 = vld [vmem:[#allocation12 + $0x9e4] ss:$16 sps:$4 sm:$0xff]   ;;  %v13959_v34 = vld [vmem:[#allocation12 + $0x9ec] ss:$16 sps:$4 sm:$0xff]  }
 0x69e   : > { %7698 = vmatpush1.bf16.msra.mxu0 %v13882_v16  ;;  %7739 = vmatpush1.bf16.msra.mxu1 %v13885_v46  ;;  %v13954_v16 = vld [vmem:[#allocation12 + $0x9e0] ss:$16 sps:$4 sm:$0xff]   ;;  %v7777_v46 = vpack.c.bf16 %v7776_v32, %v7776_v32  ;;  %v14019_v32 = vld [vmem:[#allocation12 + $0xaac] ss:$16 sps:$4 sm:$0xff]  }
 0x69f   : > { %7699 = vmatprep.subr.bf16.mxu0 %v13890_v59  ;;  %7740 = vmatprep.subr.bf16.mxu1 %v13893_v56  ;;  %v13957_v59 = vld [vmem:[#allocation12 + $0x9e8] ss:$16 sps:$4 sm:$0xff]   ;;  %v13962_v56 = vld [vmem:[#allocation12 + $0x9c4] ss:$16 sps:$4 sm:$0xff]  }
 0x6a2   : > { %7700 = vmatpush1.bf16.msra.mxu0 %v13888_v11  ;;  %7741 = vmatpush1.bf16.msra.mxu1 %v13891_v50  ;;  %v13965_v11 = vld [vmem:[#allocation12 + $0x9cc] ss:$16 sps:$4 sm:$0xff]   ;;  %v13960_v50 = vld [vmem:[#allocation12 + $0x9c0] ss:$16 sps:$4 sm:$0xff]  }
 0x6a3   : > { %7701 = vmatprep.subr.bf16.mxu0 %v13896_v9  ;;  %7742 = vmatprep.subr.bf16.mxu1 %v13899_v2  ;;  %v13963_v9 = vld [vmem:[#allocation12 + $0x9c8] ss:$16 sps:$4 sm:$0xff]  }
 0x6a6   : > { %7702 = vmatpush1.bf16.msra.mxu0 %v13894_v15  ;;  %7743 = vmatpush1.bf16.msra.mxu1 %v13897_v26 }
 0x6a7   : > { %7703 = vmatprep.subr.bf16.mxu0 %v13902_v42  ;;  %7744 = vmatprep.subr.bf16.mxu1 %v13905_v53 }
 0x6aa   : > { %7704 = vmatpush1.bf16.msra.mxu0 %v13900_v18  ;;  %7745 = vmatpush1.bf16.msra.mxu1 %v13903_v62  ;;  %v13968_v62 = vld [vmem:[#allocation12 + $0x9a4] ss:$16 sps:$4 sm:$0xff]  }
 0x6ab   : > { %7971 = vmatprep.subr.bf16.mxu0 %v13908_v5  ;;  %8012 = vmatprep.subr.bf16.mxu1 %v13911_v17 }
 0x6ad   : > { %v6040_v24 = vpop.f32.mrf.mxu0  ;;  %v6081_v0 = vpop.f32.mrf.mxu1  ;;  %7722 = vmatmul.mubr.bf16.vlgmr.msra.gmra.mxu0 %v7495_v22  ;;  %7763 = vmatmul.mubr.bf16.vlgmr.msra.gmra.mxu1 %v7495_v22  ;;  %v13966_v22 = vld [vmem:[#allocation12 + $0x9a0] ss:$16 sps:$4 sm:$0xff]  }
 0x6ae   : > { %v16664_v36 = vadd.f32 %v6040_v24, %v16653_v49  ;;  %v16667_v6 = vadd.f32 %v6081_v0, %v16655_v1  ;;  %7972 = vmatpush1.bf16.msra.mxu0 %v13906_v52  ;;  %8013 = vmatpush1.bf16.msra.mxu1 %v13909_v40  ;;  %v13927_v49 = vld [vmem:[#allocation12 + $0x888] ss:$16 sps:$4 sm:$0xff]   ;;  %v13932_v1 = vld [vmem:[#allocation12 + $0x864] ss:$16 sps:$4 sm:$0xff]  }
 0x6af   : > { %v6042_v51 = vpop.f32.mrf.mxu0  ;;  %v6083_v27 = vpop.f32.mrf.mxu1  ;;  %7973 = vmatprep.subr.bf16.mxu0 %v13914_v21  ;;  %8014 = vmatprep.subr.bf16.mxu1 %v13917_v41  ;;  %v13969_v52 = vld [vmem:[#allocation12 + $0x9a8] ss:$16 sps:$4 sm:$0xff]   ;;  %v13974_v0 = vld [vmem:[#allocation12 + $0x984] ss:$16 sps:$4 sm:$0xff]  }
 0x6b0   : > { %v16670_v54 = vadd.f32 %v6042_v51, %v16657_v48  ;;  %v16673_v19 = vadd.f32 %v6083_v27, %v16659_v43  ;;  %8003 = vmatprep.mubr.bf16.mxu0 %v14644_v8  ;;  %8044 = vmatprep.mubr.bf16.mxu1 %v14644_v8  ;;  %v13933_v48 = vld [vmem:[#allocation12 + $0x868] ss:$16 sps:$4 sm:$0xff]   ;;  %v13938_v43 = vld [vmem:[#allocation12 + $0x844] ss:$16 sps:$4 sm:$0xff]   ;;  %v13978_v51 = vld [vmem:[#allocation12 + $0x960] ss:$16 sps:$4 sm:$0xff]  }
 0x6b1   : > { %v6044_v13 = vpop.f32.mrf.mxu0  ;;  %v6085_v33 = vpop.f32.mrf.mxu1  ;;  %v13981_v27 = vld [vmem:[#allocation12 + $0x968] ss:$16 sps:$4 sm:$0xff]  }
 0x6b2   : > { %7974 = vmatpush1.bf16.msra.mxu0 %v13912_v44  ;;  %8015 = vmatpush1.bf16.msra.mxu1 %v13915_v23  ;;  %v13977_v44 = vld [vmem:[#allocation12 + $0x98c] ss:$16 sps:$4 sm:$0xff]   ;;  %v13972_v23 = vld [vmem:[#allocation12 + $0x980] ss:$16 sps:$4 sm:$0xff]   ;;  %v13987_v13 = vld [vmem:[#allocation12 + $0x948] ss:$16 sps:$4 sm:$0xff]  }
 0x6b3   : > { %v6045_v55 = vpop.f32.mrf.mxu0  ;;  %v6086_v63 = vpop.f32.mrf.mxu1  ;;  %7975 = vmatprep.subr.bf16.mxu0 %v13920_v57  ;;  %8016 = vmatprep.subr.bf16.mxu1 %v13923_v28  ;;  %v13983_v57 = vld [vmem:[#allocation12 + $0x96c] ss:$16 sps:$4 sm:$0xff]   ;;  %v13986_v28 = vld [vmem:[#allocation12 + $0x944] ss:$16 sps:$4 sm:$0xff]  }
 0x6b4   : > { %v13992_v33 = vld [vmem:[#allocation12 + $0x924] ss:$16 sps:$4 sm:$0xff]   ;;  %v14001_v63 = vld [vmem:[#allocation12 + $0x90c] ss:$16 sps:$4 sm:$0xff]  }
 0x6b5   : > { %v13998_v55 = vld [vmem:[#allocation12 + $0x904] ss:$16 sps:$4 sm:$0xff]  }
 0x6b6   : > { %7976 = vmatpush1.bf16.msra.mxu0 %v13918_v7  ;;  %8017 = vmatpush1.bf16.msra.mxu1 %v13921_v45  ;;  %v13995_v7 = vld [vmem:[#allocation12 + $0x92c] ss:$16 sps:$4 sm:$0xff]   ;;  %v13990_v45 = vld [vmem:[#allocation12 + $0x920] ss:$16 sps:$4 sm:$0xff]  }
 0x6b7   : > { %7977 = vmatprep.subr.bf16.mxu0 %v13926_v31  ;;  %8018 = vmatprep.subr.bf16.mxu1 %v13929_v3  ;;  %v13993_v31 = vld [vmem:[#allocation12 + $0x928] ss:$16 sps:$4 sm:$0xff]   ;;  %v13996_v3 = vld [vmem:[#allocation12 + $0x900] ss:$16 sps:$4 sm:$0xff]  }
 0x6ba   : > { %7978 = vmatpush1.bf16.msra.mxu0 %v13924_v29  ;;  %8019 = vmatpush1.bf16.msra.mxu1 %v13927_v49  ;;  %v13999_v29 = vld [vmem:[#allocation12 + $0x908] ss:$16 sps:$4 sm:$0xff]  }
 0x6bb   : > { %7979 = vmatprep.subr.bf16.mxu0 %v13932_v1  ;;  %8020 = vmatprep.subr.bf16.mxu1 %v13935_v12  ;;  %v8057_v49 = vld [vmem:[#allocation3 + $0x9] sm:$0x1]  ;;  %v14004_v1 = vld [vmem:[#allocation12 + $0xae4] ss:$16 sps:$4 sm:$0xff]   ;;  %v14007_v12 = vld [vmem:[#allocation12 + $0xaec] ss:$16 sps:$4 sm:$0xff]  }
 0x6be   : > { %7980 = vmatpush1.bf16.msra.mxu0 %v13930_v20  ;;  %8021 = vmatpush1.bf16.msra.mxu1 %v13933_v48  ;;  %v14002_v20 = vld [vmem:[#allocation12 + $0xae0] ss:$16 sps:$4 sm:$0xff]   ;;  %v8058_v48 = vpack.c.bf16 %v8057_v49, %v8057_v49  ;;  %v14067_v49 = vld [vmem:[#allocation12 + $0xbac] ss:$16 sps:$4 sm:$0xff]  }
 0x6bf   : > { %7981 = vmatprep.subr.bf16.mxu0 %v13938_v43  ;;  %8022 = vmatprep.subr.bf16.mxu1 %v13941_v25  ;;  %v14005_v43 = vld [vmem:[#allocation12 + $0xae8] ss:$16 sps:$4 sm:$0xff]   ;;  %v14010_v25 = vld [vmem:[#allocation12 + $0xac4] ss:$16 sps:$4 sm:$0xff]  }
 0x6c2   : > { %7982 = vmatpush1.bf16.msra.mxu0 %v13936_v39  ;;  %8023 = vmatpush1.bf16.msra.mxu1 %v13939_v14  ;;  %v14013_v39 = vld [vmem:[#allocation12 + $0xacc] ss:$16 sps:$4 sm:$0xff]   ;;  %v14008_v14 = vld [vmem:[#allocation12 + $0xac0] ss:$16 sps:$4 sm:$0xff]  }
 0x6c3   : > { %7983 = vmatprep.subr.bf16.mxu0 %v13944_v38  ;;  %8024 = vmatprep.subr.bf16.mxu1 %v13947_v35  ;;  %v14011_v38 = vld [vmem:[#allocation12 + $0xac8] ss:$16 sps:$4 sm:$0xff]  }
 0x6c6   : > { %7984 = vmatpush1.bf16.msra.mxu0 %v13942_v37  ;;  %8025 = vmatpush1.bf16.msra.mxu1 %v13945_v30 }
 0x6c7   : > { %7985 = vmatprep.subr.bf16.mxu0 %v13950_v47  ;;  %8026 = vmatprep.subr.bf16.mxu1 %v13953_v60 }
 0x6ca   : > { %7986 = vmatpush1.bf16.msra.mxu0 %v13948_v61  ;;  %8027 = vmatpush1.bf16.msra.mxu1 %v13951_v10  ;;  %v14016_v10 = vld [vmem:[#allocation12 + $0xaa4] ss:$16 sps:$4 sm:$0xff]  }
 0x6cb   : > { %8252 = vmatprep.subr.bf16.mxu0 %v13956_v58  ;;  %8293 = vmatprep.subr.bf16.mxu1 %v13959_v34 }
 0x6cd   : > { %v6317_v2 = vpop.f32.mrf.mxu0  ;;  %v6358_v15 = vpop.f32.mrf.mxu1  ;;  %8004 = vmatmul.mubr.bf16.vlgmr.msra.gmra.mxu0 %v7777_v46  ;;  %8045 = vmatmul.mubr.bf16.vlgmr.msra.gmra.mxu1 %v7777_v46  ;;  %v14017_v46 = vld [vmem:[#allocation12 + $0xaa8] ss:$16 sps:$4 sm:$0xff]  }
 0x6ce   : > { %v16678_v26 = vadd.f32 %v6317_v2, %v16664_v36  ;;  %v16681_v42 = vadd.f32 %v6358_v15, %v16667_v6  ;;  %8253 = vmatpush1.bf16.msra.mxu0 %v13954_v16  ;;  %8294 = vmatpush1.bf16.msra.mxu1 %v13957_v59  ;;  %v13975_v36 = vld [vmem:[#allocation12 + $0x988] ss:$16 sps:$4 sm:$0xff]   ;;  %v13980_v6 = vld [vmem:[#allocation12 + $0x964] ss:$16 sps:$4 sm:$0xff]   ;;  %v14014_v16 = vld [vmem:[#allocation12 + $0xaa0] ss:$16 sps:$4 sm:$0xff]  }
 0x6cf   : > { %v6319_v53 = vpop.f32.mrf.mxu0  ;;  %v6360_v18 = vpop.f32.mrf.mxu1  ;;  %8254 = vmatprep.subr.bf16.mxu0 %v13962_v56  ;;  %8295 = vmatprep.subr.bf16.mxu1 %v13965_v11  ;;  %v14025_v2 = vld [vmem:[#allocation12 + $0xa8c] ss:$16 sps:$4 sm:$0xff]   ;;  %v14020_v15 = vld [vmem:[#allocation12 + $0xa80] ss:$16 sps:$4 sm:$0xff]  }
 0x6d0   : > { %v16684_v5 = vadd.f32 %v6319_v53, %v16670_v54  ;;  %v16687_v17 = vadd.f32 %v6360_v18, %v16673_v19  ;;  %8284 = vmatprep.mubr.bf16.mxu0 %v14644_v8  ;;  %8325 = vmatprep.mubr.bf16.mxu1 %v14644_v8  ;;  %v13989_v54 = vld [vmem:[#allocation12 + $0x94c] ss:$16 sps:$4 sm:$0xff]   ;;  %v13984_v19 = vld [vmem:[#allocation12 + $0x940] ss:$16 sps:$4 sm:$0xff]  }
 0x6d1   : > { %v6321_v40 = vpop.f32.mrf.mxu0  ;;  %v6362_v21 = vpop.f32.mrf.mxu1  ;;  %v14031_v53 = vld [vmem:[#allocation12 + $0xa6c] ss:$16 sps:$4 sm:$0xff]   ;;  %v14026_v18 = vld [vmem:[#allocation12 + $0xa60] ss:$16 sps:$4 sm:$0xff]  }
 0x6d2   : > { %8255 = vmatpush1.bf16.msra.mxu0 %v13960_v50  ;;  %8296 = vmatpush1.bf16.msra.mxu1 %v13963_v9  ;;  %v14022_v9 = vld [vmem:[#allocation12 + $0xa84] ss:$16 sps:$4 sm:$0xff]   ;;  %v14043_v40 = vld [vmem:[#allocation12 + $0xa2c] ss:$16 sps:$4 sm:$0xff]   ;;  %v14038_v21 = vld [vmem:[#allocation12 + $0xa20] ss:$16 sps:$4 sm:$0xff]  }
 0x6d3   : > { %v6322_v41 = vpop.f32.mrf.mxu0  ;;  %v6363_v24 = vpop.f32.mrf.mxu1  ;;  %8256 = vmatprep.subr.bf16.mxu0 %v13968_v62  ;;  %8297 = vmatprep.subr.bf16.mxu1 %v13971_v4  ;;  %v14029_v62 = vld [vmem:[#allocation12 + $0xa68] ss:$16 sps:$4 sm:$0xff]   ;;  %v14034_v4 = vld [vmem:[#allocation12 + $0xa44] ss:$16 sps:$4 sm:$0xff]  }
 0x6d4   : > { %v14041_v41 = vld [vmem:[#allocation12 + $0xa28] ss:$16 sps:$4 sm:$0xff]   ;;  %v14046_v24 = vld [vmem:[#allocation12 + $0xa04] ss:$16 sps:$4 sm:$0xff]  }
 0x6d6   : > { %8257 = vmatpush1.bf16.msra.mxu0 %v13966_v22  ;;  %8298 = vmatpush1.bf16.msra.mxu1 %v13969_v52  ;;  %v14035_v22 = vld [vmem:[#allocation12 + $0xa48] ss:$16 sps:$4 sm:$0xff]   ;;  %v14040_v52 = vld [vmem:[#allocation12 + $0xa24] ss:$16 sps:$4 sm:$0xff]  }
 0x6d7   : > { %8258 = vmatprep.subr.bf16.mxu0 %v13974_v0  ;;  %8299 = vmatprep.subr.bf16.mxu1 %v13977_v44  ;;  %v14049_v0 = vld [vmem:[#allocation12 + $0xa0c] ss:$16 sps:$4 sm:$0xff]   ;;  %v14044_v44 = vld [vmem:[#allocation12 + $0xa00] ss:$16 sps:$4 sm:$0xff]  }
 0x6da   : > { %8259 = vmatpush1.bf16.msra.mxu0 %v13972_v23  ;;  %8300 = vmatpush1.bf16.msra.mxu1 %v13975_v36  ;;  %v14047_v23 = vld [vmem:[#allocation12 + $0xa08] ss:$16 sps:$4 sm:$0xff]   ;;  %v8338_v36 = vld [vmem:[#allocation3 + $0xa] sm:$0x1] }
 0x6db   : > { %8260 = vmatprep.subr.bf16.mxu0 %v13980_v6  ;;  %8301 = vmatprep.subr.bf16.mxu1 %v13983_v57  ;;  %v14052_v6 = vld [vmem:[#allocation12 + $0xbe4] ss:$16 sps:$4 sm:$0xff]   ;;  %v14055_v57 = vld [vmem:[#allocation12 + $0xbec] ss:$16 sps:$4 sm:$0xff]  }
 0x6de   : > { %8261 = vmatpush1.bf16.msra.mxu0 %v13978_v51  ;;  %8302 = vmatpush1.bf16.msra.mxu1 %v13981_v27  ;;  %v14050_v51 = vld [vmem:[#allocation12 + $0xbe0] ss:$16 sps:$4 sm:$0xff]   ;;  %v8339_v27 = vpack.c.bf16 %v8338_v36, %v8338_v36  ;;  %v14115_v36 = vld [vmem:[#allocation12 + $0xcac] ss:$16 sps:$4 sm:$0xff]  }
 0x6df   : > { %8262 = vmatprep.subr.bf16.mxu0 %v13986_v28  ;;  %8303 = vmatprep.subr.bf16.mxu1 %v13989_v54  ;;  %v14053_v28 = vld [vmem:[#allocation12 + $0xbe8] ss:$16 sps:$4 sm:$0xff]   ;;  %v14058_v54 = vld [vmem:[#allocation12 + $0xbc4] ss:$16 sps:$4 sm:$0xff]  }
 0x6e2   : > { %8263 = vmatpush1.bf16.msra.mxu0 %v13984_v19  ;;  %8304 = vmatpush1.bf16.msra.mxu1 %v13987_v13  ;;  %v14061_v19 = vld [vmem:[#allocation12 + $0xbcc] ss:$16 sps:$4 sm:$0xff]   ;;  %v14056_v13 = vld [vmem:[#allocation12 + $0xbc0] ss:$16 sps:$4 sm:$0xff]  }
 0x6e3   : > { %8264 = vmatprep.subr.bf16.mxu0 %v13992_v33  ;;  %8305 = vmatprep.subr.bf16.mxu1 %v13995_v7  ;;  %v14059_v33 = vld [vmem:[#allocation12 + $0xbc8] ss:$16 sps:$4 sm:$0xff]  }
 0x6e6   : > { %8265 = vmatpush1.bf16.msra.mxu0 %v13990_v45  ;;  %8306 = vmatpush1.bf16.msra.mxu1 %v13993_v31 }
 0x6e7   : > { %8266 = vmatprep.subr.bf16.mxu0 %v13998_v55  ;;  %8307 = vmatprep.subr.bf16.mxu1 %v14001_v63 }
 0x6ea   : > { %8267 = vmatpush1.bf16.msra.mxu0 %v13996_v3  ;;  %8308 = vmatpush1.bf16.msra.mxu1 %v13999_v29  ;;  %v14064_v29 = vld [vmem:[#allocation12 + $0xba4] ss:$16 sps:$4 sm:$0xff]  }
 0x6eb   : > { %8533 = vmatprep.subr.bf16.mxu0 %v14004_v1  ;;  %8574 = vmatprep.subr.bf16.mxu1 %v14007_v12 }
 0x6ed   : > { %v6598_v35 = vpop.f32.mrf.mxu0  ;;  %v6639_v37 = vpop.f32.mrf.mxu1  ;;  %8285 = vmatmul.mubr.bf16.vlgmr.msra.gmra.mxu0 %v8058_v48  ;;  %8326 = vmatmul.mubr.bf16.vlgmr.msra.gmra.mxu1 %v8058_v48 }
 0x6ee   : > { %v16692_v30 = vadd.f32 %v6598_v35, %v16678_v26  ;;  %v16695_v47 = vadd.f32 %v6639_v37, %v16681_v42  ;;  %8534 = vmatpush1.bf16.msra.mxu0 %v14002_v20  ;;  %8575 = vmatpush1.bf16.msra.mxu1 %v14005_v43  ;;  %v14023_v26 = vld [vmem:[#allocation12 + $0xa88] ss:$16 sps:$4 sm:$0xff]   ;;  %v14028_v42 = vld [vmem:[#allocation12 + $0xa64] ss:$16 sps:$4 sm:$0xff]   ;;  %v14062_v43 = vld [vmem:[#allocation12 + $0xba0] ss:$16 sps:$4 sm:$0xff]  }
 0x6ef   : > { %v6600_v60 = vpop.f32.mrf.mxu0  ;;  %v6641_v61 = vpop.f32.mrf.mxu1  ;;  %8535 = vmatprep.subr.bf16.mxu0 %v14010_v25  ;;  %8576 = vmatprep.subr.bf16.mxu1 %v14013_v39  ;;  %v14065_v25 = vld [vmem:[#allocation12 + $0xba8] ss:$16 sps:$4 sm:$0xff]   ;;  %v14073_v35 = vld [vmem:[#allocation12 + $0xb8c] ss:$16 sps:$4 sm:$0xff]   ;;  %v14068_v37 = vld [vmem:[#allocation12 + $0xb80] ss:$16 sps:$4 sm:$0xff]  }
 0x6f0   : > { %v16698_v58 = vadd.f32 %v6600_v60, %v16684_v5  ;;  %v16701_v34 = vadd.f32 %v6641_v61, %v16687_v17  ;;  %8565 = vmatprep.mubr.bf16.mxu0 %v14644_v8  ;;  %8606 = vmatprep.mubr.bf16.mxu1 %v14644_v8  ;;  %v14037_v5 = vld [vmem:[#allocation12 + $0xa4c] ss:$16 sps:$4 sm:$0xff]   ;;  %v14032_v17 = vld [vmem:[#allocation12 + $0xa40] ss:$16 sps:$4 sm:$0xff]  }
 0x6f1   : > { %v6602_v59 = vpop.f32.mrf.mxu0  ;;  %v6643_v56 = vpop.f32.mrf.mxu1  ;;  %v14079_v60 = vld [vmem:[#allocation12 + $0xb6c] ss:$16 sps:$4 sm:$0xff]   ;;  %v14074_v61 = vld [vmem:[#allocation12 + $0xb60] ss:$16 sps:$4 sm:$0xff]  }
 0x6f2   : > { %8536 = vmatpush1.bf16.msra.mxu0 %v14008_v14  ;;  %8577 = vmatpush1.bf16.msra.mxu1 %v14011_v38  ;;  %v14070_v38 = vld [vmem:[#allocation12 + $0xb84] ss:$16 sps:$4 sm:$0xff]   ;;  %v14091_v59 = vld [vmem:[#allocation12 + $0xb2c] ss:$16 sps:$4 sm:$0xff]   ;;  %v14086_v56 = vld [vmem:[#allocation12 + $0xb20] ss:$16 sps:$4 sm:$0xff]  }
 0x6f3   : > { %v6603_v11 = vpop.f32.mrf.mxu0  ;;  %v6644_v50 = vpop.f32.mrf.mxu1  ;;  %8537 = vmatprep.subr.bf16.mxu0 %v14016_v10  ;;  %8578 = vmatprep.subr.bf16.mxu1 %v14019_v32  ;;  %v14077_v10 = vld [vmem:[#allocation12 + $0xb68] ss:$16 sps:$4 sm:$0xff]   ;;  %v14082_v32 = vld [vmem:[#allocation12 + $0xb44] ss:$16 sps:$4 sm:$0xff]  }
 0x6f4   : > { %v14089_v11 = vld [vmem:[#allocation12 + $0xb28] ss:$16 sps:$4 sm:$0xff]   ;;  %v14094_v50 = vld [vmem:[#allocation12 + $0xb04] ss:$16 sps:$4 sm:$0xff]  }
 0x6f6   : > { %8538 = vmatpush1.bf16.msra.mxu0 %v14014_v16  ;;  %8579 = vmatpush1.bf16.msra.mxu1 %v14017_v46  ;;  %v14083_v16 = vld [vmem:[#allocation12 + $0xb48] ss:$16 sps:$4 sm:$0xff]   ;;  %v14088_v46 = vld [vmem:[#allocation12 + $0xb24] ss:$16 sps:$4 sm:$0xff]  }
 0x6f7   : > { %8539 = vmatprep.subr.bf16.mxu0 %v14022_v9  ;;  %8580 = vmatprep.subr.bf16.mxu1 %v14025_v2  ;;  %v14097_v9 = vld [vmem:[#allocation12 + $0xb0c] ss:$16 sps:$4 sm:$0xff]   ;;  %v14092_v2 = vld [vmem:[#allocation12 + $0xb00] ss:$16 sps:$4 sm:$0xff]  }
 0x6fa   : > { %8540 = vmatpush1.bf16.msra.mxu0 %v14020_v15  ;;  %8581 = vmatpush1.bf16.msra.mxu1 %v14023_v26  ;;  %v14095_v15 = vld [vmem:[#allocation12 + $0xb08] ss:$16 sps:$4 sm:$0xff]   ;;  %v8619_v26 = vld [vmem:[#allocation3 + $0xb] sm:$0x1] }
 0x6fb   : > { %8541 = vmatprep.subr.bf16.mxu0 %v14028_v42  ;;  %8582 = vmatprep.subr.bf16.mxu1 %v14031_v53  ;;  %v14100_v42 = vld [vmem:[#allocation12 + $0xce4] ss:$16 sps:$4 sm:$0xff]   ;;  %v14103_v53 = vld [vmem:[#allocation12 + $0xcec] ss:$16 sps:$4 sm:$0xff]  }
 0x6fe   : > { %8542 = vmatpush1.bf16.msra.mxu0 %v14026_v18  ;;  %8583 = vmatpush1.bf16.msra.mxu1 %v14029_v62  ;;  %v8620_v18 = vpack.c.bf16 %v8619_v26, %v8619_v26  ;;  %v14098_v62 = vld [vmem:[#allocation12 + $0xce0] ss:$16 sps:$4 sm:$0xff]   ;;  %v14163_v26 = vld [vmem:[#allocation12 + $0xdac] ss:$16 sps:$4 sm:$0xff]  }
 0x6ff   : > { %8543 = vmatprep.subr.bf16.mxu0 %v14034_v4  ;;  %8584 = vmatprep.subr.bf16.mxu1 %v14037_v5  ;;  %v14101_v4 = vld [vmem:[#allocation12 + $0xce8] ss:$16 sps:$4 sm:$0xff]   ;;  %v14106_v5 = vld [vmem:[#allocation12 + $0xcc4] ss:$16 sps:$4 sm:$0xff]  }
 0x702   : > { %8544 = vmatpush1.bf16.msra.mxu0 %v14032_v17  ;;  %8585 = vmatpush1.bf16.msra.mxu1 %v14035_v22  ;;  %v14109_v17 = vld [vmem:[#allocation12 + $0xccc] ss:$16 sps:$4 sm:$0xff]  }
 0x703   : > { %8545 = vmatprep.subr.bf16.mxu0 %v14040_v52  ;;  %8586 = vmatprep.subr.bf16.mxu1 %v14043_v40 }
 0x706   : > { %8546 = vmatpush1.bf16.msra.mxu0 %v14038_v21  ;;  %8587 = vmatpush1.bf16.msra.mxu1 %v14041_v41  ;;  %v14104_v41 = vld [vmem:[#allocation12 + $0xcc0] ss:$16 sps:$4 sm:$0xff]  }
 0x707   : > { %8547 = vmatprep.subr.bf16.mxu0 %v14046_v24  ;;  %8588 = vmatprep.subr.bf16.mxu1 %v14049_v0  ;;  %v14107_v24 = vld [vmem:[#allocation12 + $0xcc8] ss:$16 sps:$4 sm:$0xff]  }
 0x70a   : > { %8548 = vmatpush1.bf16.msra.mxu0 %v14044_v44  ;;  %8589 = vmatpush1.bf16.msra.mxu1 %v14047_v23  ;;  %v14112_v23 = vld [vmem:[#allocation12 + $0xca4] ss:$16 sps:$4 sm:$0xff]  }
 0x70b   : > { %8814 = vmatprep.subr.bf16.mxu0 %v14052_v6  ;;  %8855 = vmatprep.subr.bf16.mxu1 %v14055_v57 }
 0x70d   : > { %v6880_v7 = vpop.f32.mrf.mxu0  ;;  %v6921_v45 = vpop.f32.mrf.mxu1  ;;  %8566 = vmatmul.mubr.bf16.vlgmr.msra.gmra.mxu0 %v8339_v27  ;;  %8607 = vmatmul.mubr.bf16.vlgmr.msra.gmra.mxu1 %v8339_v27 }
 0x70e   : > { %v16706_v31 = vadd.f32 %v6880_v7, %v16692_v30  ;;  %v16709_v55 = vadd.f32 %v6921_v45, %v16695_v47  ;;  %8815 = vmatpush1.bf16.msra.mxu0 %v14050_v51  ;;  %8856 = vmatpush1.bf16.msra.mxu1 %v14053_v28  ;;  %v14071_v30 = vld [vmem:[#allocation12 + $0xb88] ss:$16 sps:$4 sm:$0xff]   ;;  %v14076_v47 = vld [vmem:[#allocation12 + $0xb64] ss:$16 sps:$4 sm:$0xff]   ;;  %v14110_v28 = vld [vmem:[#allocation12 + $0xca0] ss:$16 sps:$4 sm:$0xff]  }
 0x70f   : > { %v6882_v63 = vpop.f32.mrf.mxu0  ;;  %v6923_v3 = vpop.f32.mrf.mxu1  ;;  %8816 = vmatprep.subr.bf16.mxu0 %v14058_v54  ;;  %8857 = vmatprep.subr.bf16.mxu1 %v14061_v19  ;;  %v14113_v54 = vld [vmem:[#allocation12 + $0xca8] ss:$16 sps:$4 sm:$0xff]   ;;  %v14121_v7 = vld [vmem:[#allocation12 + $0xc8c] ss:$16 sps:$4 sm:$0xff]   ;;  %v14116_v45 = vld [vmem:[#allocation12 + $0xc80] ss:$16 sps:$4 sm:$0xff]  }
 0x710   : > { %v16712_v1 = vadd.f32 %v6882_v63, %v16698_v58  ;;  %v16715_v12 = vadd.f32 %v6923_v3, %v16701_v34  ;;  %8846 = vmatprep.mubr.bf16.mxu0 %v14644_v8  ;;  %8887 = vmatprep.mubr.bf16.mxu1 %v14644_v8  ;;  %v14085_v58 = vld [vmem:[#allocation12 + $0xb4c] ss:$16 sps:$4 sm:$0xff]   ;;  %v14080_v34 = vld [vmem:[#allocation12 + $0xb40] ss:$16 sps:$4 sm:$0xff]  }
 0x711   : > { %v6884_v20 = vpop.f32.mrf.mxu0  ;;  %v6925_v48 = vpop.f32.mrf.mxu1  ;;  %v14127_v63 = vld [vmem:[#allocation12 + $0xc6c] ss:$16 sps:$4 sm:$0xff]   ;;  %v14122_v3 = vld [vmem:[#allocation12 + $0xc60] ss:$16 sps:$4 sm:$0xff]  }
 0x712   : > { %8817 = vmatpush1.bf16.msra.mxu0 %v14056_v13  ;;  %8858 = vmatpush1.bf16.msra.mxu1 %v14059_v33  ;;  %v14118_v33 = vld [vmem:[#allocation12 + $0xc84] ss:$16 sps:$4 sm:$0xff]   ;;  %v14131_v20 = vld [vmem:[#allocation12 + $0xc48] ss:$16 sps:$4 sm:$0xff]  }
 0x713   : > { %v6885_v39 = vpop.f32.mrf.mxu0  ;;  %v6926_v14 = vpop.f32.mrf.mxu1  ;;  %8818 = vmatprep.subr.bf16.mxu0 %v14064_v29  ;;  %8859 = vmatprep.subr.bf16.mxu1 %v14067_v49  ;;  %v14125_v29 = vld [vmem:[#allocation12 + $0xc68] ss:$16 sps:$4 sm:$0xff]   ;;  %v14130_v49 = vld [vmem:[#allocation12 + $0xc44] ss:$16 sps:$4 sm:$0xff]  }
 0x714   : > { %v14136_v48 = vld [vmem:[#allocation12 + $0xc24] ss:$16 sps:$4 sm:$0xff]   ;;  %v14137_v39 = vld [vmem:[#allocation12 + $0xc28] ss:$16 sps:$4 sm:$0xff]  }
 0x715   : > { %v14142_v14 = vld [vmem:[#allocation12 + $0xc04] ss:$16 sps:$4 sm:$0xff]  }
 0x716   : > { %8819 = vmatpush1.bf16.msra.mxu0 %v14062_v43  ;;  %8860 = vmatpush1.bf16.msra.mxu1 %v14065_v25  ;;  %v14139_v43 = vld [vmem:[#allocation12 + $0xc2c] ss:$16 sps:$4 sm:$0xff]   ;;  %v14134_v25 = vld [vmem:[#allocation12 + $0xc20] ss:$16 sps:$4 sm:$0xff]  }
 0x717   : > { %8820 = vmatprep.subr.bf16.mxu0 %v14070_v38  ;;  %8861 = vmatprep.subr.bf16.mxu1 %v14073_v35  ;;  %v14145_v38 = vld [vmem:[#allocation12 + $0xc0c] ss:$16 sps:$4 sm:$0xff]   ;;  %v14140_v35 = vld [vmem:[#allocation12 + $0xc00] ss:$16 sps:$4 sm:$0xff]  }
 0x71a   : > { %8821 = vmatpush1.bf16.msra.mxu0 %v14068_v37  ;;  %8862 = vmatpush1.bf16.msra.mxu1 %v14071_v30  ;;  %v14143_v37 = vld [vmem:[#allocation12 + $0xc08] ss:$16 sps:$4 sm:$0xff]   ;;  %v8901_v30 = vld [vmem:[#allocation3 + $0xc] sm:$0x1] }
 0x71b   : > { %8822 = vmatprep.subr.bf16.mxu0 %v14076_v47  ;;  %8863 = vmatprep.subr.bf16.mxu1 %v14079_v60  ;;  %v14148_v47 = vld [vmem:[#allocation12 + $0xde4] ss:$16 sps:$4 sm:$0xff]   ;;  %v14151_v60 = vld [vmem:[#allocation12 + $0xdec] ss:$16 sps:$4 sm:$0xff]  }
 0x71e   : > { %8823 = vmatpush1.bf16.msra.mxu0 %v14074_v61  ;;  %8864 = vmatpush1.bf16.msra.mxu1 %v14077_v10  ;;  %v8902_v61 = vpack.c.bf16 %v8901_v30, %v8901_v30  ;;  %v14146_v10 = vld [vmem:[#allocation12 + $0xde0] ss:$16 sps:$4 sm:$0xff]   ;;  %v14211_v30 = vld [vmem:[#allocation12 + $0xeac] ss:$16 sps:$4 sm:$0xff]  }
 0x71f   : > { %8824 = vmatprep.subr.bf16.mxu0 %v14082_v32  ;;  %8865 = vmatprep.subr.bf16.mxu1 %v14085_v58  ;;  %v14149_v32 = vld [vmem:[#allocation12 + $0xde8] ss:$16 sps:$4 sm:$0xff]   ;;  %v14154_v58 = vld [vmem:[#allocation12 + $0xdc4] ss:$16 sps:$4 sm:$0xff]  }
 0x722   : > { %8825 = vmatpush1.bf16.msra.mxu0 %v14080_v34  ;;  %8866 = vmatpush1.bf16.msra.mxu1 %v14083_v16  ;;  %v14157_v34 = vld [vmem:[#allocation12 + $0xdcc] ss:$16 sps:$4 sm:$0xff]  }
 0x723   : > { %8826 = vmatprep.subr.bf16.mxu0 %v14088_v46  ;;  %8867 = vmatprep.subr.bf16.mxu1 %v14091_v59 }
 0x726   : > { %8827 = vmatpush1.bf16.msra.mxu0 %v14086_v56  ;;  %8868 = vmatpush1.bf16.msra.mxu1 %v14089_v11  ;;  %v14152_v11 = vld [vmem:[#allocation12 + $0xdc0] ss:$16 sps:$4 sm:$0xff]  }
 0x727   : > { %8828 = vmatprep.subr.bf16.mxu0 %v14094_v50  ;;  %8869 = vmatprep.subr.bf16.mxu1 %v14097_v9  ;;  %v14155_v50 = vld [vmem:[#allocation12 + $0xdc8] ss:$16 sps:$4 sm:$0xff]  }
 0x72a   : > { %8829 = vmatpush1.bf16.msra.mxu0 %v14092_v2  ;;  %8870 = vmatpush1.bf16.msra.mxu1 %v14095_v15  ;;  %v14160_v15 = vld [vmem:[#allocation12 + $0xda4] ss:$16 sps:$4 sm:$0xff]  }
 0x72b   : > { %9096 = vmatprep.subr.bf16.mxu0 %v14100_v42  ;;  %9137 = vmatprep.subr.bf16.mxu1 %v14103_v53 }
 0x72d   : > { %v7161_v22 = vpop.f32.mrf.mxu0  ;;  %v7202_v52 = vpop.f32.mrf.mxu1  ;;  %8847 = vmatmul.mubr.bf16.vlgmr.msra.gmra.mxu0 %v8620_v18  ;;  %8888 = vmatmul.mubr.bf16.vlgmr.msra.gmra.mxu1 %v8620_v18 }
 0x72e   : > { %v16720_v40 = vadd.f32 %v7161_v22, %v16706_v31  ;;  %v16723_v21 = vadd.f32 %v7202_v52, %v16709_v55  ;;  %9097 = vmatpush1.bf16.msra.mxu0 %v14098_v62  ;;  %9138 = vmatpush1.bf16.msra.mxu1 %v14101_v4  ;;  %v14119_v31 = vld [vmem:[#allocation12 + $0xc88] ss:$16 sps:$4 sm:$0xff]   ;;  %v14124_v55 = vld [vmem:[#allocation12 + $0xc64] ss:$16 sps:$4 sm:$0xff]   ;;  %v14158_v4 = vld [vmem:[#allocation12 + $0xda0] ss:$16 sps:$4 sm:$0xff]  }
 0x72f   : > { %v7163_v0 = vpop.f32.mrf.mxu0  ;;  %v7204_v44 = vpop.f32.mrf.mxu1  ;;  %9098 = vmatprep.subr.bf16.mxu0 %v14106_v5  ;;  %9139 = vmatprep.subr.bf16.mxu1 %v14109_v17  ;;  %v14161_v5 = vld [vmem:[#allocation12 + $0xda8] ss:$16 sps:$4 sm:$0xff]   ;;  %v14166_v52 = vld [vmem:[#allocation12 + $0xd84] ss:$16 sps:$4 sm:$0xff]  }
 0x730   : > { %v16726_v6 = vadd.f32 %v7163_v0, %v16712_v1  ;;  %v16729_v57 = vadd.f32 %v7204_v44, %v16715_v12  ;;  %9128 = vmatprep.mubr.bf16.mxu0 %v14644_v8  ;;  %9169 = vmatprep.mubr.bf16.mxu1 %v14644_v8  ;;  %v14133_v1 = vld [vmem:[#allocation12 + $0xc4c] ss:$16 sps:$4 sm:$0xff]   ;;  %v14128_v12 = vld [vmem:[#allocation12 + $0xc40] ss:$16 sps:$4 sm:$0xff]  }
 0x731   : > { %v7165_v51 = vpop.f32.mrf.mxu0  ;;  %v7206_v27 = vpop.f32.mrf.mxu1  ;;  %v14175_v0 = vld [vmem:[#allocation12 + $0xd6c] ss:$16 sps:$4 sm:$0xff]   ;;  %v14170_v44 = vld [vmem:[#allocation12 + $0xd60] ss:$16 sps:$4 sm:$0xff]  }
 0x732   : > { %9099 = vmatpush1.bf16.msra.mxu0 %v14104_v41  ;;  %9140 = vmatpush1.bf16.msra.mxu1 %v14107_v24  ;;  %v14167_v41 = vld [vmem:[#allocation12 + $0xd88] ss:$16 sps:$4 sm:$0xff]   ;;  %v14172_v24 = vld [vmem:[#allocation12 + $0xd64] ss:$16 sps:$4 sm:$0xff]  }
 0x733   : > { %v7166_v19 = vpop.f32.mrf.mxu0  ;;  %v7207_v13 = vpop.f32.mrf.mxu1  ;;  %9100 = vmatprep.subr.bf16.mxu0 %v14112_v23  ;;  %9141 = vmatprep.subr.bf16.mxu1 %v14115_v36  ;;  %v14173_v23 = vld [vmem:[#allocation12 + $0xd68] ss:$16 sps:$4 sm:$0xff]   ;;  %v14178_v36 = vld [vmem:[#allocation12 + $0xd44] ss:$16 sps:$4 sm:$0xff]  }
 0x734   : > { %v14179_v51 = vld [vmem:[#allocation12 + $0xd48] ss:$16 sps:$4 sm:$0xff]   ;;  %v14184_v27 = vld [vmem:[#allocation12 + $0xd24] ss:$16 sps:$4 sm:$0xff]  }
 0x735   : > { %v14185_v19 = vld [vmem:[#allocation12 + $0xd28] ss:$16 sps:$4 sm:$0xff]   ;;  %v14190_v13 = vld [vmem:[#allocation12 + $0xd04] ss:$16 sps:$4 sm:$0xff]  }
 0x736   : > { %9101 = vmatpush1.bf16.msra.mxu0 %v14110_v28  ;;  %9142 = vmatpush1.bf16.msra.mxu1 %v14113_v54  ;;  %v14187_v28 = vld [vmem:[#allocation12 + $0xd2c] ss:$16 sps:$4 sm:$0xff]   ;;  %v14182_v54 = vld [vmem:[#allocation12 + $0xd20] ss:$16 sps:$4 sm:$0xff]  }
 0x737   : > { %9102 = vmatprep.subr.bf16.mxu0 %v14118_v33  ;;  %9143 = vmatprep.subr.bf16.mxu1 %v14121_v7  ;;  %v14193_v33 = vld [vmem:[#allocation12 + $0xd0c] ss:$16 sps:$4 sm:$0xff]   ;;  %v14188_v7 = vld [vmem:[#allocation12 + $0xd00] ss:$16 sps:$4 sm:$0xff]  }
 0x73a   : > { %9103 = vmatpush1.bf16.msra.mxu0 %v14116_v45  ;;  %9144 = vmatpush1.bf16.msra.mxu1 %v14119_v31  ;;  %v14191_v45 = vld [vmem:[#allocation12 + $0xd08] ss:$16 sps:$4 sm:$0xff]   ;;  %v9182_v31 = vld [vmem:[#allocation3 + $0xd] sm:$0x1] }
 0x73b   : > { %9104 = vmatprep.subr.bf16.mxu0 %v14124_v55  ;;  %9145 = vmatprep.subr.bf16.mxu1 %v14127_v63  ;;  %v14196_v55 = vld [vmem:[#allocation12 + $0xee4] ss:$16 sps:$4 sm:$0xff]   ;;  %v14199_v63 = vld [vmem:[#allocation12 + $0xeec] ss:$16 sps:$4 sm:$0xff]  }
 0x73e   : > { %9105 = vmatpush1.bf16.msra.mxu0 %v14122_v3  ;;  %9146 = vmatpush1.bf16.msra.mxu1 %v14125_v29  ;;  %v9183_v3 = vpack.c.bf16 %v9182_v31, %v9182_v31  ;;  %v14194_v29 = vld [vmem:[#allocation12 + $0xee0] ss:$16 sps:$4 sm:$0xff]   ;;  %v14259_v31 = vld [vmem:[#allocation12 + $0xfac] ss:$16 sps:$4 sm:$0xff]  }
 0x73f   : > { %9106 = vmatprep.subr.bf16.mxu0 %v14130_v49  ;;  %9147 = vmatprep.subr.bf16.mxu1 %v14133_v1  ;;  %v14197_v49 = vld [vmem:[#allocation12 + $0xee8] ss:$16 sps:$4 sm:$0xff]   ;;  %v14202_v1 = vld [vmem:[#allocation12 + $0xec4] ss:$16 sps:$4 sm:$0xff]  }
 0x742   : > { %9107 = vmatpush1.bf16.msra.mxu0 %v14128_v12  ;;  %9148 = vmatpush1.bf16.msra.mxu1 %v14131_v20  ;;  %v14205_v12 = vld [vmem:[#allocation12 + $0xecc] ss:$16 sps:$4 sm:$0xff]  }
 0x743   : > { %9108 = vmatprep.subr.bf16.mxu0 %v14136_v48  ;;  %9149 = vmatprep.subr.bf16.mxu1 %v14139_v43 }
 0x746   : > { %9109 = vmatpush1.bf16.msra.mxu0 %v14134_v25  ;;  %9150 = vmatpush1.bf16.msra.mxu1 %v14137_v39  ;;  %v14200_v39 = vld [vmem:[#allocation12 + $0xec0] ss:$16 sps:$4 sm:$0xff]  }
 0x747   : > { %9110 = vmatprep.subr.bf16.mxu0 %v14142_v14  ;;  %9151 = vmatprep.subr.bf16.mxu1 %v14145_v38  ;;  %v14203_v14 = vld [vmem:[#allocation12 + $0xec8] ss:$16 sps:$4 sm:$0xff]  }
 0x74a   : > { %9111 = vmatpush1.bf16.msra.mxu0 %v14140_v35  ;;  %9152 = vmatpush1.bf16.msra.mxu1 %v14143_v37  ;;  %v14208_v37 = vld [vmem:[#allocation12 + $0xea4] ss:$16 sps:$4 sm:$0xff]  }
 0x74b   : > { %9377 = vmatprep.subr.bf16.mxu0 %v14148_v47  ;;  %9418 = vmatprep.subr.bf16.mxu1 %v14151_v60 }
 0x74d   : > { %v7442_v16 = vpop.f32.mrf.mxu0  ;;  %v7483_v46 = vpop.f32.mrf.mxu1  ;;  %9129 = vmatmul.mubr.bf16.vlgmr.msra.gmra.mxu0 %v8902_v61  ;;  %9170 = vmatmul.mubr.bf16.vlgmr.msra.gmra.mxu1 %v8902_v61 }
 0x74e   : > { %v16734_v59 = vadd.f32 %v7442_v16, %v16720_v40  ;;  %v16737_v56 = vadd.f32 %v7483_v46, %v16723_v21  ;;  %9378 = vmatpush1.bf16.msra.mxu0 %v14146_v10  ;;  %9419 = vmatpush1.bf16.msra.mxu1 %v14149_v32  ;;  %v14169_v40 = vld [vmem:[#allocation12 + $0xd8c] ss:$16 sps:$4 sm:$0xff]   ;;  %v14164_v21 = vld [vmem:[#allocation12 + $0xd80] ss:$16 sps:$4 sm:$0xff]   ;;  %v14214_v46 = vld [vmem:[#allocation12 + $0xe84] ss:$16 sps:$4 sm:$0xff]  }
 0x74f   : > { %v7444_v9 = vpop.f32.mrf.mxu0  ;;  %v7485_v2 = vpop.f32.mrf.mxu1  ;;  %9379 = vmatprep.subr.bf16.mxu0 %v14154_v58  ;;  %9420 = vmatprep.subr.bf16.mxu1 %v14157_v34  ;;  %v14206_v32 = vld [vmem:[#allocation12 + $0xea0] ss:$16 sps:$4 sm:$0xff]   ;;  %v14209_v58 = vld [vmem:[#allocation12 + $0xea8] ss:$16 sps:$4 sm:$0xff]  }
 0x750   : > { %v16740_v42 = vadd.f32 %v7444_v9, %v16726_v6  ;;  %v16743_v53 = vadd.f32 %v7485_v2, %v16729_v57  ;;  %9409 = vmatprep.mubr.bf16.mxu0 %v14644_v8  ;;  %9450 = vmatprep.mubr.bf16.mxu1 %v14644_v8  ;;  %v14181_v6 = vld [vmem:[#allocation12 + $0xd4c] ss:$16 sps:$4 sm:$0xff]   ;;  %v14176_v57 = vld [vmem:[#allocation12 + $0xd40] ss:$16 sps:$4 sm:$0xff]  }
 0x751   : > { %v7446_v18 = vpop.f32.mrf.mxu0  ;;  %v7487_v62 = vpop.f32.mrf.mxu1  ;;  %v14223_v9 = vld [vmem:[#allocation12 + $0xe6c] ss:$16 sps:$4 sm:$0xff]   ;;  %v14218_v2 = vld [vmem:[#allocation12 + $0xe60] ss:$16 sps:$4 sm:$0xff]  }
 0x752   : > { %9380 = vmatpush1.bf16.msra.mxu0 %v14152_v11  ;;  %9421 = vmatpush1.bf16.msra.mxu1 %v14155_v50  ;;  %v14215_v11 = vld [vmem:[#allocation12 + $0xe88] ss:$16 sps:$4 sm:$0xff]   ;;  %v14220_v50 = vld [vmem:[#allocation12 + $0xe64] ss:$16 sps:$4 sm:$0xff]  }
 0x753   : > { %v7447_v17 = vpop.f32.mrf.mxu0  ;;  %v7488_v22 = vpop.f32.mrf.mxu1  ;;  %9381 = vmatprep.subr.bf16.mxu0 %v14160_v15  ;;  %9422 = vmatprep.subr.bf16.mxu1 %v14163_v26  ;;  %v14221_v15 = vld [vmem:[#allocation12 + $0xe68] ss:$16 sps:$4 sm:$0xff]   ;;  %v14226_v26 = vld [vmem:[#allocation12 + $0xe44] ss:$16 sps:$4 sm:$0xff]  }
 0x754   : > { %v14227_v18 = vld [vmem:[#allocation12 + $0xe48] ss:$16 sps:$4 sm:$0xff]   ;;  %v14232_v62 = vld [vmem:[#allocation12 + $0xe24] ss:$16 sps:$4 sm:$0xff]  }
 0x755   : > { %v14233_v17 = vld [vmem:[#allocation12 + $0xe28] ss:$16 sps:$4 sm:$0xff]   ;;  %v14238_v22 = vld [vmem:[#allocation12 + $0xe04] ss:$16 sps:$4 sm:$0xff]  }
 0x756   : > { %9382 = vmatpush1.bf16.msra.mxu0 %v14158_v4  ;;  %9423 = vmatpush1.bf16.msra.mxu1 %v14161_v5  ;;  %v14235_v4 = vld [vmem:[#allocation12 + $0xe2c] ss:$16 sps:$4 sm:$0xff]   ;;  %v14230_v5 = vld [vmem:[#allocation12 + $0xe20] ss:$16 sps:$4 sm:$0xff]  }
 0x757   : > { %9383 = vmatprep.subr.bf16.mxu0 %v14166_v52  ;;  %9424 = vmatprep.subr.bf16.mxu1 %v14169_v40  ;;  %v14241_v52 = vld [vmem:[#allocation12 + $0xe0c] ss:$16 sps:$4 sm:$0xff]   ;;  %v14236_v40 = vld [vmem:[#allocation12 + $0xe00] ss:$16 sps:$4 sm:$0xff]  }
 0x75a   : > { %9384 = vmatpush1.bf16.msra.mxu0 %v14164_v21  ;;  %9425 = vmatpush1.bf16.msra.mxu1 %v14167_v41  ;;  %v14239_v21 = vld [vmem:[#allocation12 + $0xe08] ss:$16 sps:$4 sm:$0xff]   ;;  %v9463_v41 = vld [vmem:[#allocation3 + $0xe] sm:$0x1] }
 0x75b   : > { %9385 = vmatprep.subr.bf16.mxu0 %v14172_v24  ;;  %9426 = vmatprep.subr.bf16.mxu1 %v14175_v0  ;;  %v14244_v24 = vld [vmem:[#allocation12 + $0xfe4] ss:$16 sps:$4 sm:$0xff]   ;;  %v14247_v0 = vld [vmem:[#allocation12 + $0xfec] ss:$16 sps:$4 sm:$0xff]  }
 0x75e   : > { %9386 = vmatpush1.bf16.msra.mxu0 %v14170_v44  ;;  %9427 = vmatpush1.bf16.msra.mxu1 %v14173_v23  ;;  %v9464_v44 = vpack.c.bf16 %v9463_v41, %v9463_v41  ;;  %v14242_v23 = vld [vmem:[#allocation12 + $0xfe0] ss:$16 sps:$4 sm:$0xff]  }
 0x75f   : > { %9387 = vmatprep.subr.bf16.mxu0 %v14178_v36  ;;  %9428 = vmatprep.subr.bf16.mxu1 %v14181_v6  ;;  %v14245_v36 = vld [vmem:[#allocation12 + $0xfe8] ss:$16 sps:$4 sm:$0xff]   ;;  %v14250_v6 = vld [vmem:[#allocation12 + $0xfc4] ss:$16 sps:$4 sm:$0xff]  }
 0x762   : > { %9388 = vmatpush1.bf16.msra.mxu0 %v14176_v57  ;;  %9429 = vmatpush1.bf16.msra.mxu1 %v14179_v51  ;;  %v14253_v57 = vld [vmem:[#allocation12 + $0xfcc] ss:$16 sps:$4 sm:$0xff]  }
 0x763   : > { %9389 = vmatprep.subr.bf16.mxu0 %v14184_v27  ;;  %9430 = vmatprep.subr.bf16.mxu1 %v14187_v28 }
 0x766   : > { %9390 = vmatpush1.bf16.msra.mxu0 %v14182_v54  ;;  %9431 = vmatpush1.bf16.msra.mxu1 %v14185_v19  ;;  %v14248_v19 = vld [vmem:[#allocation12 + $0xfc0] ss:$16 sps:$4 sm:$0xff]  }
 0x767   : > { %9391 = vmatprep.subr.bf16.mxu0 %v14190_v13  ;;  %9432 = vmatprep.subr.bf16.mxu1 %v14193_v33  ;;  %v14251_v13 = vld [vmem:[#allocation12 + $0xfc8] ss:$16 sps:$4 sm:$0xff]  }
 0x76a   : > { %9392 = vmatpush1.bf16.msra.mxu0 %v14188_v7  ;;  %9433 = vmatpush1.bf16.msra.mxu1 %v14191_v45  ;;  %v14256_v45 = vld [vmem:[#allocation12 + $0xfa4] ss:$16 sps:$4 sm:$0xff]  }
 0x76b   : > { %9658 = vmatprep.subr.bf16.mxu0 %v14196_v55  ;;  %9699 = vmatprep.subr.bf16.mxu1 %v14199_v63 }
 0x76d   : > { %v7723_v20 = vpop.f32.mrf.mxu0  ;;  %v7764_v48 = vpop.f32.mrf.mxu1  ;;  %9410 = vmatmul.mubr.bf16.vlgmr.msra.gmra.mxu0 %v9183_v3  ;;  %9451 = vmatmul.mubr.bf16.vlgmr.msra.gmra.mxu1 %v9183_v3 }
 0x76e   : > { %v16748_v43 = vadd.f32 %v7723_v20, %v16734_v59  ;;  %v16751_v25 = vadd.f32 %v7764_v48, %v16737_v56  ;;  %9659 = vmatpush1.bf16.msra.mxu0 %v14194_v29  ;;  %9700 = vmatpush1.bf16.msra.mxu1 %v14197_v49  ;;  %v14217_v59 = vld [vmem:[#allocation12 + $0xe8c] ss:$16 sps:$4 sm:$0xff]   ;;  %v14212_v56 = vld [vmem:[#allocation12 + $0xe80] ss:$16 sps:$4 sm:$0xff]   ;;  %v14262_v48 = vld [vmem:[#allocation12 + $0xf84] ss:$16 sps:$4 sm:$0xff]  }
 0x76f   : > { %v7725_v38 = vpop.f32.mrf.mxu0  ;;  %v7766_v35 = vpop.f32.mrf.mxu1  ;;  %9660 = vmatprep.subr.bf16.mxu0 %v14202_v1  ;;  %9701 = vmatprep.subr.bf16.mxu1 %v14205_v12  ;;  %v14254_v49 = vld [vmem:[#allocation12 + $0xfa0] ss:$16 sps:$4 sm:$0xff]   ;;  %v14257_v1 = vld [vmem:[#allocation12 + $0xfa8] ss:$16 sps:$4 sm:$0xff]  }
 0x770   : > { %v16754_v47 = vadd.f32 %v7725_v38, %v16740_v42  ;;  %v16757_v60 = vadd.f32 %v7766_v35, %v16743_v53  ;;  %9690 = vmatprep.mubr.bf16.mxu0 %v14644_v8  ;;  %9731 = vmatprep.mubr.bf16.mxu1 %v14644_v8  ;;  %v14229_v42 = vld [vmem:[#allocation12 + $0xe4c] ss:$16 sps:$4 sm:$0xff]   ;;  %v14224_v53 = vld [vmem:[#allocation12 + $0xe40] ss:$16 sps:$4 sm:$0xff]   ;;  %v14269_v35 = vld [vmem:[#allocation12 + $0xf68] ss:$16 sps:$4 sm:$0xff]  }
 0x771   : > { %v7727_v61 = vpop.f32.mrf.mxu0  ;;  %v7768_v10 = vpop.f32.mrf.mxu1  ;;  %v14266_v38 = vld [vmem:[#allocation12 + $0xf60] ss:$16 sps:$4 sm:$0xff]  }
 0x772   : > { %9661 = vmatpush1.bf16.msra.mxu0 %v14200_v39  ;;  %9702 = vmatpush1.bf16.msra.mxu1 %v14203_v14  ;;  %v14263_v39 = vld [vmem:[#allocation12 + $0xf88] ss:$16 sps:$4 sm:$0xff]   ;;  %v14268_v14 = vld [vmem:[#allocation12 + $0xf64] ss:$16 sps:$4 sm:$0xff]   ;;  %v14283_v10 = vld [vmem:[#allocation12 + $0xf2c] ss:$16 sps:$4 sm:$0xff]  }
 0x773   : > { %v7728_v34 = vpop.f32.mrf.mxu0  ;;  %v7769_v16 = vpop.f32.mrf.mxu1  ;;  %9662 = vmatprep.subr.bf16.mxu0 %v14208_v37  ;;  %9703 = vmatprep.subr.bf16.mxu1 %v14211_v30  ;;  %v14274_v37 = vld [vmem:[#allocation12 + $0xf44] ss:$16 sps:$4 sm:$0xff]   ;;  %v14277_v30 = vld [vmem:[#allocation12 + $0xf4c] ss:$16 sps:$4 sm:$0xff]  }
 0x774   : > { %v14280_v61 = vld [vmem:[#allocation12 + $0xf24] ss:$16 sps:$4 sm:$0xff]   ;;  %v14289_v16 = vld [vmem:[#allocation12 + $0xf0c] ss:$16 sps:$4 sm:$0xff]  }
 0x775   : > { %v14286_v34 = vld [vmem:[#allocation12 + $0xf04] ss:$16 sps:$4 sm:$0xff]  }
 0x776   : > { %9663 = vmatpush1.bf16.msra.mxu0 %v14206_v32  ;;  %9704 = vmatpush1.bf16.msra.mxu1 %v14209_v58  ;;  %v14278_v32 = vld [vmem:[#allocation12 + $0xf20] ss:$16 sps:$4 sm:$0xff]   ;;  %v14281_v58 = vld [vmem:[#allocation12 + $0xf28] ss:$16 sps:$4 sm:$0xff]  }
 0x777   : > { %9664 = vmatprep.subr.bf16.mxu0 %v14214_v46  ;;  %9705 = vmatprep.subr.bf16.mxu1 %v14217_v59  ;;  %v14284_v46 = vld [vmem:[#allocation12 + $0xf00] ss:$16 sps:$4 sm:$0xff]   ;;  %v14287_v59 = vld [vmem:[#allocation12 + $0xf08] ss:$16 sps:$4 sm:$0xff]  }
 0x77a   : > { %9665 = vmatpush1.bf16.msra.mxu0 %v14212_v56  ;;  %9706 = vmatpush1.bf16.msra.mxu1 %v14215_v11  ;;  %v9744_v56 = vld [vmem:[#allocation3 + $0xf] sm:$0x1] }
 0x77b   : > { %9666 = vmatprep.subr.bf16.mxu0 %v14220_v50  ;;  %9707 = vmatprep.subr.bf16.mxu1 %v14223_v9  ;;  %v9745_v11 = vpack.c.bf16 %v9744_v56, %v9744_v56 }
 0x77e   : > { %9667 = vmatpush1.bf16.msra.mxu0 %v14218_v2  ;;  %9708 = vmatpush1.bf16.msra.mxu1 %v14221_v15 }
 0x77f   : > { %9668 = vmatprep.subr.bf16.mxu0 %v14226_v26  ;;  %9709 = vmatprep.subr.bf16.mxu1 %v14229_v42 }
 0x782   : > { %9669 = vmatpush1.bf16.msra.mxu0 %v14224_v53  ;;  %9710 = vmatpush1.bf16.msra.mxu1 %v14227_v18 }
 0x783   : > { %9670 = vmatprep.subr.bf16.mxu0 %v14232_v62  ;;  %9711 = vmatprep.subr.bf16.mxu1 %v14235_v4 }
 0x786   : > { %9671 = vmatpush1.bf16.msra.mxu0 %v14230_v5  ;;  %9712 = vmatpush1.bf16.msra.mxu1 %v14233_v17 }
 0x787   : > { %9672 = vmatprep.subr.bf16.mxu0 %v14238_v22  ;;  %9713 = vmatprep.subr.bf16.mxu1 %v14241_v52 }
 0x78a   : > { %9673 = vmatpush1.bf16.msra.mxu0 %v14236_v40  ;;  %9714 = vmatpush1.bf16.msra.mxu1 %v14239_v21 }
 0x78b   : > { %9939 = vmatprep.subr.bf16.mxu0 %v14244_v24  ;;  %9980 = vmatprep.subr.bf16.mxu1 %v14247_v0 }
 0x78d   : > { %v8005_v51 = vpop.f32.mrf.mxu0  ;;  %v8046_v27 = vpop.f32.mrf.mxu1  ;;  %9691 = vmatmul.mubr.bf16.vlgmr.msra.gmra.mxu0 %v9464_v44  ;;  %9732 = vmatmul.mubr.bf16.vlgmr.msra.gmra.mxu1 %v9464_v44 }
 0x78e   : > { %v16762_v28 = vadd.f32 %v8005_v51, %v16748_v43  ;;  %v16765_v54 = vadd.f32 %v8046_v27, %v16751_v25  ;;  %9940 = vmatpush1.bf16.msra.mxu0 %v14242_v23  ;;  %9981 = vmatpush1.bf16.msra.mxu1 %v14245_v36  ;;  %v14265_v43 = vld [vmem:[#allocation12 + $0xf8c] ss:$16 sps:$4 sm:$0xff]   ;;  %v14260_v25 = vld [vmem:[#allocation12 + $0xf80] ss:$16 sps:$4 sm:$0xff]  }
 0x78f   : > { %v8007_v33 = vpop.f32.mrf.mxu0  ;;  %v8048_v7 = vpop.f32.mrf.mxu1  ;;  %9941 = vmatprep.subr.bf16.mxu0 %v14250_v6  ;;  %9982 = vmatprep.subr.bf16.mxu1 %v14253_v57  ;;  %v14290_v51 = vld [vmem:[#allocation15 + $0x78] sm:$0xff]  }
 0x790   : > { %v16768_v55 = vadd.f32 %v8007_v33, %v16754_v47  ;;  %v16771_v63 = vadd.f32 %v8048_v7, %v16757_v60  ;;  %9971 = vmatprep.mubr.bf16.mxu0 %v14644_v8  ;;  %10012 = vmatprep.mubr.bf16.mxu1 %v14644_v8  ;;  %v14271_v8 = vld [vmem:[#allocation12 + $0xf6c] ss:$16 sps:$4 sm:$0xff]   ;;  %v14272_v47 = vld [vmem:[#allocation12 + $0xf40] ss:$16 sps:$4 sm:$0xff]   ;;  %v14275_v60 = vld [vmem:[#allocation12 + $0xf48] ss:$16 sps:$4 sm:$0xff]  }
 0x791   : > { %v8009_v3 = vpop.f32.mrf.mxu0  ;;  %v8050_v29 = vpop.f32.mrf.mxu1  ;;  %v14291_v27 = vld [vmem:[#allocation15 + $0xf8] sm:$0xff]   ;;  %v14296_v33 = vld [vmem:[#allocation15 + $0x30] sm:$0xff]  }
 0x792   : > { %9942 = vmatpush1.bf16.msra.mxu0 %v14248_v19  ;;  %9983 = vmatpush1.bf16.msra.mxu1 %v14251_v13  ;;  %v14294_v19 = vld [vmem:[#allocation15 + $0x70] sm:$0xff]   ;;  %v14302_v3 = vld [vmem:[#allocation15 + $0x60] sm:$0xff]  }
 0x793   : > { %v8010_v12 = vpop.f32.mrf.mxu0  ;;  %v8051_v20 = vpop.f32.mrf.mxu1  ;;  %9943 = vmatprep.subr.bf16.mxu0 %v14256_v45  ;;  %9984 = vmatprep.subr.bf16.mxu1 %v14259_v31  ;;  %v14295_v13 = vld [vmem:[#allocation15 + $0xf0] sm:$0xff]   ;;  %v14298_v45 = vld [vmem:[#allocation15 + $0x68] sm:$0xff]   ;;  %v14303_v29 = vld [vmem:[#allocation15 + $0xe0] sm:$0xff]  }
 0x794   : > { %v14297_v7 = vld [vmem:[#allocation15 + $0xb0] sm:$0xff]   ;;  %v14299_v31 = vld [vmem:[#allocation15 + $0xe8] sm:$0xff]   ;;  %v14306_v12 = vld [vmem:[#allocation15 + $0x58] sm:$0xff]  }
 0x795   : > { %v14307_v20 = vld [vmem:[#allocation15 + $0xd8] sm:$0xff]  }
 0x796   : > { %9944 = vmatpush1.bf16.msra.mxu0 %v14254_v49  ;;  %9985 = vmatpush1.bf16.msra.mxu1 %v14257_v1  ;;  %v14304_v49 = vld [vmem:[#allocation15 + $0x20] sm:$0xff]  }
 0x797   : > { %9945 = vmatprep.subr.bf16.mxu0 %v14262_v48  ;;  %9986 = vmatprep.subr.bf16.mxu1 %v14265_v43  ;;  %v14305_v1 = vld [vmem:[#allocation15 + $0xa0] sm:$0xff]   ;;  %v14308_v48 = vld [vmem:[#allocation15 + $0x18] sm:$0xff]  }
 0x798   : > { %v14309_v43 = vld [vmem:[#allocation15 + $0x98] sm:$0xff]  }
 0x79a   : > { %9946 = vmatpush1.bf16.msra.mxu0 %v14260_v25  ;;  %9987 = vmatpush1.bf16.msra.mxu1 %v14263_v39  ;;  %v14310_v25 = vld [vmem:[#allocation15 + $0x50] sm:$0xff]  }
 0x79b   : > { %9947 = vmatprep.subr.bf16.mxu0 %v14268_v14  ;;  %9988 = vmatprep.subr.bf16.mxu1 %v14271_v8  ;;  %v14311_v39 = vld [vmem:[#allocation15 + $0xd0] sm:$0xff]  }
 0x79c   : > { %v14312_v14 = vld [vmem:[#allocation15 + $0x10] sm:$0xff]  }
 0x79d   : > { %v14313_v8 = vld [vmem:[#allocation15 + $0x90] sm:$0xff]  }
 0x79e   : > { %9948 = vmatpush1.bf16.msra.mxu0 %v14266_v38  ;;  %9989 = vmatpush1.bf16.msra.mxu1 %v14269_v35 }
 0x79f   : > { %9949 = vmatprep.subr.bf16.mxu0 %v14274_v37  ;;  %9990 = vmatprep.subr.bf16.mxu1 %v14277_v30 }
 0x7a2   : > { %9950 = vmatpush1.bf16.msra.mxu0 %v14272_v47  ;;  %9991 = vmatpush1.bf16.msra.mxu1 %v14275_v60 }
 0x7a3   : > { %9951 = vmatprep.subr.bf16.mxu0 %v14280_v61  ;;  %9992 = vmatprep.subr.bf16.mxu1 %v14283_v10  ;;  %v14314_v61 = vld [vmem:[#allocation15 + $0x48] sm:$0xff]  }
 0x7a4   : > { %v14315_v10 = vld [vmem:[#allocation15 + $0xc8] sm:$0xff]  }
 0x7a6   : > { %9952 = vmatpush1.bf16.msra.mxu0 %v14278_v32  ;;  %9993 = vmatpush1.bf16.msra.mxu1 %v14281_v58 }
 0x7a7   : > { %9953 = vmatprep.subr.bf16.mxu0 %v14286_v34  ;;  %9994 = vmatprep.subr.bf16.mxu1 %v14289_v16  ;;  %v14316_v34 = vld [vmem:[#allocation15 + $0x8] sm:$0xff]  }
 0x7a8   : > { %v14317_v16 = vld [vmem:[#allocation15 + $0x88] sm:$0xff]  }
 0x7aa   : > { %9954 = vmatpush1.bf16.msra.mxu0 %v14284_v46  ;;  %9995 = vmatpush1.bf16.msra.mxu1 %v14287_v59 }
 0x7ab   : > { %11930 = vmatprep.subr.bf16.mxu0 %v14290_v51  ;;  %11952 = vmatprep.subr.bf16.mxu1 %v14291_v27 }
 0x7ad   : > { %v8286_v50 = vpop.f32.mrf.mxu0  ;;  %v8327_v9 = vpop.f32.mrf.mxu1  ;;  %9972 = vmatmul.mubr.bf16.vlgmr.msra.gmra.mxu0 %v9745_v11  ;;  %10013 = vmatmul.mubr.bf16.vlgmr.msra.gmra.mxu1 %v9745_v11 }
 0x7ae   : > { %v8334_v2 = vadd.f32 %v8286_v50, %v16762_v28  ;;  %v8336_v15 = vadd.f32 %v8327_v9, %v16765_v54  ;;  %v14292_v28 = vld [vmem:[#allocation15 + $0x38] sm:$0xff]   ;;  %v14318_v50 = vld [vmem:[#allocation15 + $0x40] sm:$0xff]  }
 0x7af   : > { %v8288_v26 = vpop.f32.mrf.mxu0  ;;  %v8329_v42 = vpop.f32.mrf.mxu1  ;;  %v14293_v54 = vld [vmem:[#allocation15 + $0xb8] sm:$0xff]   ;;  %11931 = vmatpush3.bf16.msra.mxu0 %v14292_v28  ;;  %v14319_v9 = vld [vmem:[#allocation15 + $0xc0] sm:$0xff]  }
 0x7b0   : > { %v8335_v53 = vadd.f32 %v8288_v26, %v16768_v55  ;;  %v8337_v18 = vadd.f32 %v8329_v42, %v16771_v63  ;;  %11953 = vmatpush3.bf16.msra.mxu1 %v14293_v54  ;;  %11932 = vmatprep.subr.bf16.mxu0 %v14294_v19  ;;  %v14300_v55 = vld [vmem:[#allocation15 + $0x28] sm:$0xff]  }
 0x7b1   : > { %v8290_v62 = vpop.f32.mrf.mxu0  ;;  %v8331_v4 = vpop.f32.mrf.mxu1  ;;  %11954 = vmatprep.subr.bf16.mxu1 %v14295_v13  ;;  %v14301_v63 = vld [vmem:[#allocation15 + $0xa8] sm:$0xff]  }
 0x7b3   : > { %v8291_v5 = vpop.f32.mrf.mxu0  ;;  %v8332_v17 = vpop.f32.mrf.mxu1  ;;  %11933 = vmatpush3.bf16.msra.mxu0 %v14296_v33 }
 0x7b4   : > { %11955 = vmatpush3.bf16.msra.mxu1 %v14297_v7  ;;  %11934 = vmatprep.subr.bf16.mxu0 %v14298_v45  ;;  %v10027_v45 = vlaneseq }
 0x7b5   : > { %11956 = vmatprep.subr.bf16.mxu1 %v14299_v31 }
 0x7b6   : > { %v10028_v31 = vshrl.u32 %v10027_v45, 7 }
 0x7b7   : > { %11935 = vmatpush3.bf16.msra.mxu0 %v14300_v55 }
 0x7b8   : > { %11957 = vmatpush3.bf16.msra.mxu1 %v14301_v63  ;;  %11936 = vmatprep.subr.bf16.mxu0 %v14302_v3  ;;  %v10029_v55 = vsub.s32 0, %v10028_v31  ;;  %v10037_v63 = vsub.s32 2, %v10028_v31  ;;  %v10025_v3 = vld [vmem:[#allocation13] sm:$0xf] }
 0x7b9   : > { %11958 = vmatprep.subr.bf16.mxu1 %v14303_v29  ;;  %v10033_v29 = vsub.s32 1, %v10028_v31 }
 0x7bb   : > { %11937 = vmatpush3.bf16.msra.mxu0 %v14304_v49  ;;  %v10041_v49 = vsub.s32 3, %v10028_v31 }
 0x7bc   : > { %11959 = vmatpush3.bf16.msra.mxu1 %v14305_v1  ;;  %11938 = vmatprep.subr.bf16.mxu0 %v14306_v12 }
 0x7bd   : > { %11960 = vmatprep.subr.bf16.mxu1 %v14307_v20  ;;  %v10030_v20 = vrot.slane %v10025_v3, %v10029_v55 }
 0x7bf   : > { %11939 = vmatpush3.bf16.msra.mxu0 %v14308_v48  ;;  %v10038_v48 = vrot.slane %v10025_v3, %v10037_v63 }
 0x7c0   : > { %11961 = vmatpush3.bf16.msra.mxu1 %v14309_v43  ;;  %11940 = vmatprep.subr.bf16.mxu0 %v14310_v25 }
 0x7c1   : > { %11962 = vmatprep.subr.bf16.mxu1 %v14311_v39 }
 0x7c3   : > { %11941 = vmatpush3.bf16.msra.mxu0 %v14312_v14 }
 0x7c4   : > { %11963 = vmatpush3.bf16.msra.mxu1 %v14313_v8  ;;  %11942 = vmatprep.subr.bf16.mxu0 %v14314_v61 }
 0x7c5   : > { %11964 = vmatprep.subr.bf16.mxu1 %v14315_v10 }
 0x7c7   : > { %11943 = vmatpush3.bf16.msra.mxu0 %v14316_v34 }
 0x7c8   : > { %11965 = vmatpush3.bf16.msra.mxu1 %v14317_v16  ;;  %11944 = vmatprep.subr.bf16.mxu0 %v14318_v50 }
 0x7c9   : > { %11966 = vmatprep.subr.bf16.mxu1 %v14319_v9 }
 0x7cd   : > { %v8567_v22 = vpop.f32.mrf.mxu0  ;;  %v8608_v52 = vpop.f32.mrf.mxu1 }
 0x7ce   : > { %v8615_v40 = vadd.f32 %v8567_v22, %v8334_v2  ;;  %v8617_v21 = vadd.f32 %v8608_v52, %v8336_v15  ;;  %v14320_v2 = vld [vmem:[#allocation15] sm:$0xff]  }
 0x7cf   : > { %v8569_v41 = vpop.f32.mrf.mxu0  ;;  %v8610_v24 = vpop.f32.mrf.mxu1  ;;  %v14321_v15 = vld [vmem:[#allocation15 + $0x80] sm:$0xff]   ;;  %11945 = vmatpush3.bf16.msra.mxu0 %v14320_v2 }
 0x7d0   : > { %v8616_v0 = vadd.f32 %v8569_v41, %v8335_v53  ;;  %v8618_v44 = vadd.f32 %v8610_v24, %v8337_v18  ;;  %11967 = vmatpush3.bf16.msra.mxu1 %v14321_v15 }
 0x7d1   : > { %v8571_v23 = vpop.f32.mrf.mxu0  ;;  %v8612_v36 = vpop.f32.mrf.mxu1 }
 0x7d3   : > { %v8572_v6 = vpop.f32.mrf.mxu0  ;;  %v8613_v57 = vpop.f32.mrf.mxu1 }
 0x7ed   : > { %v8848_v38 = vpop.f32.mrf.mxu0  ;;  %v8889_v35 = vpop.f32.mrf.mxu1 }
 0x7ee   : > { %v8896_v37 = vadd.f32 %v8848_v38, %v8615_v40  ;;  %v8898_v30 = vadd.f32 %v8889_v35, %v8617_v21  ;;  %v10034_v35 = vrot.slane %v10025_v3, %v10033_v29 }
 0x7ef   : > { %v8850_v47 = vpop.f32.mrf.mxu0  ;;  %v8891_v60 = vpop.f32.mrf.mxu1 }
 0x7f0   : > { %v8897_v32 = vadd.f32 %v8850_v47, %v8616_v0  ;;  %v8899_v58 = vadd.f32 %v8891_v60, %v8618_v44 }
 0x7f1   : > { %v8852_v46 = vpop.f32.mrf.mxu0  ;;  %v8893_v59 = vpop.f32.mrf.mxu1 }
 0x7f3   : > { %v8853_v56 = vpop.f32.mrf.mxu0  ;;  %v8894_v11 = vpop.f32.mrf.mxu1 }
 0x80d   : > { %v9130_v26 = vpop.f32.mrf.mxu0  ;;  %v9171_v42 = vpop.f32.mrf.mxu1 }
 0x80e   : > { %v9178_v53 = vadd.f32 %v9130_v26, %v8896_v37  ;;  %v9180_v18 = vadd.f32 %v9171_v42, %v8898_v30  ;;  %v10042_v37 = vrot.slane %v10025_v3, %v10041_v49 }
 0x80f   : > { %v9132_v62 = vpop.f32.mrf.mxu0  ;;  %v9173_v4 = vpop.f32.mrf.mxu1 }
 0x810   : > { %v9179_v5 = vadd.f32 %v9132_v62, %v8897_v32  ;;  %v9181_v17 = vadd.f32 %v9173_v4, %v8899_v58 }
 0x811   : > { %v9134_v22 = vpop.f32.mrf.mxu0  ;;  %v9175_v52 = vpop.f32.mrf.mxu1 }
 0x812   : > { %v10123_v52 = vld [vmem:[#allocation16] sm:$0x1] }
 0x813   : > { %v9135_v40 = vpop.f32.mrf.mxu0  ;;  %v9176_v21 = vpop.f32.mrf.mxu1 }
 0x82d   : > { %v9411_v41 = vpop.f32.mrf.mxu0  ;;  %v9452_v24 = vpop.f32.mrf.mxu1 }
 0x82e   : > { %v9459_v1 = vadd.f32 %v9411_v41, %v9178_v53  ;;  %v9461_v12 = vadd.f32 %v9452_v24, %v9180_v18 }
 0x82f   : > { %v9413_v0 = vpop.f32.mrf.mxu0  ;;  %v9454_v44 = vpop.f32.mrf.mxu1 }
 0x830   : > { %v9460_v43 = vadd.f32 %v9413_v0, %v9179_v5  ;;  %v9462_v25 = vadd.f32 %v9454_v44, %v9181_v17 }
 0x831   : > { %v9415_v23 = vpop.f32.mrf.mxu0  ;;  %v9456_v36 = vpop.f32.mrf.mxu1 }
 0x833   : > { %v9416_v6 = vpop.f32.mrf.mxu0  ;;  %v9457_v57 = vpop.f32.mrf.mxu1 }
 0x84d   : > { %v9692_v51 = vpop.f32.mrf.mxu0  ;;  %v9733_v27 = vpop.f32.mrf.mxu1 }
 0x84e   : > { %v9740_v39 = vadd.f32 %v9692_v51, %v9459_v1  ;;  %v9742_v14 = vadd.f32 %v9733_v27, %v9461_v12 }
 0x84f   : > { %v9694_v28 = vpop.f32.mrf.mxu0  ;;  %v9735_v54 = vpop.f32.mrf.mxu1 }
 0x850   : > { %v9741_v30 = vadd.f32 %v9694_v28, %v9460_v43  ;;  %v9743_v47 = vadd.f32 %v9735_v54, %v9462_v25 }
 0x851   : > { %v9696_v19 = vpop.f32.mrf.mxu0  ;;  %v9737_v13 = vpop.f32.mrf.mxu1 }
 0x853   : > { %v9697_v33 = vpop.f32.mrf.mxu0  ;;  %v9738_v7 = vpop.f32.mrf.mxu1 }
 0x86d   : > { %v9973_v8 = vpop.f32.mrf.mxu0  ;;  %v10014_v38 = vpop.f32.mrf.mxu1 }
 0x86e   : > { %v10021_v60 = vadd.f32 %v9973_v8, %v9740_v39  ;;  %v10023_v61 = vadd.f32 %v10014_v38, %v9742_v14 }
 0x86f   : > { %v9975_v10 = vpop.f32.mrf.mxu0  ;;  %v10016_v32 = vpop.f32.mrf.mxu1 }
 0x870   : > { %v10047_v58 = vadd.f32 %v10030_v20, %v10021_v60  ;;  %v10049_v34 = vadd.f32 %v10038_v48, %v10023_v61  ;;  %v10022_v16 = vadd.f32 %v9975_v10, %v9741_v30  ;;  %v10024_v46 = vadd.f32 %v10016_v32, %v9743_v47 }
 0x871   : > { %v9977_v59 = vpop.f32.mrf.mxu0  ;;  %v10018_v56 = vpop.f32.mrf.mxu1 }
 0x872   : > { %v10048_v11 = vadd.f32 %v10034_v35, %v10022_v16  ;;  %v10050_v50 = vadd.f32 %v10042_v37, %v10024_v46  ;;  %v10051_v9 = vmax.f32 %v10047_v58, 0.0  ;;  %v10053_v2 = vmax.f32 %v10049_v34, 0.0 }
 0x873   : > { %v9978_v15 = vpop.f32.mrf.mxu0  ;;  %v10019_v26 = vpop.f32.mrf.mxu1 }
 0x874   : > { %v10052_v42 = vmax.f32 %v10048_v11, 0.0  ;;  %v10054_v53 = vmax.f32 %v10050_v50, 0.0  ;;  %v10055_v4 = vpack.c.bf16 %v10051_v9, %v10051_v9  ;;  %v10057_v5 = vpack.c.bf16 %v10053_v2, %v10053_v2 }
 0x876   : > { %v10056_v18 = vpack.c.bf16 %v10052_v42, %v10052_v42  ;;  %v10058_v62 = vpack.c.bf16 %v10054_v53, %v10054_v53 }
 0x878   : > { %10348 = vmatprep.mubr.bf16.mxu0 %v10056_v18  ;;  %10388 = vmatprep.mubr.bf16.mxu1 %v10058_v62 }
 0x879   : > { %10349 = vmatmul.mubr.bf16.vlgmr.msra.gmra.mxu0 %v10055_v4  ;;  %10389 = vmatmul.mubr.bf16.vlgmr.msra.gmra.mxu1 %v10057_v5 }
 0x939   : > { %v11946_v17 = vpop.f32.mrf.mxu0  ;;  %v11968_v22 = vpop.f32.mrf.mxu1 }
 0x93b   : > { %v11947_v40 = vpop.f32.mrf.mxu0  ;;  %v11969_v21 = vpop.f32.mrf.mxu1 }
 0x93c   : > { %v11948_v41 = vadd.f32 %v11947_v40, %v11946_v17  ;;  %v11970_v23 = vadd.f32 %v11969_v21, %v11968_v22 }
 0x93d   : > { %v11949_v24 = vpop.f32.mrf.mxu0  ;;  %v11971_v0 = vpop.f32.mrf.mxu1 }
 0x93e   : > { %v10351_v44 = vadd.f32 %v11948_v41, %v10123_v52 }
 0x93f   : > { %v11950_v36 = vpop.f32.mrf.mxu0  ;;  %v11972_v6 = vpop.f32.mrf.mxu1 }
 0x940   : > { %v10391_v57 = vadd.f32 %v11970_v23, %v10351_v44 }
 0x942   : > { %10396 = vst [vmem:[%s14871_s1] sm:$0x1] %v10391_v57 }
 0x943   : > { %14543 = shalt.err (!%p14540_p1)
}
 0x944   : > { %s14544_s26 = scalar_lea.hbm %s10408_s17, 16  ;;  %s14548_s29 = scalar_lea.hbm %s16825_s9, 32 }
 0x945   : > { %p14545_p2 = scmp.ne.s32.totalorder %s10408_s17, %s14544_s26  ;;  %p14549_p4 = scmp.lt.s32.totalorder %s10408_s17, %s16825_s9 }
 0x946   : > { %p14550_p7 = scmp.lt.s32.totalorder %s14548_s29, %s14544_s26 }
 0x947   : > { %p14546_p9 = pnand %p14545_p2, %p17033_p10 }
 0x948   : > { %p14551_p5 = por %p14550_p7, %p14549_p4 }
 0x949   : > { %p14547_p3 = pneg %p14546_p9 }
 0x94b   : > { %p14552_p6 = pnand %p14551_p5, %p14547_p3 }
 0x94d   : > { %14555 = shalt.err (!%p14552_p6)
}
 0x94e   : > { %13007 = dma.vmem_to_hbm [thread:$0]  (%p17033_p10), %s10411_s28, 16, %s10408_s17, %s10398_s2  }
 0x94f PF: > { %p13054_p13 = scmp.ge.s32.totalorder %s14618_s12, 2  ;;  %s10422_s22 = sand.u32 1, %s14606_s30  }
 0x950   : > { %p17034_p8 = scmp.ne.s32.totalorder %s16875_s20, 0  ;;  %s10423_s16 = scalar_lea.sflag [#allocation6], %s10422_s22 }
 0x952   : > { %p13035_p11 = pnand %p13054_p13, %p17034_p8 }
 0x954   : > { %p13036_p0 = pneg %p13035_p11 }
 0x956   : > { %14601 = dma.done.wait (%p13036_p0), %s10423_s16, 16  }
 0x957   : > { %14603 = vsyncadd (%p13036_p0), %s10423_s16, 4294967280  ;;  %p24_p12 = scmp.ge.s32.totalorder %s14721_s15, 4   ;;  %s17035_s30 = smov %s14610_s10 }
 0x958   : > { %s17036_s10 = smov %s14614_s11  ;;  %s17037_s11 = smov %s14732_s18 }
 0x959   : > { %s17038_s12 = smov %s14721_s15  ;;  %26 = sbr.rel (!%p24_p12) target bundleno = 11 (0xb), region = 240 }
 0x95e   :  { %10427 = vsyncpa [#allocation5], 1 }
 0x95f   :  { %10429 = vsyncpa [#allocation5 + $0x1], 1 }
 0x960   :  { %10430 = vsyncpa [#allocation8], 1 }
 0x961   :  { %10431 = vsyncpa [#allocation11], 1 }
 0x962   :  { %10432 = vsyncpa [#allocation14], 1 }
 0x963   :  { %10433 = vsyncpa [#allocation17], 1 }
 0x964   :  { %10434 = vsyncpa [#allocation6], 1 }
 0x965   :  { %10436 = vsyncpa [#allocation6 + $0x1], 1 }

</bundles_post_ra>
